<compile_context>
chip_gen: v7x
topology: tpu7x:2x2x1
jax: 0.10.0
libtpu: 0.0.40
codegen_flags: <defaults>
</compile_context>

<pallas_src>
import functools

import numpy as np

import jax
import jax.numpy as jnp
from jax import lax
from jax.experimental import pallas as pl
from jax.experimental.pallas import tpu as pltpu


# ------------------------------------------------------------------ constant 0/1 matrices

def _reflect(i, n):
    if i < 0:
        return -i
    if i >= n:
        return 2 * n - 2 - i
    return i


def _pad_matrix(h, w, p, mode, kw):
    """(h*w, (h+2p)*(w+2p)+kw-1): compact activation -> padded flattened conv input (+tail)."""
    hp, wp = h + 2 * p, w + 2 * p
    m = np.zeros((h * w, hp * wp + kw - 1), np.float32)
    for rp in range(hp):
        for cp in range(wp):
            if mode == "reflect":
                r, c = _reflect(rp - p, h), _reflect(cp - p, w)
                m[r * w + c, rp * wp + cp] = 1.0
            else:  # zero pad
                r, c = rp - p, cp - p
                if 0 <= r < h and 0 <= c < w:
                    m[r * w + c, rp * wp + cp] = 1.0
    return m


def _dilate_matrix(h, w, kw):
    """ConvTranspose2d(k=3,s=2,p=1,op=1) input map: dilate-by-2 + pad(1 top/left, 2 bot/right)."""
    hp, wp = 2 * h + 2, 2 * w + 2
    m = np.zeros((h * w, hp * wp + kw - 1), np.float32)
    for r in range(h):
        for c in range(w):
            m[r * w + c, (2 * r + 1) * wp + (2 * c + 1)] = 1.0
    return m


def _compact_matrix(hp, wp, kh, kw, stride):
    """(oh_full*wp, oh*ow): row-extended stride-1 conv output -> compact (stride-subsampled)."""
    oh_f, ow_f = hp - kh + 1, wp - kw + 1
    oh, ow = -(-oh_f // stride), -(-ow_f // stride)
    m = np.zeros((oh_f * wp, oh * ow), np.float32)
    for i in range(oh):
        for j in range(ow):
            m[i * stride * wp + j * stride, i * ow + j] = 1.0
    return m


# --------------------------------------------------------------------------- weight prep

def _conv_w_mat(w):
    """PyTorch Conv2d weight (Cout, Cin, kh, kw) -> GEMM matrix (Cout, kh*kw*Cin), tap-major."""
    co, ci, kh, kw = w.shape
    return jnp.transpose(w, (0, 2, 3, 1)).reshape(co, kh * kw * ci)


def _convT_w_mat(wt):
    """ConvTranspose2d weight (Cin, Cout, kh, kw) -> conv-equivalent GEMM matrix."""
    wc = jnp.transpose(jnp.flip(wt, (2, 3)), (1, 0, 2, 3))   # (Cout, Cin, kh, kw), flipped
    return _conv_w_mat(wc)


# ---------------------------------------------------------------------------- the kernel

def _conv_layer(xc, p_ref, c_ref, w_ref, b_ref, wp, kh, kw, mext, epilogue, skip=None):
    """One conv layer on a compact flattened activation value xc: (Cin, h*w) f32.

    p_ref : (h*w, Lpad)      bf16  pad / dilate selection matrix
    c_ref : (mext, Mc)       bf16  row-extended -> compact (+stride) selection matrix
    w_ref : (1, Cout, T*Cin) bf16  conv weights as a single GEMM matrix
    b_ref : (1, Cout, 1)     f32   bias
    Returns (Cout, Mc) f32 after the fused epilogue ("relu" | "skip" | "tanh").
    """
    # pad / dilate via one selection matmul; hoisted single bf16 cast of the padded input
    xp = jnp.dot(xc.astype(jnp.bfloat16), p_ref[...],
                 preferred_element_type=jnp.float32).astype(jnp.bfloat16)  # (Cin, Lpad)

    # in-VMEM im2col: T contiguous lane slices, one sublane concat, one big-K GEMM
    taps = [xp[:, di * wp + dj: di * wp + dj + mext]
            for di in range(kh) for dj in range(kw)]
    patches = jnp.concatenate(taps, axis=0)                                # (T*Cin, mext) bf16
    y_ext = jnp.dot(w_ref[0], patches, preferred_element_type=jnp.float32)  # (Cout, mext)

    # compact (and stride-subsample) via one selection matmul, then bias
    y = jnp.dot(y_ext.astype(jnp.bfloat16), c_ref[...],
                preferred_element_type=jnp.float32) + b_ref[0]             # (Cout, Mc)

    if epilogue == "tanh":
        return jnp.tanh(y)

    # InstanceNorm2d(affine=False, eps=1e-5), single-pass stats over the spatial (lane) axis
    inv = 1.0 / y.shape[1]
    mu = jnp.sum(y, axis=1, keepdims=True) * inv
    m2 = jnp.sum(y * y, axis=1, keepdims=True) * inv
    var = jnp.maximum(m2 - mu * mu, 0.0)
    yn = (y - mu) * lax.rsqrt(var + 1e-5)
    if epilogue == "relu":
        return jnp.maximum(yn, 0.0)
    return yn + skip                                                       # "skip"


def _generator_kernel(geoms, n_res, x_ref, *refs):
    """Whole ResNet generator for one (generator, sample) grid point; activations in VMEM."""
    n_conv = 6 + 2 * n_res
    wb = refs[:2 * n_conv]
    (p_c, c_c, p_d1, c_d1, p_d2, c_d2,
     p_r, c_r, p_u1, c_u1, p_u2, c_u2) = refs[2 * n_conv: 2 * n_conv + 12]
    o_ref = refs[2 * n_conv + 12]

    def wbi(i):
        return wb[2 * i], wb[2 * i + 1]

    x = x_ref[0, 0]                                                        # (Cin_p, H*W) f32

    h = _conv_layer(x, p_c, c_c, *wbi(0), *geoms["c"], "relu")             # c7s1-C
    h = _conv_layer(h, p_d1, c_d1, *wbi(1), *geoms["d1"], "relu")          # d2C  (stride 2)
    h = _conv_layer(h, p_d2, c_d2, *wbi(2), *geoms["d2"], "relu")          # d4C  (stride 2)
    for r in range(n_res):                                                 # residual blocks
        t = _conv_layer(h, p_r, c_r, *wbi(3 + 2 * r), *geoms["r"], "relu")
        h = _conv_layer(t, p_r, c_r, *wbi(4 + 2 * r), *geoms["r"], "skip", skip=h)
    h = _conv_layer(h, p_u1, c_u1, *wbi(3 + 2 * n_res), *geoms["u1"], "relu")  # u2C (convT)
    h = _conv_layer(h, p_u2, c_u2, *wbi(4 + 2 * n_res), *geoms["u2"], "relu")  # uC  (convT)
    y = _conv_layer(h, p_c, c_c, *wbi(5 + 2 * n_res), *geoms["c"], "tanh")     # c7s1-3 + tanh

    o_ref[0, 0] = y


# ---------------------------------------------------------------- params + forward wrapper

def init_generator_params(key, in_ch=3, C=8, n_blocks=2):
    def norm(k, shape):
        return jax.random.normal(k, shape, jnp.float32) * 0.02

    keys = iter(jax.random.split(key, 32))
    p = {
        "c1_w": norm(next(keys), (C, in_ch, 7, 7)), "c1_b": jnp.zeros((C,), jnp.float32),
        "d1_w": norm(next(keys), (2 * C, C, 3, 3)), "d1_b": jnp.zeros((2 * C,), jnp.float32),
        "d2_w": norm(next(keys), (4 * C, 2 * C, 3, 3)), "d2_b": jnp.zeros((4 * C,), jnp.float32),
        "res": [],
        # ConvTranspose2d weight layout: (in, out, kh, kw)
        "u1_w": norm(next(keys), (4 * C, 2 * C, 3, 3)), "u1_b": jnp.zeros((2 * C,), jnp.float32),
        "u2_w": norm(next(keys), (2 * C, C, 3, 3)), "u2_b": jnp.zeros((C,), jnp.float32),
        "c2_w": norm(next(keys), (in_ch, C, 7, 7)), "c2_b": jnp.zeros((in_ch,), jnp.float32),
    }
    for _ in range(n_blocks):
        p["res"].append({
            "w1": norm(next(keys), (4 * C, 4 * C, 3, 3)), "b1": jnp.zeros((4 * C,), jnp.float32),
            "w2": norm(next(keys), (4 * C, 4 * C, 3, 3)), "b2": jnp.zeros((4 * C,), jnp.float32),
        })
    return p


def cyclegan_forward(params_a2b, params_b2a, a, b):
    """Matches CycleGAN.forward: returns (fake_a, fake_b) = (G_b2a(b), G_a2b(a)).  NCHW f32."""
    N, cin, H, W = a.shape
    assert b.shape == a.shape and H % 4 == 0 and W % 4 == 0
    n_res = len(params_a2b["res"])
    cin_p = ((cin + 7) // 8) * 8
    h2, w2, h4, w4 = H // 2, W // 2, H // 4, W // 4

    # constant selection matrices (shared by both generators / all samples)
    mats_np = [
        _pad_matrix(H, W, 3, "reflect", 7),                 # P_c   (c7s1 layers)
        _compact_matrix(H + 6, W + 6, 7, 7, 1),             # C_c
        _pad_matrix(H, W, 1, "zero", 3),                    # P_d1
        _compact_matrix(H + 2, W + 2, 3, 3, 2),             # C_d1  (stride-2 select)
        _pad_matrix(h2, w2, 1, "zero", 3),                  # P_d2
        _compact_matrix(h2 + 2, w2 + 2, 3, 3, 2),           # C_d2
        _pad_matrix(h4, w4, 1, "reflect", 3),               # P_res
        _compact_matrix(h4 + 2, w4 + 2, 3, 3, 1),           # C_res
        _dilate_matrix(h4, w4, 3),                          # P_u1  (convT dilate+pad)
        _compact_matrix(2 * h4 + 2, 2 * w4 + 2, 3, 3, 1),   # C_u1
        _dilate_matrix(h2, w2, 3),                          # P_u2
        _compact_matrix(2 * h2 + 2, 2 * w2 + 2, 3, 3, 1),   # C_u2
    ]
    mats = [jnp.asarray(m, jnp.bfloat16) for m in mats_np]

    # per-layer (Wp, kh, kw, Mext) of the row-extended stride-1 conv
    geoms = {
        "c":  (W + 6, 7, 7, H * (W + 6)),
        "d1": (W + 2, 3, 3, H * (W + 2)),
        "d2": (w2 + 2, 3, 3, h2 * (w2 + 2)),
        "r":  (w4 + 2, 3, 3, h4 * (w4 + 2)),
        "u1": (2 * w4 + 2, 3, 3, 2 * h4 * (2 * w4 + 2)),
        "u2": (2 * w2 + 2, 3, 3, 2 * h2 * (2 * w2 + 2)),
    }

    def prep(pp):
        c1w = jnp.pad(pp["c1_w"], ((0, 0), (0, cin_p - cin), (0, 0), (0, 0)))
        c2w = jnp.pad(pp["c2_w"], ((0, cin_p - cin), (0, 0), (0, 0), (0, 0)))
        c2b = jnp.pad(pp["c2_b"], ((0, cin_p - cin),))
        out = [(_conv_w_mat(c1w), pp["c1_b"]),
               (_conv_w_mat(pp["d1_w"]), pp["d1_b"]),
               (_conv_w_mat(pp["d2_w"]), pp["d2_b"])]
        for blk in pp["res"]:
            out.append((_conv_w_mat(blk["w1"]), blk["b1"]))
            out.append((_conv_w_mat(blk["w2"]), blk["b2"]))
        out.append((_convT_w_mat(pp["u1_w"]), pp["u1_b"]))
        out.append((_convT_w_mat(pp["u2_w"]), pp["u2_b"]))
        out.append((_conv_w_mat(c2w), c2b))
        return out

    # stack the two generators along a leading axis: index 0 = b2a(b), index 1 = a2b(a)
    wb_args = []
    for (w0, b0), (w1, b1) in zip(prep(params_b2a), prep(params_a2b)):
        wb_args.append(jnp.stack([w0, w1]).astype(jnp.bfloat16))
        wb_args.append(jnp.stack([b0, b1]).astype(jnp.float32).reshape(2, -1, 1))

    x = jnp.stack([b, a], axis=0)                                     # (2, N, cin, H, W)
    x = jnp.pad(x, ((0, 0), (0, 0), (0, cin_p - cin), (0, 0), (0, 0)))
    x = x.reshape(2, N, cin_p, H * W).astype(jnp.float32)

    in_specs = [pl.BlockSpec((1, 1, cin_p, H * W), lambda g, n: (g, n, 0, 0))]
    for arr in wb_args:
        in_specs.append(pl.BlockSpec((1,) + arr.shape[1:], lambda g, n: (g, 0, 0)))
    for m in mats:
        in_specs.append(pl.BlockSpec(m.shape, lambda g, n: (0, 0)))

    kern = functools.partial(_generator_kernel, geoms, n_res)
    out = pl.pallas_call(
        kern,
        out_shape=jax.ShapeDtypeStruct((2, N, cin_p, H * W), jnp.float32),
        grid=(2, N),
        in_specs=in_specs,
        out_specs=pl.BlockSpec((1, 1, cin_p, H * W), lambda g, n: (g, n, 0, 0)),
        compiler_params=pltpu.CompilerParams(
            dimension_semantics=("parallel", "parallel")),
    )(x, *wb_args, *mats)

    out = out.reshape(2, N, cin_p, H, W)[:, :, :cin]
    return out[0], out[1]                                             # (fake_a, fake_b)


# --------------------------------------------------------------------------------- main

if __name__ == "__main__":
    key = jax.random.PRNGKey(0)
    k_a, k_b, k_g1, k_g2 = jax.random.split(key, 4)

    # small shapes: batch=2, 3 input channels (fixed by the module), spatial=16,
    # gen_channels=8, 2 residual blocks
    a = jax.random.normal(k_a, (2, 3, 16, 16), jnp.float32)
    b = jax.random.normal(k_b, (2, 3, 16, 16), jnp.float32)

    params_a2b = init_generator_params(k_g1, in_ch=3, C=8, n_blocks=2)
    params_b2a = init_generator_params(k_g2, in_ch=3, C=8, n_blocks=2)

    fwd = jax.jit(cyclegan_forward)
    fake_a, fake_b = fwd(params_a2b, params_b2a, a, b)
    jax.block_until_ready((fake_a, fake_b))

    assert fake_a.shape == (2, 3, 16, 16) and fake_b.shape == (2, 3, 16, 16)
    assert bool(jnp.all(jnp.isfinite(fake_a))) and bool(jnp.all(jnp.isfinite(fake_b)))
    print("KERNEL_OK")
</pallas_src>

<mosaic_0001>
module attributes {stable_mosaic.version = 11 : i64} {
  func.func @_generator_kernel(%arg0: i32, %arg1: i32, %arg2: memref<1x1x8x256xf32, #tpu.memory_space<vmem>>, %arg3: memref<1x8x392xbf16, #tpu.memory_space<vmem>>, %arg4: memref<1x8x1xf32, #tpu.memory_space<vmem>>, %arg5: memref<1x16x72xbf16, #tpu.memory_space<vmem>>, %arg6: memref<1x16x1xf32, #tpu.memory_space<vmem>>, %arg7: memref<1x32x144xbf16, #tpu.memory_space<vmem>>, %arg8: memref<1x32x1xf32, #tpu.memory_space<vmem>>, %arg9: memref<1x32x288xbf16, #tpu.memory_space<vmem>>, %arg10: memref<1x32x1xf32, #tpu.memory_space<vmem>>, %arg11: memref<1x32x288xbf16, #tpu.memory_space<vmem>>, %arg12: memref<1x32x1xf32, #tpu.memory_space<vmem>>, %arg13: memref<1x32x288xbf16, #tpu.memory_space<vmem>>, %arg14: memref<1x32x1xf32, #tpu.memory_space<vmem>>, %arg15: memref<1x32x288xbf16, #tpu.memory_space<vmem>>, %arg16: memref<1x32x1xf32, #tpu.memory_space<vmem>>, %arg17: memref<1x16x288xbf16, #tpu.memory_space<vmem>>, %arg18: memref<1x16x1xf32, #tpu.memory_space<vmem>>, %arg19: memref<1x8x144xbf16, #tpu.memory_space<vmem>>, %arg20: memref<1x8x1xf32, #tpu.memory_space<vmem>>, %arg21: memref<1x8x392xbf16, #tpu.memory_space<vmem>>, %arg22: memref<1x8x1xf32, #tpu.memory_space<vmem>>, %arg23: memref<256x490xbf16, #tpu.memory_space<vmem>>, %arg24: memref<352x256xbf16, #tpu.memory_space<vmem>>, %arg25: memref<256x326xbf16, #tpu.memory_space<vmem>>, %arg26: memref<288x64xbf16, #tpu.memory_space<vmem>>, %arg27: memref<64x102xbf16, #tpu.memory_space<vmem>>, %arg28: memref<80x16xbf16, #tpu.memory_space<vmem>>, %arg29: memref<16x38xbf16, #tpu.memory_space<vmem>>, %arg30: memref<24x16xbf16, #tpu.memory_space<vmem>>, %arg31: memref<16x102xbf16, #tpu.memory_space<vmem>>, %arg32: memref<80x64xbf16, #tpu.memory_space<vmem>>, %arg33: memref<64x326xbf16, #tpu.memory_space<vmem>>, %arg34: memref<288x256xbf16, #tpu.memory_space<vmem>>, %arg35: memref<1x1x8x256xf32, #tpu.memory_space<vmem>>) attributes {dimension_semantics = [#tpu.dimension_semantics<parallel>, #tpu.dimension_semantics<parallel>], iteration_bounds = array<i64: 2, 2>, scalar_prefetch = 0 : i64, scratch_operands = 0 : i64, tpu.core_type = #tpu.core_type<tc>, window_params = [{transform_indices = @transform_0, window_bounds = array<i64: 1, 1, 8, 256>}, {transform_indices = @transform_1, window_bounds = array<i64: 1, 8, 392>}, {transform_indices = @transform_2, window_bounds = array<i64: 1, 8, 1>}, {transform_indices = @transform_3, window_bounds = array<i64: 1, 16, 72>}, {transform_indices = @transform_4, window_bounds = array<i64: 1, 16, 1>}, {transform_indices = @transform_5, window_bounds = array<i64: 1, 32, 144>}, {transform_indices = @transform_6, window_bounds = array<i64: 1, 32, 1>}, {transform_indices = @transform_7, window_bounds = array<i64: 1, 32, 288>}, {transform_indices = @transform_8, window_bounds = array<i64: 1, 32, 1>}, {transform_indices = @transform_9, window_bounds = array<i64: 1, 32, 288>}, {transform_indices = @transform_10, window_bounds = array<i64: 1, 32, 1>}, {transform_indices = @transform_11, window_bounds = array<i64: 1, 32, 288>}, {transform_indices = @transform_12, window_bounds = array<i64: 1, 32, 1>}, {transform_indices = @transform_13, window_bounds = array<i64: 1, 32, 288>}, {transform_indices = @transform_14, window_bounds = array<i64: 1, 32, 1>}, {transform_indices = @transform_15, window_bounds = array<i64: 1, 16, 288>}, {transform_indices = @transform_16, window_bounds = array<i64: 1, 16, 1>}, {transform_indices = @transform_17, window_bounds = array<i64: 1, 8, 144>}, {transform_indices = @transform_18, window_bounds = array<i64: 1, 8, 1>}, {transform_indices = @transform_19, window_bounds = array<i64: 1, 8, 392>}, {transform_indices = @transform_20, window_bounds = array<i64: 1, 8, 1>}, {pipeline_mode = #tpu.pipeline_mode<synchronous>, transform_indices = @transform_21, window_bounds = array<i64: 256, 490>}, {pipeline_mode = #tpu.pipeline_mode<synchronous>, transform_indices = @transform_22, window_bounds = array<i64: 352, 256>}, {pipeline_mode = #tpu.pipeline_mode<synchronous>, transform_indices = @transform_23, window_bounds = array<i64: 256, 326>}, {pipeline_mode = #tpu.pipeline_mode<synchronous>, transform_indices = @transform_24, window_bounds = array<i64: 288, 64>}, {pipeline_mode = #tpu.pipeline_mode<synchronous>, transform_indices = @transform_25, window_bounds = array<i64: 64, 102>}, {pipeline_mode = #tpu.pipeline_mode<synchronous>, transform_indices = @transform_26, window_bounds = array<i64: 80, 16>}, {pipeline_mode = #tpu.pipeline_mode<synchronous>, transform_indices = @transform_27, window_bounds = array<i64: 16, 38>}, {pipeline_mode = #tpu.pipeline_mode<synchronous>, transform_indices = @transform_28, window_bounds = array<i64: 24, 16>}, {pipeline_mode = #tpu.pipeline_mode<synchronous>, transform_indices = @transform_29, window_bounds = array<i64: 16, 102>}, {pipeline_mode = #tpu.pipeline_mode<synchronous>, transform_indices = @transform_30, window_bounds = array<i64: 80, 64>}, {pipeline_mode = #tpu.pipeline_mode<synchronous>, transform_indices = @transform_31, window_bounds = array<i64: 64, 326>}, {pipeline_mode = #tpu.pipeline_mode<synchronous>, transform_indices = @transform_32, window_bounds = array<i64: 288, 256>}, {transform_indices = @transform_33, window_bounds = array<i64: 1, 1, 8, 256>}]} {
    %c0 = arith.constant 0 : index
    %c0_0 = arith.constant 0 : index
    %c0_1 = arith.constant 0 : index
    %c0_2 = arith.constant 0 : index
    %0 = vector.load %arg2[%c0, %c0_0, %c0_1, %c0_2] : memref<1x1x8x256xf32, #tpu.memory_space<vmem>>, vector<1x1x8x256xf32>
    %1 = vector.shape_cast %0 : vector<1x1x8x256xf32> to vector<8x256xf32>
    %2 = arith.truncf %1 : vector<8x256xf32> to vector<8x256xbf16>
    %c0_3 = arith.constant 0 : index
    %c0_4 = arith.constant 0 : index
    %3 = vector.load %arg23[%c0_3, %c0_4] : memref<256x490xbf16, #tpu.memory_space<vmem>>, vector<256x490xbf16>
    %cst = arith.constant dense<0.000000e+00> : vector<8x490xf32>
    %4 = tpu.matmul %2, %3, %cst {dimension_numbers = #tpu.dot_dimension_numbers<[1], [0], [0], [1], [0, 0, 1, 1], [], []>} : vector<8x256xbf16>, vector<256x490xbf16>, vector<8x490xf32> -> vector<8x490xf32>
    %5 = arith.truncf %4 : vector<8x490xf32> to vector<8x490xbf16>
    %6 = vector.extract_strided_slice %5 {offsets = [0, 0], sizes = [8, 352], strides = [1, 1]} : vector<8x490xbf16> to vector<8x352xbf16>
    %7 = vector.extract_strided_slice %5 {offsets = [0, 1], sizes = [8, 352], strides = [1, 1]} : vector<8x490xbf16> to vector<8x352xbf16>
    %8 = vector.extract_strided_slice %5 {offsets = [0, 2], sizes = [8, 352], strides = [1, 1]} : vector<8x490xbf16> to vector<8x352xbf16>
    %9 = vector.extract_strided_slice %5 {offsets = [0, 3], sizes = [8, 352], strides = [1, 1]} : vector<8x490xbf16> to vector<8x352xbf16>
    %10 = vector.extract_strided_slice %5 {offsets = [0, 4], sizes = [8, 352], strides = [1, 1]} : vector<8x490xbf16> to vector<8x352xbf16>
    %11 = vector.extract_strided_slice %5 {offsets = [0, 5], sizes = [8, 352], strides = [1, 1]} : vector<8x490xbf16> to vector<8x352xbf16>
    %12 = vector.extract_strided_slice %5 {offsets = [0, 6], sizes = [8, 352], strides = [1, 1]} : vector<8x490xbf16> to vector<8x352xbf16>
    %13 = vector.extract_strided_slice %5 {offsets = [0, 22], sizes = [8, 352], strides = [1, 1]} : vector<8x490xbf16> to vector<8x352xbf16>
    %14 = vector.extract_strided_slice %5 {offsets = [0, 23], sizes = [8, 352], strides = [1, 1]} : vector<8x490xbf16> to vector<8x352xbf16>
    %15 = vector.extract_strided_slice %5 {offsets = [0, 24], sizes = [8, 352], strides = [1, 1]} : vector<8x490xbf16> to vector<8x352xbf16>
    %16 = vector.extract_strided_slice %5 {offsets = [0, 25], sizes = [8, 352], strides = [1, 1]} : vector<8x490xbf16> to vector<8x352xbf16>
    %17 = vector.extract_strided_slice %5 {offsets = [0, 26], sizes = [8, 352], strides = [1, 1]} : vector<8x490xbf16> to vector<8x352xbf16>
    %18 = vector.extract_strided_slice %5 {offsets = [0, 27], sizes = [8, 352], strides = [1, 1]} : vector<8x490xbf16> to vector<8x352xbf16>
    %19 = vector.extract_strided_slice %5 {offsets = [0, 28], sizes = [8, 352], strides = [1, 1]} : vector<8x490xbf16> to vector<8x352xbf16>
    %20 = vector.extract_strided_slice %5 {offsets = [0, 44], sizes = [8, 352], strides = [1, 1]} : vector<8x490xbf16> to vector<8x352xbf16>
    %21 = vector.extract_strided_slice %5 {offsets = [0, 45], sizes = [8, 352], strides = [1, 1]} : vector<8x490xbf16> to vector<8x352xbf16>
    %22 = vector.extract_strided_slice %5 {offsets = [0, 46], sizes = [8, 352], strides = [1, 1]} : vector<8x490xbf16> to vector<8x352xbf16>
    %23 = vector.extract_strided_slice %5 {offsets = [0, 47], sizes = [8, 352], strides = [1, 1]} : vector<8x490xbf16> to vector<8x352xbf16>
    %24 = vector.extract_strided_slice %5 {offsets = [0, 48], sizes = [8, 352], strides = [1, 1]} : vector<8x490xbf16> to vector<8x352xbf16>
    %25 = vector.extract_strided_slice %5 {offsets = [0, 49], sizes = [8, 352], strides = [1, 1]} : vector<8x490xbf16> to vector<8x352xbf16>
    %26 = vector.extract_strided_slice %5 {offsets = [0, 50], sizes = [8, 352], strides = [1, 1]} : vector<8x490xbf16> to vector<8x352xbf16>
    %27 = vector.extract_strided_slice %5 {offsets = [0, 66], sizes = [8, 352], strides = [1, 1]} : vector<8x490xbf16> to vector<8x352xbf16>
    %28 = vector.extract_strided_slice %5 {offsets = [0, 67], sizes = [8, 352], strides = [1, 1]} : vector<8x490xbf16> to vector<8x352xbf16>
    %29 = vector.extract_strided_slice %5 {offsets = [0, 68], sizes = [8, 352], strides = [1, 1]} : vector<8x490xbf16> to vector<8x352xbf16>
    %30 = vector.extract_strided_slice %5 {offsets = [0, 69], sizes = [8, 352], strides = [1, 1]} : vector<8x490xbf16> to vector<8x352xbf16>
    %31 = vector.extract_strided_slice %5 {offsets = [0, 70], sizes = [8, 352], strides = [1, 1]} : vector<8x490xbf16> to vector<8x352xbf16>
    %32 = vector.extract_strided_slice %5 {offsets = [0, 71], sizes = [8, 352], strides = [1, 1]} : vector<8x490xbf16> to vector<8x352xbf16>
    %33 = vector.extract_strided_slice %5 {offsets = [0, 72], sizes = [8, 352], strides = [1, 1]} : vector<8x490xbf16> to vector<8x352xbf16>
    %34 = vector.extract_strided_slice %5 {offsets = [0, 88], sizes = [8, 352], strides = [1, 1]} : vector<8x490xbf16> to vector<8x352xbf16>
    %35 = vector.extract_strided_slice %5 {offsets = [0, 89], sizes = [8, 352], strides = [1, 1]} : vector<8x490xbf16> to vector<8x352xbf16>
    %36 = vector.extract_strided_slice %5 {offsets = [0, 90], sizes = [8, 352], strides = [1, 1]} : vector<8x490xbf16> to vector<8x352xbf16>
    %37 = vector.extract_strided_slice %5 {offsets = [0, 91], sizes = [8, 352], strides = [1, 1]} : vector<8x490xbf16> to vector<8x352xbf16>
    %38 = vector.extract_strided_slice %5 {offsets = [0, 92], sizes = [8, 352], strides = [1, 1]} : vector<8x490xbf16> to vector<8x352xbf16>
    %39 = vector.extract_strided_slice %5 {offsets = [0, 93], sizes = [8, 352], strides = [1, 1]} : vector<8x490xbf16> to vector<8x352xbf16>
    %40 = vector.extract_strided_slice %5 {offsets = [0, 94], sizes = [8, 352], strides = [1, 1]} : vector<8x490xbf16> to vector<8x352xbf16>
    %41 = vector.extract_strided_slice %5 {offsets = [0, 110], sizes = [8, 352], strides = [1, 1]} : vector<8x490xbf16> to vector<8x352xbf16>
    %42 = vector.extract_strided_slice %5 {offsets = [0, 111], sizes = [8, 352], strides = [1, 1]} : vector<8x490xbf16> to vector<8x352xbf16>
    %43 = vector.extract_strided_slice %5 {offsets = [0, 112], sizes = [8, 352], strides = [1, 1]} : vector<8x490xbf16> to vector<8x352xbf16>
    %44 = vector.extract_strided_slice %5 {offsets = [0, 113], sizes = [8, 352], strides = [1, 1]} : vector<8x490xbf16> to vector<8x352xbf16>
    %45 = vector.extract_strided_slice %5 {offsets = [0, 114], sizes = [8, 352], strides = [1, 1]} : vector<8x490xbf16> to vector<8x352xbf16>
    %46 = vector.extract_strided_slice %5 {offsets = [0, 115], sizes = [8, 352], strides = [1, 1]} : vector<8x490xbf16> to vector<8x352xbf16>
    %47 = vector.extract_strided_slice %5 {offsets = [0, 116], sizes = [8, 352], strides = [1, 1]} : vector<8x490xbf16> to vector<8x352xbf16>
    %48 = vector.extract_strided_slice %5 {offsets = [0, 132], sizes = [8, 352], strides = [1, 1]} : vector<8x490xbf16> to vector<8x352xbf16>
    %49 = vector.extract_strided_slice %5 {offsets = [0, 133], sizes = [8, 352], strides = [1, 1]} : vector<8x490xbf16> to vector<8x352xbf16>
    %50 = vector.extract_strided_slice %5 {offsets = [0, 134], sizes = [8, 352], strides = [1, 1]} : vector<8x490xbf16> to vector<8x352xbf16>
    %51 = vector.extract_strided_slice %5 {offsets = [0, 135], sizes = [8, 352], strides = [1, 1]} : vector<8x490xbf16> to vector<8x352xbf16>
    %52 = vector.extract_strided_slice %5 {offsets = [0, 136], sizes = [8, 352], strides = [1, 1]} : vector<8x490xbf16> to vector<8x352xbf16>
    %53 = vector.extract_strided_slice %5 {offsets = [0, 137], sizes = [8, 352], strides = [1, 1]} : vector<8x490xbf16> to vector<8x352xbf16>
    %54 = vector.extract_strided_slice %5 {offsets = [0, 138], sizes = [8, 352], strides = [1, 1]} : vector<8x490xbf16> to vector<8x352xbf16>
    %55 = tpu.concatenate %6, %7, %8, %9, %10, %11, %12, %13, %14, %15, %16, %17, %18, %19, %20, %21 in 0 : vector<8x352xbf16>, vector<8x352xbf16>, vector<8x352xbf16>, vector<8x352xbf16>, vector<8x352xbf16>, vector<8x352xbf16>, vector<8x352xbf16>, vector<8x352xbf16>, vector<8x352xbf16>, vector<8x352xbf16>, vector<8x352xbf16>, vector<8x352xbf16>, vector<8x352xbf16>, vector<8x352xbf16>, vector<8x352xbf16>, vector<8x352xbf16> -> vector<128x352xbf16>
    %56 = tpu.concatenate %22, %23, %24, %25, %26, %27, %28, %29, %30, %31, %32, %33, %34, %35, %36, %37 in 0 : vector<8x352xbf16>, vector<8x352xbf16>, vector<8x352xbf16>, vector<8x352xbf16>, vector<8x352xbf16>, vector<8x352xbf16>, vector<8x352xbf16>, vector<8x352xbf16>, vector<8x352xbf16>, vector<8x352xbf16>, vector<8x352xbf16>, vector<8x352xbf16>, vector<8x352xbf16>, vector<8x352xbf16>, vector<8x352xbf16>, vector<8x352xbf16> -> vector<128x352xbf16>
    %57 = tpu.concatenate %38, %39, %40, %41, %42, %43, %44, %45, %46, %47, %48, %49, %50, %51, %52, %53 in 0 : vector<8x352xbf16>, vector<8x352xbf16>, vector<8x352xbf16>, vector<8x352xbf16>, vector<8x352xbf16>, vector<8x352xbf16>, vector<8x352xbf16>, vector<8x352xbf16>, vector<8x352xbf16>, vector<8x352xbf16>, vector<8x352xbf16>, vector<8x352xbf16>, vector<8x352xbf16>, vector<8x352xbf16>, vector<8x352xbf16>, vector<8x352xbf16> -> vector<128x352xbf16>
    %58 = tpu.concatenate %55, %56, %57, %54 in 0 : vector<128x352xbf16>, vector<128x352xbf16>, vector<128x352xbf16>, vector<8x352xbf16> -> vector<392x352xbf16>
    %c0_5 = arith.constant 0 : index
    %c0_6 = arith.constant 0 : index
    %c0_7 = arith.constant 0 : index
    %59 = vector.load %arg3[%c0_5, %c0_6, %c0_7] : memref<1x8x392xbf16, #tpu.memory_space<vmem>>, vector<1x8x392xbf16>
    %60 = vector.shape_cast %59 : vector<1x8x392xbf16> to vector<8x392xbf16>
    %cst_8 = arith.constant dense<0.000000e+00> : vector<8x352xf32>
    %61 = tpu.matmul %60, %58, %cst_8 {dimension_numbers = #tpu.dot_dimension_numbers<[1], [0], [0], [1], [0, 0, 1, 1], [], []>} : vector<8x392xbf16>, vector<392x352xbf16>, vector<8x352xf32> -> vector<8x352xf32>
    %62 = arith.truncf %61 : vector<8x352xf32> to vector<8x352xbf16>
    %c0_9 = arith.constant 0 : index
    %c0_10 = arith.constant 0 : index
    %63 = vector.load %arg24[%c0_9, %c0_10] : memref<352x256xbf16, #tpu.memory_space<vmem>>, vector<352x256xbf16>
    %cst_11 = arith.constant dense<0.000000e+00> : vector<8x256xf32>
    %64 = tpu.matmul %62, %63, %cst_11 {dimension_numbers = #tpu.dot_dimension_numbers<[1], [0], [0], [1], [0, 0, 1, 1], [], []>} : vector<8x352xbf16>, vector<352x256xbf16>, vector<8x256xf32> -> vector<8x256xf32>
    %c0_12 = arith.constant 0 : index
    %c0_13 = arith.constant 0 : index
    %c0_14 = arith.constant 0 : index
    %65 = vector.load %arg4[%c0_12, %c0_13, %c0_14] : memref<1x8x1xf32, #tpu.memory_space<vmem>>, vector<1x8x1xf32>
    %66 = vector.shape_cast %65 : vector<1x8x1xf32> to vector<8x1xf32>
    %67 = vector.broadcast %66 : vector<8x1xf32> to vector<8x256xf32>
    %68 = arith.addf %64, %67 : vector<8x256xf32>
    %cst_15 = arith.constant dense<0.000000e+00> : vector<8xf32>
    %69 = vector.multi_reduction <add>, %68, %cst_15 [1] : vector<8x256xf32> to vector<8xf32>
    %70 = vector.shape_cast %69 : vector<8xf32> to vector<8x1xf32>
    %cst_16 = arith.constant 3.906250e-03 : f32
    %71 = vector.broadcast %cst_16 : f32 to vector<8x1xf32>
    %72 = arith.mulf %70, %71 : vector<8x1xf32>
    %73 = arith.mulf %68, %68 : vector<8x256xf32>
    %cst_17 = arith.constant dense<0.000000e+00> : vector<8xf32>
    %74 = vector.multi_reduction <add>, %73, %cst_17 [1] : vector<8x256xf32> to vector<8xf32>
    %75 = vector.shape_cast %74 : vector<8xf32> to vector<8x1xf32>
    %cst_18 = arith.constant 3.906250e-03 : f32
    %76 = vector.broadcast %cst_18 : f32 to vector<8x1xf32>
    %77 = arith.mulf %75, %76 : vector<8x1xf32>
    %78 = arith.mulf %72, %72 : vector<8x1xf32>
    %79 = arith.subf %77, %78 : vector<8x1xf32>
    %cst_19 = arith.constant 0.000000e+00 : f32
    %80 = vector.broadcast %cst_19 : f32 to vector<8x1xf32>
    %81 = arith.maximumf %79, %80 : vector<8x1xf32>
    %82 = vector.broadcast %72 : vector<8x1xf32> to vector<8x256xf32>
    %83 = arith.subf %68, %82 : vector<8x256xf32>
    %cst_20 = arith.constant 9.99999974E-6 : f32
    %84 = vector.broadcast %cst_20 : f32 to vector<8x1xf32>
    %85 = arith.addf %81, %84 : vector<8x1xf32>
    %86 = math.rsqrt %85 : vector<8x1xf32>
    %87 = vector.broadcast %86 : vector<8x1xf32> to vector<8x256xf32>
    %88 = arith.mulf %83, %87 : vector<8x256xf32>
    %cst_21 = arith.constant 0.000000e+00 : f32
    %89 = vector.broadcast %cst_21 : f32 to vector<8x256xf32>
    %90 = arith.maximumf %88, %89 : vector<8x256xf32>
    %91 = arith.truncf %90 : vector<8x256xf32> to vector<8x256xbf16>
    %c0_22 = arith.constant 0 : index
    %c0_23 = arith.constant 0 : index
    %92 = vector.load %arg25[%c0_22, %c0_23] : memref<256x326xbf16, #tpu.memory_space<vmem>>, vector<256x326xbf16>
    %cst_24 = arith.constant dense<0.000000e+00> : vector<8x326xf32>
    %93 = tpu.matmul %91, %92, %cst_24 {dimension_numbers = #tpu.dot_dimension_numbers<[1], [0], [0], [1], [0, 0, 1, 1], [], []>} : vector<8x256xbf16>, vector<256x326xbf16>, vector<8x326xf32> -> vector<8x326xf32>
    %94 = arith.truncf %93 : vector<8x326xf32> to vector<8x326xbf16>
    %95 = vector.extract_strided_slice %94 {offsets = [0, 0], sizes = [8, 288], strides = [1, 1]} : vector<8x326xbf16> to vector<8x288xbf16>
    %96 = vector.extract_strided_slice %94 {offsets = [0, 1], sizes = [8, 288], strides = [1, 1]} : vector<8x326xbf16> to vector<8x288xbf16>
    %97 = vector.extract_strided_slice %94 {offsets = [0, 2], sizes = [8, 288], strides = [1, 1]} : vector<8x326xbf16> to vector<8x288xbf16>
    %98 = vector.extract_strided_slice %94 {offsets = [0, 18], sizes = [8, 288], strides = [1, 1]} : vector<8x326xbf16> to vector<8x288xbf16>
    %99 = vector.extract_strided_slice %94 {offsets = [0, 19], sizes = [8, 288], strides = [1, 1]} : vector<8x326xbf16> to vector<8x288xbf16>
    %100 = vector.extract_strided_slice %94 {offsets = [0, 20], sizes = [8, 288], strides = [1, 1]} : vector<8x326xbf16> to vector<8x288xbf16>
    %101 = vector.extract_strided_slice %94 {offsets = [0, 36], sizes = [8, 288], strides = [1, 1]} : vector<8x326xbf16> to vector<8x288xbf16>
    %102 = vector.extract_strided_slice %94 {offsets = [0, 37], sizes = [8, 288], strides = [1, 1]} : vector<8x326xbf16> to vector<8x288xbf16>
    %103 = vector.extract_strided_slice %94 {offsets = [0, 38], sizes = [8, 288], strides = [1, 1]} : vector<8x326xbf16> to vector<8x288xbf16>
    %104 = tpu.concatenate %95, %96, %97, %98, %99, %100, %101, %102, %103 in 0 : vector<8x288xbf16>, vector<8x288xbf16>, vector<8x288xbf16>, vector<8x288xbf16>, vector<8x288xbf16>, vector<8x288xbf16>, vector<8x288xbf16>, vector<8x288xbf16>, vector<8x288xbf16> -> vector<72x288xbf16>
    %c0_25 = arith.constant 0 : index
    %c0_26 = arith.constant 0 : index
    %c0_27 = arith.constant 0 : index
    %105 = vector.load %arg5[%c0_25, %c0_26, %c0_27] : memref<1x16x72xbf16, #tpu.memory_space<vmem>>, vector<1x16x72xbf16>
    %106 = vector.shape_cast %105 : vector<1x16x72xbf16> to vector<16x72xbf16>
    %cst_28 = arith.constant dense<0.000000e+00> : vector<16x288xf32>
    %107 = tpu.matmul %106, %104, %cst_28 {dimension_numbers = #tpu.dot_dimension_numbers<[1], [0], [0], [1], [0, 0, 1, 1], [], []>} : vector<16x72xbf16>, vector<72x288xbf16>, vector<16x288xf32> -> vector<16x288xf32>
    %108 = arith.truncf %107 : vector<16x288xf32> to vector<16x288xbf16>
    %c0_29 = arith.constant 0 : index
    %c0_30 = arith.constant 0 : index
    %109 = vector.load %arg26[%c0_29, %c0_30] : memref<288x64xbf16, #tpu.memory_space<vmem>>, vector<288x64xbf16>
    %cst_31 = arith.constant dense<0.000000e+00> : vector<16x64xf32>
    %110 = tpu.matmul %108, %109, %cst_31 {dimension_numbers = #tpu.dot_dimension_numbers<[1], [0], [0], [1], [0, 0, 1, 1], [], []>} : vector<16x288xbf16>, vector<288x64xbf16>, vector<16x64xf32> -> vector<16x64xf32>
    %c0_32 = arith.constant 0 : index
    %c0_33 = arith.constant 0 : index
    %c0_34 = arith.constant 0 : index
    %111 = vector.load %arg6[%c0_32, %c0_33, %c0_34] : memref<1x16x1xf32, #tpu.memory_space<vmem>>, vector<1x16x1xf32>
    %112 = vector.shape_cast %111 : vector<1x16x1xf32> to vector<16x1xf32>
    %113 = vector.broadcast %112 : vector<16x1xf32> to vector<16x64xf32>
    %114 = arith.addf %110, %113 : vector<16x64xf32>
    %cst_35 = arith.constant dense<0.000000e+00> : vector<16xf32>
    %115 = vector.multi_reduction <add>, %114, %cst_35 [1] : vector<16x64xf32> to vector<16xf32>
    %116 = vector.shape_cast %115 : vector<16xf32> to vector<16x1xf32>
    %cst_36 = arith.constant 1.562500e-02 : f32
    %117 = vector.broadcast %cst_36 : f32 to vector<16x1xf32>
    %118 = arith.mulf %116, %117 : vector<16x1xf32>
    %119 = arith.mulf %114, %114 : vector<16x64xf32>
    %cst_37 = arith.constant dense<0.000000e+00> : vector<16xf32>
    %120 = vector.multi_reduction <add>, %119, %cst_37 [1] : vector<16x64xf32> to vector<16xf32>
    %121 = vector.shape_cast %120 : vector<16xf32> to vector<16x1xf32>
    %cst_38 = arith.constant 1.562500e-02 : f32
    %122 = vector.broadcast %cst_38 : f32 to vector<16x1xf32>
    %123 = arith.mulf %121, %122 : vector<16x1xf32>
    %124 = arith.mulf %118, %118 : vector<16x1xf32>
    %125 = arith.subf %123, %124 : vector<16x1xf32>
    %cst_39 = arith.constant 0.000000e+00 : f32
    %126 = vector.broadcast %cst_39 : f32 to vector<16x1xf32>
    %127 = arith.maximumf %125, %126 : vector<16x1xf32>
    %128 = vector.broadcast %118 : vector<16x1xf32> to vector<16x64xf32>
    %129 = arith.subf %114, %128 : vector<16x64xf32>
    %cst_40 = arith.constant 9.99999974E-6 : f32
    %130 = vector.broadcast %cst_40 : f32 to vector<16x1xf32>
    %131 = arith.addf %127, %130 : vector<16x1xf32>
    %132 = math.rsqrt %131 : vector<16x1xf32>
    %133 = vector.broadcast %132 : vector<16x1xf32> to vector<16x64xf32>
    %134 = arith.mulf %129, %133 : vector<16x64xf32>
    %cst_41 = arith.constant 0.000000e+00 : f32
    %135 = vector.broadcast %cst_41 : f32 to vector<16x64xf32>
    %136 = arith.maximumf %134, %135 : vector<16x64xf32>
    %137 = arith.truncf %136 : vector<16x64xf32> to vector<16x64xbf16>
    %c0_42 = arith.constant 0 : index
    %c0_43 = arith.constant 0 : index
    %138 = vector.load %arg27[%c0_42, %c0_43] : memref<64x102xbf16, #tpu.memory_space<vmem>>, vector<64x102xbf16>
    %cst_44 = arith.constant dense<0.000000e+00> : vector<16x102xf32>
    %139 = tpu.matmul %137, %138, %cst_44 {dimension_numbers = #tpu.dot_dimension_numbers<[1], [0], [0], [1], [0, 0, 1, 1], [], []>} : vector<16x64xbf16>, vector<64x102xbf16>, vector<16x102xf32> -> vector<16x102xf32>
    %140 = arith.truncf %139 : vector<16x102xf32> to vector<16x102xbf16>
    %141 = vector.extract_strided_slice %140 {offsets = [0, 0], sizes = [16, 80], strides = [1, 1]} : vector<16x102xbf16> to vector<16x80xbf16>
    %142 = vector.extract_strided_slice %140 {offsets = [0, 1], sizes = [16, 80], strides = [1, 1]} : vector<16x102xbf16> to vector<16x80xbf16>
    %143 = vector.extract_strided_slice %140 {offsets = [0, 2], sizes = [16, 80], strides = [1, 1]} : vector<16x102xbf16> to vector<16x80xbf16>
    %144 = vector.extract_strided_slice %140 {offsets = [0, 10], sizes = [16, 80], strides = [1, 1]} : vector<16x102xbf16> to vector<16x80xbf16>
    %145 = vector.extract_strided_slice %140 {offsets = [0, 11], sizes = [16, 80], strides = [1, 1]} : vector<16x102xbf16> to vector<16x80xbf16>
    %146 = vector.extract_strided_slice %140 {offsets = [0, 12], sizes = [16, 80], strides = [1, 1]} : vector<16x102xbf16> to vector<16x80xbf16>
    %147 = vector.extract_strided_slice %140 {offsets = [0, 20], sizes = [16, 80], strides = [1, 1]} : vector<16x102xbf16> to vector<16x80xbf16>
    %148 = vector.extract_strided_slice %140 {offsets = [0, 21], sizes = [16, 80], strides = [1, 1]} : vector<16x102xbf16> to vector<16x80xbf16>
    %149 = vector.extract_strided_slice %140 {offsets = [0, 22], sizes = [16, 80], strides = [1, 1]} : vector<16x102xbf16> to vector<16x80xbf16>
    %150 = tpu.concatenate %141, %142, %143, %144, %145, %146, %147, %148, %149 in 0 : vector<16x80xbf16>, vector<16x80xbf16>, vector<16x80xbf16>, vector<16x80xbf16>, vector<16x80xbf16>, vector<16x80xbf16>, vector<16x80xbf16>, vector<16x80xbf16>, vector<16x80xbf16> -> vector<144x80xbf16>
    %c0_45 = arith.constant 0 : index
    %c0_46 = arith.constant 0 : index
    %c0_47 = arith.constant 0 : index
    %151 = vector.load %arg7[%c0_45, %c0_46, %c0_47] : memref<1x32x144xbf16, #tpu.memory_space<vmem>>, vector<1x32x144xbf16>
    %152 = vector.shape_cast %151 : vector<1x32x144xbf16> to vector<32x144xbf16>
    %cst_48 = arith.constant dense<0.000000e+00> : vector<32x80xf32>
    %153 = tpu.matmul %152, %150, %cst_48 {dimension_numbers = #tpu.dot_dimension_numbers<[1], [0], [0], [1], [0, 0, 1, 1], [], []>} : vector<32x144xbf16>, vector<144x80xbf16>, vector<32x80xf32> -> vector<32x80xf32>
    %154 = arith.truncf %153 : vector<32x80xf32> to vector<32x80xbf16>
    %c0_49 = arith.constant 0 : index
    %c0_50 = arith.constant 0 : index
    %155 = vector.load %arg28[%c0_49, %c0_50] : memref<80x16xbf16, #tpu.memory_space<vmem>>, vector<80x16xbf16>
    %cst_51 = arith.constant dense<0.000000e+00> : vector<32x16xf32>
    %156 = tpu.matmul %154, %155, %cst_51 {dimension_numbers = #tpu.dot_dimension_numbers<[1], [0], [0], [1], [0, 0, 1, 1], [], []>} : vector<32x80xbf16>, vector<80x16xbf16>, vector<32x16xf32> -> vector<32x16xf32>
    %c0_52 = arith.constant 0 : index
    %c0_53 = arith.constant 0 : index
    %c0_54 = arith.constant 0 : index
    %157 = vector.load %arg8[%c0_52, %c0_53, %c0_54] : memref<1x32x1xf32, #tpu.memory_space<vmem>>, vector<1x32x1xf32>
    %158 = vector.shape_cast %157 : vector<1x32x1xf32> to vector<32x1xf32>
    %159 = vector.broadcast %158 : vector<32x1xf32> to vector<32x16xf32>
    %160 = arith.addf %156, %159 : vector<32x16xf32>
    %cst_55 = arith.constant dense<0.000000e+00> : vector<32xf32>
    %161 = vector.multi_reduction <add>, %160, %cst_55 [1] : vector<32x16xf32> to vector<32xf32>
    %162 = vector.shape_cast %161 : vector<32xf32> to vector<32x1xf32>
    %cst_56 = arith.constant 6.250000e-02 : f32
    %163 = vector.broadcast %cst_56 : f32 to vector<32x1xf32>
    %164 = arith.mulf %162, %163 : vector<32x1xf32>
    %165 = arith.mulf %160, %160 : vector<32x16xf32>
    %cst_57 = arith.constant dense<0.000000e+00> : vector<32xf32>
    %166 = vector.multi_reduction <add>, %165, %cst_57 [1] : vector<32x16xf32> to vector<32xf32>
    %167 = vector.shape_cast %166 : vector<32xf32> to vector<32x1xf32>
    %cst_58 = arith.constant 6.250000e-02 : f32
    %168 = vector.broadcast %cst_58 : f32 to vector<32x1xf32>
    %169 = arith.mulf %167, %168 : vector<32x1xf32>
    %170 = arith.mulf %164, %164 : vector<32x1xf32>
    %171 = arith.subf %169, %170 : vector<32x1xf32>
    %cst_59 = arith.constant 0.000000e+00 : f32
    %172 = vector.broadcast %cst_59 : f32 to vector<32x1xf32>
    %173 = arith.maximumf %171, %172 : vector<32x1xf32>
    %174 = vector.broadcast %164 : vector<32x1xf32> to vector<32x16xf32>
    %175 = arith.subf %160, %174 : vector<32x16xf32>
    %cst_60 = arith.constant 9.99999974E-6 : f32
    %176 = vector.broadcast %cst_60 : f32 to vector<32x1xf32>
    %177 = arith.addf %173, %176 : vector<32x1xf32>
    %178 = math.rsqrt %177 : vector<32x1xf32>
    %179 = vector.broadcast %178 : vector<32x1xf32> to vector<32x16xf32>
    %180 = arith.mulf %175, %179 : vector<32x16xf32>
    %cst_61 = arith.constant 0.000000e+00 : f32
    %181 = vector.broadcast %cst_61 : f32 to vector<32x16xf32>
    %182 = arith.maximumf %180, %181 : vector<32x16xf32>
    %183 = arith.truncf %182 : vector<32x16xf32> to vector<32x16xbf16>
    %c0_62 = arith.constant 0 : index
    %c0_63 = arith.constant 0 : index
    %184 = vector.load %arg29[%c0_62, %c0_63] : memref<16x38xbf16, #tpu.memory_space<vmem>>, vector<16x38xbf16>
    %cst_64 = arith.constant dense<0.000000e+00> : vector<32x38xf32>
    %185 = tpu.matmul %183, %184, %cst_64 {dimension_numbers = #tpu.dot_dimension_numbers<[1], [0], [0], [1], [0, 0, 1, 1], [], []>} : vector<32x16xbf16>, vector<16x38xbf16>, vector<32x38xf32> -> vector<32x38xf32>
    %186 = arith.truncf %185 : vector<32x38xf32> to vector<32x38xbf16>
    %187 = vector.extract_strided_slice %186 {offsets = [0, 0], sizes = [32, 24], strides = [1, 1]} : vector<32x38xbf16> to vector<32x24xbf16>
    %188 = vector.extract_strided_slice %186 {offsets = [0, 1], sizes = [32, 24], strides = [1, 1]} : vector<32x38xbf16> to vector<32x24xbf16>
    %189 = vector.extract_strided_slice %186 {offsets = [0, 2], sizes = [32, 24], strides = [1, 1]} : vector<32x38xbf16> to vector<32x24xbf16>
    %190 = vector.extract_strided_slice %186 {offsets = [0, 6], sizes = [32, 24], strides = [1, 1]} : vector<32x38xbf16> to vector<32x24xbf16>
    %191 = vector.extract_strided_slice %186 {offsets = [0, 7], sizes = [32, 24], strides = [1, 1]} : vector<32x38xbf16> to vector<32x24xbf16>
    %192 = vector.extract_strided_slice %186 {offsets = [0, 8], sizes = [32, 24], strides = [1, 1]} : vector<32x38xbf16> to vector<32x24xbf16>
    %193 = vector.extract_strided_slice %186 {offsets = [0, 12], sizes = [32, 24], strides = [1, 1]} : vector<32x38xbf16> to vector<32x24xbf16>
    %194 = vector.extract_strided_slice %186 {offsets = [0, 13], sizes = [32, 24], strides = [1, 1]} : vector<32x38xbf16> to vector<32x24xbf16>
    %195 = vector.extract_strided_slice %186 {offsets = [0, 14], sizes = [32, 24], strides = [1, 1]} : vector<32x38xbf16> to vector<32x24xbf16>
    %196 = tpu.concatenate %187, %188, %189, %190, %191, %192, %193, %194, %195 in 0 : vector<32x24xbf16>, vector<32x24xbf16>, vector<32x24xbf16>, vector<32x24xbf16>, vector<32x24xbf16>, vector<32x24xbf16>, vector<32x24xbf16>, vector<32x24xbf16>, vector<32x24xbf16> -> vector<288x24xbf16>
    %c0_65 = arith.constant 0 : index
    %c0_66 = arith.constant 0 : index
    %c0_67 = arith.constant 0 : index
    %197 = vector.load %arg9[%c0_65, %c0_66, %c0_67] : memref<1x32x288xbf16, #tpu.memory_space<vmem>>, vector<1x32x288xbf16>
    %198 = vector.shape_cast %197 : vector<1x32x288xbf16> to vector<32x288xbf16>
    %cst_68 = arith.constant dense<0.000000e+00> : vector<32x24xf32>
    %199 = tpu.matmul %198, %196, %cst_68 {dimension_numbers = #tpu.dot_dimension_numbers<[1], [0], [0], [1], [0, 0, 1, 1], [], []>} : vector<32x288xbf16>, vector<288x24xbf16>, vector<32x24xf32> -> vector<32x24xf32>
    %200 = arith.truncf %199 : vector<32x24xf32> to vector<32x24xbf16>
    %c0_69 = arith.constant 0 : index
    %c0_70 = arith.constant 0 : index
    %201 = vector.load %arg30[%c0_69, %c0_70] : memref<24x16xbf16, #tpu.memory_space<vmem>>, vector<24x16xbf16>
    %cst_71 = arith.constant dense<0.000000e+00> : vector<32x16xf32>
    %202 = tpu.matmul %200, %201, %cst_71 {dimension_numbers = #tpu.dot_dimension_numbers<[1], [0], [0], [1], [0, 0, 1, 1], [], []>} : vector<32x24xbf16>, vector<24x16xbf16>, vector<32x16xf32> -> vector<32x16xf32>
    %c0_72 = arith.constant 0 : index
    %c0_73 = arith.constant 0 : index
    %c0_74 = arith.constant 0 : index
    %203 = vector.load %arg10[%c0_72, %c0_73, %c0_74] : memref<1x32x1xf32, #tpu.memory_space<vmem>>, vector<1x32x1xf32>
    %204 = vector.shape_cast %203 : vector<1x32x1xf32> to vector<32x1xf32>
    %205 = vector.broadcast %204 : vector<32x1xf32> to vector<32x16xf32>
    %206 = arith.addf %202, %205 : vector<32x16xf32>
    %cst_75 = arith.constant dense<0.000000e+00> : vector<32xf32>
    %207 = vector.multi_reduction <add>, %206, %cst_75 [1] : vector<32x16xf32> to vector<32xf32>
    %208 = vector.shape_cast %207 : vector<32xf32> to vector<32x1xf32>
    %cst_76 = arith.constant 6.250000e-02 : f32
    %209 = vector.broadcast %cst_76 : f32 to vector<32x1xf32>
    %210 = arith.mulf %208, %209 : vector<32x1xf32>
    %211 = arith.mulf %206, %206 : vector<32x16xf32>
    %cst_77 = arith.constant dense<0.000000e+00> : vector<32xf32>
    %212 = vector.multi_reduction <add>, %211, %cst_77 [1] : vector<32x16xf32> to vector<32xf32>
    %213 = vector.shape_cast %212 : vector<32xf32> to vector<32x1xf32>
    %cst_78 = arith.constant 6.250000e-02 : f32
    %214 = vector.broadcast %cst_78 : f32 to vector<32x1xf32>
    %215 = arith.mulf %213, %214 : vector<32x1xf32>
    %216 = arith.mulf %210, %210 : vector<32x1xf32>
    %217 = arith.subf %215, %216 : vector<32x1xf32>
    %cst_79 = arith.constant 0.000000e+00 : f32
    %218 = vector.broadcast %cst_79 : f32 to vector<32x1xf32>
    %219 = arith.maximumf %217, %218 : vector<32x1xf32>
    %220 = vector.broadcast %210 : vector<32x1xf32> to vector<32x16xf32>
    %221 = arith.subf %206, %220 : vector<32x16xf32>
    %cst_80 = arith.constant 9.99999974E-6 : f32
    %222 = vector.broadcast %cst_80 : f32 to vector<32x1xf32>
    %223 = arith.addf %219, %222 : vector<32x1xf32>
    %224 = math.rsqrt %223 : vector<32x1xf32>
    %225 = vector.broadcast %224 : vector<32x1xf32> to vector<32x16xf32>
    %226 = arith.mulf %221, %225 : vector<32x16xf32>
    %cst_81 = arith.constant 0.000000e+00 : f32
    %227 = vector.broadcast %cst_81 : f32 to vector<32x16xf32>
    %228 = arith.maximumf %226, %227 : vector<32x16xf32>
    %229 = arith.truncf %228 : vector<32x16xf32> to vector<32x16xbf16>
    %c0_82 = arith.constant 0 : index
    %c0_83 = arith.constant 0 : index
    %230 = vector.load %arg29[%c0_82, %c0_83] : memref<16x38xbf16, #tpu.memory_space<vmem>>, vector<16x38xbf16>
    %cst_84 = arith.constant dense<0.000000e+00> : vector<32x38xf32>
    %231 = tpu.matmul %229, %230, %cst_84 {dimension_numbers = #tpu.dot_dimension_numbers<[1], [0], [0], [1], [0, 0, 1, 1], [], []>} : vector<32x16xbf16>, vector<16x38xbf16>, vector<32x38xf32> -> vector<32x38xf32>
    %232 = arith.truncf %231 : vector<32x38xf32> to vector<32x38xbf16>
    %233 = vector.extract_strided_slice %232 {offsets = [0, 0], sizes = [32, 24], strides = [1, 1]} : vector<32x38xbf16> to vector<32x24xbf16>
    %234 = vector.extract_strided_slice %232 {offsets = [0, 1], sizes = [32, 24], strides = [1, 1]} : vector<32x38xbf16> to vector<32x24xbf16>
    %235 = vector.extract_strided_slice %232 {offsets = [0, 2], sizes = [32, 24], strides = [1, 1]} : vector<32x38xbf16> to vector<32x24xbf16>
    %236 = vector.extract_strided_slice %232 {offsets = [0, 6], sizes = [32, 24], strides = [1, 1]} : vector<32x38xbf16> to vector<32x24xbf16>
    %237 = vector.extract_strided_slice %232 {offsets = [0, 7], sizes = [32, 24], strides = [1, 1]} : vector<32x38xbf16> to vector<32x24xbf16>
    %238 = vector.extract_strided_slice %232 {offsets = [0, 8], sizes = [32, 24], strides = [1, 1]} : vector<32x38xbf16> to vector<32x24xbf16>
    %239 = vector.extract_strided_slice %232 {offsets = [0, 12], sizes = [32, 24], strides = [1, 1]} : vector<32x38xbf16> to vector<32x24xbf16>
    %240 = vector.extract_strided_slice %232 {offsets = [0, 13], sizes = [32, 24], strides = [1, 1]} : vector<32x38xbf16> to vector<32x24xbf16>
    %241 = vector.extract_strided_slice %232 {offsets = [0, 14], sizes = [32, 24], strides = [1, 1]} : vector<32x38xbf16> to vector<32x24xbf16>
    %242 = tpu.concatenate %233, %234, %235, %236, %237, %238, %239, %240, %241 in 0 : vector<32x24xbf16>, vector<32x24xbf16>, vector<32x24xbf16>, vector<32x24xbf16>, vector<32x24xbf16>, vector<32x24xbf16>, vector<32x24xbf16>, vector<32x24xbf16>, vector<32x24xbf16> -> vector<288x24xbf16>
    %c0_85 = arith.constant 0 : index
    %c0_86 = arith.constant 0 : index
    %c0_87 = arith.constant 0 : index
    %243 = vector.load %arg11[%c0_85, %c0_86, %c0_87] : memref<1x32x288xbf16, #tpu.memory_space<vmem>>, vector<1x32x288xbf16>
    %244 = vector.shape_cast %243 : vector<1x32x288xbf16> to vector<32x288xbf16>
    %cst_88 = arith.constant dense<0.000000e+00> : vector<32x24xf32>
    %245 = tpu.matmul %244, %242, %cst_88 {dimension_numbers = #tpu.dot_dimension_numbers<[1], [0], [0], [1], [0, 0, 1, 1], [], []>} : vector<32x288xbf16>, vector<288x24xbf16>, vector<32x24xf32> -> vector<32x24xf32>
    %246 = arith.truncf %245 : vector<32x24xf32> to vector<32x24xbf16>
    %c0_89 = arith.constant 0 : index
    %c0_90 = arith.constant 0 : index
    %247 = vector.load %arg30[%c0_89, %c0_90] : memref<24x16xbf16, #tpu.memory_space<vmem>>, vector<24x16xbf16>
    %cst_91 = arith.constant dense<0.000000e+00> : vector<32x16xf32>
    %248 = tpu.matmul %246, %247, %cst_91 {dimension_numbers = #tpu.dot_dimension_numbers<[1], [0], [0], [1], [0, 0, 1, 1], [], []>} : vector<32x24xbf16>, vector<24x16xbf16>, vector<32x16xf32> -> vector<32x16xf32>
    %c0_92 = arith.constant 0 : index
    %c0_93 = arith.constant 0 : index
    %c0_94 = arith.constant 0 : index
    %249 = vector.load %arg12[%c0_92, %c0_93, %c0_94] : memref<1x32x1xf32, #tpu.memory_space<vmem>>, vector<1x32x1xf32>
    %250 = vector.shape_cast %249 : vector<1x32x1xf32> to vector<32x1xf32>
    %251 = vector.broadcast %250 : vector<32x1xf32> to vector<32x16xf32>
    %252 = arith.addf %248, %251 : vector<32x16xf32>
    %cst_95 = arith.constant dense<0.000000e+00> : vector<32xf32>
    %253 = vector.multi_reduction <add>, %252, %cst_95 [1] : vector<32x16xf32> to vector<32xf32>
    %254 = vector.shape_cast %253 : vector<32xf32> to vector<32x1xf32>
    %cst_96 = arith.constant 6.250000e-02 : f32
    %255 = vector.broadcast %cst_96 : f32 to vector<32x1xf32>
    %256 = arith.mulf %254, %255 : vector<32x1xf32>
    %257 = arith.mulf %252, %252 : vector<32x16xf32>
    %cst_97 = arith.constant dense<0.000000e+00> : vector<32xf32>
    %258 = vector.multi_reduction <add>, %257, %cst_97 [1] : vector<32x16xf32> to vector<32xf32>
    %259 = vector.shape_cast %258 : vector<32xf32> to vector<32x1xf32>
    %cst_98 = arith.constant 6.250000e-02 : f32
    %260 = vector.broadcast %cst_98 : f32 to vector<32x1xf32>
    %261 = arith.mulf %259, %260 : vector<32x1xf32>
    %262 = arith.mulf %256, %256 : vector<32x1xf32>
    %263 = arith.subf %261, %262 : vector<32x1xf32>
    %cst_99 = arith.constant 0.000000e+00 : f32
    %264 = vector.broadcast %cst_99 : f32 to vector<32x1xf32>
    %265 = arith.maximumf %263, %264 : vector<32x1xf32>
    %266 = vector.broadcast %256 : vector<32x1xf32> to vector<32x16xf32>
    %267 = arith.subf %252, %266 : vector<32x16xf32>
    %cst_100 = arith.constant 9.99999974E-6 : f32
    %268 = vector.broadcast %cst_100 : f32 to vector<32x1xf32>
    %269 = arith.addf %265, %268 : vector<32x1xf32>
    %270 = math.rsqrt %269 : vector<32x1xf32>
    %271 = vector.broadcast %270 : vector<32x1xf32> to vector<32x16xf32>
    %272 = arith.mulf %267, %271 : vector<32x16xf32>
    %273 = arith.addf %272, %182 : vector<32x16xf32>
    %274 = arith.truncf %273 : vector<32x16xf32> to vector<32x16xbf16>
    %c0_101 = arith.constant 0 : index
    %c0_102 = arith.constant 0 : index
    %275 = vector.load %arg29[%c0_101, %c0_102] : memref<16x38xbf16, #tpu.memory_space<vmem>>, vector<16x38xbf16>
    %cst_103 = arith.constant dense<0.000000e+00> : vector<32x38xf32>
    %276 = tpu.matmul %274, %275, %cst_103 {dimension_numbers = #tpu.dot_dimension_numbers<[1], [0], [0], [1], [0, 0, 1, 1], [], []>} : vector<32x16xbf16>, vector<16x38xbf16>, vector<32x38xf32> -> vector<32x38xf32>
    %277 = arith.truncf %276 : vector<32x38xf32> to vector<32x38xbf16>
    %278 = vector.extract_strided_slice %277 {offsets = [0, 0], sizes = [32, 24], strides = [1, 1]} : vector<32x38xbf16> to vector<32x24xbf16>
    %279 = vector.extract_strided_slice %277 {offsets = [0, 1], sizes = [32, 24], strides = [1, 1]} : vector<32x38xbf16> to vector<32x24xbf16>
    %280 = vector.extract_strided_slice %277 {offsets = [0, 2], sizes = [32, 24], strides = [1, 1]} : vector<32x38xbf16> to vector<32x24xbf16>
    %281 = vector.extract_strided_slice %277 {offsets = [0, 6], sizes = [32, 24], strides = [1, 1]} : vector<32x38xbf16> to vector<32x24xbf16>
    %282 = vector.extract_strided_slice %277 {offsets = [0, 7], sizes = [32, 24], strides = [1, 1]} : vector<32x38xbf16> to vector<32x24xbf16>
    %283 = vector.extract_strided_slice %277 {offsets = [0, 8], sizes = [32, 24], strides = [1, 1]} : vector<32x38xbf16> to vector<32x24xbf16>
    %284 = vector.extract_strided_slice %277 {offsets = [0, 12], sizes = [32, 24], strides = [1, 1]} : vector<32x38xbf16> to vector<32x24xbf16>
    %285 = vector.extract_strided_slice %277 {offsets = [0, 13], sizes = [32, 24], strides = [1, 1]} : vector<32x38xbf16> to vector<32x24xbf16>
    %286 = vector.extract_strided_slice %277 {offsets = [0, 14], sizes = [32, 24], strides = [1, 1]} : vector<32x38xbf16> to vector<32x24xbf16>
    %287 = tpu.concatenate %278, %279, %280, %281, %282, %283, %284, %285, %286 in 0 : vector<32x24xbf16>, vector<32x24xbf16>, vector<32x24xbf16>, vector<32x24xbf16>, vector<32x24xbf16>, vector<32x24xbf16>, vector<32x24xbf16>, vector<32x24xbf16>, vector<32x24xbf16> -> vector<288x24xbf16>
    %c0_104 = arith.constant 0 : index
    %c0_105 = arith.constant 0 : index
    %c0_106 = arith.constant 0 : index
    %288 = vector.load %arg13[%c0_104, %c0_105, %c0_106] : memref<1x32x288xbf16, #tpu.memory_space<vmem>>, vector<1x32x288xbf16>
    %289 = vector.shape_cast %288 : vector<1x32x288xbf16> to vector<32x288xbf16>
    %cst_107 = arith.constant dense<0.000000e+00> : vector<32x24xf32>
    %290 = tpu.matmul %289, %287, %cst_107 {dimension_numbers = #tpu.dot_dimension_numbers<[1], [0], [0], [1], [0, 0, 1, 1], [], []>} : vector<32x288xbf16>, vector<288x24xbf16>, vector<32x24xf32> -> vector<32x24xf32>
    %291 = arith.truncf %290 : vector<32x24xf32> to vector<32x24xbf16>
    %c0_108 = arith.constant 0 : index
    %c0_109 = arith.constant 0 : index
    %292 = vector.load %arg30[%c0_108, %c0_109] : memref<24x16xbf16, #tpu.memory_space<vmem>>, vector<24x16xbf16>
    %cst_110 = arith.constant dense<0.000000e+00> : vector<32x16xf32>
    %293 = tpu.matmul %291, %292, %cst_110 {dimension_numbers = #tpu.dot_dimension_numbers<[1], [0], [0], [1], [0, 0, 1, 1], [], []>} : vector<32x24xbf16>, vector<24x16xbf16>, vector<32x16xf32> -> vector<32x16xf32>
    %c0_111 = arith.constant 0 : index
    %c0_112 = arith.constant 0 : index
    %c0_113 = arith.constant 0 : index
    %294 = vector.load %arg14[%c0_111, %c0_112, %c0_113] : memref<1x32x1xf32, #tpu.memory_space<vmem>>, vector<1x32x1xf32>
    %295 = vector.shape_cast %294 : vector<1x32x1xf32> to vector<32x1xf32>
    %296 = vector.broadcast %295 : vector<32x1xf32> to vector<32x16xf32>
    %297 = arith.addf %293, %296 : vector<32x16xf32>
    %cst_114 = arith.constant dense<0.000000e+00> : vector<32xf32>
    %298 = vector.multi_reduction <add>, %297, %cst_114 [1] : vector<32x16xf32> to vector<32xf32>
    %299 = vector.shape_cast %298 : vector<32xf32> to vector<32x1xf32>
    %cst_115 = arith.constant 6.250000e-02 : f32
    %300 = vector.broadcast %cst_115 : f32 to vector<32x1xf32>
    %301 = arith.mulf %299, %300 : vector<32x1xf32>
    %302 = arith.mulf %297, %297 : vector<32x16xf32>
    %cst_116 = arith.constant dense<0.000000e+00> : vector<32xf32>
    %303 = vector.multi_reduction <add>, %302, %cst_116 [1] : vector<32x16xf32> to vector<32xf32>
    %304 = vector.shape_cast %303 : vector<32xf32> to vector<32x1xf32>
    %cst_117 = arith.constant 6.250000e-02 : f32
    %305 = vector.broadcast %cst_117 : f32 to vector<32x1xf32>
    %306 = arith.mulf %304, %305 : vector<32x1xf32>
    %307 = arith.mulf %301, %301 : vector<32x1xf32>
    %308 = arith.subf %306, %307 : vector<32x1xf32>
    %cst_118 = arith.constant 0.000000e+00 : f32
    %309 = vector.broadcast %cst_118 : f32 to vector<32x1xf32>
    %310 = arith.maximumf %308, %309 : vector<32x1xf32>
    %311 = vector.broadcast %301 : vector<32x1xf32> to vector<32x16xf32>
    %312 = arith.subf %297, %311 : vector<32x16xf32>
    %cst_119 = arith.constant 9.99999974E-6 : f32
    %313 = vector.broadcast %cst_119 : f32 to vector<32x1xf32>
    %314 = arith.addf %310, %313 : vector<32x1xf32>
    %315 = math.rsqrt %314 : vector<32x1xf32>
    %316 = vector.broadcast %315 : vector<32x1xf32> to vector<32x16xf32>
    %317 = arith.mulf %312, %316 : vector<32x16xf32>
    %cst_120 = arith.constant 0.000000e+00 : f32
    %318 = vector.broadcast %cst_120 : f32 to vector<32x16xf32>
    %319 = arith.maximumf %317, %318 : vector<32x16xf32>
    %320 = arith.truncf %319 : vector<32x16xf32> to vector<32x16xbf16>
    %c0_121 = arith.constant 0 : index
    %c0_122 = arith.constant 0 : index
    %321 = vector.load %arg29[%c0_121, %c0_122] : memref<16x38xbf16, #tpu.memory_space<vmem>>, vector<16x38xbf16>
    %cst_123 = arith.constant dense<0.000000e+00> : vector<32x38xf32>
    %322 = tpu.matmul %320, %321, %cst_123 {dimension_numbers = #tpu.dot_dimension_numbers<[1], [0], [0], [1], [0, 0, 1, 1], [], []>} : vector<32x16xbf16>, vector<16x38xbf16>, vector<32x38xf32> -> vector<32x38xf32>
    %323 = arith.truncf %322 : vector<32x38xf32> to vector<32x38xbf16>
    %324 = vector.extract_strided_slice %323 {offsets = [0, 0], sizes = [32, 24], strides = [1, 1]} : vector<32x38xbf16> to vector<32x24xbf16>
    %325 = vector.extract_strided_slice %323 {offsets = [0, 1], sizes = [32, 24], strides = [1, 1]} : vector<32x38xbf16> to vector<32x24xbf16>
    %326 = vector.extract_strided_slice %323 {offsets = [0, 2], sizes = [32, 24], strides = [1, 1]} : vector<32x38xbf16> to vector<32x24xbf16>
    %327 = vector.extract_strided_slice %323 {offsets = [0, 6], sizes = [32, 24], strides = [1, 1]} : vector<32x38xbf16> to vector<32x24xbf16>
    %328 = vector.extract_strided_slice %323 {offsets = [0, 7], sizes = [32, 24], strides = [1, 1]} : vector<32x38xbf16> to vector<32x24xbf16>
    %329 = vector.extract_strided_slice %323 {offsets = [0, 8], sizes = [32, 24], strides = [1, 1]} : vector<32x38xbf16> to vector<32x24xbf16>
    %330 = vector.extract_strided_slice %323 {offsets = [0, 12], sizes = [32, 24], strides = [1, 1]} : vector<32x38xbf16> to vector<32x24xbf16>
    %331 = vector.extract_strided_slice %323 {offsets = [0, 13], sizes = [32, 24], strides = [1, 1]} : vector<32x38xbf16> to vector<32x24xbf16>
    %332 = vector.extract_strided_slice %323 {offsets = [0, 14], sizes = [32, 24], strides = [1, 1]} : vector<32x38xbf16> to vector<32x24xbf16>
    %333 = tpu.concatenate %324, %325, %326, %327, %328, %329, %330, %331, %332 in 0 : vector<32x24xbf16>, vector<32x24xbf16>, vector<32x24xbf16>, vector<32x24xbf16>, vector<32x24xbf16>, vector<32x24xbf16>, vector<32x24xbf16>, vector<32x24xbf16>, vector<32x24xbf16> -> vector<288x24xbf16>
    %c0_124 = arith.constant 0 : index
    %c0_125 = arith.constant 0 : index
    %c0_126 = arith.constant 0 : index
    %334 = vector.load %arg15[%c0_124, %c0_125, %c0_126] : memref<1x32x288xbf16, #tpu.memory_space<vmem>>, vector<1x32x288xbf16>
    %335 = vector.shape_cast %334 : vector<1x32x288xbf16> to vector<32x288xbf16>
    %cst_127 = arith.constant dense<0.000000e+00> : vector<32x24xf32>
    %336 = tpu.matmul %335, %333, %cst_127 {dimension_numbers = #tpu.dot_dimension_numbers<[1], [0], [0], [1], [0, 0, 1, 1], [], []>} : vector<32x288xbf16>, vector<288x24xbf16>, vector<32x24xf32> -> vector<32x24xf32>
    %337 = arith.truncf %336 : vector<32x24xf32> to vector<32x24xbf16>
    %c0_128 = arith.constant 0 : index
    %c0_129 = arith.constant 0 : index
    %338 = vector.load %arg30[%c0_128, %c0_129] : memref<24x16xbf16, #tpu.memory_space<vmem>>, vector<24x16xbf16>
    %cst_130 = arith.constant dense<0.000000e+00> : vector<32x16xf32>
    %339 = tpu.matmul %337, %338, %cst_130 {dimension_numbers = #tpu.dot_dimension_numbers<[1], [0], [0], [1], [0, 0, 1, 1], [], []>} : vector<32x24xbf16>, vector<24x16xbf16>, vector<32x16xf32> -> vector<32x16xf32>
    %c0_131 = arith.constant 0 : index
    %c0_132 = arith.constant 0 : index
    %c0_133 = arith.constant 0 : index
    %340 = vector.load %arg16[%c0_131, %c0_132, %c0_133] : memref<1x32x1xf32, #tpu.memory_space<vmem>>, vector<1x32x1xf32>
    %341 = vector.shape_cast %340 : vector<1x32x1xf32> to vector<32x1xf32>
    %342 = vector.broadcast %341 : vector<32x1xf32> to vector<32x16xf32>
    %343 = arith.addf %339, %342 : vector<32x16xf32>
    %cst_134 = arith.constant dense<0.000000e+00> : vector<32xf32>
    %344 = vector.multi_reduction <add>, %343, %cst_134 [1] : vector<32x16xf32> to vector<32xf32>
    %345 = vector.shape_cast %344 : vector<32xf32> to vector<32x1xf32>
    %cst_135 = arith.constant 6.250000e-02 : f32
    %346 = vector.broadcast %cst_135 : f32 to vector<32x1xf32>
    %347 = arith.mulf %345, %346 : vector<32x1xf32>
    %348 = arith.mulf %343, %343 : vector<32x16xf32>
    %cst_136 = arith.constant dense<0.000000e+00> : vector<32xf32>
    %349 = vector.multi_reduction <add>, %348, %cst_136 [1] : vector<32x16xf32> to vector<32xf32>
    %350 = vector.shape_cast %349 : vector<32xf32> to vector<32x1xf32>
    %cst_137 = arith.constant 6.250000e-02 : f32
    %351 = vector.broadcast %cst_137 : f32 to vector<32x1xf32>
    %352 = arith.mulf %350, %351 : vector<32x1xf32>
    %353 = arith.mulf %347, %347 : vector<32x1xf32>
    %354 = arith.subf %352, %353 : vector<32x1xf32>
    %cst_138 = arith.constant 0.000000e+00 : f32
    %355 = vector.broadcast %cst_138 : f32 to vector<32x1xf32>
    %356 = arith.maximumf %354, %355 : vector<32x1xf32>
    %357 = vector.broadcast %347 : vector<32x1xf32> to vector<32x16xf32>
    %358 = arith.subf %343, %357 : vector<32x16xf32>
    %cst_139 = arith.constant 9.99999974E-6 : f32
    %359 = vector.broadcast %cst_139 : f32 to vector<32x1xf32>
    %360 = arith.addf %356, %359 : vector<32x1xf32>
    %361 = math.rsqrt %360 : vector<32x1xf32>
    %362 = vector.broadcast %361 : vector<32x1xf32> to vector<32x16xf32>
    %363 = arith.mulf %358, %362 : vector<32x16xf32>
    %364 = arith.addf %363, %273 : vector<32x16xf32>
    %365 = arith.truncf %364 : vector<32x16xf32> to vector<32x16xbf16>
    %c0_140 = arith.constant 0 : index
    %c0_141 = arith.constant 0 : index
    %366 = vector.load %arg31[%c0_140, %c0_141] : memref<16x102xbf16, #tpu.memory_space<vmem>>, vector<16x102xbf16>
    %cst_142 = arith.constant dense<0.000000e+00> : vector<32x102xf32>
    %367 = tpu.matmul %365, %366, %cst_142 {dimension_numbers = #tpu.dot_dimension_numbers<[1], [0], [0], [1], [0, 0, 1, 1], [], []>} : vector<32x16xbf16>, vector<16x102xbf16>, vector<32x102xf32> -> vector<32x102xf32>
    %368 = arith.truncf %367 : vector<32x102xf32> to vector<32x102xbf16>
    %369 = vector.extract_strided_slice %368 {offsets = [0, 0], sizes = [32, 80], strides = [1, 1]} : vector<32x102xbf16> to vector<32x80xbf16>
    %370 = vector.extract_strided_slice %368 {offsets = [0, 1], sizes = [32, 80], strides = [1, 1]} : vector<32x102xbf16> to vector<32x80xbf16>
    %371 = vector.extract_strided_slice %368 {offsets = [0, 2], sizes = [32, 80], strides = [1, 1]} : vector<32x102xbf16> to vector<32x80xbf16>
    %372 = vector.extract_strided_slice %368 {offsets = [0, 10], sizes = [32, 80], strides = [1, 1]} : vector<32x102xbf16> to vector<32x80xbf16>
    %373 = vector.extract_strided_slice %368 {offsets = [0, 11], sizes = [32, 80], strides = [1, 1]} : vector<32x102xbf16> to vector<32x80xbf16>
    %374 = vector.extract_strided_slice %368 {offsets = [0, 12], sizes = [32, 80], strides = [1, 1]} : vector<32x102xbf16> to vector<32x80xbf16>
    %375 = vector.extract_strided_slice %368 {offsets = [0, 20], sizes = [32, 80], strides = [1, 1]} : vector<32x102xbf16> to vector<32x80xbf16>
    %376 = vector.extract_strided_slice %368 {offsets = [0, 21], sizes = [32, 80], strides = [1, 1]} : vector<32x102xbf16> to vector<32x80xbf16>
    %377 = vector.extract_strided_slice %368 {offsets = [0, 22], sizes = [32, 80], strides = [1, 1]} : vector<32x102xbf16> to vector<32x80xbf16>
    %378 = tpu.concatenate %369, %370, %371, %372, %373, %374, %375, %376, %377 in 0 : vector<32x80xbf16>, vector<32x80xbf16>, vector<32x80xbf16>, vector<32x80xbf16>, vector<32x80xbf16>, vector<32x80xbf16>, vector<32x80xbf16>, vector<32x80xbf16>, vector<32x80xbf16> -> vector<288x80xbf16>
    %c0_143 = arith.constant 0 : index
    %c0_144 = arith.constant 0 : index
    %c0_145 = arith.constant 0 : index
    %379 = vector.load %arg17[%c0_143, %c0_144, %c0_145] : memref<1x16x288xbf16, #tpu.memory_space<vmem>>, vector<1x16x288xbf16>
    %380 = vector.shape_cast %379 : vector<1x16x288xbf16> to vector<16x288xbf16>
    %cst_146 = arith.constant dense<0.000000e+00> : vector<16x80xf32>
    %381 = tpu.matmul %380, %378, %cst_146 {dimension_numbers = #tpu.dot_dimension_numbers<[1], [0], [0], [1], [0, 0, 1, 1], [], []>} : vector<16x288xbf16>, vector<288x80xbf16>, vector<16x80xf32> -> vector<16x80xf32>
    %382 = arith.truncf %381 : vector<16x80xf32> to vector<16x80xbf16>
    %c0_147 = arith.constant 0 : index
    %c0_148 = arith.constant 0 : index
    %383 = vector.load %arg32[%c0_147, %c0_148] : memref<80x64xbf16, #tpu.memory_space<vmem>>, vector<80x64xbf16>
    %cst_149 = arith.constant dense<0.000000e+00> : vector<16x64xf32>
    %384 = tpu.matmul %382, %383, %cst_149 {dimension_numbers = #tpu.dot_dimension_numbers<[1], [0], [0], [1], [0, 0, 1, 1], [], []>} : vector<16x80xbf16>, vector<80x64xbf16>, vector<16x64xf32> -> vector<16x64xf32>
    %c0_150 = arith.constant 0 : index
    %c0_151 = arith.constant 0 : index
    %c0_152 = arith.constant 0 : index
    %385 = vector.load %arg18[%c0_150, %c0_151, %c0_152] : memref<1x16x1xf32, #tpu.memory_space<vmem>>, vector<1x16x1xf32>
    %386 = vector.shape_cast %385 : vector<1x16x1xf32> to vector<16x1xf32>
    %387 = vector.broadcast %386 : vector<16x1xf32> to vector<16x64xf32>
    %388 = arith.addf %384, %387 : vector<16x64xf32>
    %cst_153 = arith.constant dense<0.000000e+00> : vector<16xf32>
    %389 = vector.multi_reduction <add>, %388, %cst_153 [1] : vector<16x64xf32> to vector<16xf32>
    %390 = vector.shape_cast %389 : vector<16xf32> to vector<16x1xf32>
    %cst_154 = arith.constant 1.562500e-02 : f32
    %391 = vector.broadcast %cst_154 : f32 to vector<16x1xf32>
    %392 = arith.mulf %390, %391 : vector<16x1xf32>
    %393 = arith.mulf %388, %388 : vector<16x64xf32>
    %cst_155 = arith.constant dense<0.000000e+00> : vector<16xf32>
    %394 = vector.multi_reduction <add>, %393, %cst_155 [1] : vector<16x64xf32> to vector<16xf32>
    %395 = vector.shape_cast %394 : vector<16xf32> to vector<16x1xf32>
    %cst_156 = arith.constant 1.562500e-02 : f32
    %396 = vector.broadcast %cst_156 : f32 to vector<16x1xf32>
    %397 = arith.mulf %395, %396 : vector<16x1xf32>
    %398 = arith.mulf %392, %392 : vector<16x1xf32>
    %399 = arith.subf %397, %398 : vector<16x1xf32>
    %cst_157 = arith.constant 0.000000e+00 : f32
    %400 = vector.broadcast %cst_157 : f32 to vector<16x1xf32>
    %401 = arith.maximumf %399, %400 : vector<16x1xf32>
    %402 = vector.broadcast %392 : vector<16x1xf32> to vector<16x64xf32>
    %403 = arith.subf %388, %402 : vector<16x64xf32>
    %cst_158 = arith.constant 9.99999974E-6 : f32
    %404 = vector.broadcast %cst_158 : f32 to vector<16x1xf32>
    %405 = arith.addf %401, %404 : vector<16x1xf32>
    %406 = math.rsqrt %405 : vector<16x1xf32>
    %407 = vector.broadcast %406 : vector<16x1xf32> to vector<16x64xf32>
    %408 = arith.mulf %403, %407 : vector<16x64xf32>
    %cst_159 = arith.constant 0.000000e+00 : f32
    %409 = vector.broadcast %cst_159 : f32 to vector<16x64xf32>
    %410 = arith.maximumf %408, %409 : vector<16x64xf32>
    %411 = arith.truncf %410 : vector<16x64xf32> to vector<16x64xbf16>
    %c0_160 = arith.constant 0 : index
    %c0_161 = arith.constant 0 : index
    %412 = vector.load %arg33[%c0_160, %c0_161] : memref<64x326xbf16, #tpu.memory_space<vmem>>, vector<64x326xbf16>
    %cst_162 = arith.constant dense<0.000000e+00> : vector<16x326xf32>
    %413 = tpu.matmul %411, %412, %cst_162 {dimension_numbers = #tpu.dot_dimension_numbers<[1], [0], [0], [1], [0, 0, 1, 1], [], []>} : vector<16x64xbf16>, vector<64x326xbf16>, vector<16x326xf32> -> vector<16x326xf32>
    %414 = arith.truncf %413 : vector<16x326xf32> to vector<16x326xbf16>
    %415 = vector.extract_strided_slice %414 {offsets = [0, 0], sizes = [16, 288], strides = [1, 1]} : vector<16x326xbf16> to vector<16x288xbf16>
    %416 = vector.extract_strided_slice %414 {offsets = [0, 1], sizes = [16, 288], strides = [1, 1]} : vector<16x326xbf16> to vector<16x288xbf16>
    %417 = vector.extract_strided_slice %414 {offsets = [0, 2], sizes = [16, 288], strides = [1, 1]} : vector<16x326xbf16> to vector<16x288xbf16>
    %418 = vector.extract_strided_slice %414 {offsets = [0, 18], sizes = [16, 288], strides = [1, 1]} : vector<16x326xbf16> to vector<16x288xbf16>
    %419 = vector.extract_strided_slice %414 {offsets = [0, 19], sizes = [16, 288], strides = [1, 1]} : vector<16x326xbf16> to vector<16x288xbf16>
    %420 = vector.extract_strided_slice %414 {offsets = [0, 20], sizes = [16, 288], strides = [1, 1]} : vector<16x326xbf16> to vector<16x288xbf16>
    %421 = vector.extract_strided_slice %414 {offsets = [0, 36], sizes = [16, 288], strides = [1, 1]} : vector<16x326xbf16> to vector<16x288xbf16>
    %422 = vector.extract_strided_slice %414 {offsets = [0, 37], sizes = [16, 288], strides = [1, 1]} : vector<16x326xbf16> to vector<16x288xbf16>
    %423 = vector.extract_strided_slice %414 {offsets = [0, 38], sizes = [16, 288], strides = [1, 1]} : vector<16x326xbf16> to vector<16x288xbf16>
    %424 = tpu.concatenate %415, %416, %417, %418, %419, %420, %421, %422, %423 in 0 : vector<16x288xbf16>, vector<16x288xbf16>, vector<16x288xbf16>, vector<16x288xbf16>, vector<16x288xbf16>, vector<16x288xbf16>, vector<16x288xbf16>, vector<16x288xbf16>, vector<16x288xbf16> -> vector<144x288xbf16>
    %c0_163 = arith.constant 0 : index
    %c0_164 = arith.constant 0 : index
    %c0_165 = arith.constant 0 : index
    %425 = vector.load %arg19[%c0_163, %c0_164, %c0_165] : memref<1x8x144xbf16, #tpu.memory_space<vmem>>, vector<1x8x144xbf16>
    %426 = vector.shape_cast %425 : vector<1x8x144xbf16> to vector<8x144xbf16>
    %cst_166 = arith.constant dense<0.000000e+00> : vector<8x288xf32>
    %427 = tpu.matmul %426, %424, %cst_166 {dimension_numbers = #tpu.dot_dimension_numbers<[1], [0], [0], [1], [0, 0, 1, 1], [], []>} : vector<8x144xbf16>, vector<144x288xbf16>, vector<8x288xf32> -> vector<8x288xf32>
    %428 = arith.truncf %427 : vector<8x288xf32> to vector<8x288xbf16>
    %c0_167 = arith.constant 0 : index
    %c0_168 = arith.constant 0 : index
    %429 = vector.load %arg34[%c0_167, %c0_168] : memref<288x256xbf16, #tpu.memory_space<vmem>>, vector<288x256xbf16>
    %cst_169 = arith.constant dense<0.000000e+00> : vector<8x256xf32>
    %430 = tpu.matmul %428, %429, %cst_169 {dimension_numbers = #tpu.dot_dimension_numbers<[1], [0], [0], [1], [0, 0, 1, 1], [], []>} : vector<8x288xbf16>, vector<288x256xbf16>, vector<8x256xf32> -> vector<8x256xf32>
    %c0_170 = arith.constant 0 : index
    %c0_171 = arith.constant 0 : index
    %c0_172 = arith.constant 0 : index
    %431 = vector.load %arg20[%c0_170, %c0_171, %c0_172] : memref<1x8x1xf32, #tpu.memory_space<vmem>>, vector<1x8x1xf32>
    %432 = vector.shape_cast %431 : vector<1x8x1xf32> to vector<8x1xf32>
    %433 = vector.broadcast %432 : vector<8x1xf32> to vector<8x256xf32>
    %434 = arith.addf %430, %433 : vector<8x256xf32>
    %cst_173 = arith.constant dense<0.000000e+00> : vector<8xf32>
    %435 = vector.multi_reduction <add>, %434, %cst_173 [1] : vector<8x256xf32> to vector<8xf32>
    %436 = vector.shape_cast %435 : vector<8xf32> to vector<8x1xf32>
    %cst_174 = arith.constant 3.906250e-03 : f32
    %437 = vector.broadcast %cst_174 : f32 to vector<8x1xf32>
    %438 = arith.mulf %436, %437 : vector<8x1xf32>
    %439 = arith.mulf %434, %434 : vector<8x256xf32>
    %cst_175 = arith.constant dense<0.000000e+00> : vector<8xf32>
    %440 = vector.multi_reduction <add>, %439, %cst_175 [1] : vector<8x256xf32> to vector<8xf32>
    %441 = vector.shape_cast %440 : vector<8xf32> to vector<8x1xf32>
    %cst_176 = arith.constant 3.906250e-03 : f32
    %442 = vector.broadcast %cst_176 : f32 to vector<8x1xf32>
    %443 = arith.mulf %441, %442 : vector<8x1xf32>
    %444 = arith.mulf %438, %438 : vector<8x1xf32>
    %445 = arith.subf %443, %444 : vector<8x1xf32>
    %cst_177 = arith.constant 0.000000e+00 : f32
    %446 = vector.broadcast %cst_177 : f32 to vector<8x1xf32>
    %447 = arith.maximumf %445, %446 : vector<8x1xf32>
    %448 = vector.broadcast %438 : vector<8x1xf32> to vector<8x256xf32>
    %449 = arith.subf %434, %448 : vector<8x256xf32>
    %cst_178 = arith.constant 9.99999974E-6 : f32
    %450 = vector.broadcast %cst_178 : f32 to vector<8x1xf32>
    %451 = arith.addf %447, %450 : vector<8x1xf32>
    %452 = math.rsqrt %451 : vector<8x1xf32>
    %453 = vector.broadcast %452 : vector<8x1xf32> to vector<8x256xf32>
    %454 = arith.mulf %449, %453 : vector<8x256xf32>
    %cst_179 = arith.constant 0.000000e+00 : f32
    %455 = vector.broadcast %cst_179 : f32 to vector<8x256xf32>
    %456 = arith.maximumf %454, %455 : vector<8x256xf32>
    %457 = arith.truncf %456 : vector<8x256xf32> to vector<8x256xbf16>
    %c0_180 = arith.constant 0 : index
    %c0_181 = arith.constant 0 : index
    %458 = vector.load %arg23[%c0_180, %c0_181] : memref<256x490xbf16, #tpu.memory_space<vmem>>, vector<256x490xbf16>
    %cst_182 = arith.constant dense<0.000000e+00> : vector<8x490xf32>
    %459 = tpu.matmul %457, %458, %cst_182 {dimension_numbers = #tpu.dot_dimension_numbers<[1], [0], [0], [1], [0, 0, 1, 1], [], []>} : vector<8x256xbf16>, vector<256x490xbf16>, vector<8x490xf32> -> vector<8x490xf32>
    %460 = arith.truncf %459 : vector<8x490xf32> to vector<8x490xbf16>
    %461 = vector.extract_strided_slice %460 {offsets = [0, 0], sizes = [8, 352], strides = [1, 1]} : vector<8x490xbf16> to vector<8x352xbf16>
    %462 = vector.extract_strided_slice %460 {offsets = [0, 1], sizes = [8, 352], strides = [1, 1]} : vector<8x490xbf16> to vector<8x352xbf16>
    %463 = vector.extract_strided_slice %460 {offsets = [0, 2], sizes = [8, 352], strides = [1, 1]} : vector<8x490xbf16> to vector<8x352xbf16>
    %464 = vector.extract_strided_slice %460 {offsets = [0, 3], sizes = [8, 352], strides = [1, 1]} : vector<8x490xbf16> to vector<8x352xbf16>
    %465 = vector.extract_strided_slice %460 {offsets = [0, 4], sizes = [8, 352], strides = [1, 1]} : vector<8x490xbf16> to vector<8x352xbf16>
    %466 = vector.extract_strided_slice %460 {offsets = [0, 5], sizes = [8, 352], strides = [1, 1]} : vector<8x490xbf16> to vector<8x352xbf16>
    %467 = vector.extract_strided_slice %460 {offsets = [0, 6], sizes = [8, 352], strides = [1, 1]} : vector<8x490xbf16> to vector<8x352xbf16>
    %468 = vector.extract_strided_slice %460 {offsets = [0, 22], sizes = [8, 352], strides = [1, 1]} : vector<8x490xbf16> to vector<8x352xbf16>
    %469 = vector.extract_strided_slice %460 {offsets = [0, 23], sizes = [8, 352], strides = [1, 1]} : vector<8x490xbf16> to vector<8x352xbf16>
    %470 = vector.extract_strided_slice %460 {offsets = [0, 24], sizes = [8, 352], strides = [1, 1]} : vector<8x490xbf16> to vector<8x352xbf16>
    %471 = vector.extract_strided_slice %460 {offsets = [0, 25], sizes = [8, 352], strides = [1, 1]} : vector<8x490xbf16> to vector<8x352xbf16>
    %472 = vector.extract_strided_slice %460 {offsets = [0, 26], sizes = [8, 352], strides = [1, 1]} : vector<8x490xbf16> to vector<8x352xbf16>
    %473 = vector.extract_strided_slice %460 {offsets = [0, 27], sizes = [8, 352], strides = [1, 1]} : vector<8x490xbf16> to vector<8x352xbf16>
    %474 = vector.extract_strided_slice %460 {offsets = [0, 28], sizes = [8, 352], strides = [1, 1]} : vector<8x490xbf16> to vector<8x352xbf16>
    %475 = vector.extract_strided_slice %460 {offsets = [0, 44], sizes = [8, 352], strides = [1, 1]} : vector<8x490xbf16> to vector<8x352xbf16>
    %476 = vector.extract_strided_slice %460 {offsets = [0, 45], sizes = [8, 352], strides = [1, 1]} : vector<8x490xbf16> to vector<8x352xbf16>
    %477 = vector.extract_strided_slice %460 {offsets = [0, 46], sizes = [8, 352], strides = [1, 1]} : vector<8x490xbf16> to vector<8x352xbf16>
    %478 = vector.extract_strided_slice %460 {offsets = [0, 47], sizes = [8, 352], strides = [1, 1]} : vector<8x490xbf16> to vector<8x352xbf16>
    %479 = vector.extract_strided_slice %460 {offsets = [0, 48], sizes = [8, 352], strides = [1, 1]} : vector<8x490xbf16> to vector<8x352xbf16>
    %480 = vector.extract_strided_slice %460 {offsets = [0, 49], sizes = [8, 352], strides = [1, 1]} : vector<8x490xbf16> to vector<8x352xbf16>
    %481 = vector.extract_strided_slice %460 {offsets = [0, 50], sizes = [8, 352], strides = [1, 1]} : vector<8x490xbf16> to vector<8x352xbf16>
    %482 = vector.extract_strided_slice %460 {offsets = [0, 66], sizes = [8, 352], strides = [1, 1]} : vector<8x490xbf16> to vector<8x352xbf16>
    %483 = vector.extract_strided_slice %460 {offsets = [0, 67], sizes = [8, 352], strides = [1, 1]} : vector<8x490xbf16> to vector<8x352xbf16>
    %484 = vector.extract_strided_slice %460 {offsets = [0, 68], sizes = [8, 352], strides = [1, 1]} : vector<8x490xbf16> to vector<8x352xbf16>
    %485 = vector.extract_strided_slice %460 {offsets = [0, 69], sizes = [8, 352], strides = [1, 1]} : vector<8x490xbf16> to vector<8x352xbf16>
    %486 = vector.extract_strided_slice %460 {offsets = [0, 70], sizes = [8, 352], strides = [1, 1]} : vector<8x490xbf16> to vector<8x352xbf16>
    %487 = vector.extract_strided_slice %460 {offsets = [0, 71], sizes = [8, 352], strides = [1, 1]} : vector<8x490xbf16> to vector<8x352xbf16>
    %488 = vector.extract_strided_slice %460 {offsets = [0, 72], sizes = [8, 352], strides = [1, 1]} : vector<8x490xbf16> to vector<8x352xbf16>
    %489 = vector.extract_strided_slice %460 {offsets = [0, 88], sizes = [8, 352], strides = [1, 1]} : vector<8x490xbf16> to vector<8x352xbf16>
    %490 = vector.extract_strided_slice %460 {offsets = [0, 89], sizes = [8, 352], strides = [1, 1]} : vector<8x490xbf16> to vector<8x352xbf16>
    %491 = vector.extract_strided_slice %460 {offsets = [0, 90], sizes = [8, 352], strides = [1, 1]} : vector<8x490xbf16> to vector<8x352xbf16>
    %492 = vector.extract_strided_slice %460 {offsets = [0, 91], sizes = [8, 352], strides = [1, 1]} : vector<8x490xbf16> to vector<8x352xbf16>
    %493 = vector.extract_strided_slice %460 {offsets = [0, 92], sizes = [8, 352], strides = [1, 1]} : vector<8x490xbf16> to vector<8x352xbf16>
    %494 = vector.extract_strided_slice %460 {offsets = [0, 93], sizes = [8, 352], strides = [1, 1]} : vector<8x490xbf16> to vector<8x352xbf16>
    %495 = vector.extract_strided_slice %460 {offsets = [0, 94], sizes = [8, 352], strides = [1, 1]} : vector<8x490xbf16> to vector<8x352xbf16>
    %496 = vector.extract_strided_slice %460 {offsets = [0, 110], sizes = [8, 352], strides = [1, 1]} : vector<8x490xbf16> to vector<8x352xbf16>
    %497 = vector.extract_strided_slice %460 {offsets = [0, 111], sizes = [8, 352], strides = [1, 1]} : vector<8x490xbf16> to vector<8x352xbf16>
    %498 = vector.extract_strided_slice %460 {offsets = [0, 112], sizes = [8, 352], strides = [1, 1]} : vector<8x490xbf16> to vector<8x352xbf16>
    %499 = vector.extract_strided_slice %460 {offsets = [0, 113], sizes = [8, 352], strides = [1, 1]} : vector<8x490xbf16> to vector<8x352xbf16>
    %500 = vector.extract_strided_slice %460 {offsets = [0, 114], sizes = [8, 352], strides = [1, 1]} : vector<8x490xbf16> to vector<8x352xbf16>
    %501 = vector.extract_strided_slice %460 {offsets = [0, 115], sizes = [8, 352], strides = [1, 1]} : vector<8x490xbf16> to vector<8x352xbf16>
    %502 = vector.extract_strided_slice %460 {offsets = [0, 116], sizes = [8, 352], strides = [1, 1]} : vector<8x490xbf16> to vector<8x352xbf16>
    %503 = vector.extract_strided_slice %460 {offsets = [0, 132], sizes = [8, 352], strides = [1, 1]} : vector<8x490xbf16> to vector<8x352xbf16>
    %504 = vector.extract_strided_slice %460 {offsets = [0, 133], sizes = [8, 352], strides = [1, 1]} : vector<8x490xbf16> to vector<8x352xbf16>
    %505 = vector.extract_strided_slice %460 {offsets = [0, 134], sizes = [8, 352], strides = [1, 1]} : vector<8x490xbf16> to vector<8x352xbf16>
    %506 = vector.extract_strided_slice %460 {offsets = [0, 135], sizes = [8, 352], strides = [1, 1]} : vector<8x490xbf16> to vector<8x352xbf16>
    %507 = vector.extract_strided_slice %460 {offsets = [0, 136], sizes = [8, 352], strides = [1, 1]} : vector<8x490xbf16> to vector<8x352xbf16>
    %508 = vector.extract_strided_slice %460 {offsets = [0, 137], sizes = [8, 352], strides = [1, 1]} : vector<8x490xbf16> to vector<8x352xbf16>
    %509 = vector.extract_strided_slice %460 {offsets = [0, 138], sizes = [8, 352], strides = [1, 1]} : vector<8x490xbf16> to vector<8x352xbf16>
    %510 = tpu.concatenate %461, %462, %463, %464, %465, %466, %467, %468, %469, %470, %471, %472, %473, %474, %475, %476 in 0 : vector<8x352xbf16>, vector<8x352xbf16>, vector<8x352xbf16>, vector<8x352xbf16>, vector<8x352xbf16>, vector<8x352xbf16>, vector<8x352xbf16>, vector<8x352xbf16>, vector<8x352xbf16>, vector<8x352xbf16>, vector<8x352xbf16>, vector<8x352xbf16>, vector<8x352xbf16>, vector<8x352xbf16>, vector<8x352xbf16>, vector<8x352xbf16> -> vector<128x352xbf16>
    %511 = tpu.concatenate %477, %478, %479, %480, %481, %482, %483, %484, %485, %486, %487, %488, %489, %490, %491, %492 in 0 : vector<8x352xbf16>, vector<8x352xbf16>, vector<8x352xbf16>, vector<8x352xbf16>, vector<8x352xbf16>, vector<8x352xbf16>, vector<8x352xbf16>, vector<8x352xbf16>, vector<8x352xbf16>, vector<8x352xbf16>, vector<8x352xbf16>, vector<8x352xbf16>, vector<8x352xbf16>, vector<8x352xbf16>, vector<8x352xbf16>, vector<8x352xbf16> -> vector<128x352xbf16>
    %512 = tpu.concatenate %493, %494, %495, %496, %497, %498, %499, %500, %501, %502, %503, %504, %505, %506, %507, %508 in 0 : vector<8x352xbf16>, vector<8x352xbf16>, vector<8x352xbf16>, vector<8x352xbf16>, vector<8x352xbf16>, vector<8x352xbf16>, vector<8x352xbf16>, vector<8x352xbf16>, vector<8x352xbf16>, vector<8x352xbf16>, vector<8x352xbf16>, vector<8x352xbf16>, vector<8x352xbf16>, vector<8x352xbf16>, vector<8x352xbf16>, vector<8x352xbf16> -> vector<128x352xbf16>
    %513 = tpu.concatenate %510, %511, %512, %509 in 0 : vector<128x352xbf16>, vector<128x352xbf16>, vector<128x352xbf16>, vector<8x352xbf16> -> vector<392x352xbf16>
    %c0_183 = arith.constant 0 : index
    %c0_184 = arith.constant 0 : index
    %c0_185 = arith.constant 0 : index
    %514 = vector.load %arg21[%c0_183, %c0_184, %c0_185] : memref<1x8x392xbf16, #tpu.memory_space<vmem>>, vector<1x8x392xbf16>
    %515 = vector.shape_cast %514 : vector<1x8x392xbf16> to vector<8x392xbf16>
    %cst_186 = arith.constant dense<0.000000e+00> : vector<8x352xf32>
    %516 = tpu.matmul %515, %513, %cst_186 {dimension_numbers = #tpu.dot_dimension_numbers<[1], [0], [0], [1], [0, 0, 1, 1], [], []>} : vector<8x392xbf16>, vector<392x352xbf16>, vector<8x352xf32> -> vector<8x352xf32>
    %517 = arith.truncf %516 : vector<8x352xf32> to vector<8x352xbf16>
    %c0_187 = arith.constant 0 : index
    %c0_188 = arith.constant 0 : index
    %518 = vector.load %arg24[%c0_187, %c0_188] : memref<352x256xbf16, #tpu.memory_space<vmem>>, vector<352x256xbf16>
    %cst_189 = arith.constant dense<0.000000e+00> : vector<8x256xf32>
    %519 = tpu.matmul %517, %518, %cst_189 {dimension_numbers = #tpu.dot_dimension_numbers<[1], [0], [0], [1], [0, 0, 1, 1], [], []>} : vector<8x352xbf16>, vector<352x256xbf16>, vector<8x256xf32> -> vector<8x256xf32>
    %c0_190 = arith.constant 0 : index
    %c0_191 = arith.constant 0 : index
    %c0_192 = arith.constant 0 : index
    %520 = vector.load %arg22[%c0_190, %c0_191, %c0_192] : memref<1x8x1xf32, #tpu.memory_space<vmem>>, vector<1x8x1xf32>
    %521 = vector.shape_cast %520 : vector<1x8x1xf32> to vector<8x1xf32>
    %522 = vector.broadcast %521 : vector<8x1xf32> to vector<8x256xf32>
    %523 = arith.addf %519, %522 : vector<8x256xf32>
    %524 = math.tanh %523 : vector<8x256xf32>
    %c0_193 = arith.constant 0 : index
    %c0_194 = arith.constant 0 : index
    %c0_195 = arith.constant 0 : index
    %c0_196 = arith.constant 0 : index
    %525 = vector.load %arg35[%c0_193, %c0_194, %c0_195, %c0_196] : memref<1x1x8x256xf32, #tpu.memory_space<vmem>>, vector<1x1x8x256xf32>
    %526 = vector.shape_cast %525 : vector<1x1x8x256xf32> to vector<8x256xf32>
    %527 = vector.shape_cast %524 : vector<8x256xf32> to vector<1x1x8x256xf32>
    tpu.vector_store %arg35[%c0_193, %c0_194, %c0_195, %c0_196], %527 {strides = array<i32>} : memref<1x1x8x256xf32, #tpu.memory_space<vmem>>, vector<1x1x8x256xf32>,
    return
  }
  func.func @transform_0(%arg0: i32, %arg1: i32) -> (i32, i32, i32, i32) {
    %c0_i32 = arith.constant 0 : i32
    %c0_i32_0 = arith.constant 0 : i32
    %c0_i32_1 = arith.constant 0 : i32
    return %arg0, %arg1, %c0_i32, %c0_i32_0 : i32, i32, i32, i32
  }
  func.func @transform_1(%arg0: i32, %arg1: i32) -> (i32, i32, i32) {
    %c0_i32 = arith.constant 0 : i32
    %c0_i32_0 = arith.constant 0 : i32
    %c0_i32_1 = arith.constant 0 : i32
    return %arg0, %c0_i32, %c0_i32_0 : i32, i32, i32
  }
  func.func @transform_2(%arg0: i32, %arg1: i32) -> (i32, i32, i32) {
    %c0_i32 = arith.constant 0 : i32
    %c0_i32_0 = arith.constant 0 : i32
    %c0_i32_1 = arith.constant 0 : i32
    return %arg0, %c0_i32, %c0_i32_0 : i32, i32, i32
  }
  func.func @transform_3(%arg0: i32, %arg1: i32) -> (i32, i32, i32) {
    %c0_i32 = arith.constant 0 : i32
    %c0_i32_0 = arith.constant 0 : i32
    %c0_i32_1 = arith.constant 0 : i32
    return %arg0, %c0_i32, %c0_i32_0 : i32, i32, i32
  }
  func.func @transform_4(%arg0: i32, %arg1: i32) -> (i32, i32, i32) {
    %c0_i32 = arith.constant 0 : i32
    %c0_i32_0 = arith.constant 0 : i32
    %c0_i32_1 = arith.constant 0 : i32
    return %arg0, %c0_i32, %c0_i32_0 : i32, i32, i32
  }
  func.func @transform_5(%arg0: i32, %arg1: i32) -> (i32, i32, i32) {
    %c0_i32 = arith.constant 0 : i32
    %c0_i32_0 = arith.constant 0 : i32
    %c0_i32_1 = arith.constant 0 : i32
    return %arg0, %c0_i32, %c0_i32_0 : i32, i32, i32
  }
  func.func @transform_6(%arg0: i32, %arg1: i32) -> (i32, i32, i32) {
    %c0_i32 = arith.constant 0 : i32
    %c0_i32_0 = arith.constant 0 : i32
    %c0_i32_1 = arith.constant 0 : i32
    return %arg0, %c0_i32, %c0_i32_0 : i32, i32, i32
  }
  func.func @transform_7(%arg0: i32, %arg1: i32) -> (i32, i32, i32) {
    %c0_i32 = arith.constant 0 : i32
    %c0_i32_0 = arith.constant 0 : i32
    %c0_i32_1 = arith.constant 0 : i32
    return %arg0, %c0_i32, %c0_i32_0 : i32, i32, i32
  }
  func.func @transform_8(%arg0: i32, %arg1: i32) -> (i32, i32, i32) {
    %c0_i32 = arith.constant 0 : i32
    %c0_i32_0 = arith.constant 0 : i32
    %c0_i32_1 = arith.constant 0 : i32
    return %arg0, %c0_i32, %c0_i32_0 : i32, i32, i32
  }
  func.func @transform_9(%arg0: i32, %arg1: i32) -> (i32, i32, i32) {
    %c0_i32 = arith.constant 0 : i32
    %c0_i32_0 = arith.constant 0 : i32
    %c0_i32_1 = arith.constant 0 : i32
    return %arg0, %c0_i32, %c0_i32_0 : i32, i32, i32
  }
  func.func @transform_10(%arg0: i32, %arg1: i32) -> (i32, i32, i32) {
    %c0_i32 = arith.constant 0 : i32
    %c0_i32_0 = arith.constant 0 : i32
    %c0_i32_1 = arith.constant 0 : i32
    return %arg0, %c0_i32, %c0_i32_0 : i32, i32, i32
  }
  func.func @transform_11(%arg0: i32, %arg1: i32) -> (i32, i32, i32) {
    %c0_i32 = arith.constant 0 : i32
    %c0_i32_0 = arith.constant 0 : i32
    %c0_i32_1 = arith.constant 0 : i32
    return %arg0, %c0_i32, %c0_i32_0 : i32, i32, i32
  }
  func.func @transform_12(%arg0: i32, %arg1: i32) -> (i32, i32, i32) {
    %c0_i32 = arith.constant 0 : i32
    %c0_i32_0 = arith.constant 0 : i32
    %c0_i32_1 = arith.constant 0 : i32
    return %arg0, %c0_i32, %c0_i32_0 : i32, i32, i32
  }
  func.func @transform_13(%arg0: i32, %arg1: i32) -> (i32, i32, i32) {
    %c0_i32 = arith.constant 0 : i32
    %c0_i32_0 = arith.constant 0 : i32
    %c0_i32_1 = arith.constant 0 : i32
    return %arg0, %c0_i32, %c0_i32_0 : i32, i32, i32
  }
  func.func @transform_14(%arg0: i32, %arg1: i32) -> (i32, i32, i32) {
    %c0_i32 = arith.constant 0 : i32
    %c0_i32_0 = arith.constant 0 : i32
    %c0_i32_1 = arith.constant 0 : i32
    return %arg0, %c0_i32, %c0_i32_0 : i32, i32, i32
  }
  func.func @transform_15(%arg0: i32, %arg1: i32) -> (i32, i32, i32) {
    %c0_i32 = arith.constant 0 : i32
    %c0_i32_0 = arith.constant 0 : i32
    %c0_i32_1 = arith.constant 0 : i32
    return %arg0, %c0_i32, %c0_i32_0 : i32, i32, i32
  }
  func.func @transform_16(%arg0: i32, %arg1: i32) -> (i32, i32, i32) {
    %c0_i32 = arith.constant 0 : i32
    %c0_i32_0 = arith.constant 0 : i32
    %c0_i32_1 = arith.constant 0 : i32
    return %arg0, %c0_i32, %c0_i32_0 : i32, i32, i32
  }
  func.func @transform_17(%arg0: i32, %arg1: i32) -> (i32, i32, i32) {
    %c0_i32 = arith.constant 0 : i32
    %c0_i32_0 = arith.constant 0 : i32
    %c0_i32_1 = arith.constant 0 : i32
    return %arg0, %c0_i32, %c0_i32_0 : i32, i32, i32
  }
  func.func @transform_18(%arg0: i32, %arg1: i32) -> (i32, i32, i32) {
    %c0_i32 = arith.constant 0 : i32
    %c0_i32_0 = arith.constant 0 : i32
    %c0_i32_1 = arith.constant 0 : i32
    return %arg0, %c0_i32, %c0_i32_0 : i32, i32, i32
  }
  func.func @transform_19(%arg0: i32, %arg1: i32) -> (i32, i32, i32) {
    %c0_i32 = arith.constant 0 : i32
    %c0_i32_0 = arith.constant 0 : i32
    %c0_i32_1 = arith.constant 0 : i32
    return %arg0, %c0_i32, %c0_i32_0 : i32, i32, i32
  }
  func.func @transform_20(%arg0: i32, %arg1: i32) -> (i32, i32, i32) {
    %c0_i32 = arith.constant 0 : i32
    %c0_i32_0 = arith.constant 0 : i32
    %c0_i32_1 = arith.constant 0 : i32
    return %arg0, %c0_i32, %c0_i32_0 : i32, i32, i32
  }
  func.func @transform_21(%arg0: i32, %arg1: i32) -> (i32, i32) {
    %c0_i32 = arith.constant 0 : i32
    %c0_i32_0 = arith.constant 0 : i32
    %c0_i32_1 = arith.constant 0 : i32
    return %c0_i32, %c0_i32_0 : i32, i32
  }
  func.func @transform_22(%arg0: i32, %arg1: i32) -> (i32, i32) {
    %c0_i32 = arith.constant 0 : i32
    %c0_i32_0 = arith.constant 0 : i32
    %c0_i32_1 = arith.constant 0 : i32
    return %c0_i32, %c0_i32_0 : i32, i32
  }
  func.func @transform_23(%arg0: i32, %arg1: i32) -> (i32, i32) {
    %c0_i32 = arith.constant 0 : i32
    %c0_i32_0 = arith.constant 0 : i32
    %c0_i32_1 = arith.constant 0 : i32
    return %c0_i32, %c0_i32_0 : i32, i32
  }
  func.func @transform_24(%arg0: i32, %arg1: i32) -> (i32, i32) {
    %c0_i32 = arith.constant 0 : i32
    %c0_i32_0 = arith.constant 0 : i32
    %c0_i32_1 = arith.constant 0 : i32
    return %c0_i32, %c0_i32_0 : i32, i32
  }
  func.func @transform_25(%arg0: i32, %arg1: i32) -> (i32, i32) {
    %c0_i32 = arith.constant 0 : i32
    %c0_i32_0 = arith.constant 0 : i32
    %c0_i32_1 = arith.constant 0 : i32
    return %c0_i32, %c0_i32_0 : i32, i32
  }
  func.func @transform_26(%arg0: i32, %arg1: i32) -> (i32, i32) {
    %c0_i32 = arith.constant 0 : i32
    %c0_i32_0 = arith.constant 0 : i32
    %c0_i32_1 = arith.constant 0 : i32
    return %c0_i32, %c0_i32_0 : i32, i32
  }
  func.func @transform_27(%arg0: i32, %arg1: i32) -> (i32, i32) {
    %c0_i32 = arith.constant 0 : i32
    %c0_i32_0 = arith.constant 0 : i32
    %c0_i32_1 = arith.constant 0 : i32
    return %c0_i32, %c0_i32_0 : i32, i32
  }
  func.func @transform_28(%arg0: i32, %arg1: i32) -> (i32, i32) {
    %c0_i32 = arith.constant 0 : i32
    %c0_i32_0 = arith.constant 0 : i32
    %c0_i32_1 = arith.constant 0 : i32
    return %c0_i32, %c0_i32_0 : i32, i32
  }
  func.func @transform_29(%arg0: i32, %arg1: i32) -> (i32, i32) {
    %c0_i32 = arith.constant 0 : i32
    %c0_i32_0 = arith.constant 0 : i32
    %c0_i32_1 = arith.constant 0 : i32
    return %c0_i32, %c0_i32_0 : i32, i32
  }
  func.func @transform_30(%arg0: i32, %arg1: i32) -> (i32, i32) {
    %c0_i32 = arith.constant 0 : i32
    %c0_i32_0 = arith.constant 0 : i32
    %c0_i32_1 = arith.constant 0 : i32
    return %c0_i32, %c0_i32_0 : i32, i32
  }
  func.func @transform_31(%arg0: i32, %arg1: i32) -> (i32, i32) {
    %c0_i32 = arith.constant 0 : i32
    %c0_i32_0 = arith.constant 0 : i32
    %c0_i32_1 = arith.constant 0 : i32
    return %c0_i32, %c0_i32_0 : i32, i32
  }
  func.func @transform_32(%arg0: i32, %arg1: i32) -> (i32, i32) {
    %c0_i32 = arith.constant 0 : i32
    %c0_i32_0 = arith.constant 0 : i32
    %c0_i32_1 = arith.constant 0 : i32
    return %c0_i32, %c0_i32_0 : i32, i32
  }
  func.func @transform_33(%arg0: i32, %arg1: i32) -> (i32, i32, i32, i32) {
    %c0_i32 = arith.constant 0 : i32
    %c0_i32_0 = arith.constant 0 : i32
    %c0_i32_1 = arith.constant 0 : i32
    return %arg0, %arg1, %c0_i32, %c0_i32_0 : i32, i32, i32, i32
  }
}

</mosaic_0001>

<bundles_post_ra>
// kernel: cyclegan_forward.1
= control target key start
LH: loop header
LB: loop body
LE: loop exit
PB: predicated region body
PF: predicated region fallthrough
CT: control target
= control target key end

     0   :  { %s10223_s6 = smov 1   ;;  %s10224_s10 = smov 2   ;;  %s13332_s0 = inlined_call_operand.smem [shape: u32[34], index: -1, kind: input, shape index: {}] }
   0x1   :  { %s10302_s5 = sld [smem:[%s13332_s0]]   ;;  %s10225_s14 = smov 3  }
   0x2   :  { %s10307_s9 = sld [smem:[%s13332_s0 + %s10223_s6]]   ;;  %s10226_s18 = smov 4  }
   0x3   :  { %s10312_s13 = sld [smem:[%s13332_s0 + %s10224_s10]]   ;;  %s10227_s22 = smov 5  }
   0x4   :  { %s10317_s17 = sld [smem:[%s13332_s0 + %s10225_s14]]   ;;  %s10228_s26 = smov 6  }
   0x5   :  { %s10322_s21 = sld [smem:[%s13332_s0 + %s10226_s18]]   ;;  %s10229_s30 = smov 7  }
   0x6   :  { %s10327_s25 = sld [smem:[%s13332_s0 + %s10227_s22]]   ;;  %s10230_s4 = smov 8  }
   0x7   :  { %13485 = sst [smem:[#allocation2_spill]] %s10302_s5  ;;  %s10231_s10 = smov 9  }
   0x8   :  { %13486 = sst [smem:[#allocation3_spill]] %s10307_s9  ;;  %s10232_s15 = smov 10  }
   0x9   :  { %13487 = sst [smem:[#allocation4_spill]] %s10312_s13  ;;  %s10233_s20 = smov 11  }
   0xa   :  { %13488 = sst [smem:[#allocation5_spill]] %s10317_s17  ;;  %s10235_s1 = smov 13  }
   0xb   :  { %13489 = sst [smem:[#allocation6_spill]] %s10322_s21  ;;  %s10236_s7 = smov 14  }
   0xc   :  { %13490 = sst [smem:[#allocation7_spill]] %s10327_s25  ;;  %s10238_s22 = smov 16  }
   0xd   :  { %s10332_s29 = sld [smem:[%s13332_s0 + %s10228_s26]]   ;;  %s10234_s26 = smov 12  }
   0xe   :  { %s10337_s3 = sld [smem:[%s13332_s0 + %s10229_s30]]   ;;  %s10239_s28 = smov 17  }
   0xf   :  { %s10342_s8 = sld [smem:[%s13332_s0 + %s10230_s4]]   ;;  %s10473_s11 = smov 0  }
  0x10   :  { %s10347_s14 = sld [smem:[%s13332_s0 + %s10231_s10]]   ;;  %s10471_s10 = smov 0  }
  0x11   :  { %s10352_s19 = sld [smem:[%s13332_s0 + %s10232_s15]]   ;;  %s10237_s15 = smov 15  }
  0x12   :  { %s10357_s24 = sld [smem:[%s13332_s0 + %s10233_s20]]   ;;  %s10477_s16 = smov 0  }
  0x13   :  { %13491 = sst [smem:[#allocation8_spill]] %s10332_s29 }
  0x14   :  { %13492 = sst [smem:[#allocation9_spill]] %s10337_s3 }
  0x15   :  { %13493 = sst [smem:[#allocation10_spill]] %s10342_s8 }
  0x16   :  { %13494 = sst [smem:[#allocation11_spill]] %s10347_s14 }
  0x17   :  { %13495 = sst [smem:[#allocation12_spill]] %s10352_s19 }
  0x18   :  { %13496 = sst [smem:[#allocation13_spill]] %s10357_s24 }
  0x19   :  { %s10362_s30 = sld [smem:[%s13332_s0 + %s10234_s26]]  }
  0x1a   :  { %s10367_s6 = sld [smem:[%s13332_s0 + %s10235_s1]]  }
  0x1b   :  { %s10372_s12 = sld [smem:[%s13332_s0 + %s10236_s7]]   ;;  %s10240_s7 = smov 18  }
  0x1c   :  { %s10377_s20 = sld [smem:[%s13332_s0 + %s10237_s15]]   ;;  %s10241_s15 = smov 19  }
  0x1d   :  { %s10382_s27 = sld [smem:[%s13332_s0 + %s10238_s22]]   ;;  %s10242_s22 = smov 20  }
  0x1e   :  { %s10387_s4 = sld [smem:[%s13332_s0 + %s10239_s28]]   ;;  %s10243_s28 = smov 21  }
  0x1f   :  { %13497 = sst [smem:[#allocation14_spill]] %s10362_s30 }
  0x20   :  { %13498 = sst [smem:[#allocation15_spill]] %s10367_s6 }
  0x21   :  { %13499 = sst [smem:[#allocation16_spill]] %s10372_s12 }
  0x22   :  { %13500 = sst [smem:[#allocation17_spill]] %s10377_s20 }
  0x23   :  { %13501 = sst [smem:[#allocation18_spill]] %s10382_s27 }
  0x24   :  { %13502 = sst [smem:[#allocation19_spill]] %s10387_s4 }
  0x25   :  { %s10392_s12 = sld [smem:[%s13332_s0 + %s10240_s7]]   ;;  %s10244_s7 = smov 22  }
  0x26   :  { %s10397_s20 = sld [smem:[%s13332_s0 + %s10241_s15]]   ;;  %s10245_s15 = smov 23  }
  0x27   :  { %s10402_s27 = sld [smem:[%s13332_s0 + %s10242_s22]]   ;;  %s10246_s22 = smov 24  }
  0x28   :  { %s10407_s4 = sld [smem:[%s13332_s0 + %s10243_s28]]   ;;  %s10247_s28 = smov 25  }
  0x29   :  { %s10427_s6 = sld [smem:[%s13332_s0 + %s10247_s28]]   ;;  %s10251_s28 = smov 29  }
  0x2a   :  { %s10447_s14 = sld [smem:[%s13332_s0 + %s10251_s28]]   ;;  %s10255_s28 = smov 33  }
  0x2b   :  { %13503 = sst [smem:[#allocation20_spill]] %s10392_s12 }
  0x2c   :  { %13504 = sst [smem:[#allocation21_spill]] %s10397_s20 }
  0x2d   :  { %13505 = sst [smem:[#allocation22_spill]] %s10402_s27 }
  0x2e   :  { %s10412_s12 = sld [smem:[%s13332_s0 + %s10244_s7]]   ;;  %s10248_s7 = smov 26  }
  0x2f   :  { %s10417_s20 = sld [smem:[%s13332_s0 + %s10245_s15]]   ;;  %s10249_s15 = smov 27  }
  0x30   :  { %s10422_s27 = sld [smem:[%s13332_s0 + %s10246_s22]]   ;;  %s10250_s22 = smov 28  }
  0x31   :  { %13509 = sst [smem:[#allocation26_spill]] %s10427_s6 }
  0x32   :  { %s10432_s30 = sld [smem:[%s13332_s0 + %s10248_s7]]   ;;  %s10252_s7 = smov 30  }
  0x33   :  { %s10437_s24 = sld [smem:[%s13332_s0 + %s10249_s15]]   ;;  %s10253_s15 = smov 31  }
  0x34   :  { %13506 = sst [smem:[#allocation23_spill]] %s10412_s12 }
  0x35   :  { %13507 = sst [smem:[#allocation24_spill]] %s10417_s20 }
  0x36   :  { %13508 = sst [smem:[#allocation25_spill]] %s10422_s27 }
  0x37   :  { %s10442_s19 = sld [smem:[%s13332_s0 + %s10250_s22]]   ;;  %s10254_s22 = smov 32  }
  0x38   :  { %13510 = sst [smem:[#allocation27_spill]] %s10432_s30 }
  0x39   :  { %13512 = sst [smem:[#allocation29_spill]] %s10447_s14 }
  0x3a   :  { %s10452_s8 = sld [smem:[%s13332_s0 + %s10252_s7]]   ;;  %s10469_s7 = smov 0  }
  0x3b   :  { %s10457_s3 = sld [smem:[%s13332_s0 + %s10253_s15]]   ;;  %s10475_s15 = smov 0  }
  0x3c   :  { %s10467_s14 = sld [smem:[%s13332_s0 + %s10255_s28]]  }
  0x3d   :  { %13511 = sst [smem:[#allocation28_spill]] %s10442_s19 }
  0x3e   :  { %s10462_s19 = sld [smem:[%s13332_s0 + %s10254_s22]]  }
  0x41   :  { %13513 = sst [smem:[#allocation30_spill]] %s10457_s3 }
  0x42   :  { %13514 = sst [smem:[#allocation31_spill]] %s10467_s14 }
  0x43 LB: > { %s13515_s3 = sld [smem:[#allocation30_spill]]  ;;  %s13516_s30 = sld [smem:[#allocation27_spill]]  ;;  %s10209_s10 = sphi %s10471_s10, %s13780_s10   ;;  %s10205_s7 = sphi %s10469_s7, %s13779_s7   ;;  %s10221_s16 = sphi %s10477_s16, %s77_s16   ;;  %s10217_s15 = sphi %s10475_s15, %s13782_s15   ;;  %s10213_s11 = sphi %s10473_s11, %s13781_s11  }
  0x44   : > { %s13517_s27 = sld [smem:[#allocation25_spill]]  ;;  %s13518_s17 = sld [smem:[#allocation5_spill]] }
  0x45   : > { %s13519_s6 = sld [smem:[#allocation26_spill]]  ;;  %s13520_s12 = sld [smem:[#allocation23_spill]] }
  0x46   : > { %s13521_s20 = sld [smem:[#allocation24_spill]]  ;;  %13523 = sst [smem:[#allocation33_spill]] %s10217_s15 }
  0x47   : > { %13522 = sst [smem:[#allocation32_spill]] %s10213_s11  ;;  %s86_s0 = sadd.s32 1, %s10213_s11 }
  0x48   : > { %13524 = sst [smem:[#allocation34_spill]] %s10221_s16  ;;  %s89_s18 = sadd.s32 1, %s10217_s15 }
  0x49   : > { %p87_p0 = scmp.ge.s32.totalorder %s86_s0, 2  ;;  %p8621_p1 = scmp.ge.s32.totalorder %s10221_s16, 1 }
  0x4a   : > { %p1138_p2 = scmp.lt.s32.totalorder %s10221_s16, 5 }
  0x4b   : > { %s13784_s0 = smov (%p87_p0, %s86_s0), 0  ;;  %s13786_s18 = smov (!%p87_p0, %s89_s18), %s10217_s15 }
  0x4c   : > { %13525 = sst [smem:[#allocation35_spill]] %s13784_s0  ;;  %p1139_p3 = pnand %p8621_p1, %p1138_p2 }
  0x4d   : > { %p91_p4 = scmp.ge.s32.totalorder %s13786_s18, 2 }
  0x4e   : > { %1142 = sbr.rel (%p1139_p3) target bundleno = 10602 (0x296a), region = 152 }
  0x4f   : > { %s13788_s18 = smov (%p91_p4, %s13786_s18), 0 }
  0x50   : > { %13526 = sst [smem:[#allocation36_spill]] %s13788_s18 }
  0x55   : > { %v9631_v0 = vld [vmem:[%s10407_s4 + $0x4] ss:$16 sps:$4 sm:$0xff]   ;;  %v9633_v1 = vld [vmem:[%s10407_s4 + $0xc] ss:$16 sps:$4 sm:$0xff]   ;;  %v9635_v2 = vld [vmem:[%s10407_s4] ss:$16 sps:$4 sm:$0xff]  }
  0x56   : > { %1831 = vmatprep.subr.bf16.mxu0 %v9631_v0  ;;  %v9636_v3 = vld [vmem:[%s10407_s4 + $0x8] ss:$16 sps:$4 sm:$0xff]   ;;  %1872 = vmatprep.subr.bf16.mxu1 %v9633_v1  ;;  %v9637_v4 = vld [vmem:[%s10407_s4 + $0x24] ss:$16 sps:$4 sm:$0xff]   ;;  %v9639_v5 = vld [vmem:[%s10407_s4 + $0x2c] ss:$16 sps:$4 sm:$0xff]  }
  0x57   : > { %1832 = vmatpush1.bf16.msra.mxu0 %v9635_v2  ;;  %1873 = vmatpush1.bf16.msra.mxu1 %v9636_v3  ;;  %v9641_v6 = vld [vmem:[%s10407_s4 + $0x20] ss:$16 sps:$4 sm:$0xff]   ;;  %v9642_v7 = vld [vmem:[%s10407_s4 + $0x28] ss:$16 sps:$4 sm:$0xff]   ;;  %v9643_v8 = vld [vmem:[%s10407_s4 + $0x44] ss:$16 sps:$4 sm:$0xff]  }
  0x58   : > { %1833 = vmatprep.subr.bf16.mxu0 %v9637_v4  ;;  %1874 = vmatprep.subr.bf16.mxu1 %v9639_v5  ;;  %v9645_v9 = vld [vmem:[%s10407_s4 + $0x4c] ss:$16 sps:$4 sm:$0xff]   ;;  %v9647_v10 = vld [vmem:[%s10407_s4 + $0x40] ss:$16 sps:$4 sm:$0xff]   ;;  %v9648_v11 = vld [vmem:[%s10407_s4 + $0x48] ss:$16 sps:$4 sm:$0xff]  }
  0x59   : > { %v9649_v12 = vld [vmem:[%s10407_s4 + $0x64] ss:$16 sps:$4 sm:$0xff]   ;;  %v9651_v13 = vld [vmem:[%s10407_s4 + $0x6c] ss:$16 sps:$4 sm:$0xff]   ;;  %v9653_v14 = vld [vmem:[%s10407_s4 + $0x60] ss:$16 sps:$4 sm:$0xff]  }
  0x5a   : > { %v9654_v15 = vld [vmem:[%s10407_s4 + $0x68] ss:$16 sps:$4 sm:$0xff]   ;;  %v9655_v16 = vld [vmem:[%s10407_s4 + $0x84] ss:$16 sps:$4 sm:$0xff]   ;;  %v9657_v17 = vld [vmem:[%s10407_s4 + $0x8c] ss:$16 sps:$4 sm:$0xff]  }
  0x5b   : > { %1834 = vmatpush1.bf16.msra.mxu0 %v9641_v6  ;;  %1875 = vmatpush1.bf16.msra.mxu1 %v9642_v7  ;;  %v9659_v18 = vld [vmem:[%s10407_s4 + $0x80] ss:$16 sps:$4 sm:$0xff]   ;;  %v9660_v19 = vld [vmem:[%s10407_s4 + $0x88] ss:$16 sps:$4 sm:$0xff]   ;;  %v9661_v20 = vld [vmem:[%s10407_s4 + $0xa4] ss:$16 sps:$4 sm:$0xff]  }
  0x5c   : > { %1835 = vmatprep.subr.bf16.mxu0 %v9643_v8  ;;  %1876 = vmatprep.subr.bf16.mxu1 %v9645_v9  ;;  %v9663_v21 = vld [vmem:[%s10407_s4 + $0xac] ss:$16 sps:$4 sm:$0xff]   ;;  %v9665_v22 = vld [vmem:[%s10407_s4 + $0xa0] ss:$16 sps:$4 sm:$0xff]   ;;  %v9666_v23 = vld [vmem:[%s10407_s4 + $0xa8] ss:$16 sps:$4 sm:$0xff]  }
  0x5d   : > { %v9667_v24 = vld [vmem:[%s10407_s4 + $0xc4] ss:$16 sps:$4 sm:$0xff]   ;;  %v9669_v25 = vld [vmem:[%s10407_s4 + $0xcc] ss:$16 sps:$4 sm:$0xff]   ;;  %p1327_p5 = scmp.lt.s32.totalorder %s10209_s10, 1  ;;  %p1329_p6 = scmp.lt.s32.totalorder %s10205_s7, 1 }
  0x5e   : > { %v9671_v26 = vld [vmem:[%s10407_s4 + $0xc0] ss:$16 sps:$4 sm:$0xff]   ;;  %v9672_v27 = vld [vmem:[%s10407_s4 + $0xc8] ss:$16 sps:$4 sm:$0xff]   ;;  %v9673_v28 = vld [vmem:[%s10407_s4 + $0xe4] ss:$16 sps:$4 sm:$0xff]  }
  0x5f   : > { %1836 = vmatpush1.bf16.msra.mxu0 %v9647_v10  ;;  %1877 = vmatpush1.bf16.msra.mxu1 %v9648_v11  ;;  %v9675_v29 = vld [vmem:[%s10407_s4 + $0xec] ss:$16 sps:$4 sm:$0xff]   ;;  %s13790_s10 = smov (!%p1327_p5, %s10209_s10), 1  ;;  %v9677_v30 = vld [vmem:[%s10407_s4 + $0xe0] ss:$16 sps:$4 sm:$0xff]   ;;  %s13792_s7 = smov (!%p1329_p6, %s10205_s7), 1 }
  0x60   : > { %1837 = vmatprep.subr.bf16.mxu0 %v9649_v12  ;;  %1878 = vmatprep.subr.bf16.mxu1 %v9651_v13  ;;  %v9678_v31 = vld [vmem:[%s10407_s4 + $0xe8] ss:$16 sps:$4 sm:$0xff]   ;;  %v9679_v32 = vld [vmem:[%s10407_s4 + $0x104] ss:$16 sps:$4 sm:$0xff]   ;;  %v9681_v33 = vld [vmem:[%s10407_s4 + $0x10c] ss:$16 sps:$4 sm:$0xff]  }
  0x61   : > { %v9683_v34 = vld [vmem:[%s10407_s4 + $0x100] ss:$16 sps:$4 sm:$0xff]   ;;  %v9684_v35 = vld [vmem:[%s10407_s4 + $0x108] ss:$16 sps:$4 sm:$0xff]   ;;  %s8622_s22 = sshll.u32 %s13792_s7, 1  ;;  %s8623_s23 = sshll.u32 %s13790_s10, 2 }
  0x62   : > { %v9685_v36 = vld [vmem:[%s10407_s4 + $0x124] ss:$16 sps:$4 sm:$0xff]   ;;  %v9687_v37 = vld [vmem:[%s10407_s4 + $0x12c] ss:$16 sps:$4 sm:$0xff]   ;;  %s13527_s5 = sld [smem:[#allocation2_spill]]  ;;  %s10548_s26 = sadd.s32 %s8623_s23, %s8622_s22  ;;  %vm2066_vm0 = vcmask 1043456  }
  0x63   : > { %1838 = vmatpush1.bf16.msra.mxu0 %v9653_v14  ;;  %1879 = vmatpush1.bf16.msra.mxu1 %v9654_v15  ;;  %13528 = sst [smem:[#allocation37_spill]] %s10548_s26  ;;  %v9689_v38 = vld [vmem:[%s10407_s4 + $0x120] ss:$16 sps:$4 sm:$0xff]   ;;  %v9690_v39 = vld [vmem:[%s10407_s4 + $0x128] ss:$16 sps:$4 sm:$0xff]   ;;  %s13334_s28 = sshll.u32 %s10548_s26, 3 }
  0x64   : > { %1839 = vmatprep.subr.bf16.mxu0 %v9655_v16  ;;  %1880 = vmatprep.subr.bf16.mxu1 %v9657_v17  ;;  %v9691_v40 = vld [vmem:[%s10407_s4 + $0x144] ss:$16 sps:$4 sm:$0xff]   ;;  %v9693_v41 = vld [vmem:[%s10407_s4 + $0x14c] ss:$16 sps:$4 sm:$0xff]   ;;  %v9695_v42 = vld [vmem:[%s10407_s4 + $0x140] ss:$16 sps:$4 sm:$0xff]  }
  0x65   : > { %v9696_v43 = vld [vmem:[%s10407_s4 + $0x148] ss:$16 sps:$4 sm:$0xff]   ;;  %v9697_v44 = vld [vmem:[%s10407_s4 + $0x164] ss:$16 sps:$4 sm:$0xff]   ;;  %v9699_v45 = vld [vmem:[%s10407_s4 + $0x16c] ss:$16 sps:$4 sm:$0xff]  }
  0x66   : > { %v9701_v46 = vld [vmem:[%s10407_s4 + $0x160] ss:$16 sps:$4 sm:$0xff]   ;;  %v9702_v47 = vld [vmem:[%s10407_s4 + $0x168] ss:$16 sps:$4 sm:$0xff]   ;;  %v9703_v48 = vld [vmem:[%s10407_s4 + $0x184] ss:$16 sps:$4 sm:$0xff]  }
  0x67   : > { %1840 = vmatpush1.bf16.msra.mxu0 %v9659_v18  ;;  %1881 = vmatpush1.bf16.msra.mxu1 %v9660_v19  ;;  %v9705_v49 = vld [vmem:[%s10407_s4 + $0x18c] ss:$16 sps:$4 sm:$0xff]   ;;  %v9707_v52 = vld [vmem:[%s10407_s4 + $0x180] ss:$16 sps:$4 sm:$0xff]   ;;  %v9708_v53 = vld [vmem:[%s10407_s4 + $0x188] ss:$16 sps:$4 sm:$0xff]  }
  0x68   : > { %1841 = vmatprep.subr.bf16.mxu0 %v9661_v20  ;;  %1882 = vmatprep.subr.bf16.mxu1 %v9663_v21  ;;  %s10561_s1 = scalar_lea.vmem %s13527_s5, %s13334_s28  ;;  %v9709_v54 = vld [vmem:[%s10407_s4 + $0x1a4] ss:$16 sps:$4 sm:$0xff]   ;;  %v9711_v55 = vld [vmem:[%s10407_s4 + $0x1ac] ss:$16 sps:$4 sm:$0xff]   ;;  %v9713_v56 = vld [vmem:[%s10407_s4 + $0x1a0] ss:$16 sps:$4 sm:$0xff]  }
  0x69   : > { %v1444_v50 = vld [vmem:[%s10561_s1 + $0x8] sm:$0xff]  ;;  %v9715_v58 = vld [vmem:[%s10407_s4 + $0x1c4] ss:$16 sps:$4 sm:$0xff]   ;;  %v9719_v60 = vld [vmem:[%s10407_s4 + $0x1c0] ss:$16 sps:$4 sm:$0xff]   ;;  %s13349_s2 = smov 126  }
  0x6a   : > { %v1446_v51 = vpack.c.bf16 %v1444_v50, %v1444_v50  ;;  %v9714_v57 = vld [vmem:[%s10407_s4 + $0x1a8] ss:$16 sps:$4 sm:$0xff]   ;;  %v9717_v59 = vld [vmem:[%s10407_s4 + $0x1cc] ss:$16 sps:$4 sm:$0xff]   ;;  %v9721_v62 = vld [vmem:[%s10407_s4 + $0x1e4] ss:$16 sps:$4 sm:$0xff]  }
  0x6b   : > { %1842 = vmatpush1.bf16.msra.mxu0 %v9665_v22  ;;  %1883 = vmatpush1.bf16.msra.mxu1 %v9666_v23  ;;  %v9720_v61 = vld [vmem:[%s10407_s4 + $0x1c8] ss:$16 sps:$4 sm:$0xff]   ;;  %v9723_v63 = vld [vmem:[%s10407_s4 + $0x1ec] ss:$16 sps:$4 sm:$0xff]   ;;  %v9725_v0 = vld [vmem:[%s10407_s4 + $0x1e0] ss:$16 sps:$4 sm:$0xff]  }
  0x6c   : > { %1843 = vmatprep.subr.bf16.mxu0 %v9667_v24  ;;  %1884 = vmatprep.subr.bf16.mxu1 %v9669_v25  ;;  %v9726_v1 = vld [vmem:[%s10407_s4 + $0x1e8] ss:$16 sps:$4 sm:$0xff]   ;;  %v1443_v2 = vld [vmem:[%s10561_s1] sm:$0xff]  ;;  %s13335_s7 = smov 124   ;;  %s13337_s22 = smov 107   ;;  %vm1929_vm1 = vcmask 1039360  }
  0x6d   : > { %1863 = vmatprep.mubr.bf16.mxu0 %v1446_v51  ;;  %1904 = vmatprep.mubr.bf16.mxu1 %v1446_v51  ;;  %v1445_v3 = vpack.c.bf16 %v1443_v2, %v1443_v2  ;;  %s13339_s23 = smov 105   ;;  %s13345_s1 = smov 103   ;;  %vm1938_vm2 = vcmask 1031168   ;;  %vm13469_vm3 = vcmask 1022976   ;;  %vm1956_vm4 = vcmask 1014784  }
  0x6e   : > { %s13341_s28 = smov 86   ;;  %s13362_s5 = smov 125   ;;  %vm13426_vm5 = vcmask 1006592   ;;  %vm13421_vm6 = vcmask 998400   ;;  %vm13457_vm7 = vcmask 867328   ;;  %vm13450_vm8 = vcmask 859136  }
  0x6f   : > { %1844 = vmatpush1.bf16.msra.mxu0 %v9671_v26  ;;  %1885 = vmatpush1.bf16.msra.mxu1 %v9672_v27  ;;  %s13535_s18 = smov 86   ;;  %s13366_s0 = smov 106   ;;  %vm13449_vm9 = vcmask 850944   ;;  %vm13448_vm10 = vcmask 842752   ;;  %vm13436_vm11 = vcmask 834560   ;;  %vm13423_vm12 = vcmask 818176  }
  0x70   : > { %1845 = vmatprep.subr.bf16.mxu0 %v9673_v28  ;;  %1886 = vmatprep.subr.bf16.mxu1 %v9675_v29  ;;  %s13369_s15 = smov 104   ;;  %s13375_s11 = smov 85   ;;  %vm13422_vm13 = vcmask 826368   ;;  %vm13429_vm14 = vcmask 678912   ;;  %vm2183_vm15 = vcmask 883712  }
  0x71   : > { %s13377_s16 = smov 83   ;;  %s13539_s14 = smov 88  }
  0x72   : > { %s13379_s26 = smov 123   ;;  %s13586_s9 = sld [smem:[#allocation3_spill]] }
  0x73   : > { %1846 = vmatpush1.bf16.msra.mxu0 %v9677_v30  ;;  %1887 = vmatpush1.bf16.msra.mxu1 %v9678_v31  ;;  %s13618_s13 = sld [smem:[#allocation4_spill]]  ;;  %s13621_s21 = sld [smem:[#allocation6_spill]] }
  0x74   : > { %1847 = vmatprep.subr.bf16.mxu0 %v9679_v32  ;;  %1888 = vmatprep.subr.bf16.mxu1 %v9681_v33  ;;  %s13622_s29 = sld [smem:[#allocation8_spill]]  ;;  %s13623_s25 = sld [smem:[#allocation7_spill]] }
  0x77   : > { %1848 = vmatpush1.bf16.msra.mxu0 %v9683_v34  ;;  %1889 = vmatpush1.bf16.msra.mxu1 %v9684_v35 }
  0x78   : > { %1849 = vmatprep.subr.bf16.mxu0 %v9685_v36  ;;  %1890 = vmatprep.subr.bf16.mxu1 %v9687_v37 }
  0x7b   : > { %1850 = vmatpush1.bf16.msra.mxu0 %v9689_v38  ;;  %1891 = vmatpush1.bf16.msra.mxu1 %v9690_v39 }
  0x7c   : > { %1851 = vmatprep.subr.bf16.mxu0 %v9691_v40  ;;  %1892 = vmatprep.subr.bf16.mxu1 %v9693_v41 }
  0x7f   : > { %1852 = vmatpush1.bf16.msra.mxu0 %v9695_v42  ;;  %1893 = vmatpush1.bf16.msra.mxu1 %v9696_v43 }
  0x80   : > { %1853 = vmatprep.subr.bf16.mxu0 %v9697_v44  ;;  %1894 = vmatprep.subr.bf16.mxu1 %v9699_v45 }
  0x83   : > { %1854 = vmatpush1.bf16.msra.mxu0 %v9701_v46  ;;  %1895 = vmatpush1.bf16.msra.mxu1 %v9702_v47 }
  0x84   : > { %1855 = vmatprep.subr.bf16.mxu0 %v9703_v48  ;;  %1896 = vmatprep.subr.bf16.mxu1 %v9705_v49 }
  0x87   : > { %1856 = vmatpush1.bf16.msra.mxu0 %v9707_v52  ;;  %1897 = vmatpush1.bf16.msra.mxu1 %v9708_v53 }
  0x88   : > { %1857 = vmatprep.subr.bf16.mxu0 %v9709_v54  ;;  %1898 = vmatprep.subr.bf16.mxu1 %v9711_v55 }
  0x8b   : > { %1858 = vmatpush1.bf16.msra.mxu0 %v9713_v56  ;;  %1899 = vmatpush1.bf16.msra.mxu1 %v9714_v57 }
  0x8c   : > { %1859 = vmatprep.subr.bf16.mxu0 %v9715_v58  ;;  %1900 = vmatprep.subr.bf16.mxu1 %v9717_v59 }
  0x8f   : > { %1860 = vmatpush1.bf16.msra.mxu0 %v9719_v60  ;;  %1901 = vmatpush1.bf16.msra.mxu1 %v9720_v61 }
  0x90   : > { %1861 = vmatprep.subr.bf16.mxu0 %v9721_v62  ;;  %1902 = vmatprep.subr.bf16.mxu1 %v9723_v63 }
  0x93   : > { %1862 = vmatpush1.bf16.msra.mxu0 %v9725_v0  ;;  %1903 = vmatpush1.bf16.msra.mxu1 %v9726_v1 }
  0x96   : > { %1864 = vmatmul.mubr.bf16.vlgmr.msra.gmra.mrb[0].mxu0 %v1445_v3  ;;  %1905 = vmatmul.mubr.bf16.vlgmr.msra.gmra.mrb[0].mxu1 %v1445_v3 }
 0x169   : > { %v1865_v4 = vpop.f32.mrb[0].mxu0  ;;  %v1906_v5 = vpop.f32.mrb[0].mxu1 }
 0x16a   : > { %v10584_v6 = vpack.c.bf16 %v1865_v4, %v1865_v4  ;;  %v10586_v7 = vpack.c.bf16 %v1906_v5, %v1906_v5  ;;  %v1908_v8 = vpop.f32.mrb[1].mxu1  ;;  %v1867_v9 = vpop.f32.mrb[1].mxu0 }
 0x16b   : > { %v1910_v10 = vpop.f32.mrb[2].mxu1  ;;  %v1869_v11 = vpop.f32.mrb[2].mxu0  ;;  %v10620_v14 = vpack.c.bf16 %v1867_v9, %v1867_v9  ;;  %v10626_v15 = vpack.c.bf16 %v1908_v8, %v1908_v8 }
 0x16c   : > { %1936 = vrot.lane.b32.xlu1 %v10586_v7, %s13349_s2  ;;  %v1911_v12 = vpop.f32.mrb[3].mxu1  ;;  %1932 = vrot.lane.b32.xlu0 %v10584_v6, %s13349_s2  ;;  %v1870_v13 = vpop.f32.mrb[3].mxu0  ;;  %v10653_v16 = vrot.slane %v10584_v6, 4  ;;  %v10660_v17 = vrot.slane %v10586_v7, 4 }
 0x16d   : > { %13529 = vst [vmem:[#allocation38_spill] sm:$0xff] %v10626_v15  ;;  %v2053_v20 = vrot.slane %v10626_v15, 4  ;;  %v1921_v25 = vrot.slane %v10620_v14, 4 }
 0x170   : > { %1954 = vrot.lane.b32.xlu1 %v10586_v7, %s13335_s7  ;;  %1950 = vrot.lane.b32.xlu0 %v10584_v6, %s13335_s7  ;;  %s13343_s7 = smov 84  }
 0x174   : > { %2191 = vrot.lane.b32.xlu1 %v10586_v7, %s13337_s22  ;;  %1986 = vrot.lane.b32.xlu0 %v10584_v6, %s13339_s23 }
 0x178   : > { %2187 = vrot.lane.b32.xlu1 %v10584_v6, %s13337_s22  ;;  %2004 = vrot.lane.b32.xlu0 %v10584_v6, %s13345_s1  ;;  %s13347_s22 = smov 122  }
 0x17c   : > { %1990 = vrot.lane.b32.xlu1 %v10586_v7, %s13339_s23  ;;  %2214 = vrot.lane.b32.xlu0 %v10584_v6, %s13341_s28  ;;  %s13353_s23 = smov 101  }
 0x180   : > { %2008 = vrot.lane.b32.xlu1 %v10586_v7, %s13345_s1  ;;  %2041 = vrot.lane.b32.xlu0 %v10584_v6, %s13343_s7  ;;  %s13355_s1 = smov 88  }
 0x184   : > { %2218 = vrot.lane.b32.xlu1 %v10586_v7, %s13341_s28  ;;  %1972 = vrot.lane.b32.xlu0 %v10586_v7, %s13347_s22  ;;  %s13351_s28 = smov 109  }
 0x188   : > { %2045 = vrot.lane.b32.xlu1 %v10586_v7, %s13343_s7  ;;  %2022 = vrot.lane.b32.xlu0 %v10584_v6, %s13353_s23  ;;  %s13530_s7 = smov 124  }
 0x18c   : > { %1968 = vrot.lane.b32.xlu1 %v10584_v6, %s13347_s22  ;;  %1934 = vrot.lane.b32.xlu0 %v10620_v14, %s13349_s2  ;;  %s13531_s22 = smov 107  }
 0x190   : > { %2312 = vrot.lane.b32.xlu1 %v10586_v7, %s13351_s28  ;;  %2166 = vrot.lane.b32.xlu0 %v10626_v15, %s13349_s2  ;;  %s13532_s2 = smov 122  }
 0x194   : > { %2308 = vrot.lane.b32.xlu1 %v10584_v6, %s13351_s28  ;;  %1952 = vrot.lane.b32.xlu0 %v10620_v14, %s13530_s7  ;;  %s13357_s28 = smov 118  }
 0x198   : > { %2026 = vrot.lane.b32.xlu1 %v10586_v7, %s13353_s23  ;;  %2172 = vrot.lane.b32.xlu0 %v10626_v15, %s13530_s7  ;;  %s13533_s23 = smov 105   ;;  %s13552_s7 = smov 102  }
 0x19c   : > { %2322 = vrot.lane.b32.xlu1 %v10586_v7, %s13355_s1  ;;  %2189 = vrot.lane.b32.xlu0 %v10620_v14, %s13531_s22  ;;  %s13359_s1 = smov 127  }
 0x1a0   : > { %1970 = vrot.lane.b32.xlu1 %v10620_v14, %s13532_s2  ;;  %2193 = vrot.lane.b32.xlu0 %v10626_v15, %s13531_s22 }
 0x1a4   : > { %2644 = vrot.lane.b32.xlu1 %v10620_v14, %s13357_s28  ;;  %1988 = vrot.lane.b32.xlu0 %v10620_v14, %s13533_s23  ;;  %s13534_s28 = smov 103  }
 0x1a8   : > { %1923 = vrot.lane.b32.xlu1 %v10653_v16, %s13359_s1  ;;  %2202 = vrot.lane.b32.xlu0 %v10626_v15, %s13533_s23  ;;  %s13364_s1 = smov 108   ;;  %s13390_s23 = smov 87  }
 0x1ac   : > { %1945 = vrot.lane.b32.xlu1 %v10660_v17, %s13362_s5  ;;  %2006 = vrot.lane.b32.xlu0 %v10620_v14, %s13534_s28 }
 0x1b0   : > { %1941 = vrot.lane.b32.xlu1 %v10653_v16, %s13362_s5  ;;  %2208 = vrot.lane.b32.xlu0 %v10626_v15, %s13534_s28  ;;  %s13536_s5 = smov 84   ;;  %s13550_s28 = smov 104  }
 0x1b4   : > { %2175 = vrot.lane.b32.xlu1 %v10653_v16, %s13364_s1  ;;  %2216 = vrot.lane.b32.xlu0 %v10620_v14, %s13535_s18  ;;  %s13373_s1 = smov 102  }
 0x1b8   : > { %1981 = vrot.lane.b32.xlu1 %v10660_v17, %s13366_s0  ;;  %2220 = vrot.lane.b32.xlu0 %v10626_v15, %s13535_s18  ;;  %s13537_s0 = smov 109   ;;  %s13411_s18 = smov 110  }
 0x1bc   : > { %1999 = vrot.lane.b32.xlu1 %v10660_v17, %s13369_s15  ;;  %2043 = vrot.lane.b32.xlu0 %v10620_v14, %s13536_s5 }
 0x1c0   : > { %1995 = vrot.lane.b32.xlu1 %v10653_v16, %s13369_s15  ;;  %2047 = vrot.lane.b32.xlu0 %v10626_v15, %s13536_s5  ;;  %s13538_s15 = smov 101   ;;  %s13548_s5 = smov 123  }
 0x1c4   : > { %2017 = vrot.lane.b32.xlu1 %v10660_v17, %s13373_s1  ;;  %2310 = vrot.lane.b32.xlu0 %v10620_v14, %s13537_s0 }
 0x1c8   : > { %2013 = vrot.lane.b32.xlu1 %v10653_v16, %s13373_s1  ;;  %2314 = vrot.lane.b32.xlu0 %v10626_v15, %s13537_s0  ;;  %s13382_s1 = smov 100  }
 0x1cc   : > { %2226 = vrot.lane.b32.xlu1 %v10653_v16, %s13375_s11  ;;  %2024 = vrot.lane.b32.xlu0 %v10620_v14, %s13538_s15  ;;  %s13540_s11 = smov 127   ;;  %s13546_s15 = smov 83  }
 0x1d0   : > { %2054 = vrot.lane.b32.xlu1 %v10653_v16, %s13377_s16  ;;  %2320 = vrot.lane.b32.xlu0 %v10620_v14, %s13539_s14  ;;  %s13541_s16 = smov 108  }
 0x1d4   : > { %1963 = vrot.lane.b32.xlu1 %v10660_v17, %s13379_s26  ;;  %2324 = vrot.lane.b32.xlu0 %v10626_v15, %s13539_s14  ;;  %s13542_s26 = smov 106   ;;  %s13543_s14 = smov 125  }
 0x1d8   : > { %2035 = vrot.lane.b32.xlu1 %v10660_v17, %s13382_s1  ;;  %1927 = vrot.lane.b32.xlu0 %v10660_v17, %s13540_s11 }
 0x1dc   : > { %2031 = vrot.lane.b32.xlu1 %v10653_v16, %s13382_s1  ;;  %2179 = vrot.lane.b32.xlu0 %v10660_v17, %s13541_s16  ;;  %s13544_s1 = smov 85  }
 0x1de   : > { %v10714_v18 = vpop.permute.xlu1 %1936  ;;  %v10716_v19 = vpop.permute.xlu0 %1932 }
 0x1e0   : > { %2163 = vrot.lane.b32.xlu1 %v2053_v20, %s13540_s11  ;;  %1977 = vrot.lane.b32.xlu0 %v10653_v16, %s13542_s26 }
 0x1e2   : > { %v10722_v21 = vpop.permute.xlu1 %1954  ;;  %v10724_v22 = vpop.permute.xlu0 %1950 }
 0x1e4   : > { %2169 = vrot.lane.b32.xlu1 %v2053_v20, %s13543_s14  ;;  %2230 = vrot.lane.b32.xlu0 %v10660_v17, %s13544_s1 }
 0x1e6   : > { %v10729_v23 = vpop.permute.xlu1 %2191  ;;  %v10731_v24 = vpop.permute.xlu0 %1986 }
 0x1e7   : > { %13545 = vst [vmem:[#allocation39_spill] sm:$0xff] %v10729_v23 }
 0x1e8   : > { %2058 = vrot.lane.b32.xlu0 %v10660_v17, %s13546_s15  ;;  %2177 = vrot.lane.b32.xlu1 %v1921_v25, %s13541_s16 }
 0x1ea   : > { %v10737_v26 = vpop.permute.xlu1 %2187  ;;  %v10739_v27 = vpop.permute.xlu0 %2004 }
 0x1eb   : > { %13547 = vst [vmem:[#allocation40_spill] sm:$0xff] %v10737_v26 }
 0x1ec   : > { %1959 = vrot.lane.b32.xlu0 %v10653_v16, %s13548_s5  ;;  %2181 = vrot.lane.b32.xlu1 %v2053_v20, %s13541_s16 }
 0x1ee   : > { %v10744_v28 = vpop.permute.xlu1 %1990  ;;  %v10746_v29 = vpop.permute.xlu0 %2214 }
 0x1ef   : > { %13549 = vst [vmem:[#allocation41_spill] sm:$0xff] %v10746_v29 }
 0x1f0   : > { %2300 = vrot.lane.b32.xlu0 %v10660_v17, %s13411_s18  ;;  %2199 = vrot.lane.b32.xlu1 %v2053_v20, %s13542_s26 }
 0x1f2   : > { %v10751_v30 = vpop.permute.xlu1 %2008  ;;  %v10753_v31 = vpop.permute.xlu0 %2041 }
 0x1f4   : > { %2296 = vrot.lane.b32.xlu0 %v10653_v16, %s13411_s18  ;;  %2205 = vrot.lane.b32.xlu1 %v2053_v20, %s13550_s28 }
 0x1f6   : > { %v10758_v32 = vpop.permute.xlu1 %2218  ;;  %v10760_v33 = vpop.permute.xlu0 %1972 }
 0x1f7   : > { %13551 = vst [vmem:[#allocation42_spill] sm:$0xff] %v10758_v32 }
 0x1f8   : > { %2331 = vrot.lane.b32.xlu0 %v10660_v17, %s13390_s23  ;;  %2211 = vrot.lane.b32.xlu1 %v2053_v20, %s13552_s7 }
 0x1fa   : > { %v10765_v34 = vpop.permute.xlu1 %2045  ;;  %v10767_v35 = vpop.permute.xlu0 %2022 }
 0x1fc   : > { %2228 = vrot.lane.b32.xlu1 %v1921_v25, %s13544_s1  ;;  %1925 = vrot.lane.b32.xlu0 %v1921_v25, %s13540_s11 }
 0x1fe   : > { %v10771_v36 = vpop.permute.xlu1 %1968  ;;  %v10773_v37 = vpop.permute.xlu0 %1934 }
 0x200   : > { %2232 = vrot.lane.b32.xlu1 %v2053_v20, %s13544_s1  ;;  %1943 = vrot.lane.b32.xlu0 %v1921_v25, %s13543_s14  ;;  %s13451_s1 = smov 90  }
 0x202   : > { %v10777_v38 = vpop.permute.xlu1 %2312  ;;  %v10779_v39 = vpop.permute.xlu0 %2166 }
 0x203   : > { %13553 = vst [vmem:[#allocation43_spill] sm:$0xff] %v10777_v38 }
 0x204   : > { %2056 = vrot.lane.b32.xlu1 %v1921_v25, %s13546_s15  ;;  %1979 = vrot.lane.b32.xlu0 %v1921_v25, %s13542_s26 }
 0x206   : > { %v10783_v40 = vpop.permute.xlu1 %2308  ;;  %v10785_v41 = vpop.permute.xlu0 %1952 }
 0x207   : > { %13554 = vst [vmem:[#allocation44_spill] sm:$0xff] %v10783_v40 }
 0x208   : > { %2060 = vrot.lane.b32.xlu1 %v2053_v20, %s13546_s15  ;;  %1997 = vrot.lane.b32.xlu0 %v1921_v25, %s13550_s28  ;;  %s13558_s15 = smov 100  }
 0x20a   : > { %v10789_v42 = vpop.permute.xlu1 %2026  ;;  %v10791_v43 = vpop.permute.xlu0 %2172 }
 0x20c   : > { %2298 = vrot.lane.b32.xlu1 %v1921_v25, %s13411_s18  ;;  %2015 = vrot.lane.b32.xlu0 %v1921_v25, %s13552_s7 }
 0x20e   : > { %v10795_v44 = vpop.permute.xlu1 %2322  ;;  %v10797_v45 = vpop.permute.xlu0 %2189 }
 0x20f   : > { %13555 = vst [vmem:[#allocation45_spill] sm:$0xff] %v10795_v44  ;;  %13556 = vst [vmem:[#allocation46_spill] sm:$0xff] %v10797_v45 }
 0x210   : > { %2302 = vrot.lane.b32.xlu1 %v2053_v20, %s13411_s18  ;;  %1961 = vrot.lane.b32.xlu0 %v1921_v25, %s13548_s5  ;;  %s13424_s18 = smov 36  }
 0x212   : > { %v10801_v46 = vpop.permute.xlu1 %1970  ;;  %v10803_v47 = vpop.permute.xlu0 %2193 }
 0x213   : > { %13557 = vst [vmem:[#allocation47_spill] sm:$0xff] %v10803_v47 }
 0x214   : > { %2329 = vrot.lane.b32.xlu1 %v1921_v25, %s13390_s23  ;;  %2033 = vrot.lane.b32.xlu0 %v1921_v25, %s13558_s15 }
 0x216   : > { %v10807_v48 = vpop.permute.xlu1 %2644  ;;  %v10809_v49 = vpop.permute.xlu0 %1988 }
 0x217   : > { %13559 = vst [vmem:[#allocation48_spill] sm:$0xff] %v10807_v48 }
 0x218   : > { %2333 = vrot.lane.b32.xlu1 %v2053_v20, %s13390_s23  ;;  %s13432_s23 = smov 82  }
 0x21a   : > { %v1924_v50 = vpop.permute.xlu1 %1923  ;;  %v10812_v51 = vpop.permute.xlu0 %2202 }
 0x21b   : > { %13560 = vst [vmem:[#allocation49_spill] sm:$0xff] %v10812_v51 }
 0x21e   : > { %v10814_v52 = vpop.permute.xlu1 %1945  ;;  %v10816_v53 = vpop.permute.xlu0 %2006 }
 0x222   : > { %v10818_v54 = vpop.permute.xlu1 %1941  ;;  %v10820_v55 = vpop.permute.xlu0 %2208 }
 0x223   : > { %13561 = vst [vmem:[#allocation50_spill] sm:$0xff] %v10820_v55 }
 0x226   : > { %v10822_v56 = vpop.permute.xlu1 %2175  ;;  %v10824_v57 = vpop.permute.xlu0 %2216 }
 0x22a   : > { %v10826_v58 = vpop.permute.xlu1 %1981  ;;  %v10828_v59 = vpop.permute.xlu0 %2220 }
 0x22b   : > { %13562 = vst [vmem:[#allocation51_spill] sm:$0xff] %v10828_v59 }
 0x22e   : > { %v10830_v60 = vpop.permute.xlu1 %1999  ;;  %v10832_v61 = vpop.permute.xlu0 %2043 }
 0x232   : > { %v10834_v62 = vpop.permute.xlu1 %1995  ;;  %v10836_v63 = vpop.permute.xlu0 %2047 }
 0x233   : > { %13563 = vst [vmem:[#allocation52_spill] sm:$0xff] %v10836_v63 }
 0x236   : > { %v10838_v0 = vpop.permute.xlu1 %2017  ;;  %v10840_v1 = vpop.permute.xlu0 %2310 }
 0x237   : > { %13564 = vst [vmem:[#allocation53_spill] sm:$0xff] %v10840_v1 }
 0x23a   : > { %v10842_v2 = vpop.permute.xlu1 %2013  ;;  %v10844_v3 = vpop.permute.xlu0 %2314 }
 0x23e   : > { %v10846_v4 = vpop.permute.xlu1 %2226  ;;  %v10848_v5 = vpop.permute.xlu0 %2024 }
 0x23f   : > { %13565 = vst [vmem:[#allocation54_spill] sm:$0xff] %v10846_v4 }
 0x242   : > { %v10850_v8 = vpop.permute.xlu1 %2054  ;;  %v10852_v9 = vpop.permute.xlu0 %2320 }
 0x246   : > { %v10854_v10 = vpop.permute.xlu1 %1963  ;;  %v10856_v11 = vpop.permute.xlu0 %2324 }
 0x247   : > { %13566 = vst [vmem:[#allocation55_spill] sm:$0xff] %v10856_v11 }
 0x24a   : > { %v10858_v12 = vpop.permute.xlu1 %2035  ;;  %v10860_v13 = vpop.permute.xlu0 %1927 }
 0x24e   : > { %v10862_v16 = vpop.permute.xlu1 %2031  ;;  %v10864_v17 = vpop.permute.xlu0 %2179 }
 0x252   : > { %v10866_v20 = vpop.permute.xlu1 %2163  ;;  %v10868_v25 = vpop.permute.xlu0 %1977 }
 0x253   : > { %v2242_v48 = vsel %vm2066_vm0, %v10626_v15, %v10866_v20 }
 0x254   : > { %2410 = vrot.lane.b32.xlu0 %v2242_v48, %s13432_s23 }
 0x256   : > { %v10874_v40 = vpop.permute.xlu1 %2169  ;;  %v10876_v1 = vpop.permute.xlu0 %2230 }
 0x257   : > { %13567 = vst [vmem:[#allocation56_spill] sm:$0xff] %v10876_v1  ;;  %v2248_v44 = vsel %vm2066_vm0, %v10779_v39, %v10874_v40 }
 0x258   : > { %2418 = vrot.lane.b32.xlu0 %v2248_v44, %s13432_s23 }
 0x25a   : > { %v10882_v11 = vpop.permute.xlu0 %2058  ;;  %v10884_v38 = vpop.permute.xlu1 %2177 }
 0x25e   : > { %v1960_v29 = vpop.permute.xlu0 %1959  ;;  %v10886_v4 = vpop.permute.xlu1 %2181 }
 0x25f   : > { %v2258_v15 = vsel %vm2066_vm0, %v10791_v43, %v10886_v4 }
 0x260   : > { %2426 = vrot.lane.b32.xlu0 %v2258_v15, %s13432_s23 }
 0x262   : > { %v10892_v32 = vpop.permute.xlu0 %2300  ;;  %v10894_v1 = vpop.permute.xlu1 %2199 }
 0x263   : > { %13568 = vst [vmem:[#allocation57_spill] sm:$0xff] %v10892_v32  ;;  %v10899_v44 = vsel %vm2066_vm0, %v10803_v47, %v10894_v1 }
 0x264   : > { %13569 = vst [vmem:[#allocation58_spill] sm:$0xff] %v10899_v44  ;;  %2434 = vrot.lane.b32.xlu0 %v10899_v44, %s13432_s23 }
 0x266   : > { %v10903_v26 = vpop.permute.xlu0 %2296  ;;  %v10905_v45 = vpop.permute.xlu1 %2205 }
 0x267   : > { %13570 = vst [vmem:[#allocation59_spill] sm:$0xff] %v10903_v26  ;;  %13571 = vst [vmem:[#allocation60_spill] sm:$0xff] %v10905_v45  ;;  %v10910_v15 = vsel %vm2066_vm0, %v10812_v51, %v10905_v45 }
 0x268   : > { %13572 = vst [vmem:[#allocation61_spill] sm:$0xff] %v10910_v15  ;;  %2442 = vrot.lane.b32.xlu0 %v10910_v15, %s13432_s23 }
 0x26a   : > { %v10914_v32 = vpop.permute.xlu0 %2331  ;;  %v10916_v23 = vpop.permute.xlu1 %2211 }
 0x26b   : > { %13573 = vst [vmem:[#allocation62_spill] sm:$0xff] %v10914_v32  ;;  %13574 = vst [vmem:[#allocation63_spill] sm:$0xff] %v10916_v23  ;;  %v2280_v44 = vsel %vm2066_vm0, %v10820_v55, %v10916_v23  ;;  %v1976_v23 = vsel %vm13421_vm6, %v10801_v46, %v10760_v33 }
 0x26c   : > { %2450 = vrot.lane.b32.xlu0 %v2280_v44, %s13432_s23  ;;  %v10939_v44 = vsel %vm1938_vm2, %v10716_v19, %v10773_v37 }
 0x26d   : > { %13575 = vst [vmem:[#allocation64_spill] sm:$0xff] %v10939_v44 }
 0x26e   : > { %v10922_v26 = vpop.permute.xlu1 %2228  ;;  %v1926_v47 = vpop.permute.xlu0 %1925 }
 0x26f   : > { %v1930_v51 = vsel %vm1929_vm1, %v1924_v50, %v1926_v47  ;;  %v1931_v15 = vsel %vm1929_vm1, %v1926_v47, %v10860_v13 }
 0x270   : > { %v10929_v32 = vsel %vm2066_vm0, %v10620_v14, %v1931_v15  ;;  %v10933_v45 = vsel %vm2066_vm0, %v10584_v6, %v1930_v51  ;;  %v10947_v14 = vsel %vm1938_vm2, %v10773_v37, %v10714_v18 }
 0x271   : > { %2681 = vmatprep.subr.bf16.mxu0 %v10929_v32  ;;  %13577 = vst [vmem:[#allocation66_spill] sm:$0xff] %v10947_v14 }
 0x272   : > { %v10941_v50 = vpop.permute.xlu1 %2232  ;;  %2682 = vmatpush1.bf16.msra.mxu0 %v10933_v45  ;;  %v1944_v47 = vpop.permute.xlu0 %1943 }
 0x273   : > { %13576 = vst [vmem:[#allocation65_spill] sm:$0xff] %v10941_v50  ;;  %v1948_v6 = vsel %vm13469_vm3, %v10818_v54, %v1944_v47  ;;  %v1949_v51 = vsel %vm13469_vm3, %v1944_v47, %v10814_v52  ;;  %v10956_v19 = vsel %vm2066_vm0, %v10828_v59, %v10941_v50 }
 0x274   : > { %13578 = vst [vmem:[#allocation67_spill] sm:$0xff] %v10956_v19  ;;  %2458 = vrot.lane.b32.xlu0 %v10956_v19, %s13432_s23  ;;  %v10962_v15 = vsel %vm2066_vm0, %v10947_v14, %v1949_v51  ;;  %v10966_v37 = vsel %vm2066_vm0, %v10939_v44, %v1948_v6  ;;  %v10987_v44 = vsel %vm1956_vm4, %v10724_v22, %v10785_v41 }
 0x275   : > { %2683 = vmatprep.subr.bf16.mxu0 %v10962_v15  ;;  %v10992_v14 = vsel %vm1956_vm4, %v10785_v41, %v10722_v21 }
 0x276   : > { %v10969_v54 = vpop.permute.xlu1 %2056  ;;  %2684 = vmatpush1.bf16.msra.mxu0 %v10966_v37  ;;  %v1980_v47 = vpop.permute.xlu0 %1979 }
 0x27a   : > { %v10972_v59 = vpop.permute.xlu1 %2060  ;;  %v1998_v50 = vpop.permute.xlu0 %1997 }
 0x27b   : > { %13579 = vst [vmem:[#allocation68_spill] sm:$0xff] %v10972_v59  ;;  %v10977_v19 = vsel %vm2066_vm0, %v10836_v63, %v10972_v59  ;;  %v10998_v63 = vsel %vm13457_vm7, %v1980_v47, %v10826_v58 }
 0x27c   : > { %13580 = vst [vmem:[#allocation69_spill] sm:$0xff] %v10977_v19  ;;  %2466 = vrot.lane.b32.xlu0 %v10977_v19, %s13432_s23 }
 0x27e   : > { %v10981_v6 = vpop.permute.xlu1 %2298  ;;  %v2016_v51 = vpop.permute.xlu0 %2015 }
 0x27f   : > { %13581 = vst [vmem:[#allocation70_spill] sm:$0xff] %v10981_v6 }
 0x280   : > { %2537 = vrot.lane.b32.xlu0 %v2242_v48, %s13424_s18 }
 0x282   : > { %v10994_v19 = vpop.permute.xlu1 %2302  ;;  %v1962_v6 = vpop.permute.xlu0 %1961 }
 0x283   : > { %v1966_v48 = vsel %vm13426_vm5, %v1960_v29, %v1962_v6  ;;  %v1967_v22 = vsel %vm13426_vm5, %v1962_v6, %v10854_v10  ;;  %v2345_v59 = vsel %vm2066_vm0, %v10779_v39, %v10994_v19  ;;  %v11016_v29 = vsel %vm13457_vm7, %v10868_v25, %v1980_v47 }
 0x284   : > { %2545 = vrot.lane.b32.xlu0 %v2345_v59, %s13424_s18  ;;  %v2097_v41 = vsel %vm2066_vm0, %v10992_v14, %v1967_v22  ;;  %v2093_v55 = vsel %vm2066_vm0, %v10987_v44, %v1966_v48  ;;  %v2109_v59 = vsel %vm2066_vm0, %v1976_v23, %v10998_v63  ;;  %v2003_v48 = vsel %vm13449_vm9, %v1998_v50, %v10830_v60 }
 0x285   : > { %2685 = vmatprep.subr.bf16.mxu0 %v2097_v41  ;;  %v2353_v41 = vsel %vm2066_vm0, %v10844_v3, %v10886_v4  ;;  %v1975_v25 = vsel %vm13421_vm6, %v10771_v36, %v10801_v46  ;;  %v1994_v23 = vsel %vm13450_vm8, %v10809_v49, %v10744_v28  ;;  %v2002_v47 = vsel %vm13449_vm9, %v10834_v62, %v1998_v50 }
 0x286   : > { %v11018_v6 = vpop.permute.xlu1 %2329  ;;  %2686 = vmatpush1.bf16.msra.mxu0 %v2093_v55  ;;  %v2105_v55 = vsel %vm2066_vm0, %v1975_v25, %v11016_v29  ;;  %v2021_v36 = vsel %vm13436_vm11, %v2016_v51, %v10838_v0  ;;  %v2368_v46 = vsel %vm2066_vm0, %v10824_v57, %v10922_v26  ;;  %v2012_v62 = vsel %vm13448_vm10, %v10816_v53, %v10751_v30 }
 0x287   : > { %2687 = vmatprep.subr.bf16.mxu0 %v2109_v59  ;;  %v2356_v22 = vsel %vm2066_vm0, %v10852_v9, %v11018_v6  ;;  %v11043_v59 = vsel %vm2066_vm0, %v1994_v23, %v2003_v48  ;;  %v2020_v48 = vsel %vm13436_vm11, %v10842_v2, %v2016_v51  ;;  %v2371_v25 = vsel %vm2066_vm0, %v10832_v61, %v10969_v54 }
 0x288   : > { %2571 = vrot.lane.b32.xlu1 %v2356_v22, %s13424_s18  ;;  %2553 = vrot.lane.b32.xlu0 %v2353_v41, %s13424_s18  ;;  %v1993_v22 = vsel %vm13450_vm8, %v10731_v24, %v10809_v49  ;;  %v2034_v41 = vpop.permute.xlu0 %2033  ;;  %v11067_v24 = vsel %vm2066_vm0, %v2012_v62, %v2021_v36  ;;  %v2011_v23 = vsel %vm13448_vm10, %v10739_v27, %v10816_v53  ;;  %vm13428_vm6 = vcmask 687104  }
 0x289   : > { %v11061_v50 = vsel %vm2066_vm0, %v1993_v22, %v2002_v47  ;;  %v2039_v49 = vsel %vm13423_vm12, %v2034_v41, %v10858_v12  ;;  %v2165_v2 = vsel %vm1929_vm1, %v10860_v13, %v10866_v20  ;;  %v2171_v51 = vsel %vm13469_vm3, %v10814_v52, %v10874_v40 }
 0x28a   : > { %2688 = vmatpush1.bf16.msra.mxu0 %v2105_v55  ;;  %v2030_v55 = vsel %vm13422_vm13, %v10848_v5, %v10789_v42  ;;  %v11091_v27 = vsel %vm2066_vm0, %v2011_v23, %v2020_v48  ;;  %v2038_v53 = vsel %vm13423_vm12, %v10862_v16, %v2034_v41  ;;  %v11100_v20 = vsel %vm1938_vm2, %v10714_v18, %v10779_v39 }
 0x28b   : > { %2689 = vmatprep.subr.bf16.mxu0 %v11043_v59  ;;  %v2145_v40 = vsel %vm2066_vm0, %v2030_v55, %v2039_v49  ;;  %v11104_v47 = vsel %vm2066_vm0, %v10586_v7, %v2165_v2  ;;  %v2245_v36 = vsel %vm2066_vm0, %v11100_v20, %v2171_v51  ;;  %v2064_v16 = vsel %vm13429_vm14, %v10969_v54, %v10882_v11  ;;  %v13587_v2 = vld [vmem:[#allocation60_spill] sm:$0xff]  ;;  %v13588_v51 = vld [vmem:[#allocation63_spill] sm:$0xff] }
 0x28c   : > { %2579 = vrot.lane.b32.xlu1 %v2368_v46, %s13424_s18  ;;  %2406 = vrot.lane.b32.xlu0 %v10929_v32, %s13432_s23  ;;  %v2029_v46 = vsel %vm13422_vm13, %v10767_v35, %v10848_v5  ;;  %v11117_v39 = vsel %vm2183_vm15, %v10884_v38, %v10864_v17  ;;  %v2051_v41 = vsel %vm13428_vm6, %v10832_v61, %v10765_v34  ;;  %vm13458_vm13 = vcmask 875520  }
 0x28d   : > { %v2141_v22 = vsel %vm2066_vm0, %v2029_v46, %v2038_v53  ;;  %v11127_v62 = vsel %vm2066_vm0, %v2051_v41, %v2064_v16  ;;  %v2063_v35 = vsel %vm13429_vm14, %v10850_v8, %v10969_v54  ;;  %v2252_v5 = vsel %vm2066_vm0, %v10992_v14, %v11117_v39  ;;  %v13589_v53 = vld [vmem:[#allocation49_spill] sm:$0xff]  ;;  %v13592_v41 = vld [vmem:[#allocation56_spill] sm:$0xff] }
 0x28e   : > { %2690 = vmatpush1.bf16.msra.mxu0 %v11061_v50  ;;  %v11139_v48 = vsel %vm2183_vm15, %v10822_v56, %v10884_v38  ;;  %v2050_v8 = vsel %vm13428_vm6, %v10753_v31, %v10832_v61  ;;  %v2201_v38 = vsel %vm13457_vm7, %v10826_v58, %v10894_v1  ;;  %v2186_v31 = vsel %vm2183_vm15, %v10864_v17, %v10886_v4  ;;  %v13582_v61 = vld [vmem:[#allocation47_spill] sm:$0xff] }
 0x28f   : > { %2691 = vmatprep.subr.bf16.mxu0 %v11067_v24  ;;  %v11148_v54 = vsel %vm2066_vm0, %v2050_v8, %v2063_v35  ;;  %v2250_v14 = vsel %vm2066_vm0, %v10987_v44, %v11139_v48  ;;  %v2174_v56 = vsel %vm1956_vm4, %v10722_v21, %v10791_v43  ;;  %v13583_v44 = vld [vmem:[#allocation39_spill] sm:$0xff]  ;;  %v13585_v43 = vld [vmem:[#allocation40_spill] sm:$0xff]  ;;  %v2213_v55 = vsel %vm13436_vm11, %v10838_v0, %v13588_v51  ;;  %v13594_v8 = vld [vmem:[#allocation42_spill] sm:$0xff] }
 0x290   : > { %2587 = vrot.lane.b32.xlu1 %v2371_v25, %s13424_s18  ;;  %2404 = vrot.lane.b32.xlu0 %v10933_v45, %s13432_s23  ;;  %v2255_v49 = vsel %vm2066_vm0, %v2174_v56, %v2186_v31  ;;  %vm13431_vm12 = vcmask 695296   ;;  %s11215_s18 = sshll.u32 %s13790_s10, 4  ;;  %vm13430_vm5 = vcmask 703488   ;;  %v13600_v51 = vld [vmem:[#allocation41_spill] sm:$0xff]  ;;  %vm13437_vm11 = vcmask 64512  }
 0x291   : > { %s11219_s5 = scalar_lea.vmem %s13586_s9, %s11215_s18  ;;  %s13598_s9 = smov 36   ;;  %vm4259_vm7 = vcmask 130048   ;;  %vm4802_vm3 = vcmask 195584  }
 0x292   : > { %2692 = vmatpush1.bf16.msra.mxu0 %v11091_v27  ;;  %s11660_s7 = scalar_lea.vmem %s13621_s21, %s11215_s18  ;;  %s13470_s21 = smov 114  }
 0x293   : > { %2693 = vmatprep.subr.bf16.mxu0 %v2145_v40  ;;  %v2204_v40 = vsel %vm13450_vm8, %v10744_v28, %v13589_v53  ;;  %vm4099_vm8 = vcmask 523264  }
 0x294   : > { %2408 = vrot.lane.b32.xlu1 %v11104_v47, %s13432_s23  ;;  %2416 = vrot.lane.b32.xlu0 %v2245_v36, %s13432_s23 }
 0x296   : > { %2694 = vmatpush1.bf16.msra.mxu0 %v2141_v22  ;;  %v13591_v22 = vld [vmem:[#allocation65_spill] sm:$0xff] }
 0x297   : > { %2695 = vmatprep.subr.bf16.mxu0 %v11127_v62  ;;  %v2237_v35 = vsel %vm13431_vm12, %v13592_v41, %v13591_v22 }
 0x298   : > { %2422 = vrot.lane.b32.xlu0 %v2252_v5, %s13432_s23  ;;  %2414 = vrot.lane.b32.xlu1 %v10962_v15, %s13432_s23  ;;  %v2198_v15 = vsel %vm13458_vm13, %v13583_v44, %v13582_v61  ;;  %v13593_v5 = vld [vmem:[#allocation51_spill] sm:$0xff] }
 0x299   : > { %v2265_v1 = vsel %vm2066_vm0, %v2198_v15, %v2201_v38  ;;  %v11225_v38 = vld [vmem:[%s11219_s5] sm:$0xff] }
 0x29a   : > { %2696 = vmatpush1.bf16.msra.mxu0 %v11148_v54  ;;  %v8725_v61 = vcombine.high %v11225_v38, %v11225_v38 }
 0x29c   : > { %2420 = vrot.lane.b32.xlu0 %v2250_v14, %s13432_s23  ;;  %2412 = vrot.lane.b32.xlu1 %v10966_v37, %s13432_s23  ;;  %v13584_v37 = vld [vmem:[#allocation46_spill] sm:$0xff]  ;;  %v2225_v14 = vsel %vm13430_vm5, %v13594_v8, %v13593_v5 }
 0x29d   : > { %v2197_v4 = vsel %vm13458_vm13, %v13584_v37, %v13583_v44  ;;  %v2196_v25 = vsel %vm13458_vm13, %v13585_v43, %v13584_v37  ;;  %v2289_v56 = vsel %vm2066_vm0, %v2225_v14, %v2237_v35  ;;  %v13595_v44 = vld [vmem:[#allocation68_spill] sm:$0xff]  ;;  %2795 = vmatprep.mubr.bf16.mxu1 %v8725_v61  ;;  %2713 = vmatprep.mubr.bf16.mxu0 %v8725_v61  ;;  %vm4381_vm13 = vcmask 654336  }
 0x29e   : > { %v11178_v17 = vsel %vm2066_vm0, %v2197_v4, %v10998_v63  ;;  %v11189_v23 = vsel %vm2066_vm0, %v2196_v25, %v11016_v29  ;;  %v2207_v63 = vsel %vm13449_vm9, %v10830_v60, %v13587_v2  ;;  %v13590_v29 = vld [vmem:[#allocation50_spill] sm:$0xff]  ;;  %v2065_v15 = vsel %vm13429_vm14, %v10882_v11, %v13595_v44  ;;  %v13597_v25 = vld [vmem:[#allocation57_spill] sm:$0xff] }
 0x29f   : > { %v2210_v36 = vsel %vm13448_vm10, %v10751_v30, %v13590_v29  ;;  %v2271_v16 = vsel %vm2066_vm0, %v2204_v40, %v2207_v63  ;;  %v13477_v4 = vmov 0   ;;  %v2236_v11 = vsel %vm13431_vm12, %v10922_v26, %v13592_v41  ;;  %v13607_v41 = vld [vmem:[#allocation59_spill] sm:$0xff] }
 0x2a0   : > { %2432 = vrot.lane.b32.xlu0 %v2265_v1, %s13432_s23  ;;  %2424 = vrot.lane.b32.xlu1 %v2255_v49, %s13432_s23  ;;  %v2277_v46 = vsel %vm2066_vm0, %v2210_v36, %v2213_v55  ;;  %v13596_v49 = vld [vmem:[#allocation52_spill] sm:$0xff]  ;;  %v2223_v55 = vsel %vm13430_vm5, %v13600_v51, %v10824_v57  ;;  %vm2316_vm14 = vcmask 891904   ;;  %vm3757_vm10 = vcmask 588800  }
 0x2a1   : > { %v2052_v37 = vsel %vm13428_vm6, %v10765_v34, %v13596_v49  ;;  %9629 = vset.pattern.permute.xlu1 %v13477_v4  ;;  %9630 = vset.pattern.permute.xlu0 %v13477_v4  ;;  %v2224_v34 = vsel %vm13430_vm5, %v10824_v57, %v13594_v8  ;;  %vm2304_vm6 = vcmask 900096   ;;  %v2334_v57 = vpop.permute.xlu1 %2333  ;;  %vm13434_vm5 = vcmask 711680   ;;  %v13608_v8 = vld [vmem:[#allocation64_spill] sm:$0xff] }
 0x2a2   : > { %v11242_v43 = vsel %vm2066_vm0, %v2052_v37, %v2065_v15  ;;  %v2307_v2 = vsel %vm2304_vm6, %v13597_v25, %v10994_v19  ;;  %v13601_v19 = vld [vmem:[#allocation43_spill] sm:$0xff]  ;;  %vm10287_vm9 = vmmov 0  }
 0x2a3   : > { %v2343_v53 = vsel %vm2066_vm0, %v11100_v20, %v2307_v2  ;;  %v13602_v20 = vld [vmem:[#allocation62_spill] sm:$0xff]  ;;  %v13613_v2 = vld [vmem:[#allocation69_spill] sm:$0xff] }
 0x2a4   : > { %2430 = vrot.lane.b32.xlu1 %v11178_v17, %s13432_s23  ;;  %2438 = vrot.lane.b32.xlu0 %v11043_v59, %s13432_s23  ;;  %v2337_v29 = vsel %vm13434_vm5, %v13602_v20, %v2334_v57 }
 0x2a8   : > { %2428 = vrot.lane.b32.xlu1 %v11189_v23, %s13432_s23  ;;  %2436 = vrot.lane.b32.xlu0 %v11061_v50, %s13432_s23 }
 0x2ac   : > { %2440 = vrot.lane.b32.xlu1 %v2271_v16, %s13432_s23  ;;  %2448 = vrot.lane.b32.xlu0 %v2277_v46, %s13432_s23 }
 0x2b0   : > { %2456 = vrot.lane.b32.xlu0 %v2289_v56, %s13432_s23  ;;  %2446 = vrot.lane.b32.xlu1 %v11067_v24, %s13432_s23  ;;  %v2286_v24 = vsel %vm2066_vm0, %v2224_v34, %v2236_v11  ;;  %v13612_v34 = vld [vmem:[#allocation58_spill] sm:$0xff] }
 0x2b4   : > { %2464 = vrot.lane.b32.xlu0 %v11242_v43, %s13432_s23  ;;  %2444 = vrot.lane.b32.xlu1 %v11091_v27, %s13432_s23  ;;  %v13599_v27 = vld [vmem:[#allocation54_spill] sm:$0xff] }
 0x2b5   : > { %v2235_v63 = vsel %vm13431_vm12, %v13599_v27, %v10922_v26  ;;  %vm13435_vm12 = vcmask 719872  }
 0x2b6   : > { %v2283_v40 = vsel %vm2066_vm0, %v2223_v55, %v2235_v63  ;;  %v2336_v63 = vsel %vm13434_vm5, %v11018_v6, %v13602_v20  ;;  %vm13447_vm5 = vcmask 670720  }
 0x2b8   : > { %2535 = vrot.lane.b32.xlu0 %v11104_v47, %s13598_s9  ;;  %2454 = vrot.lane.b32.xlu1 %v2286_v24, %s13432_s23  ;;  %v2319_v47 = vsel %vm2316_vm14, %v13601_v19, %v10844_v3  ;;  %v13603_v3 = vld [vmem:[#allocation55_spill] sm:$0xff] }
 0x2b9   : > { %v2351_v26 = vsel %vm2066_vm0, %v2319_v47, %v2186_v31  ;;  %v13604_v31 = vld [vmem:[#allocation45_spill] sm:$0xff] }
 0x2ba   : > { %v2328_v36 = vsel %vm13435_vm12, %v13604_v31, %v13603_v3 }
 0x2bc   : > { %2543 = vrot.lane.b32.xlu0 %v2343_v53, %s13598_s9  ;;  %2452 = vrot.lane.b32.xlu1 %v2283_v40, %s13432_s23 }
 0x2c0   : > { %2551 = vrot.lane.b32.xlu0 %v2351_v26, %s13598_s9  ;;  %2462 = vrot.lane.b32.xlu1 %v11127_v62, %s13432_s23  ;;  %v13616_v26 = vld [vmem:[#allocation67_spill] sm:$0xff] }
 0x2c4   : > { %2559 = vrot.lane.b32.xlu0 %v2265_v1, %s13598_s9  ;;  %2460 = vrot.lane.b32.xlu1 %v11148_v54, %s13432_s23  ;;  %v2362_v1 = vsel %vm2066_vm0, %v2328_v36, %v2337_v29  ;;  %v13605_v54 = vld [vmem:[#allocation70_spill] sm:$0xff]  ;;  %s13610_s23 = smov 118  }
 0x2c5   : > { %v2306_v22 = vsel %vm2304_vm6, %v13605_v54, %v13597_v25  ;;  %v2305_v35 = vsel %vm2304_vm6, %v13607_v41, %v13605_v54 }
 0x2c6   : > { %v2411_v46 = vpop.permute.xlu0 %2410  ;;  %v2339_v14 = vsel %vm2066_vm0, %v13608_v8, %v2305_v35 }
 0x2c8   : > { %2567 = vrot.lane.b32.xlu0 %v2271_v16, %s13598_s9  ;;  %2533 = vrot.lane.b32.xlu1 %v10929_v32, %s13598_s9  ;;  %v13606_v16 = vld [vmem:[#allocation66_spill] sm:$0xff] }
 0x2c9   : > { %v2341_v32 = vsel %vm2066_vm0, %v13606_v16, %v2306_v22 }
 0x2ca   : > { %v2419_v5 = vpop.permute.xlu0 %2418 }
 0x2cc   : > { %2575 = vrot.lane.b32.xlu0 %v2362_v1, %s13598_s9  ;;  %2531 = vrot.lane.b32.xlu1 %v10933_v45, %s13598_s9  ;;  %v13609_v45 = vld [vmem:[#allocation53_spill] sm:$0xff] }
 0x2cd   : > { %v2318_v44 = vsel %vm2316_vm14, %v13609_v45, %v13601_v19  ;;  %v13615_v19 = vld [vmem:[#allocation61_spill] sm:$0xff] }
 0x2ce   : > { %v2349_v15 = vsel %vm2066_vm0, %v2318_v44, %v11117_v39  ;;  %v2365_v39 = vsel %vm2066_vm0, %v13603_v3, %v2334_v57 }
 0x2d0   : > { %2583 = vrot.lane.b32.xlu0 %v2289_v56, %s13598_s9  ;;  %2541 = vrot.lane.b32.xlu1 %v2341_v32, %s13598_s9  ;;  %v13611_v56 = vld [vmem:[#allocation44_spill] sm:$0xff] }
 0x2d1   : > { %v2317_v49 = vsel %vm2316_vm14, %v13611_v56, %v13609_v45 }
 0x2d2   : > { %v11306_v61 = vpop.permute.xlu0 %2426  ;;  %v2347_v11 = vsel %vm2066_vm0, %v2317_v49, %v11139_v48 }
 0x2d4   : > { %2591 = vrot.lane.b32.xlu0 %v11242_v43, %s13598_s9  ;;  %2539 = vrot.lane.b32.xlu1 %v2339_v14, %s13598_s9 }
 0x2d6   : > { %v11322_v37 = vpop.permute.xlu0 %2434 }
 0x2d8   : > { %2646 = vrot.lane.b32.xlu0 %v10586_v7, %s13610_s23  ;;  %2549 = vrot.lane.b32.xlu1 %v2349_v15, %s13598_s9 }
 0x2da   : > { %v11331_v25 = vpop.permute.xlu0 %2442 }
 0x2dc   : > { %2561 = vrot.lane.b32.xlu0 %v13612_v34, %s13598_s9  ;;  %2547 = vrot.lane.b32.xlu1 %v2347_v11, %s13598_s9 }
 0x2de   : > { %v11340_v48 = vpop.permute.xlu0 %2450 }
 0x2e0   : > { %2577 = vrot.lane.b32.xlu0 %v2365_v39, %s13598_s9  ;;  %2557 = vrot.lane.b32.xlu1 %v11178_v17, %s13598_s9  ;;  %v2327_v17 = vsel %vm13435_vm12, %v10852_v9, %v13604_v31  ;;  %v13614_v9 = vld [vmem:[#allocation38_spill] sm:$0xff]  ;;  %v2077_v31 = vsel %vm2066_vm0, %v10586_v7, %v10860_v13  ;;  %vm13446_vm12 = vcmask 293888  }
 0x2e4   : > { %2593 = vrot.lane.b32.xlu0 %v13613_v2, %s13598_s9  ;;  %2555 = vrot.lane.b32.xlu1 %v11189_v23, %s13598_s9  ;;  %v2359_v23 = vsel %vm2066_vm0, %v2327_v17, %v2336_v63 }
 0x2e6   : > { %v11344_v27 = vpop.permute.xlu0 %2458 }
 0x2e8   : > { %2565 = vrot.lane.b32.xlu1 %v11043_v59, %s13598_s9 }
 0x2ec   : > { %2563 = vrot.lane.b32.xlu1 %v11061_v50, %s13598_s9 }
 0x2ee   : > { %v11354_v51 = vpop.permute.xlu0 %2466 }
 0x2f0   : > { %2573 = vrot.lane.b32.xlu1 %v2359_v23, %s13598_s9  ;;  %v2149_v23 = vsel %vm2066_vm0, %v10789_v42, %v10858_v12 }
 0x2f2   : > { %v11358_v59 = vpop.permute.xlu0 %2537 }
 0x2f4   : > { %2581 = vrot.lane.b32.xlu1 %v2286_v24, %s13598_s9 }
 0x2f6   : > { %v11361_v55 = vpop.permute.xlu0 %2545 }
 0x2f8   : > { %2589 = vrot.lane.b32.xlu1 %v11127_v62, %s13598_s9 }
 0x2fa   : > { %v11365_v6 = vpop.permute.xlu1 %2571  ;;  %v11367_v50 = vpop.permute.xlu0 %2553 }
 0x2fc   : > { %2648 = vrot.lane.b32.xlu1 %v13614_v9, %s13610_s23 }
 0x2fe   : > { %v11371_v53 = vpop.permute.xlu1 %2579  ;;  %v2407_v40 = vpop.permute.xlu0 %2406 }
 0x300   : > { %2569 = vrot.lane.b32.xlu1 %v13615_v19, %s13598_s9  ;;  %v8724_v19 = vcombine.low %v11225_v38, %v11225_v38 }
 0x302   : > { %v11375_v47 = vpop.permute.xlu1 %2587  ;;  %v2405_v24 = vpop.permute.xlu0 %2404 }
 0x303   : > { %v2469_v3 = vsel %vm13447_vm5, %v2405_v24, %v2407_v40 }
 0x304   : > { %2585 = vrot.lane.b32.xlu1 %v13616_v26, %s13598_s9 }
 0x306   : > { %v2409_v62 = vpop.permute.xlu1 %2408  ;;  %v2417_v57 = vpop.permute.xlu0 %2416 }
 0x307   : > { %v2470_v20 = vsel %vm13447_vm5, %v2407_v40, %v2409_v62  ;;  %v2471_v29 = vsel %vm13447_vm5, %v2409_v62, %v2411_v46  ;;  %v2474_v36 = vsel %vm13447_vm5, %v2417_v57, %v2419_v5  ;;  %v2089_v46 = vsel %vm2066_vm0, %v10714_v18, %v10814_v52 }
 0x308   : > { %2697 = vmatprep.subr.bf16.mxu0 %v2470_v20  ;;  %9006 = vmatprep.subr.bf16.mxu1 %v2471_v29  ;;  %v2101_v18 = vsel %vm2066_vm0, %v10722_v21, %v10854_v10 }
 0x309   : > { %2698 = vmatpush1.bf16.msra.mxu0 %v2469_v3  ;;  %9007 = vmatpush3.bf16.msra.mxu1 %v2077_v31 }
 0x30a   : > { %v2415_v1 = vpop.permute.xlu1 %2414  ;;  %9008 = vmatprep.subr.bf16.mxu1 %v2474_v36  ;;  %v2423_v54 = vpop.permute.xlu0 %2422 }
 0x30b   : > { %v2473_v22 = vsel %vm13447_vm5, %v2415_v1, %v2417_v57 }
 0x30c   : > { %2699 = vmatprep.subr.bf16.mxu0 %v2473_v22 }
 0x30d   : > { %9009 = vmatpush3.bf16.msra.mxu1 %v2089_v46 }
 0x30e   : > { %v2413_v16 = vpop.permute.xlu1 %2412  ;;  %v2421_v32 = vpop.permute.xlu0 %2420 }
 0x30f   : > { %v2472_v41 = vsel %vm13447_vm5, %v2413_v16, %v2415_v1  ;;  %v2475_v8 = vsel %vm13447_vm5, %v2421_v32, %v2423_v54 }
 0x310   : > { %2700 = vmatpush1.bf16.msra.mxu0 %v2472_v41 }
 0x312   : > { %v2425_v7 = vpop.permute.xlu1 %2424  ;;  %v2433_v13 = vpop.permute.xlu0 %2432 }
 0x313   : > { %v2476_v35 = vsel %vm13447_vm5, %v2423_v54, %v2425_v7  ;;  %v2477_v5 = vsel %vm13447_vm5, %v2425_v7, %v11306_v61  ;;  %v2480_v52 = vsel %vm13447_vm5, %v2433_v13, %v11322_v37  ;;  %v2113_v61 = vsel %vm2066_vm0, %v10760_v33, %v10826_v58 }
 0x314   : > { %2701 = vmatprep.subr.bf16.mxu0 %v2476_v35  ;;  %9010 = vmatprep.subr.bf16.mxu1 %v2477_v5  ;;  %v2125_v33 = vsel %vm2066_vm0, %v10744_v28, %v10830_v60 }
 0x315   : > { %2702 = vmatpush1.bf16.msra.mxu0 %v2475_v8  ;;  %9011 = vmatpush3.bf16.msra.mxu1 %v2101_v18 }
 0x316   : > { %v2431_v14 = vpop.permute.xlu1 %2430  ;;  %9012 = vmatprep.subr.bf16.mxu1 %v2480_v52  ;;  %v2439_v45 = vpop.permute.xlu0 %2438 }
 0x317   : > { %v2479_v44 = vsel %vm13447_vm5, %v2431_v14, %v2433_v13 }
 0x318   : > { %2703 = vmatprep.subr.bf16.mxu0 %v2479_v44 }
 0x319   : > { %9013 = vmatpush3.bf16.msra.mxu1 %v2113_v61 }
 0x31a   : > { %v2429_v15 = vpop.permute.xlu1 %2428  ;;  %v2437_v56 = vpop.permute.xlu0 %2436 }
 0x31b   : > { %v2478_v21 = vsel %vm13447_vm5, %v2429_v15, %v2431_v14  ;;  %v2481_v34 = vsel %vm13447_vm5, %v2437_v56, %v2439_v45 }
 0x31c   : > { %2704 = vmatpush1.bf16.msra.mxu0 %v2478_v21 }
 0x31e   : > { %v2441_v10 = vpop.permute.xlu1 %2440  ;;  %v2449_v49 = vpop.permute.xlu0 %2448 }
 0x31f   : > { %v2482_v37 = vsel %vm13447_vm5, %v2439_v45, %v2441_v10  ;;  %v2483_v11 = vsel %vm13447_vm5, %v2441_v10, %v11331_v25  ;;  %v2486_v58 = vsel %vm13447_vm5, %v2449_v49, %v11340_v48  ;;  %v2137_v25 = vsel %vm2066_vm0, %v10751_v30, %v10838_v0 }
 0x320   : > { %2705 = vmatprep.subr.bf16.mxu0 %v2482_v37  ;;  %9014 = vmatprep.subr.bf16.mxu1 %v2483_v11 }
 0x321   : > { %2706 = vmatpush1.bf16.msra.mxu0 %v2481_v34  ;;  %9015 = vmatpush3.bf16.msra.mxu1 %v2125_v33 }
 0x322   : > { %v2447_v39 = vpop.permute.xlu1 %2446  ;;  %9016 = vmatprep.subr.bf16.mxu1 %v2486_v58  ;;  %v2457_v2 = vpop.permute.xlu0 %2456 }
 0x323   : > { %v2485_v63 = vsel %vm13447_vm5, %v2447_v39, %v2449_v49  ;;  %v2489_v28 = vsel %vm13447_vm5, %v2457_v2, %v11344_v27  ;;  %v11428_v27 = vld [vmem:[%s11219_s5 + $0x8] sm:$0xff]  ;;  %s11537_s5 = sshll.u32 %s13790_s10, 3 }
 0x324   : > { %2707 = vmatprep.subr.bf16.mxu0 %v2485_v63  ;;  %s1344_s9 = scalar_lea.vmem %s13618_s13, %s11537_s5  ;;  %s13620_s13 = smov 110  }
 0x325   : > { %9017 = vmatpush3.bf16.msra.mxu1 %v2137_v25  ;;  %s1349_s15 = scalar_lea.vmem %s13518_s17, %s11537_s5  ;;  %s11871_s17 = smul.u32 48, %s13790_s10 }
 0x326   : > { %v2445_v60 = vpop.permute.xlu1 %2444  ;;  %9018 = vmatprep.subr.bf16.mxu1 %v2489_v28  ;;  %v2465_v17 = vpop.permute.xlu0 %2464 }
 0x327   : > { %v2484_v48 = vsel %vm13447_vm5, %v2445_v60, %v2447_v39  ;;  %v2492_v9 = vsel %vm13447_vm5, %v2465_v17, %v11354_v51  ;;  %v8727_v51 = vcombine.high %v11428_v27, %v11428_v27 }
 0x328   : > { %2708 = vmatpush1.bf16.msra.mxu0 %v2484_v48  ;;  %v8726_v48 = vcombine.low %v11428_v27, %v11428_v27 }
 0x329   : > { %9019 = vmatpush3.bf16.msra.mxu1 %v2149_v23 }
 0x32a   : > { %v2455_v30 = vpop.permute.xlu1 %2454  ;;  %9020 = vmatprep.subr.bf16.mxu1 %v2492_v9  ;;  %v2536_v0 = vpop.permute.xlu0 %2535 }
 0x32b   : > { %v2488_v40 = vsel %vm13447_vm5, %v2455_v30, %v2457_v2  ;;  %v2598_v26 = vsel %vm13446_vm12, %v2536_v0, %v11358_v59 }
 0x32c   : > { %2709 = vmatprep.subr.bf16.mxu0 %v2488_v40 }
 0x32d   : > { %9021 = vmatpush3.bf16.msra.mxu1 %v11242_v43 }
 0x32e   : > { %v2453_v24 = vpop.permute.xlu1 %2452  ;;  %v2544_v42 = vpop.permute.xlu0 %2543  ;;  %2803 = vmatprep.subr.bf16.mxu1 %v13477_v4 }
 0x32f   : > { %v2487_v12 = vsel %vm13447_vm5, %v2453_v24, %v2455_v30  ;;  %v2601_v57 = vsel %vm13446_vm12, %v2544_v42, %v11361_v55  ;;  %v9733_v24 = vld [vmem:[%s13520_s12 + $0x4] ss:$8 sps:$4 sm:$0xff]  }
 0x330   : > { %2710 = vmatpush1.bf16.msra.mxu0 %v2487_v12  ;;  %2796 = vmatmul.mubr.bf16.vlgmr.msra.gmra.mrb[4].mxu1 %v8724_v19  ;;  %v9731_v12 = vld [vmem:[%s13520_s12] ss:$8 sps:$4 sm:$0xff]  }
 0x331   : > { %2804 = vmatpush1.bf16.msra.mxu1 %v2598_v26  ;;  %8730 = vmatprep.mubr.msk.bf16.mxu1 %vm13437_vm11, %v8727_v51  ;;  %v9734_v26 = vld [vmem:[%s13520_s12 + $0x10] ss:$8 sps:$4 sm:$0xff]  }
 0x332   : > { %v2463_v38 = vpop.permute.xlu1 %2462  ;;  %v2552_v43 = vpop.permute.xlu0 %2551  ;;  %2805 = vmatprep.subr.bf16.mxu1 %v13477_v4 }
 0x333   : > { %v2491_v62 = vsel %vm13447_vm5, %v2463_v38, %v2465_v17  ;;  %v2604_v3 = vsel %vm13446_vm12, %v2552_v43, %v11367_v50 }
 0x334   : > { %2711 = vmatprep.subr.bf16.mxu0 %v2491_v62  ;;  %v9742_v62 = vld [vmem:[%s13520_s12 + $0x34] ss:$8 sps:$4 sm:$0xff]  }
 0x335   : > { %2806 = vmatpush1.bf16.msra.mxu1 %v2601_v57  ;;  %v9740_v57 = vld [vmem:[%s13520_s12 + $0x30] ss:$8 sps:$4 sm:$0xff]  }
 0x336   : > { %v2461_v20 = vpop.permute.xlu1 %2460  ;;  %v2560_v29 = vpop.permute.xlu0 %2559  ;;  %2807 = vmatprep.subr.bf16.mxu1 %v13477_v4 }
 0x337   : > { %v2490_v59 = vsel %vm13447_vm5, %v2461_v20, %v2463_v38  ;;  %v9739_v38 = vld [vmem:[%s13520_s12 + $0x24] ss:$8 sps:$4 sm:$0xff]   ;;  %vm3699_vm5 = vcmask 736256  }
 0x338   : > { %2712 = vmatpush1.bf16.msra.mxu0 %v2490_v59  ;;  %v9745_v20 = vld [vmem:[%s13520_s12 + $0x44] ss:$8 sps:$4 sm:$0xff]   ;;  %v9748_v59 = vld [vmem:[%s13520_s12 + $0x54] ss:$8 sps:$4 sm:$0xff]  }
 0x339   : > { %2808 = vmatpush1.bf16.msra.mxu1 %v2604_v3  ;;  %v9746_v3 = vld [vmem:[%s13520_s12 + $0x50] ss:$8 sps:$4 sm:$0xff]  }
 0x33a   : > { %v2534_v31 = vpop.permute.xlu1 %2533  ;;  %v11448_v36 = vpop.permute.xlu0 %2567  ;;  %2809 = vmatprep.subr.bf16.mxu1 %v13477_v4 }
 0x33b   : > { %v2597_v1 = vsel %vm13446_vm12, %v2534_v31, %v2536_v0  ;;  %2714 = vmatmul.mubr.bf16.vlgmr.msra.gmra.mrb[4].mxu0 %v8724_v19 }
 0x33c   : > { %2722 = vmatprep.subr.bf16.mxu0 %v2597_v1  ;;  %8729 = vmatprep.mubr.msk.bf16.mxu0 %vm13437_vm11, %v8727_v51  ;;  %vm13439_vm11 = vcmask 965632   ;;  %v9736_v51 = vld [vmem:[%s13520_s12 + $0x14] ss:$8 sps:$4 sm:$0xff]  }
 0x33d   : > { %v9754_v1 = vld [vmem:[%s13520_s12 + $0x74] ss:$8 sps:$4 sm:$0xff]  }
 0x33e   : > { %v2532_v55 = vpop.permute.xlu1 %2531  ;;  %v11453_v54 = vpop.permute.xlu0 %2575 }
 0x33f   : > { %v2596_v22 = vsel %vm13446_vm12, %v2532_v55, %v2534_v31  ;;  %v9751_v31 = vld [vmem:[%s13520_s12 + $0x64] ss:$8 sps:$4 sm:$0xff]   ;;  %v9752_v55 = vld [vmem:[%s13520_s12 + $0x70] ss:$8 sps:$4 sm:$0xff]  }
 0x340   : > { %2723 = vmatpush1.bf16.msra.mxu0 %v2596_v22  ;;  %v9755_v22 = vld [vmem:[%s13520_s12 + $0x80] ss:$8 sps:$4 sm:$0xff]  }
 0x342   : > { %v2542_v46 = vpop.permute.xlu1 %2541  ;;  %v11456_v50 = vpop.permute.xlu0 %2583 }
 0x343   : > { %v2600_v16 = vsel %vm13446_vm12, %v2542_v46, %v2544_v42 }
 0x344   : > { %2724 = vmatprep.subr.bf16.mxu0 %v2600_v16  ;;  %v9763_v16 = vld [vmem:[%s13520_s12 + $0xa4] ss:$8 sps:$4 sm:$0xff]  }
 0x346   : > { %v2540_v32 = vpop.permute.xlu1 %2539  ;;  %v11459_v41 = vpop.permute.xlu0 %2591 }
 0x347   : > { %v2599_v7 = vsel %vm13446_vm12, %v2540_v32, %v2542_v46  ;;  %v9760_v46 = vld [vmem:[%s13520_s12 + $0x94] ss:$8 sps:$4 sm:$0xff]   ;;  %v9761_v32 = vld [vmem:[%s13520_s12 + $0xa0] ss:$8 sps:$4 sm:$0xff]  }
 0x348   : > { %2725 = vmatpush1.bf16.msra.mxu0 %v2599_v7  ;;  %v9764_v7 = vld [vmem:[%s13520_s12 + $0xb0] ss:$8 sps:$4 sm:$0xff]  }
 0x34a   : > { %v2550_v13 = vpop.permute.xlu1 %2549  ;;  %v2647_v35 = vpop.permute.xlu0 %2646 }
 0x34b   : > { %v2603_v5 = vsel %vm13446_vm12, %v2550_v13, %v2552_v43  ;;  %v9737_v43 = vld [vmem:[%s13520_s12 + $0x20] ss:$8 sps:$4 sm:$0xff]  }
 0x34c   : > { %2726 = vmatprep.subr.bf16.mxu0 %v2603_v5  ;;  %v9772_v5 = vld [vmem:[%s13520_s12 + $0xd4] ss:$8 sps:$4 sm:$0xff]  }
 0x34e   : > { %v2548_v8 = vpop.permute.xlu1 %2547  ;;  %v2562_v18 = vpop.permute.xlu0 %2561 }
 0x34f   : > { %v2602_v52 = vsel %vm13446_vm12, %v2548_v8, %v2550_v13  ;;  %v2607_v14 = vsel %vm13446_vm12, %v2560_v29, %v2562_v18  ;;  %v9769_v13 = vld [vmem:[%s13520_s12 + $0xc4] ss:$8 sps:$4 sm:$0xff]   ;;  %v9770_v8 = vld [vmem:[%s13520_s12 + $0xd0] ss:$8 sps:$4 sm:$0xff]  }
 0x350   : > { %2727 = vmatpush1.bf16.msra.mxu0 %v2602_v52  ;;  %2810 = vmatpush1.bf16.msra.mxu1 %v2607_v14  ;;  %v9775_v18 = vld [vmem:[%s13520_s12 + $0xe4] ss:$8 sps:$4 sm:$0xff]   ;;  %v9773_v52 = vld [vmem:[%s13520_s12 + $0xe0] ss:$8 sps:$4 sm:$0xff]   ;;  %v9778_v14 = vld [vmem:[%s13520_s12 + $0xf4] ss:$8 sps:$4 sm:$0xff]  }
 0x351   : > { %2811 = vmatprep.subr.bf16.mxu1 %v13477_v4 }
 0x352   : > { %v2558_v45 = vpop.permute.xlu1 %2557  ;;  %v2578_v9 = vpop.permute.xlu0 %2577 }
 0x353   : > { %v2606_v44 = vsel %vm13446_vm12, %v2558_v45, %v2560_v29  ;;  %v2613_v30 = vsel %vm13446_vm12, %v11453_v54, %v2578_v9  ;;  %v9743_v29 = vld [vmem:[%s13520_s12 + $0x40] ss:$8 sps:$4 sm:$0xff]  }
 0x354   : > { %2728 = vmatprep.subr.bf16.mxu0 %v2606_v44  ;;  %v9781_v44 = vld [vmem:[%s13520_s12 + $0x104] ss:$8 sps:$4 sm:$0xff]  }
 0x356   : > { %v2556_v61 = vpop.permute.xlu1 %2555  ;;  %v2594_v27 = vpop.permute.xlu0 %2593 }
 0x357   : > { %v2605_v15 = vsel %vm13446_vm12, %v2556_v61, %v2558_v45  ;;  %v2619_v19 = vsel %vm13446_vm12, %v11459_v41, %v2594_v27  ;;  %v9776_v45 = vld [vmem:[%s13520_s12 + $0xf0] ss:$8 sps:$4 sm:$0xff]   ;;  %v2890_v61 = vld [vmem:[%s1344_s9] sm:$0xff]  ;;  %s13619_s9 = smov 126  }
 0x358   : > { %2729 = vmatpush1.bf16.msra.mxu0 %v2605_v15  ;;  %2893 = vperm.xlu1 %9629, %v2890_v61   ;;  %v9794_v27 = vld [vmem:[%s13520_s12 + $0x150] ss:$8 sps:$4 sm:$0xff]   ;;  %v9830_v61 = vld [vmem:[%s13521_s20 + $0x20] ss:$12 sps:$4 sm:$0xff]  }
 0x35a   : > { %v2566_v56 = vpop.permute.xlu1 %2565 }
 0x35b   : > { %v2609_v21 = vsel %vm13446_vm12, %v2566_v56, %v11448_v36 }
 0x35c   : > { %2730 = vmatprep.subr.bf16.mxu0 %v2609_v21 }
 0x35e   : > { %v2564_v10 = vpop.permute.xlu1 %2563 }
 0x35f   : > { %v2608_v49 = vsel %vm13446_vm12, %v2564_v10, %v2566_v56 }
 0x360   : > { %2731 = vmatpush1.bf16.msra.mxu0 %v2608_v49 }
 0x362   : > { %v2574_v37 = vpop.permute.xlu1 %2573 }
 0x363   : > { %v2612_v11 = vsel %vm13446_vm12, %v2574_v37, %v11453_v54  ;;  %v2611_v34 = vsel %vm13446_vm12, %v11365_v6, %v2574_v37  ;;  %v13617_v6 = vld [vmem:[#allocation48_spill] sm:$0xff]  ;;  %v9757_v54 = vld [vmem:[%s13520_s12 + $0x84] ss:$8 sps:$4 sm:$0xff]  }
 0x364   : > { %2732 = vmatprep.subr.bf16.mxu0 %v2612_v11  ;;  %v2651_v28 = vsel %vm13439_vm11, %v13617_v6, %v2647_v35  ;;  %v9787_v6 = vld [vmem:[%s13520_s12 + $0x124] ss:$8 sps:$4 sm:$0xff]  }
 0x365   : > { %2733 = vmatpush1.bf16.msra.mxu0 %v2611_v34 }
 0x366   : > { %v2582_v33 = vpop.permute.xlu1 %2581 }
 0x367   : > { %v2615_v58 = vsel %vm13446_vm12, %v2582_v33, %v11456_v50  ;;  %v2614_v39 = vsel %vm13446_vm12, %v11371_v53, %v2582_v33  ;;  %v2673_v53 = vsel %vm2066_vm0, %v2651_v28, 0  ;;  %v9785_v28 = vld [vmem:[%s13520_s12 + $0x120] ss:$8 sps:$4 sm:$0xff]  }
 0x368   : > { %2734 = vmatprep.subr.bf16.mxu0 %v2615_v58  ;;  %v9779_v58 = vld [vmem:[%s13520_s12 + $0x100] ss:$8 sps:$4 sm:$0xff]  }
 0x369   : > { %2735 = vmatpush1.bf16.msra.mxu0 %v2614_v39 }
 0x36a   : > { %v2590_v2 = vpop.permute.xlu1 %2589 }
 0x36b   : > { %v2618_v63 = vsel %vm13446_vm12, %v2590_v2, %v11459_v41  ;;  %v2617_v25 = vsel %vm13446_vm12, %v11375_v47, %v2590_v2  ;;  %v9766_v41 = vld [vmem:[%s13520_s12 + $0xb4] ss:$8 sps:$4 sm:$0xff]  }
 0x36c   : > { %2736 = vmatprep.subr.bf16.mxu0 %v2618_v63  ;;  %v9784_v63 = vld [vmem:[%s13520_s12 + $0x114] ss:$8 sps:$4 sm:$0xff]  }
 0x36d   : > { %2737 = vmatpush1.bf16.msra.mxu0 %v2617_v25  ;;  %v9782_v25 = vld [vmem:[%s13520_s12 + $0x110] ss:$8 sps:$4 sm:$0xff]  }
 0x36e   : > { %v2649_v60 = vpop.permute.xlu1 %2648 }
 0x36f   : > { %v2652_v17 = vsel %vm13439_vm11, %v2647_v35, %v2649_v60  ;;  %v2679_v42 = vsel %vm2066_vm0, %v2649_v60, 0  ;;  %v9767_v35 = vld [vmem:[%s13520_s12 + $0xc0] ss:$8 sps:$4 sm:$0xff]   ;;  %v9790_v60 = vld [vmem:[%s13520_s12 + $0x134] ss:$8 sps:$4 sm:$0xff]   ;;  %vm13445_vm11 = vcmask 785408  }
 0x370   : > { %8728 = vmatprep.subr.msk.bf16.mxu0 %vm2066_vm0, %v2652_v17  ;;  %v9788_v17 = vld [vmem:[%s13520_s12 + $0x130] ss:$8 sps:$4 sm:$0xff]  }
 0x371   : > { %2739 = vmatpush1.bf16.msra.mxu0 %v2673_v53  ;;  %v9793_v53 = vld [vmem:[%s13520_s12 + $0x144] ss:$8 sps:$4 sm:$0xff]  }
 0x372   : > { %v2570_v23 = vpop.permute.xlu1 %2569 }
 0x373   : > { %v2610_v47 = vsel %vm13446_vm12, %v11448_v36, %v2570_v23  ;;  %v9749_v36 = vld [vmem:[%s13520_s12 + $0x60] ss:$8 sps:$4 sm:$0xff]  }
 0x374   : > { %2755 = vmatmul.mubr.bf16.vlgmr.msra.gmra.mrb[4].mxu0 %v8726_v48  ;;  %2812 = vmatpush1.bf16.msra.mxu1 %v2610_v47  ;;  %v9796_v47 = vld [vmem:[%s13520_s12 + $0x154] ss:$8 sps:$4 sm:$0xff]  }
 0x375   : > { %2813 = vmatprep.subr.bf16.mxu1 %v13477_v4 }
 0x376   : > { %v2586_v0 = vpop.permute.xlu1 %2585 }
 0x377   : > { %v2616_v40 = vsel %vm13446_vm12, %v11456_v50, %v2586_v0  ;;  %v9758_v50 = vld [vmem:[%s13520_s12 + $0x90] ss:$8 sps:$4 sm:$0xff]   ;;  %vm3690_vm12 = vcmask 744448  }
 0x378   : > { %2814 = vmatpush1.bf16.msra.mxu1 %v2613_v30 }
 0x379   : > { %2815 = vmatprep.subr.bf16.mxu1 %v13477_v4 }
 0x37c   : > { %2816 = vmatpush1.bf16.msra.mxu1 %v2616_v40 }
 0x37d   : > { %2817 = vmatprep.subr.bf16.mxu1 %v13477_v4 }
 0x380   : > { %2818 = vmatpush1.bf16.msra.mxu1 %v2619_v19 }
 0x381   : > { %2819 = vmatprep.subr.bf16.mxu1 %v13477_v4 }
 0x384   : > { %2820 = vmatpush1.bf16.msra.mxu1 %v2679_v42  ;;  %v9799_v42 = vld [vmem:[%s13521_s20 + $0x4] ss:$12 sps:$4 sm:$0xff]  }
 0x385   : > { %3120 = vmatprep.subr.bf16.mxu1 %v9733_v24  ;;  %v9797_v24 = vld [vmem:[%s13521_s20] ss:$12 sps:$4 sm:$0xff]   ;;  %3545 = vmatprep.subr.bf16.mxu0 %v9799_v42 }
 0x386   : > { %3546 = vmatpush1.bf16.msra.mxu0 %v9797_v24 }
 0x387   : > { %2836 = vmatmul.mubr.bf16.vlgmr.msra.gmra.mrb[8].mxu1 %v8726_v48  ;;  %v9791_v48 = vld [vmem:[%s13520_s12 + $0x140] ss:$8 sps:$4 sm:$0xff]   ;;  %s13453_s12 = smov 91  }
 0x388   : > { %3121 = vmatpush1.bf16.msra.mxu1 %v9731_v12  ;;  %v9802_v12 = vld [vmem:[%s13521_s20 + $0x1c] ss:$12 sps:$4 sm:$0xff]  }
 0x389   : > { %3122 = vmatprep.subr.bf16.mxu1 %v9736_v51  ;;  %v9800_v51 = vld [vmem:[%s13521_s20 + $0x18] ss:$12 sps:$4 sm:$0xff]   ;;  %3547 = vmatprep.subr.bf16.mxu0 %v9802_v12 }
 0x38a   : > { %3548 = vmatpush1.bf16.msra.mxu0 %v9800_v51 }
 0x38c   : > { %3123 = vmatpush1.bf16.msra.mxu1 %v9734_v26  ;;  %v9805_v26 = vld [vmem:[%s13521_s20 + $0x34] ss:$12 sps:$4 sm:$0xff]  }
 0x38d   : > { %3124 = vmatprep.subr.bf16.mxu1 %v9739_v38  ;;  %v9824_v38 = vld [vmem:[%s13521_s20 + $0xc8] ss:$12 sps:$4 sm:$0xff]   ;;  %3549 = vmatprep.subr.bf16.mxu0 %v9805_v26 }
 0x390   : > { %3125 = vmatpush1.bf16.msra.mxu1 %v9737_v43  ;;  %v9825_v43 = vld [vmem:[%s13521_s20 + $0x8] ss:$12 sps:$4 sm:$0xff]  }
 0x391   : > { %3126 = vmatprep.subr.bf16.mxu1 %v9742_v62  ;;  %v9803_v62 = vld [vmem:[%s13521_s20 + $0x30] ss:$12 sps:$4 sm:$0xff]  }
 0x392   : > { %3550 = vmatpush1.bf16.msra.mxu0 %v9803_v62 }
 0x394   : > { %3127 = vmatpush1.bf16.msra.mxu1 %v9740_v57  ;;  %v9808_v57 = vld [vmem:[%s13521_s20 + $0x4c] ss:$12 sps:$4 sm:$0xff]  }
 0x395   : > { %3128 = vmatprep.subr.bf16.mxu1 %v9745_v20  ;;  %v9806_v20 = vld [vmem:[%s13521_s20 + $0x48] ss:$12 sps:$4 sm:$0xff]   ;;  %3551 = vmatprep.subr.bf16.mxu0 %v9808_v57 }
 0x396   : > { %3552 = vmatpush1.bf16.msra.mxu0 %v9806_v20 }
 0x398   : > { %3129 = vmatpush1.bf16.msra.mxu1 %v9743_v29  ;;  %v9811_v29 = vld [vmem:[%s13521_s20 + $0x64] ss:$12 sps:$4 sm:$0xff]  }
 0x399   : > { %3130 = vmatprep.subr.bf16.mxu1 %v9748_v59  ;;  %v9809_v59 = vld [vmem:[%s13521_s20 + $0x60] ss:$12 sps:$4 sm:$0xff]   ;;  %3553 = vmatprep.subr.bf16.mxu0 %v9811_v29 }
 0x39a   : > { %3554 = vmatpush1.bf16.msra.mxu0 %v9809_v59 }
 0x39c   : > { %3131 = vmatpush1.bf16.msra.mxu1 %v9746_v3  ;;  %v9814_v3 = vld [vmem:[%s13521_s20 + $0x7c] ss:$12 sps:$4 sm:$0xff]  }
 0x39d   : > { %3132 = vmatprep.subr.bf16.mxu1 %v9751_v31  ;;  %v9812_v31 = vld [vmem:[%s13521_s20 + $0x78] ss:$12 sps:$4 sm:$0xff]   ;;  %3555 = vmatprep.subr.bf16.mxu0 %v9814_v3 }
 0x39e   : > { %3556 = vmatpush1.bf16.msra.mxu0 %v9812_v31 }
 0x3a0   : > { %3133 = vmatpush1.bf16.msra.mxu1 %v9749_v36  ;;  %v9817_v36 = vld [vmem:[%s13521_s20 + $0x94] ss:$12 sps:$4 sm:$0xff]  }
 0x3a1   : > { %3134 = vmatprep.subr.bf16.mxu1 %v9754_v1  ;;  %v9815_v1 = vld [vmem:[%s13521_s20 + $0x90] ss:$12 sps:$4 sm:$0xff]   ;;  %3557 = vmatprep.subr.bf16.mxu0 %v9817_v36 }
 0x3a2   : > { %3558 = vmatpush1.bf16.msra.mxu0 %v9815_v1 }
 0x3a4   : > { %3135 = vmatpush1.bf16.msra.mxu1 %v9752_v55  ;;  %v9820_v55 = vld [vmem:[%s13521_s20 + $0xac] ss:$12 sps:$4 sm:$0xff]  }
 0x3a5   : > { %3136 = vmatprep.subr.bf16.mxu1 %v9757_v54  ;;  %v9818_v54 = vld [vmem:[%s13521_s20 + $0xa8] ss:$12 sps:$4 sm:$0xff]   ;;  %3559 = vmatprep.subr.bf16.mxu0 %v9820_v55 }
 0x3a6   : > { %3560 = vmatpush1.bf16.msra.mxu0 %v9818_v54 }
 0x3a8   : > { %3137 = vmatpush1.bf16.msra.mxu1 %v9755_v22  ;;  %v9823_v22 = vld [vmem:[%s13521_s20 + $0xc4] ss:$12 sps:$4 sm:$0xff]  }
 0x3a9   : > { %3138 = vmatprep.subr.bf16.mxu1 %v9760_v46  ;;  %v9821_v46 = vld [vmem:[%s13521_s20 + $0xc0] ss:$12 sps:$4 sm:$0xff]   ;;  %3561 = vmatprep.subr.bf16.mxu0 %v9823_v22 }
 0x3aa   : > { %3562 = vmatpush1.bf16.msra.mxu0 %v9821_v46 }
 0x3ac   : > { %3139 = vmatpush1.bf16.msra.mxu1 %v9758_v50 }
 0x3ad   : > { %3140 = vmatprep.subr.bf16.mxu1 %v9763_v16 }
 0x3b0   : > { %3141 = vmatpush1.bf16.msra.mxu1 %v9761_v32 }
 0x3b1   : > { %3142 = vmatprep.subr.bf16.mxu1 %v9766_v41 }
 0x3b4   : > { %3143 = vmatpush1.bf16.msra.mxu1 %v9764_v7 }
 0x3b5   : > { %3144 = vmatprep.subr.bf16.mxu1 %v9769_v13 }
 0x3b8   : > { %3145 = vmatpush1.bf16.msra.mxu1 %v9767_v35 }
 0x3b9   : > { %3146 = vmatprep.subr.bf16.mxu1 %v9772_v5 }
 0x3bc   : > { %3147 = vmatpush1.bf16.msra.mxu1 %v9770_v8 }
 0x3bd   : > { %3148 = vmatprep.subr.bf16.mxu1 %v9775_v18 }
 0x3c0   : > { %3149 = vmatpush1.bf16.msra.mxu1 %v9773_v52 }
 0x3c1   : > { %3150 = vmatprep.subr.bf16.mxu1 %v9778_v14  ;;  %v9828_v14 = vld [vmem:[%s13521_s20 + $0xdc] ss:$12 sps:$4 sm:$0xff]  }
 0x3c2   : > { %3563 = vmatprep.subr.bf16.mxu0 %v9828_v14  ;;  %v9864_v14 = vld [vmem:[%s13517_s27 + $0x48] sm:$0xff]  }
 0x3c4   : > { %3151 = vmatpush1.bf16.msra.mxu1 %v9776_v45  ;;  %v9829_v45 = vld [vmem:[%s13521_s20 + $0xe0] ss:$12 sps:$4 sm:$0xff]  }
 0x3c5   : > { %3161 = vmatprep.subr.bf16.mxu1 %v9781_v44  ;;  %v9826_v44 = vld [vmem:[%s13521_s20 + $0xd8] ss:$12 sps:$4 sm:$0xff]  }
 0x3c6   : > { %3564 = vmatpush1.bf16.msra.mxu0 %v9826_v44  ;;  %v9866_v44 = vld [vmem:[%s13517_s27 + $0x50] sm:$0xff]  }
 0x3d7   : > { %v2894_v50 = vpop.permute.xlu1 %2893 }
 0x403   : > { %v9022_v15 = vpop.f32.mrb[4].mxu1 }
 0x404   : > { %v9023_v56 = vpop.f32.mrb[5].mxu1 }
 0x405   : > { %v9024_v21 = vadd.f32 %v9023_v56, %v9022_v15  ;;  %v9025_v10 = vpop.f32.mrb[6].mxu1  ;;  %v9833_v15 = vld [vmem:[%s13521_s20 + $0xf4] ss:$12 sps:$4 sm:$0xff]   ;;  %v9834_v56 = vld [vmem:[%s13521_s20 + $0xf8] ss:$12 sps:$4 sm:$0xff]  }
 0x406   : > { %v9026_v49 = vpop.f32.mrb[7].mxu1  ;;  %v9835_v10 = vld [vmem:[%s13521_s20 + $0x38] ss:$12 sps:$4 sm:$0xff]   ;;  %3565 = vmatprep.subr.bf16.mxu0 %v9833_v15 }
 0x407   : > { %v9838_v49 = vld [vmem:[%s13521_s20 + $0x10c] ss:$12 sps:$4 sm:$0xff]  }
 0x408   : > { %v9868_v15 = vld [vmem:[%s13517_s27 + $0x58] sm:$0xff]  }
 0x447   : > { %v2756_v37 = vpop.f32.mrb[4].mxu0 }
 0x448   : > { %v2758_v11 = vpop.f32.mrb[5].mxu0  ;;  %v2843_v39 = vpack.c.bf16 %v2756_v37, %v2756_v37  ;;  %v9839_v37 = vld [vmem:[%s13521_s20 + $0x110] ss:$12 sps:$4 sm:$0xff]  }
 0x449   : > { %v2844_v34 = vpack.c.bf16 %v2758_v11, %v2758_v11  ;;  %v2760_v33 = vpop.f32.mrb[6].mxu0  ;;  %v9836_v11 = vld [vmem:[%s13521_s20 + $0x108] ss:$12 sps:$4 sm:$0xff]  }
 0x44a   : > { %v2761_v2 = vpop.f32.mrb[7].mxu0  ;;  %v9841_v33 = vld [vmem:[%s13521_s20 + $0x120] ss:$12 sps:$4 sm:$0xff]  }
 0x44b   : > { %3152 = vmatprep.mubr.bf16.mxu1 %v2844_v34  ;;  %v9840_v34 = vld [vmem:[%s13521_s20 + $0x50] ss:$12 sps:$4 sm:$0xff]   ;;  %v9845_v2 = vld [vmem:[%s13521_s20 + $0x68] ss:$12 sps:$4 sm:$0xff]  }
 0x44c   : > { %3153 = vmatmul.mubr.bf16.vlgmr.msra.gmra.mrb[12].mxu1 %v2843_v39  ;;  %v9844_v39 = vld [vmem:[%s13521_s20 + $0x128] ss:$12 sps:$4 sm:$0xff]  }
 0x44d   : > { %3162 = vmatpush1.bf16.msra.mxu1 %v9779_v58  ;;  %3193 = vmatprep.mubr.bf16.mxu1 %v13477_v4  ;;  %v9843_v58 = vld [vmem:[%s13521_s20 + $0x124] ss:$12 sps:$4 sm:$0xff]  }
 0x44e   : > { %3163 = vmatprep.subr.bf16.mxu1 %v9784_v63  ;;  %v9848_v63 = vld [vmem:[%s13521_s20 + $0x13c] ss:$12 sps:$4 sm:$0xff]  }
 0x451   : > { %3164 = vmatpush1.bf16.msra.mxu1 %v9782_v25  ;;  %v9849_v25 = vld [vmem:[%s13521_s20 + $0x140] ss:$12 sps:$4 sm:$0xff]  }
 0x452   : > { %3165 = vmatprep.subr.bf16.mxu1 %v9787_v6  ;;  %v9846_v6 = vld [vmem:[%s13521_s20 + $0x138] ss:$12 sps:$4 sm:$0xff]  }
 0x455   : > { %3166 = vmatpush1.bf16.msra.mxu1 %v9785_v28  ;;  %v9850_v28 = vld [vmem:[%s13521_s20 + $0x80] ss:$12 sps:$4 sm:$0xff]  }
 0x456   : > { %3167 = vmatprep.subr.bf16.mxu1 %v9790_v60  ;;  %v9853_v60 = vld [vmem:[%s13521_s20 + $0x154] ss:$12 sps:$4 sm:$0xff]  }
 0x459   : > { %3168 = vmatpush1.bf16.msra.mxu1 %v9788_v17  ;;  %v9854_v17 = vld [vmem:[%s13521_s20 + $0x158] ss:$12 sps:$4 sm:$0xff]  }
 0x45a   : > { %v2837_v23 = vpop.f32.mrb[8].mxu1  ;;  %3169 = vmatprep.subr.bf16.mxu1 %v9793_v53  ;;  %v9851_v53 = vld [vmem:[%s13521_s20 + $0x150] ss:$12 sps:$4 sm:$0xff]  }
 0x45b   : > { %v2838_v9 = vadd.f32 %v9024_v21, %v2837_v23  ;;  %v2839_v30 = vpop.f32.mrb[9].mxu1  ;;  %v9831_v21 = vld [vmem:[%s13521_s20 + $0xf0] ss:$12 sps:$4 sm:$0xff]   ;;  %v9858_v23 = vld [vmem:[%s13521_s20 + $0x16c] ss:$12 sps:$4 sm:$0xff]  }
 0x45c   : > { %v2840_v0 = vpop.f32.mrb[10].mxu1  ;;  %3566 = vmatpush1.bf16.msra.mxu0 %v9831_v21  ;;  %v9860_v30 = vld [vmem:[%s13521_s20 + $0xb0] ss:$12 sps:$4 sm:$0xff]   ;;  %v9870_v21 = vld [vmem:[%s13517_s27 + $0x60] sm:$0xff]  }
 0x45d   : > { %3170 = vmatpush1.bf16.msra.mxu1 %v9791_v48  ;;  %v2841_v40 = vpop.f32.mrb[11].mxu1  ;;  %v2845_v19 = vpack.c.bf16 %v2838_v9, %v2838_v9  ;;  %3567 = vmatprep.subr.bf16.mxu0 %v9838_v49  ;;  %v9855_v48 = vld [vmem:[%s13521_s20 + $0x98] ss:$12 sps:$4 sm:$0xff]   ;;  %v9856_v9 = vld [vmem:[%s13521_s20 + $0x168] ss:$12 sps:$4 sm:$0xff]  }
 0x45e   : > { %3171 = vmatprep.subr.bf16.mxu1 %v9796_v47  ;;  %v9859_v47 = vld [vmem:[%s13521_s20 + $0x170] ss:$12 sps:$4 sm:$0xff]   ;;  %s13455_s20 = smov 92   ;;  %v9872_v49 = vld [vmem:[%s13517_s27 + $0x68] sm:$0xff]  }
 0x460   : > { %3568 = vmatpush1.bf16.msra.mxu0 %v9836_v11  ;;  %v9874_v11 = vld [vmem:[%s13517_s27 + $0x70] sm:$0xff]  }
 0x461   : > { %3172 = vmatpush1.bf16.msra.mxu1 %v9794_v27  ;;  %3569 = vmatprep.subr.bf16.mxu0 %v9843_v58 }
 0x462   : > { %9028 = vmatprep.subr.bf16.mxu1 %v9824_v38 }
 0x464   : > { %8775 = vmatmul.mubr.msk.bf16.vlgmr.msra.gmra.mrb[12].mxu1 %vm13445_vm11, %v2845_v19  ;;  %3570 = vmatpush1.bf16.msra.mxu0 %v9841_v33  ;;  %vm3681_vm11 = vcmask 752640  }
 0x465   : > { %9029 = vmatpush3.bf16.msra.mxu1 %v9825_v43  ;;  %3571 = vmatprep.subr.bf16.mxu0 %v9848_v63 }
 0x466   : > { %9030 = vmatprep.subr.bf16.mxu1 %v9829_v45  ;;  %v9865_v45 = vld [vmem:[%s13517_s27 + $0x8] sm:$0xff]  }
 0x468   : > { %3572 = vmatpush1.bf16.msra.mxu0 %v9846_v6 }
 0x469   : > { %9031 = vmatpush3.bf16.msra.mxu1 %v9830_v61  ;;  %3573 = vmatprep.subr.bf16.mxu0 %v9853_v60  ;;  %v9867_v61 = vld [vmem:[%s13517_s27 + $0x10] sm:$0xff]  }
 0x46a   : > { %9032 = vmatprep.subr.bf16.mxu1 %v9834_v56  ;;  %v9869_v56 = vld [vmem:[%s13517_s27 + $0x18] sm:$0xff]  }
 0x46c   : > { %3574 = vmatpush1.bf16.msra.mxu0 %v9851_v53 }
 0x46d   : > { %9033 = vmatpush3.bf16.msra.mxu1 %v9835_v10  ;;  %3575 = vmatprep.subr.bf16.mxu0 %v9858_v23  ;;  %v9871_v10 = vld [vmem:[%s13517_s27 + $0x20] sm:$0xff]  }
 0x46e   : > { %9034 = vmatprep.subr.bf16.mxu1 %v9839_v37  ;;  %v9873_v37 = vld [vmem:[%s13517_s27 + $0x28] sm:$0xff]  }
 0x470   : > { %3576 = vmatpush1.bf16.msra.mxu0 %v9856_v9 }
 0x471   : > { %9035 = vmatpush3.bf16.msra.mxu1 %v9840_v34 }
 0x472   : > { %9036 = vmatprep.subr.bf16.mxu1 %v9844_v39 }
 0x475   : > { %9037 = vmatpush3.bf16.msra.mxu1 %v9845_v2 }
 0x476   : > { %9038 = vmatprep.subr.bf16.mxu1 %v9849_v25 }
 0x479   : > { %9039 = vmatpush3.bf16.msra.mxu1 %v9850_v28 }
 0x47a   : > { %9040 = vmatprep.subr.bf16.mxu1 %v9854_v17 }
 0x47d   : > { %9041 = vmatpush3.bf16.msra.mxu1 %v9855_v48 }
 0x47e   : > { %9042 = vmatprep.subr.bf16.mxu1 %v9859_v47 }
 0x481   : > { %9043 = vmatpush3.bf16.msra.mxu1 %v9860_v30 }
 0x537   : > { %v3195_v16 = vpop.f32.mrb[12].mxu1 }
 0x538   : > { %v11574_v32 = vadd.f32 %v3195_v16, %v2894_v50  ;;  %v3197_v41 = vpop.f32.mrb[13].mxu1 }
 0x539   : > { %v11576_v7 = vadd.f32 %v3197_v41, %v2894_v50  ;;  %v3199_v13 = vpop.f32.mrb[14].mxu1 }
 0x53a   : > { %v3206_v35 = vmul.f32 %v11574_v32, %v11574_v32  ;;  %v3200_v5 = vpop.f32.mrb[15].mxu1 }
 0x53b   : > { %v3207_v8 = vmul.f32 %v11576_v7, %v11576_v7  ;;  %v3202_v18 = vadd.f32 %v11576_v7, %v11574_v32 }
 0x53d   : > { %3203 = vadd.xlane.f32.xlu0 %v3202_v18  ;;  %v3208_v52 = vadd.f32 %v3207_v8, %v3206_v35  ;;  %v3894_v8 = vld [vmem:[%s11660_s7 + $0x8] sm:$0xff]  ;;  %v9862_v18 = vld [vmem:[%s13517_s27 + $0x40] sm:$0xff]  }
 0x53e   : > { %9056 = vmatprep.subr.bf16.mxu1 %v9862_v18  ;;  %v9861_v18 = vld [vmem:[%s1349_s15] sm:$0xff]   ;;  %s13459_s15 = smov 117  }
 0x53f   : > { %3209 = vadd.xlane.f32.xlu1 %v3208_v52  ;;  %v9863_v52 = vld [vmem:[%s13517_s27] sm:$0xff]  }
 0x5ca   : > { %v3204_v0 = vpop.xlane.xlu0 %3203 }
 0x5cb   : > { %v3205_v40 = vmul.f32 0.00390625, %v3204_v0 }
 0x5cc   : > { %v3210_v27 = vpop.xlane.xlu1 %3209 }
 0x5cd   : > { %v3211_v19 = vmul.f32 0.00390625, %v3210_v27  ;;  %v3212_v24 = vmul.f32 %v3205_v40, %v3205_v40  ;;  %v3215_v26 = vsub.f32 %v11574_v32, %v3205_v40  ;;  %v3216_v38 = vsub.f32 %v11576_v7, %v3205_v40 }
 0x5cf   : > { %v3213_v42 = vsub.f32 %v3211_v19, %v3212_v24 }
 0x5d1   : > { %v3214_v12 = vmax.f32 %v3213_v42, 0.0 }
 0x5d3   : > { %v3217_v51 = vadd.f32 1e-05, %v3214_v12 }
 0x5d5   : > { %10016 = vrsqrt.f32 %v3217_v51 }
 0x5df   : > { %v10017_v43 = vpop.eup %10016 }
 0x5e0   : > { %v3220_v62 = vmul.f32 %v10017_v43, %v3216_v38  ;;  %v3219_v57 = vmul.f32 %v10017_v43, %v3215_v26 }
 0x5e2   : > { %v3222_v20 = vmax.f32 %v3220_v62, 0.0  ;;  %v3221_v29 = vmax.f32 %v3219_v57, 0.0 }
 0x5e4   : > { %v3224_v59 = vpack.c.bf16 %v3222_v20, %v3222_v20  ;;  %v3223_v3 = vpack.c.bf16 %v3221_v29, %v3221_v29 }
 0x5e6   : > { %3577 = vmatprep.mubr.bf16.mxu0 %v3224_v59  ;;  %3618 = vmatprep.mubr.bf16.mxu1 %v3224_v59 }
 0x5e7   : > { %3578 = vmatmul.mubr.bf16.vlgmr.msra.gmra.mrb[8].mxu0 %v3223_v3  ;;  %3619 = vmatmul.mubr.bf16.vlgmr.msra.gmra.mrb[16].mxu1 %v3223_v3 }
 0x5e8   : > { %3802 = vmatprep.mubr.bf16.mxu0 %v13477_v4  ;;  %9057 = vmatpush3.bf16.msra.mxu1 %v9863_v52  ;;  %v10286_v52 = vmov 0.0  }
 0x5e9   : > { %9058 = vmatprep.subr.bf16.mxu1 %v9864_v14 }
 0x5ec   : > { %9059 = vmatpush3.bf16.msra.mxu1 %v9865_v45 }
 0x5ed   : > { %9060 = vmatprep.subr.bf16.mxu1 %v9866_v44 }
 0x5f0   : > { %9061 = vmatpush3.bf16.msra.mxu1 %v9867_v61 }
 0x5f1   : > { %9062 = vmatprep.subr.bf16.mxu1 %v9868_v15  ;;  %v9875_v15 = vld [vmem:[%s13517_s27 + $0x30] sm:$0xff]  }
 0x5f4   : > { %9063 = vmatpush3.bf16.msra.mxu1 %v9869_v56  ;;  %v9876_v56 = vld [vmem:[%s13517_s27 + $0x78] sm:$0xff]  }
 0x5f5   : > { %9064 = vmatprep.subr.bf16.mxu1 %v9870_v21  ;;  %v9877_v21 = vld [vmem:[%s13517_s27 + $0x38] sm:$0xff]  }
 0x5f8   : > { %9065 = vmatpush3.bf16.msra.mxu1 %v9871_v10  ;;  %v9878_v10 = vld [vmem:[%s13517_s27 + $0x80] sm:$0xff]  }
 0x5f9   : > { %9066 = vmatprep.subr.bf16.mxu1 %v9872_v49  ;;  %v9879_v49 = vld [vmem:[%s13517_s27 + $0x88] sm:$0xff]   ;;  %s13632_s27 = smov 115  }
 0x5fc   : > { %9067 = vmatpush3.bf16.msra.mxu1 %v9873_v37  ;;  %v3893_v37 = vld [vmem:[%s11660_s7] sm:$0xff]  ;;  %s11771_s7 = sshll.u32 %s13790_s10, 5 }
 0x5fd   : > { %9068 = vmatprep.subr.bf16.mxu1 %v9874_v11 }
 0x600   : > { %9069 = vmatpush3.bf16.msra.mxu1 %v9875_v15 }
 0x601   : > { %9070 = vmatprep.subr.bf16.mxu1 %v9876_v56 }
 0x604   : > { %9071 = vmatpush3.bf16.msra.mxu1 %v9877_v21 }
 0x605   : > { %4266 = vmatprep.subr.bf16.mxu1 %v13477_v4 }
 0x6ba   : > { %v3579_v31 = vpop.f32.mrb[8].mxu0  ;;  %v9044_v36 = vpop.f32.mrb[16].mxu1 }
 0x6bb   : > { %v11615_v1 = vpack.c.bf16 %v3579_v31, %v3579_v31  ;;  %v3581_v55 = vpop.f32.mrb[9].mxu0  ;;  %v9045_v54 = vpop.f32.mrb[17].mxu1 }
 0x6bc   : > { %v9046_v22 = vadd.f32 %v9045_v54, %v9044_v36  ;;  %v3583_v46 = vpop.f32.mrb[10].mxu0  ;;  %v9047_v50 = vpop.f32.mrb[18].mxu1  ;;  %v11623_v7 = vpack.c.bf16 %v3581_v55, %v3581_v55 }
 0x6bd   : > { %v9048_v16 = vpop.f32.mrb[19].mxu1  ;;  %3643 = vrot.lane.b32.xlu1 %v11615_v1, %s13619_s9  ;;  %v3584_v32 = vpop.f32.mrb[11].mxu0  ;;  %v3632_v41 = vrot.slane %v11615_v1, 4 }
 0x6be   : > { %v3633_v13 = vrot.slane %v11623_v7, 4  ;;  %v11633_v35 = vpack.c.bf16 %v9046_v22, %v9046_v22 }
 0x6bf   : > { %3635 = vrot.lane.b32.xlu0 %v3632_v41, %s13540_s11 }
 0x6c0   : > { %v3634_v5 = vrot.slane %v11633_v35, 4 }
 0x6c1   : > { %3659 = vrot.lane.b32.xlu1 %v11615_v1, %s13537_s0 }
 0x6c3   : > { %3651 = vrot.lane.b32.xlu0 %v3632_v41, %s13620_s13 }
 0x6c5   : > { %3645 = vrot.lane.b32.xlu1 %v11623_v7, %s13619_s9 }
 0x6c7   : > { %3667 = vrot.lane.b32.xlu0 %v3632_v41, %s13541_s16 }
 0x6c9   : > { %3661 = vrot.lane.b32.xlu1 %v11623_v7, %s13537_s0 }
 0x6cb   : > { %3637 = vrot.lane.b32.xlu0 %v3633_v13, %s13540_s11 }
 0x6cd   : > { %3653 = vrot.lane.b32.xlu1 %v3633_v13, %s13620_s13 }
 0x6cf   : > { %3647 = vrot.lane.b32.xlu0 %v11633_v35, %s13619_s9 }
 0x6d1   : > { %3669 = vrot.lane.b32.xlu1 %v3633_v13, %s13541_s16 }
 0x6d3   : > { %3663 = vrot.lane.b32.xlu0 %v11633_v35, %s13537_s0 }
 0x6d5   : > { %3639 = vrot.lane.b32.xlu1 %v3634_v5, %s13540_s11 }
 0x6d7   : > { %3679 = vrot.lane.b32.xlu0 %v11633_v35, %s13455_s20 }
 0x6d9   : > { %3677 = vrot.lane.b32.xlu1 %v11623_v7, %s13455_s20 }
 0x6db   : > { %3655 = vrot.lane.b32.xlu0 %v3634_v5, %s13620_s13 }
 0x6dd   : > { %3686 = vrot.lane.b32.xlu1 %v3633_v13, %s13453_s12 }
 0x6df   : > { %3671 = vrot.lane.b32.xlu0 %v3634_v5, %s13541_s16 }
 0x6e1   : > { %3675 = vrot.lane.b32.xlu1 %v11615_v1, %s13455_s20  ;;  %s11781_s20 = scalar_lea.vmem %s13623_s25, %s11771_s7 }
 0x6e3   : > { %3688 = vrot.lane.b32.xlu0 %v3634_v5, %s13453_s12 }
 0x6e5   : > { %3693 = vrot.lane.b32.xlu1 %v11615_v1, %s13451_s1 }
 0x6e7   : > { %3684 = vrot.lane.b32.xlu0 %v3632_v41, %s13453_s12  ;;  %s1364_s12 = scalar_lea.vmem %s13622_s29, %s11771_s7 }
 0x6e9   : > { %3697 = vrot.lane.b32.xlu1 %v11633_v35, %s13451_s1 }
 0x6eb   : > { %3695 = vrot.lane.b32.xlu0 %v11623_v7, %s13451_s1  ;;  %s13467_s1 = smov 116  }
 0x6ed   : > { %3902 = vperm.xlu1 %9629, %v3894_v8  }
 0x6ef   : > { %3897 = vperm.xlu0 %9630, %v3893_v37  }
 0x72f   : > { %v3644_v34 = vpop.permute.xlu1 %3643 }
 0x731   : > { %v3636_v33 = vpop.permute.xlu0 %3635 }
 0x733   : > { %v3660_v58 = vpop.permute.xlu1 %3659 }
 0x735   : > { %v3652_v39 = vpop.permute.xlu0 %3651 }
 0x737   : > { %v3646_v2 = vpop.permute.xlu1 %3645 }
 0x738   : > { %v3649_v12 = vsel %vm1938_vm2, %v3644_v34, %v3646_v2 }
 0x739   : > { %v3668_v63 = vpop.permute.xlu0 %3667 }
 0x73b   : > { %v3662_v25 = vpop.permute.xlu1 %3661 }
 0x73c   : > { %v3665_v29 = vsel %vm2316_vm14, %v3660_v58, %v3662_v25 }
 0x73d   : > { %v3638_v6 = vpop.permute.xlu0 %3637 }
 0x73e   : > { %v3641_v48 = vsel %vm1929_vm1, %v3636_v33, %v3638_v6 }
 0x73f   : > { %v3654_v28 = vpop.permute.xlu1 %3653  ;;  %v3704_v0 = vsel %vm2066_vm0, %v11615_v1, %v3641_v48 }
 0x740   : > { %v3657_v27 = vsel %vm2304_vm6, %v3652_v39, %v3654_v28 }
 0x741   : > { %v11680_v60 = vpop.permute.xlu0 %3647  ;;  %v3716_v38 = vsel %vm2066_vm0, %v3649_v12, %v3657_v27 }
 0x742   : > { %v3650_v24 = vsel %vm1938_vm2, %v3646_v2, %v11680_v60 }
 0x743   : > { %v3670_v17 = vpop.permute.xlu1 %3669 }
 0x744   : > { %v3673_v43 = vsel %vm2183_vm15, %v3668_v63, %v3670_v17 }
 0x745   : > { %v11682_v53 = vpop.permute.xlu0 %3663  ;;  %v3728_v31 = vsel %vm2066_vm0, %v3665_v29, %v3673_v43 }
 0x746   : > { %v3666_v57 = vsel %vm2316_vm14, %v3662_v25, %v11682_v53 }
 0x747   : > { %v3640_v23 = vpop.permute.xlu1 %3639 }
 0x748   : > { %v3642_v47 = vsel %vm1929_vm1, %v3638_v6, %v3640_v23  ;;  %v3712_v14 = vsel %vm2066_vm0, %v11633_v35, %v3640_v23 }
 0x749   : > { %v11686_v9 = vpop.permute.xlu0 %3679  ;;  %v3708_v30 = vsel %vm2066_vm0, %v11623_v7, %v3642_v47 }
 0x74a   : > { %3770 = vmatprep.subr.bf16.mxu0 %v3708_v30 }
 0x74b   : > { %v3678_v40 = vpop.permute.xlu1 %3677  ;;  %3771 = vmatpush1.bf16.msra.mxu0 %v3704_v0 }
 0x74c   : > { %v3683_v1 = vsel %vm3681_vm11, %v3678_v40, %v11686_v9 }
 0x74d   : > { %v3656_v19 = vpop.permute.xlu0 %3655 }
 0x74e   : > { %v3658_v42 = vsel %vm2304_vm6, %v3654_v28, %v3656_v19  ;;  %v3724_v45 = vsel %vm2066_vm0, %v11680_v60, %v3656_v19 }
 0x74f   : > { %v3687_v51 = vpop.permute.xlu1 %3686  ;;  %v3720_v26 = vsel %vm2066_vm0, %v3650_v24, %v3658_v42 }
 0x750   : > { %3772 = vmatprep.subr.bf16.mxu0 %v3720_v26 }
 0x751   : > { %3773 = vmatpush1.bf16.msra.mxu0 %v3716_v38  ;;  %v3672_v62 = vpop.permute.xlu0 %3671 }
 0x752   : > { %v3674_v20 = vsel %vm2183_vm15, %v3670_v17, %v3672_v62  ;;  %v3736_v44 = vsel %vm2066_vm0, %v11682_v53, %v3672_v62 }
 0x753   : > { %v3676_v59 = vpop.permute.xlu1 %3675  ;;  %v3732_v3 = vsel %vm2066_vm0, %v3666_v57, %v3674_v20 }
 0x754   : > { %3774 = vmatprep.subr.bf16.mxu0 %v3732_v3  ;;  %v3682_v50 = vsel %vm3681_vm11, %v3676_v59, %v3678_v40  ;;  %v9880_v59 = vld [vmem:[%s13519_s6] sm:$0xff]   ;;  %v9881_v3 = vld [vmem:[%s13519_s6 + $0x8] sm:$0xff]  }
 0x755   : > { %3775 = vmatpush1.bf16.msra.mxu0 %v3728_v31  ;;  %v3689_v36 = vpop.permute.xlu0 %3688  ;;  %v9882_v31 = vld [vmem:[%s13519_s6 + $0x10] sm:$0xff]  }
 0x756   : > { %v3692_v55 = vsel %vm3690_vm12, %v3687_v51, %v3689_v36  ;;  %v3748_v35 = vsel %vm2066_vm0, %v11686_v9, %v3689_v36  ;;  %v9883_v36 = vld [vmem:[%s13519_s6 + $0x18] sm:$0xff]   ;;  %s13625_s6 = sld [smem:[#allocation10_spill]] }
 0x757   : > { %v3694_v54 = vpop.permute.xlu1 %3693  ;;  %v3744_v22 = vsel %vm2066_vm0, %v3683_v1, %v3692_v55 }
 0x758   : > { %3776 = vmatprep.subr.bf16.mxu0 %v3744_v22 }
 0x759   : > { %v3685_v46 = vpop.permute.xlu0 %3684 }
 0x75a   : > { %v3691_v16 = vsel %vm3690_vm12, %v3685_v46, %v3687_v51 }
 0x75b   : > { %v3740_v32 = vsel %vm2066_vm0, %v3682_v50, %v3691_v16  ;;  %v3698_v41 = vpop.permute.xlu1 %3697 }
 0x75c   : > { %3777 = vmatpush1.bf16.msra.mxu0 %v3740_v32  ;;  %v3768_v61 = vsel %vm2066_vm0, %v3698_v41, 0 }
 0x75d   : > { %v3696_v7 = vpop.permute.xlu0 %3695 }
 0x75e   : > { %v3700_v13 = vsel %vm3699_vm5, %v3694_v54, %v3696_v7  ;;  %v3701_v5 = vsel %vm3699_vm5, %v3696_v7, %v3698_v41 }
 0x75f   : > { %8825 = vmatprep.subr.msk.bf16.mxu0 %vm2066_vm0, %v3701_v5  ;;  %v3762_v8 = vsel %vm2066_vm0, %v3700_v13, 0 }
 0x760   : > { %3779 = vmatpush1.bf16.msra.mxu0 %v3762_v8 }
 0x761   : > { %9310 = vmatprep.subr.bf16.mxu0 %v10286_v52 }
 0x763   : > { %8826 = vmatmul.mubr.msk.bf16.vlgmr.msra.gmra.mrb[12].mxu0 %vm3757_vm10, %v9861_v18 }
 0x764   : > { %9311 = vmatpush3.bf16.msra.mxu0 %v3712_v14  ;;  %9320 = vmatprep.mubr.msk.bf16.mxu0 %vm10287_vm9, %v10286_v52 }
 0x765   : > { %9312 = vmatprep.subr.bf16.mxu0 %v10286_v52 }
 0x768   : > { %9313 = vmatpush3.bf16.msra.mxu0 %v3724_v45 }
 0x769   : > { %9314 = vmatprep.subr.bf16.mxu0 %v10286_v52 }
 0x76c   : > { %9315 = vmatpush3.bf16.msra.mxu0 %v3736_v44  ;;  %v3903_v40 = vpop.permute.xlu1 %3902 }
 0x76d   : > { %9316 = vmatprep.subr.bf16.mxu0 %v10286_v52 }
 0x76e   : > { %v3898_v30 = vpop.permute.xlu0 %3897 }
 0x770   : > { %9317 = vmatpush3.bf16.msra.mxu0 %v3748_v35 }
 0x771   : > { %9318 = vmatprep.subr.bf16.mxu0 %v10286_v52 }
 0x774   : > { %9319 = vmatpush3.bf16.msra.mxu0 %v3768_v61 }
 0x775   : > { %9324 = vmatprep.subr.bf16.mxu0 %v10286_v52 }
 0x777   : > { %9321 = vmatmul.mubr.msk.bf16.vlgmr.msra.gmra.mrb[16].mxu0 %vm3757_vm10, %v9861_v18  ;;  %vm4013_vm10 = vcmask 261120  }
 0x778   : > { %9328 = vmatprep.mubr.msk.bf16.mxu0 %vm10287_vm9, %v10286_v52  ;;  %9325 = vmatpush3.bf16.msra.mxu0 %v9878_v10 }
 0x779   : > { %9326 = vmatprep.subr.bf16.mxu0 %v10286_v52 }
 0x77c   : > { %9327 = vmatpush3.bf16.msra.mxu0 %v9879_v49 }
 0x77d   : > { %9332 = vmatprep.subr.bf16.mxu0 %v10286_v52 }
 0x836   : > { %v3804_v11 = vpop.f32.mrb[12].mxu0 }
 0x837   : > { %v3806_v34 = vpop.f32.mrb[13].mxu0 }
 0x838   : > { %v3808_v33 = vpop.f32.mrb[14].mxu0 }
 0x839   : > { %v3854_v58 = vpack.c.bf16 %v3808_v33, %v3804_v11  ;;  %v3810_v39 = vpop.f32.mrb[15].mxu0 }
 0x83a   : > { %v3855_v2 = vpack.c.bf16 %v3810_v39, %v3806_v34 }
 0x83c   : > { %4049 = vmatprep.mubr.bf16.mxu1 %v3855_v2  ;;  %v4327_v2 = vld [vmem:[%s1364_s12] sm:$0xff] }
 0x83d   : > { %4050 = vmatmul.mubr.bf16.vlgmr.msra.gmra.mrb[20].mxu1 %v3854_v58 }
 0x84a   : > { %v3847_v63 = vpop.f32.mrb[16].mxu0 }
 0x84b   : > { %v9322_v25 = vpop.f32.mrb[17].mxu0 }
 0x84c   : > { %v3850_v6 = vpop.f32.mrb[18].mxu0  ;;  %v4329_v25 = vld [vmem:[%s1364_s12 + $0x10] sm:$0xff] }
 0x84d   : > { %v3856_v28 = vpack.c.bf16 %v3850_v6, %v3847_v63  ;;  %v9323_v60 = vpop.f32.mrb[19].mxu0  ;;  %v4328_v63 = vld [vmem:[%s1364_s12 + $0x8] sm:$0xff] }
 0x84e   : > { %v9884_v6 = vld [vmem:[%s11781_s20 + $0x4] ss:$8 sps:$4 sm:$0xff]  }
 0x84f   : > { %9329 = vmatmul.mubr.msk.bf16.vlgmr.msra.gmra.mrb[20].mxu0 %vm4013_vm10, %v3856_v28  ;;  %v4330_v28 = vld [vmem:[%s1364_s12 + $0x18] sm:$0xff]  ;;  %8856 = vmatprep.mubr.msk.bf16.mxu1 %vm4259_vm7, %v9884_v6  ;;  %v9890_v60 = vld [vmem:[%s13516_s30] sm:$0xff]   ;;  %s13624_s12 = sld [smem:[#allocation9_spill]] }
 0x850   : > { %9340 = vmatprep.mubr.msk.bf16.mxu0 %vm10287_vm9, %v10286_v52  ;;  %9333 = vmatpush3.bf16.msra.mxu0 %v9880_v59 }
 0x851   : > { %9334 = vmatprep.subr.bf16.mxu0 %v10286_v52 }
 0x854   : > { %9335 = vmatpush3.bf16.msra.mxu0 %v9881_v3 }
 0x855   : > { %9336 = vmatprep.subr.bf16.mxu0 %v10286_v52 }
 0x858   : > { %9337 = vmatpush3.bf16.msra.mxu0 %v9882_v31 }
 0x859   : > { %9338 = vmatprep.subr.bf16.mxu0 %v10286_v52 }
 0x85c   : > { %9339 = vmatpush3.bf16.msra.mxu0 %v9883_v36 }
 0x85d   : > { %9344 = vmatprep.subr.bf16.mxu0 %v9890_v60 }
 0x910   : > { %v9072_v17 = vpop.f32.mrb[20].mxu1 }
 0x911   : > { %v9073_v53 = vpop.f32.mrb[21].mxu1 }
 0x912   : > { %v9074_v48 = vadd.f32 %v9073_v53, %v9072_v17  ;;  %v9075_v23 = vpop.f32.mrb[22].mxu1  ;;  %v9891_v17 = vld [vmem:[%s13516_s30 + $0x8] sm:$0xff]  }
 0x913   : > { %v9076_v47 = vpop.f32.mrb[23].mxu1 }
 0x914   : > { %v9077_v9 = vadd.f32 %v9076_v47, %v9075_v23  ;;  %v4052_v0 = vadd.f32 %v9074_v48, %v3898_v30 }
 0x916   : > { %v4055_v42 = vadd.f32 %v9077_v9, %v3903_v40 }
 0x922   : > { %v4092_v27 = vpop.f32.mrb[20].mxu0 }
 0x923   : > { %v4093_v19 = vadd.f32 %v4092_v27, %v4052_v0  ;;  %v9330_v24 = vpop.f32.mrb[21].mxu0  ;;  %v9886_v27 = vld [vmem:[%s11781_s20] ss:$8 sps:$4 sm:$0xff]  }
 0x924   : > { %v4095_v12 = vpop.f32.mrb[22].mxu0  ;;  %v9889_v24 = vld [vmem:[%s11781_s20 + $0x10] ss:$8 sps:$4 sm:$0xff]  }
 0x925   : > { %v4096_v51 = vadd.f32 %v4095_v12, %v4055_v42  ;;  %v9331_v26 = vpop.f32.mrb[23].mxu0  ;;  %v4100_v38 = vsel %vm4099_vm8, %v4093_v19, 0.0  ;;  %v4108_v57 = vmul.f32 %v4093_v19, %v4093_v19  ;;  %v9892_v42 = vld [vmem:[%s13516_s30 + $0x10] sm:$0xff]   ;;  %v9893_v12 = vld [vmem:[%s13516_s30 + $0x18] sm:$0xff]  }
 0x926   : > { %4101 = vadd.xlane.f32.xlu1 %v4100_v38 }
 0x927   : > { %v4103_v43 = vsel %vm4099_vm8, %v4096_v51, 0.0  ;;  %v4109_v62 = vmul.f32 %v4096_v51, %v4096_v51  ;;  %v4110_v29 = vsel %vm4099_vm8, %v4108_v57, 0.0 }
 0x928   : > { %4104 = vadd.xlane.f32.xlu0 %v4103_v43 }
 0x929   : > { %v4113_v20 = vsel %vm4099_vm8, %v4109_v62, 0.0 }
 0x92a   : > { %4114 = vadd.xlane.f32.xlu1 %v4113_v20 }
 0x92c   : > { %4111 = vadd.xlane.f32.xlu0 %v4110_v29 }
 0x9b3   : > { %v4102_v1 = vpop.xlane.xlu1 %4101 }
 0x9b4   : > { %v4106_v54 = vmul.f32 0.015625, %v4102_v1 }
 0x9b5   : > { %v4105_v55 = vpop.xlane.xlu0 %4104 }
 0x9b6   : > { %v4107_v22 = vmul.f32 0.015625, %v4105_v55  ;;  %v4118_v41 = vmul.f32 %v4106_v54, %v4106_v54  ;;  %v4124_v61 = vsub.f32 %v4093_v19, %v4106_v54  ;;  %v9887_v19 = vld [vmem:[%s11781_s20 + $0x14] ss:$8 sps:$4 sm:$0xff]   ;;  %s13463_s20 = smov 121  }
 0x9b7   : > { %v4115_v46 = vpop.xlane.xlu1 %4114 }
 0x9b8   : > { %v4119_v50 = vmul.f32 %v4107_v22, %v4107_v22  ;;  %v4117_v16 = vmul.f32 0.015625, %v4115_v46  ;;  %v4125_v44 = vsub.f32 %v4096_v51, %v4107_v22  ;;  %v9894_v51 = vld [vmem:[%s13516_s30 + $0x20] sm:$0xff]   ;;  %s13633_s30 = smov 114  }
 0x9b9   : > { %v4112_v32 = vpop.xlane.xlu0 %4111 }
 0x9ba   : > { %v4121_v7 = vsub.f32 %v4117_v16, %v4119_v50  ;;  %v4116_v13 = vmul.f32 0.015625, %v4112_v32 }
 0x9bc   : > { %v4123_v5 = vmax.f32 %v4121_v7, 0.0  ;;  %v4120_v8 = vsub.f32 %v4116_v13, %v4118_v41 }
 0x9be   : > { %v4127_v18 = vadd.f32 1e-05, %v4123_v5  ;;  %v4122_v14 = vmax.f32 %v4120_v8, 0.0 }
 0x9c0   : > { %10018 = vrsqrt.f32 %v4127_v18  ;;  %v4126_v45 = vadd.f32 1e-05, %v4122_v14 }
 0x9c2   : > { %10020 = vrsqrt.f32 %v4126_v45 }
 0x9ca   : > { %v10019_v35 = vpop.eup %10018 }
 0x9cb   : > { %v4131_v15 = vmul.f32 %v10019_v35, %v4125_v44 }
 0x9cc   : > { %v10021_v56 = vpop.eup %10020 }
 0x9cd   : > { %v4130_v21 = vmul.f32 %v10021_v56, %v4124_v61  ;;  %v4133_v49 = vmax.f32 %v4131_v15, 0.0 }
 0x9cf   : > { %v4132_v10 = vmax.f32 %v4130_v21, 0.0 }
 0x9d1   : > { %v4134_v37 = vpack.c.bf16 %v4133_v49, %v4132_v10  ;;  %v11832_v49 = vld [vmem:[%s10437_s24] sm:$0xff]  }
 0x9d3   : > { %9341 = vmatmul.mubr.msk.bf16.vlgmr.msra.gmra.mrb[24].mxu0 %vm4099_vm8, %v4134_v37 }
 0x9d4   : > { %9345 = vmatpush3.bf16.msra.mxu0 %v9890_v60 }
 0x9d5   : > { %9346 = vmatprep.subr.bf16.mxu0 %v9891_v17 }
 0x9d8   : > { %9347 = vmatpush3.bf16.msra.mxu0 %v9891_v17 }
 0x9d9   : > { %9348 = vmatprep.subr.bf16.mxu0 %v9892_v42 }
 0x9dc   : > { %9349 = vmatpush3.bf16.msra.mxu0 %v9892_v42 }
 0x9dd   : > { %9350 = vmatprep.subr.bf16.mxu0 %v9893_v12 }
 0x9e0   : > { %9351 = vmatpush3.bf16.msra.mxu0 %v9893_v12 }
 0x9e1   : > { %9352 = vmatprep.subr.bf16.mxu0 %v9894_v51 }
 0x9e4   : > { %9353 = vmatpush3.bf16.msra.mxu0 %v9894_v51 }
 0x9e5   : > { %9358 = vmatprep.subr.bf16.mxu0 %v11832_v49 }
 0xaa6   : > { %v4204_v11 = vpop.f32.mrb[24].mxu0 }
 0xaa7   : > { %v9342_v34 = vpop.f32.mrb[25].mxu0 }
 0xaa8   : > { %v4207_v33 = vpop.f32.mrb[26].mxu0 }
 0xaa9   : > { %v4211_v58 = vpack.c.bf16 %v4207_v33, %v4204_v11  ;;  %v9343_v39 = vpop.f32.mrb[27].mxu0 }
 0xaab   : > { %4216 = vrot.lane.b32.xlu1 %v4211_v58, %s13619_s9  ;;  %4213 = vrot.lane.b32.xlu0 %v4211_v58, %s13540_s11 }
 0xaac   : > { %4267 = vmatpush1.bf16.msra.mxu1 %v4211_v58 }
 0xaad   : > { %4268 = vmatprep.subr.bf16.mxu1 %v13477_v4 }
 0xaaf   : > { %4219 = vrot.lane.b32.xlu1 %v4211_v58, %s13610_s23  ;;  %4222 = vrot.lane.b32.xlu0 %v4211_v58, %s13459_s15  ;;  %s13465_s15 = smov 120  }
 0xab3   : > { %4225 = vrot.lane.b32.xlu1 %v4211_v58, %s13467_s1  ;;  %4228 = vrot.lane.b32.xlu0 %v4211_v58, %s13541_s16 }
 0xab7   : > { %4231 = vrot.lane.b32.xlu1 %v4211_v58, %s13531_s22  ;;  %4234 = vrot.lane.b32.xlu0 %v4211_v58, %s13542_s26 }
 0xabb   : > { %4333 = vperm.xlu1 %9629, %v4327_v2   ;;  %4338 = vperm.xlu0 %9630, %v4328_v63  }
 0xabf   : > { %4343 = vperm.xlu1 %9629, %v4329_v25   ;;  %4348 = vperm.xlu0 %9630, %v4330_v28  }
 0xb1d   : > { %v4214_v53 = vpop.permute.xlu0 %4213  ;;  %v4217_v48 = vpop.permute.xlu1 %4216 }
 0xb1e   : > { %4269 = vmatpush1.bf16.msra.mxu1 %v4214_v53 }
 0xb1f   : > { %4270 = vmatprep.subr.bf16.mxu1 %v13477_v4 }
 0xb21   : > { %v4220_v23 = vpop.permute.xlu1 %4219  ;;  %v4223_v47 = vpop.permute.xlu0 %4222 }
 0xb22   : > { %4271 = vmatpush1.bf16.msra.mxu1 %v4217_v48 }
 0xb23   : > { %4272 = vmatprep.subr.bf16.mxu1 %v13477_v4 }
 0xb25   : > { %v4226_v9 = vpop.permute.xlu1 %4225  ;;  %v4229_v30 = vpop.permute.xlu0 %4228 }
 0xb26   : > { %4273 = vmatpush1.bf16.msra.mxu1 %v4220_v23 }
 0xb27   : > { %4274 = vmatprep.subr.bf16.mxu1 %v13477_v4 }
 0xb29   : > { %v4232_v0 = vpop.permute.xlu1 %4231  ;;  %v4235_v40 = vpop.permute.xlu0 %4234 }
 0xb2a   : > { %4275 = vmatpush1.bf16.msra.mxu1 %v4223_v47 }
 0xb2b   : > { %4276 = vmatprep.subr.bf16.mxu1 %v13477_v4 }
 0xb2e   : > { %4277 = vmatpush1.bf16.msra.mxu1 %v4226_v9 }
 0xb2f   : > { %4278 = vmatprep.subr.bf16.mxu1 %v13477_v4 }
 0xb32   : > { %4279 = vmatpush1.bf16.msra.mxu1 %v4229_v30 }
 0xb33   : > { %4280 = vmatprep.subr.bf16.mxu1 %v13477_v4 }
 0xb36   : > { %4281 = vmatpush1.bf16.msra.mxu1 %v4232_v0 }
 0xb37   : > { %4282 = vmatprep.subr.bf16.mxu1 %v13477_v4 }
 0xb3a   : > { %4283 = vmatpush1.bf16.msra.mxu1 %v4235_v40  ;;  %v4334_v36 = vpop.permute.xlu1 %4333  ;;  %v4339_v1 = vpop.permute.xlu0 %4338 }
 0xb3d   : > { %4299 = vmatmul.mubr.bf16.vlgmr.msra.gmra.mrb[24].mxu1 %v9886_v27 }
 0xb3e   : > { %8857 = vmatprep.mubr.msk.bf16.mxu1 %vm4259_vm7, %v9887_v19  ;;  %v4344_v55 = vpop.permute.xlu1 %4343  ;;  %v4349_v32 = vpop.permute.xlu0 %4348 }
 0xb45   : > { %4307 = vmatmul.mubr.bf16.gmra.mrb[28].mxu1 %v9889_v24 }
 0xc10   : > { %v4300_v26 = vpop.f32.mrb[24].mxu1 }
 0xc11   : > { %v4302_v38 = vpop.f32.mrb[25].mxu1 }
 0xc12   : > { %v4303_v43 = vpop.f32.mrb[26].mxu1 }
 0xc13   : > { %v4315_v62 = vpack.c.bf16 %v4303_v43, %v4300_v26  ;;  %v4305_v57 = vpop.f32.mrb[27].mxu1 }
 0xc15   : > { %9354 = vmatprep.mubr.msk.bf16.mxu0 %vm4381_vm13, %v4315_v62 }
 0xc18   : > { %v4308_v20 = vpop.f32.mrb[28].mxu1 }
 0xc19   : > { %v4310_v29 = vpop.f32.mrb[29].mxu1 }
 0xc1a   : > { %v4311_v59 = vpop.f32.mrb[30].mxu1 }
 0xc1b   : > { %v4316_v3 = vpack.c.bf16 %v4311_v59, %v4308_v20  ;;  %v4313_v31 = vpop.f32.mrb[31].mxu1 }
 0xc1d   : > { %9355 = vmatmul.mubr.msk.bf16.vlgmr.msra.gmra.mrb[28].mxu0 %vm4381_vm13, %v4316_v3 }
 0xc1e   : > { %9359 = vmatpush3.bf16.msra.mxu0 %v11832_v49 }
 0xcf0   : > { %v9356_v54 = vpop.f32.mrb[28].mxu0 }
 0xcf1   : > { %v11803_v22 = vadd.f32 %v9356_v54, %v4344_v55  ;;  %v4422_v46 = vpop.f32.mrb[29].mxu0 }
 0xcf2   : > { %v11805_v50 = vadd.f32 %v4422_v46, %v4334_v36  ;;  %v9357_v16 = vpop.f32.mrb[30].mxu0 }
 0xcf3   : > { %v4425_v41 = vpop.f32.mrb[31].mxu0  ;;  %v4443_v7 = vsel %vm4259_vm7, %v11803_v22, 0.0  ;;  %v11809_v13 = vadd.f32 %v9357_v16, %v4349_v32  ;;  %v4455_v61 = vmul.f32 %v11803_v22, %v11803_v22 }
 0xcf4   : > { %v11811_v5 = vadd.f32 %v4425_v41, %v4339_v1  ;;  %4444 = vadd.xlane.f32.xlu0 %v4443_v7  ;;  %v4437_v8 = vsel %vm4259_vm7, %v11805_v50, 0.0  ;;  %v4453_v14 = vmul.f32 %v11805_v50, %v11805_v50 }
 0xcf5   : > { %4438 = vadd.xlane.f32.xlu1 %v4437_v8  ;;  %v4446_v45 = vsel %vm4259_vm7, %v11809_v13, 0.0  ;;  %v4456_v56 = vmul.f32 %v11809_v13, %v11809_v13  ;;  %v4463_v21 = vsel %vm4259_vm7, %v4455_v61, 0.0 }
 0xcf6   : > { %v4440_v18 = vsel %vm4259_vm7, %v11811_v5, 0.0  ;;  %v4454_v44 = vmul.f32 %v11811_v5, %v11811_v5  ;;  %v4457_v35 = vsel %vm4259_vm7, %v4453_v14, 0.0 }
 0xcf7   : > { %v4466_v10 = vsel %vm4259_vm7, %v4456_v56, 0.0 }
 0xcf8   : > { %4441 = vadd.xlane.f32.xlu0 %v4440_v18  ;;  %v4460_v15 = vsel %vm4259_vm7, %v4454_v44, 0.0 }
 0xcf9   : > { %4447 = vadd.xlane.f32.xlu1 %v4446_v45 }
 0xcfc   : > { %4458 = vadd.xlane.f32.xlu0 %v4457_v35 }
 0xcfd   : > { %4461 = vadd.xlane.f32.xlu1 %v4460_v15 }
 0xd00   : > { %4464 = vadd.xlane.f32.xlu0 %v4463_v21 }
 0xd01   : > { %4467 = vadd.xlane.f32.xlu1 %v4466_v10 }
 0xd81   : > { %v4445_v37 = vpop.xlane.xlu0 %4444 }
 0xd82   : > { %v4439_v11 = vpop.xlane.xlu1 %4438  ;;  %v4451_v63 = vmul.f32 0.0625, %v4445_v37 }
 0xd83   : > { %v4449_v33 = vmul.f32 0.0625, %v4439_v11 }
 0xd84   : > { %v4475_v9 = vmul.f32 %v4451_v63, %v4451_v63  ;;  %v4487_v1 = vsub.f32 %v11803_v22, %v4451_v63 }
 0xd85   : > { %v4442_v34 = vpop.xlane.xlu0 %4441  ;;  %v4473_v25 = vmul.f32 %v4449_v33, %v4449_v33  ;;  %v4485_v20 = vsub.f32 %v11805_v50, %v4449_v33 }
 0xd86   : > { %v4448_v58 = vpop.xlane.xlu1 %4447  ;;  %v4450_v39 = vmul.f32 0.0625, %v4442_v34 }
 0xd87   : > { %v4452_v17 = vmul.f32 0.0625, %v4448_v58 }
 0xd88   : > { %v4474_v60 = vmul.f32 %v4450_v39, %v4450_v39  ;;  %v4486_v59 = vsub.f32 %v11811_v5, %v4450_v39 }
 0xd89   : > { %v4459_v2 = vpop.xlane.xlu0 %4458  ;;  %v4476_v27 = vmul.f32 %v4452_v17, %v4452_v17  ;;  %v4488_v46 = vsub.f32 %v11809_v13, %v4452_v17 }
 0xd8a   : > { %v4469_v6 = vmul.f32 0.0625, %v4459_v2  ;;  %v4462_v28 = vpop.xlane.xlu1 %4461 }
 0xd8b   : > { %v4470_v53 = vmul.f32 0.0625, %v4462_v28 }
 0xd8c   : > { %v4477_v48 = vsub.f32 %v4469_v6, %v4473_v25 }
 0xd8d   : > { %v4478_v23 = vsub.f32 %v4470_v53, %v4474_v60  ;;  %v4465_v47 = vpop.xlane.xlu0 %4464 }
 0xd8e   : > { %v4481_v30 = vmax.f32 %v4477_v48, 0.0  ;;  %v4471_v0 = vmul.f32 0.0625, %v4465_v47  ;;  %v4468_v40 = vpop.xlane.xlu1 %4467 }
 0xd8f   : > { %v4482_v19 = vmax.f32 %v4478_v23, 0.0  ;;  %v4472_v24 = vmul.f32 0.0625, %v4468_v40 }
 0xd90   : > { %v4489_v42 = vadd.f32 1e-05, %v4481_v30  ;;  %v4479_v12 = vsub.f32 %v4471_v0, %v4475_v9 }
 0xd91   : > { %v4490_v51 = vadd.f32 1e-05, %v4482_v19  ;;  %v4480_v26 = vsub.f32 %v4472_v24, %v4476_v27 }
 0xd92   : > { %10022 = vrsqrt.f32 %v4489_v42  ;;  %v4483_v38 = vmax.f32 %v4479_v12, 0.0 }
 0xd93   : > { %10024 = vrsqrt.f32 %v4490_v51  ;;  %v4484_v43 = vmax.f32 %v4480_v26, 0.0 }
 0xd94   : > { %v4491_v62 = vadd.f32 1e-05, %v4483_v38 }
 0xd95   : > { %v4492_v57 = vadd.f32 1e-05, %v4484_v43 }
 0xd96   : > { %10026 = vrsqrt.f32 %v4491_v62 }
 0xd97   : > { %10028 = vrsqrt.f32 %v4492_v57 }
 0xd9c   : > { %v10023_v29 = vpop.eup %10022 }
 0xd9d   : > { %v10025_v3 = vpop.eup %10024  ;;  %v11838_v31 = vmul.f32 %v10023_v29, %v4485_v20 }
 0xd9e   : > { %v11840_v36 = vmul.f32 %v10025_v3, %v4486_v59 }
 0xd9f   : > { %v4501_v55 = vmax.f32 %v11838_v31, 0.0 }
 0xda0   : > { %v10027_v54 = vpop.eup %10026  ;;  %v4502_v16 = vmax.f32 %v11840_v36, 0.0 }
 0xda1   : > { %v10029_v32 = vpop.eup %10028  ;;  %v11846_v41 = vmul.f32 %v10027_v54, %v4487_v1 }
 0xda2   : > { %v4505_v50 = vpack.c.bf16 %v4502_v16, %v4501_v55  ;;  %v11852_v7 = vmul.f32 %v10029_v32, %v4488_v46 }
 0xda3   : > { %v4503_v5 = vmax.f32 %v11846_v41, 0.0 }
 0xda4   : > { %9360 = vmatprep.mubr.msk.bf16.mxu0 %vm4259_vm7, %v4505_v50  ;;  %v4504_v22 = vmax.f32 %v11852_v7, 0.0 }
 0xda6   : > { %v4506_v13 = vpack.c.bf16 %v4504_v22, %v4503_v5 }
 0xda8   : > { %9361 = vmatmul.mubr.msk.bf16.vlgmr.msra.gmra.mrb[32].mxu0 %vm4259_vm7, %v4506_v13 }
 0xe7b   : > { %v9362_v8 = vpop.f32.mrb[32].mxu0 }
 0xe7c   : > { %v4555_v18 = vpop.f32.mrb[33].mxu0 }
 0xe7d   : > { %v9363_v14 = vpop.f32.mrb[34].mxu0 }
 0xe7e   : > { %v4571_v45 = vpack.c.bf16 %v9363_v14, %v9362_v8  ;;  %v4558_v44 = vpop.f32.mrb[35].mxu0 }
 0xe7f   : > { %v4570_v35 = vpack.c.bf16 %v4558_v44, %v4555_v18 }
 0xe80   : > { %4594 = vrot.lane.b32.xlu1 %v4571_v45, %s13463_s20 }
 0xe81   : > { %4592 = vrot.lane.b32.xlu0 %v4570_v35, %s13463_s20  ;;  %s11877_s20 = scalar_lea.vmem %s13624_s12, %s11871_s17  ;;  %s13628_s12 = smov 121  }
 0xe82   : > { %v9898_v61 = vld [vmem:[%s11877_s20 + $0x4] ss:$12 sps:$4 sm:$0xff]   ;;  %v9899_v15 = vld [vmem:[%s11877_s20 + $0x8] ss:$12 sps:$4 sm:$0xff]   ;;  %v9896_v9 = vld [vmem:[%s11877_s20] ss:$12 sps:$4 sm:$0xff]  }
 0xe83   : > { %4698 = vmatprep.mubr.bf16.mxu0 %v9898_v61  ;;  %9368 = vmatprep.mubr.msk.bf16.mxu1 %vm4013_vm10, %v9899_v15  ;;  %v9901_v30 = vld [vmem:[%s11877_s20 + $0x1c] ss:$12 sps:$4 sm:$0xff]   ;;  %v9900_v0 = vld [vmem:[%s11877_s20 + $0x20] ss:$12 sps:$4 sm:$0xff]   ;;  %v9903_v40 = vld [vmem:[%s11877_s20 + $0x18] ss:$12 sps:$4 sm:$0xff]  }
 0xe84   : > { %4598 = vrot.lane.b32.xlu1 %v4570_v35, %s13465_s15  ;;  %s13629_s20 = smov 120  }
 0xe85   : > { %4574 = vrot.lane.b32.xlu0 %v4570_v35, %s13540_s11 }
 0xe88   : > { %4600 = vrot.lane.b32.xlu1 %v4571_v45, %s13465_s15  ;;  %s13472_s15 = smov 115  }
 0xe89   : > { %4576 = vrot.lane.b32.xlu0 %v4571_v45, %s13540_s11 }
 0xe8c   : > { %4604 = vrot.lane.b32.xlu1 %v4570_v35, %s13467_s1 }
 0xe8d   : > { %4580 = vrot.lane.b32.xlu0 %v4570_v35, %s13619_s9 }
 0xe90   : > { %4606 = vrot.lane.b32.xlu1 %v4571_v45, %s13467_s1  ;;  %s1374_s1 = scalar_lea.vmem %s13625_s6, %s11771_s7  ;;  %s13626_s6 = sld [smem:[#allocation28_spill]] }
 0xe91   : > { %4582 = vrot.lane.b32.xlu0 %v4571_v45, %s13619_s9  ;;  %v4769_v56 = vld [vmem:[%s1374_s1] sm:$0xff]  ;;  %v4770_v21 = vld [vmem:[%s1374_s1 + $0x8] sm:$0xff]  ;;  %v4771_v10 = vld [vmem:[%s1374_s1 + $0x10] sm:$0xff] }
 0xe92   : > { %v4772_v37 = vld [vmem:[%s1374_s1 + $0x18] sm:$0xff]  ;;  %s13627_s1 = sld [smem:[#allocation11_spill]] }
 0xe94   : > { %4610 = vrot.lane.b32.xlu1 %v4570_v35, %s13472_s15 }
 0xe95   : > { %4586 = vrot.lane.b32.xlu0 %v4570_v35, %s13532_s2 }
 0xe96   : > { %v11896_v27 = vld [vmem:[%s13626_s6] sm:$0xff]   ;;  %v11901_v19 = vld [vmem:[%s13626_s6 + $0x8] ss:$0 sps:$4 sm:$0xff]  }
 0xe97   : > { %v11907_v24 = vsel %vm2066_vm0, %v11901_v19, 0 }
 0xe98   : > { %4612 = vrot.lane.b32.xlu1 %v4571_v45, %s13472_s15  ;;  %s13631_s15 = smov 116   ;;  %s11954_s25 = scalar_lea.vmem %s13627_s1, %s11871_s17 }
 0xe99   : > { %4588 = vrot.lane.b32.xlu0 %v4571_v45, %s13532_s2 }
 0xe9c   : > { %4616 = vrot.lane.b32.xlu1 %v4570_v35, %s13470_s21 }
 0xe9d   : > { %4618 = vrot.lane.b32.xlu0 %v4571_v45, %s13470_s21  ;;  %s13630_s21 = sld [smem:[#allocation12_spill]] }
 0xea0   : > { %4775 = vperm.xlu1 %9629, %v4769_v56  }
 0xea1   : > { %4780 = vperm.xlu0 %9630, %v4770_v21  }
 0xea3   : > { %s1384_s29 = scalar_lea.vmem %s13630_s21, %s11771_s7  ;;  %s13634_s21 = sld [smem:[#allocation13_spill]] }
 0xea4   : > { %4785 = vperm.xlu1 %9629, %v4771_v10  }
 0xea5   : > { %4790 = vperm.xlu0 %9630, %v4772_v37  }
 0xef2   : > { %v4595_v11 = vpop.permute.xlu1 %4594 }
 0xef3   : > { %v4593_v34 = vpop.permute.xlu0 %4592 }
 0xef4   : > { %9096 = vmatprep.subr.bf16.mxu0 %v4593_v34 }
 0xef5   : > { %9097 = vmatpush3.bf16.msra.mxu0 %v4570_v35 }
 0xef6   : > { %v4599_v33 = vpop.permute.xlu1 %4598  ;;  %9098 = vmatprep.subr.bf16.mxu0 %v4595_v11 }
 0xef7   : > { %v4575_v58 = vpop.permute.xlu0 %4574 }
 0xef9   : > { %9099 = vmatpush3.bf16.msra.mxu0 %v4571_v45 }
 0xefa   : > { %v4601_v39 = vpop.permute.xlu1 %4600  ;;  %9100 = vmatprep.subr.bf16.mxu0 %v4599_v33 }
 0xefb   : > { %v4577_v2 = vpop.permute.xlu0 %4576 }
 0xefd   : > { %9101 = vmatpush3.bf16.msra.mxu0 %v4575_v58 }
 0xefe   : > { %v4605_v63 = vpop.permute.xlu1 %4604  ;;  %9102 = vmatprep.subr.bf16.mxu0 %v4601_v39 }
 0xeff   : > { %v4581_v25 = vpop.permute.xlu0 %4580 }
 0xf01   : > { %9103 = vmatpush3.bf16.msra.mxu0 %v4577_v2 }
 0xf02   : > { %v4607_v6 = vpop.permute.xlu1 %4606  ;;  %9104 = vmatprep.subr.bf16.mxu0 %v4605_v63 }
 0xf03   : > { %v4583_v28 = vpop.permute.xlu0 %4582 }
 0xf05   : > { %9105 = vmatpush3.bf16.msra.mxu0 %v4581_v25 }
 0xf06   : > { %v4611_v60 = vpop.permute.xlu1 %4610  ;;  %9106 = vmatprep.subr.bf16.mxu0 %v4607_v6 }
 0xf07   : > { %v4587_v17 = vpop.permute.xlu0 %4586 }
 0xf09   : > { %9107 = vmatpush3.bf16.msra.mxu0 %v4583_v28 }
 0xf0a   : > { %v4613_v53 = vpop.permute.xlu1 %4612  ;;  %9108 = vmatprep.subr.bf16.mxu0 %v4611_v60 }
 0xf0b   : > { %v4589_v48 = vpop.permute.xlu0 %4588 }
 0xf0d   : > { %9109 = vmatpush3.bf16.msra.mxu0 %v4587_v17 }
 0xf0e   : > { %v4617_v23 = vpop.permute.xlu1 %4616  ;;  %9110 = vmatprep.subr.bf16.mxu0 %v4613_v53 }
 0xf0f   : > { %9364 = vmatprep.subr.bf16.mxu1 %v4617_v23  ;;  %v4619_v47 = vpop.permute.xlu0 %4618 }
 0xf10   : > { %9365 = vmatpush3.bf16.msra.mxu1 %v4617_v23 }
 0xf11   : > { %9111 = vmatpush3.bf16.msra.mxu0 %v4589_v48  ;;  %9366 = vmatprep.subr.bf16.mxu1 %v4619_v47 }
 0xf14   : > { %4699 = vmatmul.mubr.bf16.vlgmr.msra.gmra.mrb[36].mxu0 %v9896_v9  ;;  %9367 = vmatpush3.bf16.msra.mxu1 %v4619_v47 }
 0xf15   : > { %4706 = vmatprep.mubr.bf16.mxu0 %v9901_v30  ;;  %9372 = vmatprep.subr.bf16.mxu1 %v11896_v27 }
 0xf17   : > { %9369 = vmatmul.mubr.msk.bf16.vlgmr.msra.gmra.mrb[32].mxu1 %vm4013_vm10, %v9900_v0 }
 0xf18   : > { %9373 = vmatpush3.bf16.msra.mxu1 %v11896_v27 }
 0xf19   : > { %9512 = vmatprep.subr.msk.bf16.mxu1 %vm2066_vm0, %v11901_v19 }
 0xf1c   : > { %4707 = vmatmul.mubr.bf16.gmra.mrb[40].mxu0 %v9903_v40  ;;  %9375 = vmatpush3.bf16.msra.mxu1 %v11907_v24 }
 0xf1d   : > { %9380 = vmatprep.subr.bf16.mxu1 %v11832_v49 }
 0xf1f   : > { %v4776_v44 = vpop.permute.xlu1 %4775 }
 0xf20   : > { %v4781_v35 = vpop.permute.xlu0 %4780 }
 0xf23   : > { %v4786_v61 = vpop.permute.xlu1 %4785 }
 0xf24   : > { %v4791_v11 = vpop.permute.xlu0 %4790 }
 0xfe7   : > { %v9112_v42 = vpop.f32.mrb[36].mxu0 }
 0xfe8   : > { %v9113_v12 = vpop.f32.mrb[37].mxu0 }
 0xfe9   : > { %v9114_v51 = vadd.f32 %v9113_v12, %v9112_v42  ;;  %v9115_v26 = vpop.f32.mrb[38].mxu0 }
 0xfea   : > { %v9116_v38 = vpop.f32.mrb[39].mxu0  ;;  %v9370_v43 = vpop.f32.mrb[32].mxu1 }
 0xfeb   : > { %v9117_v62 = vadd.f32 %v9116_v38, %v9115_v26  ;;  %v4749_v57 = vpop.f32.mrb[33].mxu1 }
 0xfec   : > { %v4750_v20 = vadd.f32 %v9114_v51, %v4749_v57  ;;  %v9371_v29 = vpop.f32.mrb[34].mxu1 }
 0xfed   : > { %v4752_v59 = vpop.f32.mrb[35].mxu1 }
 0xfee   : > { %v4753_v3 = vadd.f32 %v9117_v62, %v4752_v59 }
 0xfef   : > { %v9118_v1 = vpop.f32.mrb[40].mxu0 }
 0xff0   : > { %v4764_v54 = vpack.c.bf16 %v4753_v3, %v4750_v20  ;;  %v9119_v46 = vpop.f32.mrb[41].mxu0 }
 0xff1   : > { %v9120_v32 = vadd.f32 %v9119_v46, %v9118_v1  ;;  %v9121_v50 = vpop.f32.mrb[42].mxu0 }
 0xff2   : > { %v9122_v13 = vpop.f32.mrb[43].mxu0  ;;  %9376 = vmatprep.mubr.msk.bf16.mxu1 %vm4802_vm3, %v4764_v54 }
 0xff3   : > { %v4758_v8 = vadd.f32 %v9370_v43, %v9120_v32  ;;  %v9123_v18 = vadd.f32 %v9122_v13, %v9121_v50 }
 0xff5   : > { %v4761_v14 = vadd.f32 %v9371_v29, %v9123_v18 }
 0xff7   : > { %v4765_v45 = vpack.c.bf16 %v4761_v14, %v4758_v8 }
 0xff9   : > { %9377 = vmatmul.mubr.msk.bf16.vlgmr.msra.gmra.mrb[36].mxu1 %vm4802_vm3, %v4765_v45 }
 0xffa   : > { %9381 = vmatpush3.bf16.msra.mxu1 %v11832_v49 }
0x10cc   : > { %v9378_v15 = vpop.f32.mrb[36].mxu1 }
0x10cd   : > { %v11914_v56 = vadd.f32 %v9378_v15, %v4786_v61  ;;  %v4846_v21 = vpop.f32.mrb[37].mxu1 }
0x10ce   : > { %v11916_v10 = vadd.f32 %v4846_v21, %v4776_v44  ;;  %v9379_v37 = vpop.f32.mrb[38].mxu1 }
0x10cf   : > { %v4849_v34 = vpop.f32.mrb[39].mxu1  ;;  %v4867_v33 = vsel %vm4259_vm7, %v11914_v56, 0.0  ;;  %v11920_v58 = vadd.f32 %v9379_v37, %v4791_v11  ;;  %v4879_v17 = vmul.f32 %v11914_v56, %v11914_v56 }
0x10d0   : > { %v4850_v39 = vadd.f32 %v4849_v34, %v4781_v35  ;;  %4868 = vadd.xlane.f32.xlu0 %v4867_v33  ;;  %v4861_v2 = vsel %vm4259_vm7, %v11916_v10, 0.0  ;;  %v4877_v25 = vmul.f32 %v11916_v10, %v11916_v10 }
0x10d1   : > { %4862 = vadd.xlane.f32.xlu1 %v4861_v2  ;;  %v4870_v6 = vsel %vm4259_vm7, %v11920_v58, 0.0  ;;  %v4880_v48 = vmul.f32 %v11920_v58, %v11920_v58  ;;  %v4887_v23 = vsel %vm4259_vm7, %v4879_v17, 0.0 }
0x10d2   : > { %v4864_v63 = vsel %vm4259_vm7, %v4850_v39, 0.0  ;;  %v4878_v28 = vmul.f32 %v4850_v39, %v4850_v39  ;;  %v4881_v60 = vsel %vm4259_vm7, %v4877_v25, 0.0 }
0x10d3   : > { %v4890_v47 = vsel %vm4259_vm7, %v4880_v48, 0.0 }
0x10d4   : > { %4865 = vadd.xlane.f32.xlu0 %v4864_v63  ;;  %v4884_v53 = vsel %vm4259_vm7, %v4878_v28, 0.0 }
0x10d5   : > { %4871 = vadd.xlane.f32.xlu1 %v4870_v6 }
0x10d8   : > { %4882 = vadd.xlane.f32.xlu0 %v4881_v60 }
0x10d9   : > { %4885 = vadd.xlane.f32.xlu1 %v4884_v53 }
0x10dc   : > { %4888 = vadd.xlane.f32.xlu0 %v4887_v23 }
0x10dd   : > { %4891 = vadd.xlane.f32.xlu1 %v4890_v47 }
0x115d   : > { %v4869_v9 = vpop.xlane.xlu0 %4868 }
0x115e   : > { %v4863_v30 = vpop.xlane.xlu1 %4862  ;;  %v4875_v26 = vmul.f32 0.0625, %v4869_v9 }
0x115f   : > { %v4873_v40 = vmul.f32 0.0625, %v4863_v30 }
0x1160   : > { %v4899_v54 = vmul.f32 %v4875_v26, %v4875_v26  ;;  %v4911_v6 = vsub.f32 %v11914_v56, %v4875_v26  ;;  %v9909_v26 = vld [vmem:[%s11954_s25 + $0x8] ss:$12 sps:$4 sm:$0xff]  }
0x1161   : > { %v4866_v0 = vpop.xlane.xlu0 %4865  ;;  %v4897_v38 = vmul.f32 %v4873_v40, %v4873_v40  ;;  %v4909_v11 = vsub.f32 %v11916_v10, %v4873_v40 }
0x1162   : > { %v4872_v42 = vpop.xlane.xlu1 %4871  ;;  %v4874_v12 = vmul.f32 0.0625, %v4866_v0 }
0x1163   : > { %v4876_v20 = vmul.f32 0.0625, %v4872_v42 }
0x1164   : > { %v4898_v57 = vmul.f32 %v4874_v12, %v4874_v12  ;;  %v4910_v33 = vsub.f32 %v4850_v39, %v4874_v12 }
0x1165   : > { %v4883_v51 = vpop.xlane.xlu0 %4882  ;;  %v4900_v13 = vmul.f32 %v4876_v20, %v4876_v20  ;;  %v4912_v17 = vsub.f32 %v11920_v58, %v4876_v20 }
0x1166   : > { %v4893_v43 = vmul.f32 0.0625, %v4883_v51  ;;  %v4886_v62 = vpop.xlane.xlu1 %4885  ;;  %v9908_v51 = vld [vmem:[%s11954_s25 + $0x4] ss:$12 sps:$4 sm:$0xff]  }
0x1167   : > { %v4894_v29 = vmul.f32 0.0625, %v4886_v62  ;;  %5114 = vmatprep.mubr.bf16.mxu0 %v9908_v51  ;;  %v5184_v62 = vld [vmem:[%s1384_s29 + $0x10] sm:$0xff] }
0x1168   : > { %v4901_v59 = vsub.f32 %v4893_v43, %v4897_v38  ;;  %v5182_v38 = vld [vmem:[%s1384_s29] sm:$0xff]  ;;  %v5183_v43 = vld [vmem:[%s1384_s29 + $0x8] sm:$0xff] }
0x1169   : > { %v4902_v3 = vsub.f32 %v4894_v29, %v4898_v57  ;;  %v4889_v1 = vpop.xlane.xlu0 %4888  ;;  %v5185_v57 = vld [vmem:[%s1384_s29 + $0x18] sm:$0xff]  ;;  %s12041_s29 = scalar_lea.vmem %s13634_s21, %s11871_s17  ;;  %s13636_s21 = sld [smem:[#allocation15_spill]] }
0x116a   : > { %v4905_v46 = vmax.f32 %v4901_v59, 0.0  ;;  %v4895_v32 = vmul.f32 0.0625, %v4889_v1  ;;  %v4892_v50 = vpop.xlane.xlu1 %4891  ;;  %v9916_v7 = vld [vmem:[%s12041_s29 + $0x4] ss:$12 sps:$4 sm:$0xff]  }
0x116b   : > { %v4906_v8 = vmax.f32 %v4902_v3, 0.0  ;;  %v4896_v18 = vmul.f32 0.0625, %v4892_v50 }
0x116c   : > { %v4913_v14 = vadd.f32 1e-05, %v4905_v46  ;;  %v4903_v45 = vsub.f32 %v4895_v32, %v4899_v54 }
0x116d   : > { %v4914_v44 = vadd.f32 1e-05, %v4906_v8  ;;  %v4904_v35 = vsub.f32 %v4896_v18, %v4900_v13 }
0x116e   : > { %10030 = vrsqrt.f32 %v4913_v14  ;;  %v4907_v61 = vmax.f32 %v4903_v45, 0.0 }
0x116f   : > { %10032 = vrsqrt.f32 %v4914_v44  ;;  %v4908_v15 = vmax.f32 %v4904_v35, 0.0 }
0x1170   : > { %v4915_v21 = vadd.f32 1e-05, %v4907_v61  ;;  %v9906_v61 = vld [vmem:[%s11954_s25] ss:$12 sps:$4 sm:$0xff]  }
0x1171   : > { %v4916_v37 = vadd.f32 1e-05, %v4908_v15  ;;  %v9911_v15 = vld [vmem:[%s11954_s25 + $0x1c] ss:$12 sps:$4 sm:$0xff]  }
0x1172   : > { %10034 = vrsqrt.f32 %v4915_v21  ;;  %v9910_v21 = vld [vmem:[%s11954_s25 + $0x20] ss:$12 sps:$4 sm:$0xff]  }
0x1173   : > { %10036 = vrsqrt.f32 %v4916_v37  ;;  %v9913_v37 = vld [vmem:[%s11954_s25 + $0x18] ss:$12 sps:$4 sm:$0xff]   ;;  %s13635_s25 = sld [smem:[#allocation14_spill]] }
0x1178   : > { %v10031_v34 = vpop.eup %10030 }
0x1179   : > { %v10033_v2 = vpop.eup %10032  ;;  %v4921_v63 = vmul.f32 %v10031_v34, %v4909_v11  ;;  %s1394_s1 = scalar_lea.vmem %s13635_s25, %s11771_s7  ;;  %s13637_s25 = sld [smem:[#allocation16_spill]] }
0x117a   : > { %v4922_v25 = vmul.f32 %v10033_v2, %v4910_v33 }
0x117b   : > { %v4925_v28 = vmax.f32 %v4921_v63, 0.0 }
0x117c   : > { %v10035_v60 = vpop.eup %10034  ;;  %v4926_v53 = vmax.f32 %v4922_v25, 0.0 }
0x117d   : > { %v10037_v48 = vpop.eup %10036  ;;  %v4923_v23 = vmul.f32 %v10035_v60, %v4911_v6 }
0x117e   : > { %v4929_v47 = vpack.c.bf16 %v4926_v53, %v4925_v28  ;;  %v4924_v9 = vmul.f32 %v10037_v48, %v4912_v17 }
0x117f   : > { %v4927_v30 = vmax.f32 %v4923_v23, 0.0 }
0x1180   : > { %9382 = vmatprep.mubr.msk.bf16.mxu1 %vm4259_vm7, %v4929_v47  ;;  %v4928_v10 = vmax.f32 %v4924_v9, 0.0 }
0x1182   : > { %v4930_v0 = vpack.c.bf16 %v4928_v10, %v4927_v30 }
0x1184   : > { %9383 = vmatmul.mubr.msk.bf16.vlgmr.msra.gmra.mrb[40].mxu1 %vm4259_vm7, %v4930_v0 }
0x1185   : > { %9390 = vmatprep.mubr.msk.bf16.mxu1 %vm4013_vm10, %v9909_v26 }
0x1257   : > { %v9384_v39 = vpop.f32.mrb[40].mxu1 }
0x1258   : > { %v4971_v56 = vpop.f32.mrb[41].mxu1 }
0x1259   : > { %v9385_v40 = vpop.f32.mrb[42].mxu1 }
0x125a   : > { %v4987_v42 = vpack.c.bf16 %v9385_v40, %v9384_v39  ;;  %v4974_v12 = vpop.f32.mrb[43].mxu1 }
0x125b   : > { %v4986_v58 = vpack.c.bf16 %v4974_v12, %v4971_v56 }
0x125c   : > { %5010 = vrot.lane.b32.xlu1 %v4987_v42, %s13628_s12 }
0x125d   : > { %5008 = vrot.lane.b32.xlu0 %v4986_v58, %s13628_s12 }
0x1260   : > { %5014 = vrot.lane.b32.xlu1 %v4986_v58, %s13629_s20 }
0x1261   : > { %4990 = vrot.lane.b32.xlu0 %v4986_v58, %s13540_s11 }
0x1264   : > { %5016 = vrot.lane.b32.xlu1 %v4987_v42, %s13629_s20 }
0x1265   : > { %4992 = vrot.lane.b32.xlu0 %v4987_v42, %s13540_s11 }
0x1268   : > { %5020 = vrot.lane.b32.xlu1 %v4986_v58, %s13631_s15 }
0x1269   : > { %4996 = vrot.lane.b32.xlu0 %v4986_v58, %s13619_s9 }
0x126c   : > { %5022 = vrot.lane.b32.xlu1 %v4987_v42, %s13631_s15 }
0x126d   : > { %4998 = vrot.lane.b32.xlu0 %v4987_v42, %s13619_s9 }
0x1270   : > { %5026 = vrot.lane.b32.xlu1 %v4986_v58, %s13632_s27 }
0x1271   : > { %5002 = vrot.lane.b32.xlu0 %v4986_v58, %s13532_s2 }
0x1274   : > { %5028 = vrot.lane.b32.xlu1 %v4987_v42, %s13632_s27 }
0x1275   : > { %5004 = vrot.lane.b32.xlu0 %v4987_v42, %s13532_s2 }
0x1278   : > { %5032 = vrot.lane.b32.xlu1 %v4986_v58, %s13633_s30 }
0x1279   : > { %5034 = vrot.lane.b32.xlu0 %v4987_v42, %s13633_s30 }
0x127c   : > { %5188 = vperm.xlu1 %9629, %v5182_v38  }
0x127d   : > { %5193 = vperm.xlu0 %9630, %v5183_v43  }
0x1280   : > { %5198 = vperm.xlu1 %9629, %v5184_v62  }
0x1281   : > { %5203 = vperm.xlu0 %9630, %v5185_v57  }
0x12ce   : > { %v5011_v20 = vpop.permute.xlu1 %5010 }
0x12cf   : > { %v5009_v29 = vpop.permute.xlu0 %5008 }
0x12d0   : > { %9135 = vmatprep.subr.bf16.mxu0 %v5009_v29 }
0x12d1   : > { %9136 = vmatpush3.bf16.msra.mxu0 %v4986_v58 }
0x12d2   : > { %v5015_v59 = vpop.permute.xlu1 %5014  ;;  %9137 = vmatprep.subr.bf16.mxu0 %v5011_v20 }
0x12d3   : > { %v4991_v3 = vpop.permute.xlu0 %4990 }
0x12d5   : > { %9138 = vmatpush3.bf16.msra.mxu0 %v4987_v42 }
0x12d6   : > { %v5017_v1 = vpop.permute.xlu1 %5016  ;;  %9139 = vmatprep.subr.bf16.mxu0 %v5015_v59 }
0x12d7   : > { %v4993_v54 = vpop.permute.xlu0 %4992 }
0x12d9   : > { %9140 = vmatpush3.bf16.msra.mxu0 %v4991_v3 }
0x12da   : > { %v5021_v46 = vpop.permute.xlu1 %5020  ;;  %9141 = vmatprep.subr.bf16.mxu0 %v5017_v1 }
0x12db   : > { %v4997_v32 = vpop.permute.xlu0 %4996 }
0x12dd   : > { %9142 = vmatpush3.bf16.msra.mxu0 %v4993_v54 }
0x12de   : > { %v5023_v50 = vpop.permute.xlu1 %5022  ;;  %9143 = vmatprep.subr.bf16.mxu0 %v5021_v46 }
0x12df   : > { %v4999_v13 = vpop.permute.xlu0 %4998 }
0x12e1   : > { %9144 = vmatpush3.bf16.msra.mxu0 %v4997_v32 }
0x12e2   : > { %v5027_v8 = vpop.permute.xlu1 %5026  ;;  %9145 = vmatprep.subr.bf16.mxu0 %v5023_v50 }
0x12e3   : > { %v5003_v18 = vpop.permute.xlu0 %5002 }
0x12e5   : > { %9146 = vmatpush3.bf16.msra.mxu0 %v4999_v13 }
0x12e6   : > { %v5029_v14 = vpop.permute.xlu1 %5028  ;;  %9147 = vmatprep.subr.bf16.mxu0 %v5027_v8 }
0x12e7   : > { %v5005_v45 = vpop.permute.xlu0 %5004 }
0x12e9   : > { %9148 = vmatpush3.bf16.msra.mxu0 %v5003_v18 }
0x12ea   : > { %v5033_v44 = vpop.permute.xlu1 %5032  ;;  %9149 = vmatprep.subr.bf16.mxu0 %v5029_v14 }
0x12eb   : > { %9386 = vmatprep.subr.bf16.mxu1 %v5033_v44  ;;  %v5035_v35 = vpop.permute.xlu0 %5034 }
0x12ec   : > { %9387 = vmatpush3.bf16.msra.mxu1 %v5033_v44 }
0x12ed   : > { %9150 = vmatpush3.bf16.msra.mxu0 %v5005_v45  ;;  %9388 = vmatprep.subr.bf16.mxu1 %v5035_v35 }
0x12f0   : > { %5115 = vmatmul.mubr.bf16.vlgmr.msra.gmra.mrb[44].mxu0 %v9906_v61  ;;  %9389 = vmatpush3.bf16.msra.mxu1 %v5035_v35 }
0x12f1   : > { %5122 = vmatprep.mubr.bf16.mxu0 %v9911_v15  ;;  %9394 = vmatprep.subr.bf16.mxu1 %v11896_v27 }
0x12f3   : > { %9391 = vmatmul.mubr.msk.bf16.vlgmr.msra.gmra.mrb[44].mxu1 %vm4013_vm10, %v9910_v21 }
0x12f4   : > { %9395 = vmatpush3.bf16.msra.mxu1 %v11896_v27 }
0x12f5   : > { %9513 = vmatprep.subr.msk.bf16.mxu1 %vm2066_vm0, %v11901_v19 }
0x12f8   : > { %5123 = vmatmul.mubr.bf16.gmra.mrb[48].mxu0 %v9913_v37  ;;  %9397 = vmatpush3.bf16.msra.mxu1 %v11907_v24 }
0x12f9   : > { %9402 = vmatprep.subr.bf16.mxu1 %v11832_v49 }
0x12fb   : > { %v5189_v12 = vpop.permute.xlu1 %5188 }
0x12fc   : > { %v5194_v58 = vpop.permute.xlu0 %5193 }
0x12ff   : > { %v5199_v51 = vpop.permute.xlu1 %5198 }
0x1300   : > { %v5204_v20 = vpop.permute.xlu0 %5203 }
0x13c3   : > { %v9151_v11 = vpop.f32.mrb[44].mxu0 }
0x13c4   : > { %v9152_v34 = vpop.f32.mrb[45].mxu0 }
0x13c5   : > { %v9153_v33 = vadd.f32 %v9152_v34, %v9151_v11  ;;  %v9154_v2 = vpop.f32.mrb[46].mxu0 }
0x13c6   : > { %v9155_v63 = vpop.f32.mrb[47].mxu0  ;;  %v9392_v25 = vpop.f32.mrb[44].mxu1 }
0x13c7   : > { %v9156_v6 = vadd.f32 %v9155_v63, %v9154_v2  ;;  %v5165_v28 = vpop.f32.mrb[45].mxu1 }
0x13c8   : > { %v5166_v60 = vadd.f32 %v9153_v33, %v5165_v28  ;;  %v9393_v17 = vpop.f32.mrb[46].mxu1 }
0x13c9   : > { %v5168_v53 = vpop.f32.mrb[47].mxu1 }
0x13ca   : > { %v5169_v48 = vadd.f32 %v9156_v6, %v5168_v53 }
0x13cb   : > { %v9157_v23 = vpop.f32.mrb[48].mxu0 }
0x13cc   : > { %v5180_v47 = vpack.c.bf16 %v5169_v48, %v5166_v60  ;;  %v9158_v9 = vpop.f32.mrb[49].mxu0 }
0x13cd   : > { %v9159_v30 = vadd.f32 %v9158_v9, %v9157_v23  ;;  %v9160_v10 = vpop.f32.mrb[50].mxu0 }
0x13ce   : > { %v9161_v0 = vpop.f32.mrb[51].mxu0  ;;  %9398 = vmatprep.mubr.msk.bf16.mxu1 %vm4802_vm3, %v5180_v47 }
0x13cf   : > { %v5174_v39 = vadd.f32 %v9392_v25, %v9159_v30  ;;  %v9162_v56 = vadd.f32 %v9161_v0, %v9160_v10 }
0x13d1   : > { %v5177_v40 = vadd.f32 %v9393_v17, %v9162_v56 }
0x13d3   : > { %v5181_v42 = vpack.c.bf16 %v5177_v40, %v5174_v39 }
0x13d5   : > { %9399 = vmatmul.mubr.msk.bf16.vlgmr.msra.gmra.mrb[48].mxu1 %vm4802_vm3, %v5181_v42 }
0x13d6   : > { %9403 = vmatpush3.bf16.msra.mxu1 %v11832_v49 }
0x14a8   : > { %v9400_v26 = vpop.f32.mrb[48].mxu1 }
0x14a9   : > { %v11981_v38 = vadd.f32 %v9400_v26, %v5199_v51  ;;  %v5246_v43 = vpop.f32.mrb[49].mxu1 }
0x14aa   : > { %v11983_v62 = vadd.f32 %v5246_v43, %v5189_v12  ;;  %v9401_v57 = vpop.f32.mrb[50].mxu1 }
0x14ab   : > { %v5249_v29 = vpop.f32.mrb[51].mxu1  ;;  %v5267_v59 = vsel %vm4259_vm7, %v11981_v38, 0.0  ;;  %v11987_v3 = vadd.f32 %v9401_v57, %v5204_v20  ;;  %v5279_v8 = vmul.f32 %v11981_v38, %v11981_v38 }
0x14ac   : > { %v5250_v1 = vadd.f32 %v5249_v29, %v5194_v58  ;;  %5268 = vadd.xlane.f32.xlu0 %v5267_v59  ;;  %v5261_v49 = vsel %vm4259_vm7, %v11983_v62, 0.0  ;;  %v5277_v46 = vmul.f32 %v11983_v62, %v11983_v62 }
0x14ad   : > { %5262 = vadd.xlane.f32.xlu1 %v5261_v49  ;;  %v5270_v32 = vsel %vm4259_vm7, %v11987_v3, 0.0  ;;  %v5280_v14 = vmul.f32 %v11987_v3, %v11987_v3  ;;  %v5287_v45 = vsel %vm4259_vm7, %v5279_v8, 0.0 }
0x14ae   : > { %v5264_v54 = vsel %vm4259_vm7, %v5250_v1, 0.0  ;;  %v5278_v50 = vmul.f32 %v5250_v1, %v5250_v1  ;;  %v5281_v13 = vsel %vm4259_vm7, %v5277_v46, 0.0 }
0x14af   : > { %v5290_v44 = vsel %vm4259_vm7, %v5280_v14, 0.0 }
0x14b0   : > { %5265 = vadd.xlane.f32.xlu0 %v5264_v54  ;;  %v5284_v18 = vsel %vm4259_vm7, %v5278_v50, 0.0 }
0x14b1   : > { %5271 = vadd.xlane.f32.xlu1 %v5270_v32 }
0x14b4   : > { %5282 = vadd.xlane.f32.xlu0 %v5281_v13 }
0x14b5   : > { %5285 = vadd.xlane.f32.xlu1 %v5284_v18 }
0x14b8   : > { %5288 = vadd.xlane.f32.xlu0 %v5287_v45 }
0x14b9   : > { %5291 = vadd.xlane.f32.xlu1 %v5290_v44  ;;  %v5582_v44 = vld [vmem:[%s1394_s1] sm:$0xff] }
0x1539   : > { %v5269_v35 = vpop.xlane.xlu0 %5268 }
0x153a   : > { %v5263_v61 = vpop.xlane.xlu1 %5262  ;;  %v5275_v33 = vmul.f32 0.0625, %v5269_v35  ;;  %v5583_v35 = vld [vmem:[%s1394_s1 + $0x8] sm:$0xff] }
0x153b   : > { %v5273_v21 = vmul.f32 0.0625, %v5263_v61  ;;  %v5584_v61 = vld [vmem:[%s1394_s1 + $0x10] sm:$0xff] }
0x153c   : > { %v5299_v23 = vmul.f32 %v5275_v33, %v5275_v33  ;;  %v5311_v46 = vsub.f32 %v11981_v38, %v5275_v33 }
0x153d   : > { %v5266_v15 = vpop.xlane.xlu0 %5265  ;;  %v5297_v2 = vmul.f32 %v5273_v21, %v5273_v21  ;;  %v5309_v57 = vsub.f32 %v11983_v62, %v5273_v21 }
0x153e   : > { %v5272_v37 = vpop.xlane.xlu1 %5271  ;;  %v5274_v11 = vmul.f32 0.0625, %v5266_v15  ;;  %v5585_v15 = vld [vmem:[%s1394_s1 + $0x18] sm:$0xff] }
0x153f   : > { %v5276_v28 = vmul.f32 0.0625, %v5272_v37 }
0x1540   : > { %v5298_v6 = vmul.f32 %v5274_v11, %v5274_v11  ;;  %v5310_v29 = vsub.f32 %v5250_v1, %v5274_v11 }
0x1541   : > { %v5283_v34 = vpop.xlane.xlu0 %5282  ;;  %v5300_v10 = vmul.f32 %v5276_v28, %v5276_v28  ;;  %v5312_v13 = vsub.f32 %v11987_v3, %v5276_v28 }
0x1542   : > { %v5293_v63 = vmul.f32 0.0625, %v5283_v34  ;;  %v5286_v25 = vpop.xlane.xlu1 %5285 }
0x1543   : > { %v5294_v60 = vmul.f32 0.0625, %v5286_v25 }
0x1544   : > { %v5301_v17 = vsub.f32 %v5293_v63, %v5297_v2 }
0x1545   : > { %v5302_v53 = vsub.f32 %v5294_v60, %v5298_v6  ;;  %v5289_v48 = vpop.xlane.xlu0 %5288 }
0x1546   : > { %v5305_v47 = vmax.f32 %v5301_v17, 0.0  ;;  %v5295_v9 = vmul.f32 0.0625, %v5289_v48  ;;  %v5292_v30 = vpop.xlane.xlu1 %5291 }
0x1547   : > { %v5306_v0 = vmax.f32 %v5302_v53, 0.0  ;;  %v5296_v39 = vmul.f32 0.0625, %v5292_v30  ;;  %v9919_v30 = vld [vmem:[%s12041_s29 + $0x1c] ss:$12 sps:$4 sm:$0xff]  }
0x1548   : > { %v5313_v56 = vadd.f32 1e-05, %v5305_v47  ;;  %v5303_v40 = vsub.f32 %v5295_v9, %v5299_v23  ;;  %v9914_v9 = vld [vmem:[%s12041_s29] ss:$12 sps:$4 sm:$0xff]  }
0x1549   : > { %v5314_v42 = vadd.f32 1e-05, %v5306_v0  ;;  %v5304_v12 = vsub.f32 %v5296_v39, %v5300_v10  ;;  %v9918_v10 = vld [vmem:[%s12041_s29 + $0x20] ss:$12 sps:$4 sm:$0xff]   ;;  %v9921_v0 = vld [vmem:[%s12041_s29 + $0x18] ss:$12 sps:$4 sm:$0xff]  }
0x154a   : > { %10038 = vrsqrt.f32 %v5313_v56  ;;  %v5307_v58 = vmax.f32 %v5303_v40, 0.0  ;;  %v10072_v39 = vld [vmem:[%s10437_s24] sm:$0xff]  }
0x154b   : > { %10040 = vrsqrt.f32 %v5314_v42  ;;  %v5308_v51 = vmax.f32 %v5304_v12, 0.0 }
0x154c   : > { %v5315_v26 = vadd.f32 1e-05, %v5307_v58 }
0x154d   : > { %v5316_v43 = vadd.f32 1e-05, %v5308_v51 }
0x154e   : > { %10042 = vrsqrt.f32 %v5315_v26 }
0x154f   : > { %10044 = vrsqrt.f32 %v5316_v43 }
0x1554   : > { %v10039_v20 = vpop.eup %10038 }
0x1555   : > { %v10041_v59 = vpop.eup %10040  ;;  %v5321_v49 = vmul.f32 %v10039_v20, %v5309_v57 }
0x1556   : > { %v5322_v54 = vmul.f32 %v10041_v59, %v5310_v29 }
0x1557   : > { %v12008_v32 = vadd.f32 %v5321_v49, %v4501_v55 }
0x1558   : > { %v10043_v50 = vpop.eup %10042  ;;  %v12013_v8 = vadd.f32 %v5322_v54, %v4502_v16 }
0x1559   : > { %v10045_v18 = vpop.eup %10044  ;;  %v5323_v62 = vmul.f32 %v10043_v50, %v5311_v46 }
0x155a   : > { %v5329_v1 = vpack.c.bf16 %v12013_v8, %v12008_v32  ;;  %v5324_v14 = vmul.f32 %v10045_v18, %v5312_v13 }
0x155b   : > { %v12019_v38 = vadd.f32 %v5323_v62, %v4503_v5 }
0x155c   : > { %9404 = vmatprep.mubr.msk.bf16.mxu1 %vm4259_vm7, %v5329_v1  ;;  %v12024_v31 = vadd.f32 %v5324_v14, %v4504_v22  ;;  %v9917_v22 = vld [vmem:[%s12041_s29 + $0x8] ss:$12 sps:$4 sm:$0xff]   ;;  %s12107_s29 = scalar_lea.vmem %s13636_s21, %s11871_s17  ;;  %s13638_s17 = sld [smem:[#allocation29_spill]] }
0x155d   : > { %9412 = vmatprep.mubr.msk.bf16.mxu0 %vm4013_vm10, %v9917_v22  ;;  %s13643_s21 = sld [smem:[#allocation20_spill]] }
0x155e   : > { %v5330_v36 = vpack.c.bf16 %v12024_v31, %v12019_v38 }
0x1560   : > { %9405 = vmatmul.mubr.msk.bf16.vlgmr.msra.gmra.mrb[52].mxu1 %vm4259_vm7, %v5330_v36 }
0x1561   : > { %5514 = vmatprep.mubr.bf16.mxu1 %v9916_v7 }
0x1633   : > { %v9406_v55 = vpop.f32.mrb[52].mxu1 }
0x1634   : > { %v5371_v16 = vpop.f32.mrb[53].mxu1 }
0x1635   : > { %v9407_v3 = vpop.f32.mrb[54].mxu1 }
0x1636   : > { %v5387_v45 = vpack.c.bf16 %v9407_v3, %v9406_v55  ;;  %v5374_v41 = vpop.f32.mrb[55].mxu1 }
0x1637   : > { %v5386_v5 = vpack.c.bf16 %v5374_v41, %v5371_v16 }
0x1638   : > { %5410 = vrot.lane.b32.xlu1 %v5387_v45, %s13628_s12 }
0x1639   : > { %5408 = vrot.lane.b32.xlu0 %v5386_v5, %s13628_s12 }
0x163c   : > { %5414 = vrot.lane.b32.xlu1 %v5386_v5, %s13629_s20 }
0x163d   : > { %5390 = vrot.lane.b32.xlu0 %v5386_v5, %s13540_s11 }
0x1640   : > { %5416 = vrot.lane.b32.xlu1 %v5387_v45, %s13629_s20 }
0x1641   : > { %5392 = vrot.lane.b32.xlu0 %v5387_v45, %s13540_s11 }
0x1644   : > { %5420 = vrot.lane.b32.xlu1 %v5386_v5, %s13631_s15 }
0x1645   : > { %5396 = vrot.lane.b32.xlu0 %v5386_v5, %s13619_s9 }
0x1648   : > { %5422 = vrot.lane.b32.xlu1 %v5387_v45, %s13631_s15 }
0x1649   : > { %5398 = vrot.lane.b32.xlu0 %v5387_v45, %s13619_s9 }
0x164c   : > { %5426 = vrot.lane.b32.xlu1 %v5386_v5, %s13632_s27 }
0x164d   : > { %5402 = vrot.lane.b32.xlu0 %v5386_v5, %s13532_s2 }
0x1650   : > { %5428 = vrot.lane.b32.xlu1 %v5387_v45, %s13632_s27 }
0x1651   : > { %5404 = vrot.lane.b32.xlu0 %v5387_v45, %s13532_s2 }
0x1654   : > { %5432 = vrot.lane.b32.xlu1 %v5386_v5, %s13633_s30 }
0x1655   : > { %5434 = vrot.lane.b32.xlu0 %v5387_v45, %s13633_s30 }
0x1658   : > { %5588 = vperm.xlu1 %9629, %v5582_v44  }
0x1659   : > { %5593 = vperm.xlu0 %9630, %v5583_v35  }
0x165c   : > { %5598 = vperm.xlu1 %9629, %v5584_v61  }
0x165d   : > { %5603 = vperm.xlu0 %9630, %v5585_v15  }
0x16aa   : > { %v5411_v21 = vpop.permute.xlu1 %5410 }
0x16ab   : > { %v5409_v37 = vpop.permute.xlu0 %5408 }
0x16ac   : > { %9174 = vmatprep.subr.bf16.mxu1 %v5409_v37 }
0x16ad   : > { %9175 = vmatpush3.bf16.msra.mxu1 %v5386_v5 }
0x16ae   : > { %v5415_v11 = vpop.permute.xlu1 %5414  ;;  %9176 = vmatprep.subr.bf16.mxu1 %v5411_v21 }
0x16af   : > { %v5391_v34 = vpop.permute.xlu0 %5390 }
0x16b1   : > { %9177 = vmatpush3.bf16.msra.mxu1 %v5387_v45 }
0x16b2   : > { %v5417_v33 = vpop.permute.xlu1 %5416  ;;  %9178 = vmatprep.subr.bf16.mxu1 %v5415_v11 }
0x16b3   : > { %v5393_v2 = vpop.permute.xlu0 %5392 }
0x16b5   : > { %9179 = vmatpush3.bf16.msra.mxu1 %v5391_v34 }
0x16b6   : > { %v5421_v63 = vpop.permute.xlu1 %5420  ;;  %9180 = vmatprep.subr.bf16.mxu1 %v5417_v33 }
0x16b7   : > { %v5397_v25 = vpop.permute.xlu0 %5396 }
0x16b9   : > { %9181 = vmatpush3.bf16.msra.mxu1 %v5393_v2 }
0x16ba   : > { %v5423_v6 = vpop.permute.xlu1 %5422  ;;  %9182 = vmatprep.subr.bf16.mxu1 %v5421_v63 }
0x16bb   : > { %v5399_v28 = vpop.permute.xlu0 %5398 }
0x16bd   : > { %9183 = vmatpush3.bf16.msra.mxu1 %v5397_v25 }
0x16be   : > { %v5427_v60 = vpop.permute.xlu1 %5426  ;;  %9184 = vmatprep.subr.bf16.mxu1 %v5423_v6 }
0x16bf   : > { %v5403_v17 = vpop.permute.xlu0 %5402 }
0x16c1   : > { %9185 = vmatpush3.bf16.msra.mxu1 %v5399_v28 }
0x16c2   : > { %v5429_v53 = vpop.permute.xlu1 %5428  ;;  %9186 = vmatprep.subr.bf16.mxu1 %v5427_v60 }
0x16c3   : > { %v5405_v48 = vpop.permute.xlu0 %5404 }
0x16c5   : > { %9187 = vmatpush3.bf16.msra.mxu1 %v5403_v17 }
0x16c6   : > { %v5433_v23 = vpop.permute.xlu1 %5432  ;;  %9188 = vmatprep.subr.bf16.mxu1 %v5429_v53 }
0x16c7   : > { %9408 = vmatprep.subr.bf16.mxu0 %v5433_v23  ;;  %v5435_v47 = vpop.permute.xlu0 %5434 }
0x16c8   : > { %9409 = vmatpush3.bf16.msra.mxu0 %v5433_v23 }
0x16c9   : > { %9189 = vmatpush3.bf16.msra.mxu1 %v5405_v48  ;;  %9410 = vmatprep.subr.bf16.mxu0 %v5435_v47 }
0x16cc   : > { %5515 = vmatmul.mubr.bf16.vlgmr.msra.gmra.mrb[56].mxu1 %v9914_v9  ;;  %9411 = vmatpush3.bf16.msra.mxu0 %v5435_v47 }
0x16cd   : > { %5522 = vmatprep.mubr.bf16.mxu1 %v9919_v30  ;;  %9416 = vmatprep.subr.bf16.mxu0 %v11896_v27 }
0x16cf   : > { %9413 = vmatmul.mubr.msk.bf16.vlgmr.msra.gmra.mrb[52].mxu0 %vm4013_vm10, %v9918_v10 }
0x16d0   : > { %9417 = vmatpush3.bf16.msra.mxu0 %v11896_v27 }
0x16d1   : > { %9514 = vmatprep.subr.msk.bf16.mxu0 %vm2066_vm0, %v11901_v19 }
0x16d4   : > { %5523 = vmatmul.mubr.bf16.gmra.mrb[60].mxu1 %v9921_v0  ;;  %9419 = vmatpush3.bf16.msra.mxu0 %v11907_v24 }
0x16d5   : > { %9424 = vmatprep.subr.bf16.mxu0 %v10072_v39 }
0x16d7   : > { %v5589_v14 = vpop.permute.xlu1 %5588 }
0x16d8   : > { %v5594_v36 = vpop.permute.xlu0 %5593 }
0x16db   : > { %v5599_v55 = vpop.permute.xlu1 %5598 }
0x16dc   : > { %v5604_v7 = vpop.permute.xlu0 %5603 }
0x179f   : > { %v9190_v56 = vpop.f32.mrb[56].mxu1 }
0x17a0   : > { %v9191_v40 = vpop.f32.mrb[57].mxu1 }
0x17a1   : > { %v9192_v42 = vadd.f32 %v9191_v40, %v9190_v56  ;;  %v9193_v12 = vpop.f32.mrb[58].mxu1 }
0x17a2   : > { %v9194_v58 = vpop.f32.mrb[59].mxu1  ;;  %v9414_v51 = vpop.f32.mrb[52].mxu0 }
0x17a3   : > { %v9195_v26 = vadd.f32 %v9194_v58, %v9193_v12  ;;  %v5565_v43 = vpop.f32.mrb[53].mxu0 }
0x17a4   : > { %v5566_v57 = vadd.f32 %v9192_v42, %v5565_v43  ;;  %v9415_v20 = vpop.f32.mrb[54].mxu0 }
0x17a5   : > { %v5568_v29 = vpop.f32.mrb[55].mxu0 }
0x17a6   : > { %v5569_v27 = vadd.f32 %v9195_v26, %v5568_v29 }
0x17a7   : > { %v9196_v59 = vpop.f32.mrb[60].mxu1 }
0x17a8   : > { %v5580_v49 = vpack.c.bf16 %v5569_v27, %v5566_v57  ;;  %v9197_v19 = vpop.f32.mrb[61].mxu1 }
0x17a9   : > { %v9198_v54 = vadd.f32 %v9197_v19, %v9196_v59  ;;  %v9199_v46 = vpop.f32.mrb[62].mxu1 }
0x17aa   : > { %v9200_v50 = vpop.f32.mrb[63].mxu1  ;;  %9420 = vmatprep.mubr.msk.bf16.mxu0 %vm4802_vm3, %v5580_v49 }
0x17ab   : > { %v5574_v13 = vadd.f32 %v9414_v51, %v9198_v54  ;;  %v9201_v18 = vadd.f32 %v9200_v50, %v9199_v46 }
0x17ad   : > { %v5577_v62 = vadd.f32 %v9415_v20, %v9201_v18 }
0x17af   : > { %v5581_v1 = vpack.c.bf16 %v5577_v62, %v5574_v13 }
0x17b1   : > { %9421 = vmatmul.mubr.msk.bf16.vlgmr.msra.gmra.mrb[56].mxu0 %vm4802_vm3, %v5581_v1 }
0x17b2   : > { %9425 = vmatpush3.bf16.msra.mxu0 %v10072_v39 }
0x1884   : > { %v9422_v16 = vpop.f32.mrb[56].mxu0 }
0x1885   : > { %v12067_v3 = vadd.f32 %v9422_v16, %v5599_v55  ;;  %v5646_v45 = vpop.f32.mrb[57].mxu0 }
0x1886   : > { %v12069_v41 = vadd.f32 %v5646_v45, %v5589_v14  ;;  %v9423_v5 = vpop.f32.mrb[58].mxu0 }
0x1887   : > { %v5649_v22 = vpop.f32.mrb[59].mxu0  ;;  %v5667_v44 = vsel %vm4259_vm7, %v12067_v3, 0.0  ;;  %v12073_v35 = vadd.f32 %v9423_v5, %v5604_v7  ;;  %v5679_v2 = vmul.f32 %v12067_v3, %v12067_v3 }
0x1888   : > { %v5650_v61 = vadd.f32 %v5649_v22, %v5594_v36  ;;  %5668 = vadd.xlane.f32.xlu0 %v5667_v44  ;;  %v5661_v15 = vsel %vm4259_vm7, %v12069_v41, 0.0  ;;  %v5677_v37 = vmul.f32 %v12069_v41, %v12069_v41 }
0x1889   : > { %5662 = vadd.xlane.f32.xlu1 %v5661_v15  ;;  %v5670_v11 = vsel %vm4259_vm7, %v12073_v35, 0.0  ;;  %v5680_v25 = vmul.f32 %v12073_v35, %v12073_v35  ;;  %v5687_v6 = vsel %vm4259_vm7, %v5679_v2, 0.0 }
0x188a   : > { %v5664_v21 = vsel %vm4259_vm7, %v5650_v61, 0.0  ;;  %v5678_v34 = vmul.f32 %v5650_v61, %v5650_v61  ;;  %v5681_v33 = vsel %vm4259_vm7, %v5677_v37, 0.0 }
0x188b   : > { %v5690_v28 = vsel %vm4259_vm7, %v5680_v25, 0.0 }
0x188c   : > { %5665 = vadd.xlane.f32.xlu0 %v5664_v21  ;;  %v5684_v63 = vsel %vm4259_vm7, %v5678_v34, 0.0 }
0x188d   : > { %5671 = vadd.xlane.f32.xlu1 %v5670_v11 }
0x1890   : > { %5682 = vadd.xlane.f32.xlu0 %v5681_v33 }
0x1891   : > { %5685 = vadd.xlane.f32.xlu1 %v5684_v63 }
0x1894   : > { %5688 = vadd.xlane.f32.xlu0 %v5687_v6 }
0x1895   : > { %5691 = vadd.xlane.f32.xlu1 %v5690_v28  ;;  %v9924_v28 = vld [vmem:[%s12107_s29 + $0x4] ss:$12 sps:$4 sm:$0xff]  }
0x1896   : > { %5914 = vmatprep.mubr.bf16.mxu1 %v9924_v28 }
0x1915   : > { %v5669_v60 = vpop.xlane.xlu0 %5668 }
0x1916   : > { %v5663_v17 = vpop.xlane.xlu1 %5662  ;;  %v5675_v30 = vmul.f32 0.0625, %v5669_v60  ;;  %v9925_v60 = vld [vmem:[%s12107_s29 + $0x8] ss:$12 sps:$4 sm:$0xff]  }
0x1917   : > { %v5673_v48 = vmul.f32 0.0625, %v5663_v17 }
0x1918   : > { %v5699_v26 = vmul.f32 %v5675_v30, %v5675_v30  ;;  %v5711_v5 = vsub.f32 %v12067_v3, %v5675_v30 }
0x1919   : > { %v5666_v53 = vpop.xlane.xlu0 %5665  ;;  %v5697_v10 = vmul.f32 %v5673_v48, %v5673_v48  ;;  %v5709_v1 = vsub.f32 %v12069_v41, %v5673_v48 }
0x191a   : > { %v5672_v23 = vpop.xlane.xlu1 %5671  ;;  %v5674_v47 = vmul.f32 0.0625, %v5666_v53 }
0x191b   : > { %v5676_v40 = vmul.f32 0.0625, %v5672_v23 }
0x191c   : > { %v5698_v56 = vmul.f32 %v5674_v47, %v5674_v47  ;;  %v5710_v36 = vsub.f32 %v5650_v61, %v5674_v47 }
0x191d   : > { %v5683_v9 = vpop.xlane.xlu0 %5682  ;;  %v5700_v29 = vmul.f32 %v5676_v40, %v5676_v40  ;;  %v5712_v44 = vsub.f32 %v12073_v35, %v5676_v40 }
0x191e   : > { %v5693_v0 = vmul.f32 0.0625, %v5683_v9  ;;  %v5686_v39 = vpop.xlane.xlu1 %5685 }
0x191f   : > { %v5694_v42 = vmul.f32 0.0625, %v5686_v39 }
0x1920   : > { %v5701_v12 = vsub.f32 %v5693_v0, %v5697_v10 }
0x1921   : > { %v5702_v58 = vsub.f32 %v5694_v42, %v5698_v56  ;;  %v5689_v51 = vpop.xlane.xlu0 %5688 }
0x1922   : > { %v5705_v43 = vmax.f32 %v5701_v12, 0.0  ;;  %v5695_v57 = vmul.f32 0.0625, %v5689_v51  ;;  %v5692_v20 = vpop.xlane.xlu1 %5691 }
0x1923   : > { %v5706_v27 = vmax.f32 %v5702_v58, 0.0  ;;  %v5696_v59 = vmul.f32 0.0625, %v5692_v20 }
0x1924   : > { %v5713_v49 = vadd.f32 1e-05, %v5705_v43  ;;  %v5703_v19 = vsub.f32 %v5695_v57, %v5699_v26 }
0x1925   : > { %v5714_v54 = vadd.f32 1e-05, %v5706_v27  ;;  %v5704_v46 = vsub.f32 %v5696_v59, %v5700_v29  ;;  %v9922_v29 = vld [vmem:[%s12107_s29] ss:$12 sps:$4 sm:$0xff]   ;;  %v9927_v27 = vld [vmem:[%s12107_s29 + $0x1c] ss:$12 sps:$4 sm:$0xff]  }
0x1926   : > { %10046 = vrsqrt.f32 %v5713_v49  ;;  %v5707_v50 = vmax.f32 %v5703_v19, 0.0  ;;  %v9926_v59 = vld [vmem:[%s12107_s29 + $0x20] ss:$12 sps:$4 sm:$0xff]   ;;  %v9929_v19 = vld [vmem:[%s12107_s29 + $0x18] ss:$12 sps:$4 sm:$0xff]  }
0x1927   : > { %10048 = vrsqrt.f32 %v5714_v54  ;;  %v5708_v13 = vmax.f32 %v5704_v46, 0.0  ;;  %v10073_v49 = vld [vmem:[%s13626_s6] sm:$0xff]   ;;  %v10074_v54 = vld [vmem:[%s13626_s6 + $0x8] ss:$0 sps:$4 sm:$0xff]  }
0x1928   : > { %v5715_v18 = vadd.f32 1e-05, %v5707_v50 }
0x1929   : > { %v5716_v62 = vadd.f32 1e-05, %v5708_v13 }
0x192a   : > { %10050 = vrsqrt.f32 %v5715_v18 }
0x192b   : > { %10052 = vrsqrt.f32 %v5716_v62 }
0x1930   : > { %v10047_v14 = vpop.eup %10046 }
0x1931   : > { %v10049_v55 = vpop.eup %10048  ;;  %v5721_v16 = vmul.f32 %v10047_v14, %v5709_v1 }
0x1932   : > { %v5722_v45 = vmul.f32 %v10049_v55, %v5710_v36 }
0x1933   : > { %v5725_v7 = vmax.f32 %v5721_v16, 0.0 }
0x1934   : > { %v10051_v22 = vpop.eup %10050  ;;  %v5726_v15 = vmax.f32 %v5722_v45, 0.0 }
0x1935   : > { %v10053_v21 = vpop.eup %10052  ;;  %v5723_v37 = vmul.f32 %v10051_v22, %v5711_v5 }
0x1936   : > { %v5729_v11 = vpack.c.bf16 %v5726_v15, %v5725_v7  ;;  %v5724_v34 = vmul.f32 %v10053_v21, %v5712_v44 }
0x1937   : > { %v5727_v33 = vmax.f32 %v5723_v37, 0.0 }
0x1938   : > { %9426 = vmatprep.mubr.msk.bf16.mxu0 %vm4259_vm7, %v5729_v11  ;;  %v5728_v41 = vmax.f32 %v5724_v34, 0.0 }
0x193a   : > { %v5730_v2 = vpack.c.bf16 %v5728_v41, %v5727_v33 }
0x193c   : > { %9427 = vmatmul.mubr.msk.bf16.vlgmr.msra.gmra.mrb[60].mxu0 %vm4259_vm7, %v5730_v2 }
0x193d   : > { %9434 = vmatprep.mubr.msk.bf16.mxu0 %vm4013_vm10, %v9925_v60 }
0x1a0f   : > { %v9428_v61 = vpop.f32.mrb[60].mxu0 }
0x1a10   : > { %v5771_v3 = vpop.f32.mrb[61].mxu0 }
0x1a11   : > { %v9429_v63 = vpop.f32.mrb[62].mxu0 }
0x1a12   : > { %v5787_v25 = vpack.c.bf16 %v9429_v63, %v9428_v61  ;;  %v5774_v6 = vpop.f32.mrb[63].mxu0 }
0x1a13   : > { %v5786_v35 = vpack.c.bf16 %v5774_v6, %v5771_v3 }
0x1a14   : > { %5810 = vrot.lane.b32.xlu1 %v5787_v25, %s13628_s12 }
0x1a15   : > { %5808 = vrot.lane.b32.xlu0 %v5786_v35, %s13628_s12  ;;  %s1404_s12 = scalar_lea.vmem %s13637_s25, %s11771_s7  ;;  %s13641_s7 = sld [smem:[#allocation18_spill]] }
0x1a16   : > { %v5982_v17 = vld [vmem:[%s1404_s12] sm:$0xff]  ;;  %v5983_v53 = vld [vmem:[%s1404_s12 + $0x8] sm:$0xff]  ;;  %v5984_v48 = vld [vmem:[%s1404_s12 + $0x10] sm:$0xff]  ;;  %s13644_s25 = smov 92  }
0x1a17   : > { %v5985_v23 = vld [vmem:[%s1404_s12 + $0x18] sm:$0xff]  ;;  %s13645_s12 = smov 91  }
0x1a18   : > { %5814 = vrot.lane.b32.xlu1 %v5786_v35, %s13629_s20 }
0x1a19   : > { %5790 = vrot.lane.b32.xlu0 %v5786_v35, %s13540_s11 }
0x1a1c   : > { %5816 = vrot.lane.b32.xlu1 %v5787_v25, %s13629_s20  ;;  %s9517_s20 = smul.u32 24, %s13790_s10  ;;  %s13642_s10 = sld [smem:[#allocation19_spill]] }
0x1a1d   : > { %5792 = vrot.lane.b32.xlu0 %v5787_v25, %s13540_s11 }
0x1a20   : > { %5820 = vrot.lane.b32.xlu1 %v5786_v35, %s13631_s15 }
0x1a21   : > { %5796 = vrot.lane.b32.xlu0 %v5786_v35, %s13619_s9 }
0x1a22   : > { %s1419_s29 = scalar_lea.vmem %s13642_s10, %s11537_s5  ;;  %s13653_s10 = smov 101  }
0x1a24   : > { %5822 = vrot.lane.b32.xlu1 %v5787_v25, %s13631_s15 }
0x1a25   : > { %5798 = vrot.lane.b32.xlu0 %v5787_v25, %s13619_s9 }
0x1a28   : > { %5826 = vrot.lane.b32.xlu1 %v5786_v35, %s13632_s27 }
0x1a29   : > { %5802 = vrot.lane.b32.xlu0 %v5786_v35, %s13532_s2 }
0x1a2c   : > { %5828 = vrot.lane.b32.xlu1 %v5787_v25, %s13632_s27  ;;  %s13640_s27 = smov 117  }
0x1a2d   : > { %5804 = vrot.lane.b32.xlu0 %v5787_v25, %s13532_s2 }
0x1a30   : > { %5832 = vrot.lane.b32.xlu1 %v5786_v35, %s13633_s30 }
0x1a31   : > { %5834 = vrot.lane.b32.xlu0 %v5787_v25, %s13633_s30  ;;  %s13639_s30 = sld [smem:[#allocation17_spill]] }
0x1a34   : > { %5988 = vperm.xlu1 %9629, %v5982_v17  }
0x1a35   : > { %5993 = vperm.xlu0 %9630, %v5983_v53  }
0x1a37   : > { %s12183_s1 = scalar_lea.vmem %s13639_s30, %s9517_s20  ;;  %s1423_s30 = scalar_lea.vmem %s13643_s21, %s11537_s5 }
0x1a38   : > { %5998 = vperm.xlu1 %9629, %v5984_v48   ;;  %s13650_s20 = smov 103   ;;  %s13654_s21 = smov 102  }
0x1a39   : > { %6003 = vperm.xlu0 %9630, %v5985_v23  }
0x1a86   : > { %v5811_v47 = vpop.permute.xlu1 %5810 }
0x1a87   : > { %v5809_v9 = vpop.permute.xlu0 %5808 }
0x1a88   : > { %9213 = vmatprep.subr.bf16.mxu1 %v5809_v9 }
0x1a89   : > { %9214 = vmatpush3.bf16.msra.mxu1 %v5786_v35 }
0x1a8a   : > { %v5815_v30 = vpop.permute.xlu1 %5814  ;;  %9215 = vmatprep.subr.bf16.mxu1 %v5811_v47 }
0x1a8b   : > { %v5791_v10 = vpop.permute.xlu0 %5790 }
0x1a8d   : > { %9216 = vmatpush3.bf16.msra.mxu1 %v5787_v25 }
0x1a8e   : > { %v5817_v0 = vpop.permute.xlu1 %5816  ;;  %9217 = vmatprep.subr.bf16.mxu1 %v5815_v30 }
0x1a8f   : > { %v5793_v39 = vpop.permute.xlu0 %5792 }
0x1a91   : > { %9218 = vmatpush3.bf16.msra.mxu1 %v5791_v10 }
0x1a92   : > { %v5821_v56 = vpop.permute.xlu1 %5820  ;;  %9219 = vmatprep.subr.bf16.mxu1 %v5817_v0 }
0x1a93   : > { %v5797_v40 = vpop.permute.xlu0 %5796 }
0x1a95   : > { %9220 = vmatpush3.bf16.msra.mxu1 %v5793_v39 }
0x1a96   : > { %v5823_v42 = vpop.permute.xlu1 %5822  ;;  %9221 = vmatprep.subr.bf16.mxu1 %v5821_v56 }
0x1a97   : > { %v5799_v12 = vpop.permute.xlu0 %5798 }
0x1a99   : > { %9222 = vmatpush3.bf16.msra.mxu1 %v5797_v40 }
0x1a9a   : > { %v5827_v58 = vpop.permute.xlu1 %5826  ;;  %9223 = vmatprep.subr.bf16.mxu1 %v5823_v42 }
0x1a9b   : > { %v5803_v51 = vpop.permute.xlu0 %5802 }
0x1a9d   : > { %9224 = vmatpush3.bf16.msra.mxu1 %v5799_v12 }
0x1a9e   : > { %v5829_v26 = vpop.permute.xlu1 %5828  ;;  %9225 = vmatprep.subr.bf16.mxu1 %v5827_v58  ;;  %v9930_v58 = vld [vmem:[%s13638_s17] sm:$0xff]   ;;  %s13646_s17 = smov 90  }
0x1a9f   : > { %v5805_v43 = vpop.permute.xlu0 %5804 }
0x1aa1   : > { %9226 = vmatpush3.bf16.msra.mxu1 %v5803_v51 }
0x1aa2   : > { %v5833_v57 = vpop.permute.xlu1 %5832  ;;  %9227 = vmatprep.subr.bf16.mxu1 %v5829_v26 }
0x1aa3   : > { %9430 = vmatprep.subr.bf16.mxu0 %v5833_v57  ;;  %v5835_v20 = vpop.permute.xlu0 %5834 }
0x1aa4   : > { %9431 = vmatpush3.bf16.msra.mxu0 %v5833_v57 }
0x1aa5   : > { %9228 = vmatpush3.bf16.msra.mxu1 %v5805_v43  ;;  %9432 = vmatprep.subr.bf16.mxu0 %v5835_v20 }
0x1aa8   : > { %5915 = vmatmul.mubr.bf16.vlgmr.msra.gmra.mrb[64].mxu1 %v9922_v29  ;;  %9433 = vmatpush3.bf16.msra.mxu0 %v5835_v20 }
0x1aa9   : > { %5922 = vmatprep.mubr.bf16.mxu1 %v9927_v27  ;;  %9438 = vmatprep.subr.bf16.mxu0 %v10073_v49 }
0x1aab   : > { %9435 = vmatmul.mubr.msk.bf16.vlgmr.msra.gmra.mrb[64].mxu0 %vm4013_vm10, %v9926_v59 }
0x1aac   : > { %9439 = vmatpush3.bf16.msra.mxu0 %v10073_v49 }
0x1aad   : > { %9515 = vmatprep.subr.msk.bf16.mxu0 %vm2066_vm0, %v10074_v54 }
0x1ab0   : > { %5923 = vmatmul.mubr.bf16.gmra.mrb[68].mxu1 %v9929_v19  ;;  %9441 = vmatpush3.bf16.msra.mxu0 %v11907_v24 }
0x1ab1   : > { %9446 = vmatprep.subr.bf16.mxu0 %v9930_v58 }
0x1ab3   : > { %v5989_v41 = vpop.permute.xlu1 %5988 }
0x1ab4   : > { %v5994_v2 = vpop.permute.xlu0 %5993 }
0x1ab7   : > { %v5999_v61 = vpop.permute.xlu1 %5998 }
0x1ab8   : > { %v6004_v28 = vpop.permute.xlu0 %6003 }
0x1b7b   : > { %v9229_v46 = vpop.f32.mrb[64].mxu1 }
0x1b7c   : > { %v9230_v50 = vpop.f32.mrb[65].mxu1 }
0x1b7d   : > { %v9231_v13 = vadd.f32 %v9230_v50, %v9229_v46  ;;  %v9232_v18 = vpop.f32.mrb[66].mxu1 }
0x1b7e   : > { %v9233_v62 = vpop.f32.mrb[67].mxu1  ;;  %v9436_v1 = vpop.f32.mrb[64].mxu0 }
0x1b7f   : > { %v9234_v14 = vadd.f32 %v9233_v62, %v9232_v18  ;;  %v5965_v36 = vpop.f32.mrb[65].mxu0 }
0x1b80   : > { %v5966_v55 = vadd.f32 %v9231_v13, %v5965_v36  ;;  %v9437_v16 = vpop.f32.mrb[66].mxu0 }
0x1b81   : > { %v5968_v45 = vpop.f32.mrb[67].mxu0 }
0x1b82   : > { %v5969_v5 = vadd.f32 %v9234_v14, %v5968_v45 }
0x1b83   : > { %v9235_v7 = vpop.f32.mrb[68].mxu1 }
0x1b84   : > { %v5980_v22 = vpack.c.bf16 %v5969_v5, %v5966_v55  ;;  %v9236_v44 = vpop.f32.mrb[69].mxu1 }
0x1b85   : > { %v9237_v15 = vadd.f32 %v9236_v44, %v9235_v7  ;;  %v9238_v21 = vpop.f32.mrb[70].mxu1 }
0x1b86   : > { %v9239_v37 = vpop.f32.mrb[71].mxu1  ;;  %9442 = vmatprep.mubr.msk.bf16.mxu0 %vm4802_vm3, %v5980_v22 }
0x1b87   : > { %v5974_v24 = vadd.f32 %v9436_v1, %v9237_v15  ;;  %v9240_v11 = vadd.f32 %v9239_v37, %v9238_v21 }
0x1b89   : > { %v5977_v34 = vadd.f32 %v9437_v16, %v9240_v11 }
0x1b8b   : > { %v5981_v33 = vpack.c.bf16 %v5977_v34, %v5974_v24 }
0x1b8d   : > { %9443 = vmatmul.mubr.msk.bf16.vlgmr.msra.gmra.mrb[68].mxu0 %vm4802_vm3, %v5981_v33  ;;  %vm13663_vm3 = vcmask 1022976  }
0x1b8e   : > { %9447 = vmatpush3.bf16.msra.mxu0 %v9930_v58 }
0x1c60   : > { %v9444_v3 = vpop.f32.mrb[68].mxu0 }
0x1c61   : > { %v12131_v63 = vadd.f32 %v9444_v3, %v5999_v61  ;;  %v6046_v25 = vpop.f32.mrb[69].mxu0 }
0x1c62   : > { %v12133_v6 = vadd.f32 %v6046_v25, %v5989_v41  ;;  %v9445_v35 = vpop.f32.mrb[70].mxu0 }
0x1c63   : > { %v6049_v60 = vpop.f32.mrb[71].mxu0  ;;  %v6067_v17 = vsel %vm4259_vm7, %v12131_v63, 0.0  ;;  %v12137_v53 = vadd.f32 %v9445_v35, %v6004_v28  ;;  %v6079_v39 = vmul.f32 %v12131_v63, %v12131_v63 }
0x1c64   : > { %v12139_v48 = vadd.f32 %v6049_v60, %v5994_v2  ;;  %6068 = vadd.xlane.f32.xlu0 %v6067_v17  ;;  %v6061_v23 = vsel %vm4259_vm7, %v12133_v6, 0.0  ;;  %v6077_v9 = vmul.f32 %v12133_v6, %v12133_v6 }
0x1c65   : > { %6062 = vadd.xlane.f32.xlu1 %v6061_v23  ;;  %v6070_v30 = vsel %vm4259_vm7, %v12137_v53, 0.0  ;;  %v6080_v40 = vmul.f32 %v12137_v53, %v12137_v53  ;;  %v6087_v42 = vsel %vm4259_vm7, %v6079_v39, 0.0 }
0x1c66   : > { %v6064_v47 = vsel %vm4259_vm7, %v12139_v48, 0.0  ;;  %v6078_v10 = vmul.f32 %v12139_v48, %v12139_v48  ;;  %v6081_v0 = vsel %vm4259_vm7, %v6077_v9, 0.0 }
0x1c67   : > { %v6090_v12 = vsel %vm4259_vm7, %v6080_v40, 0.0 }
0x1c68   : > { %6065 = vadd.xlane.f32.xlu0 %v6064_v47  ;;  %v6084_v56 = vsel %vm4259_vm7, %v6078_v10, 0.0 }
0x1c69   : > { %6071 = vadd.xlane.f32.xlu1 %v6070_v30 }
0x1c6c   : > { %6082 = vadd.xlane.f32.xlu0 %v6081_v0 }
0x1c6d   : > { %6085 = vadd.xlane.f32.xlu1 %v6084_v56 }
0x1c70   : > { %6088 = vadd.xlane.f32.xlu0 %v6087_v42 }
0x1c71   : > { %6091 = vadd.xlane.f32.xlu1 %v6090_v12 }
0x1cf1   : > { %v6069_v51 = vpop.xlane.xlu0 %6068 }
0x1cf2   : > { %v6063_v26 = vpop.xlane.xlu1 %6062  ;;  %v6075_v59 = vmul.f32 0.0625, %v6069_v51 }
0x1cf3   : > { %v6073_v57 = vmul.f32 0.0625, %v6063_v26 }
0x1cf4   : > { %v6099_v14 = vmul.f32 %v6075_v59, %v6075_v59  ;;  %v6111_v35 = vsub.f32 %v12131_v63, %v6075_v59 }
0x1cf5   : > { %v6066_v43 = vpop.xlane.xlu0 %6065  ;;  %v6097_v49 = vmul.f32 %v6073_v57, %v6073_v57  ;;  %v6109_v33 = vsub.f32 %v12133_v6, %v6073_v57 }
0x1cf6   : > { %v6072_v20 = vpop.xlane.xlu1 %6071  ;;  %v6074_v29 = vmul.f32 0.0625, %v6066_v43 }
0x1cf7   : > { %v6076_v50 = vmul.f32 0.0625, %v6072_v20 }
0x1cf8   : > { %v6098_v46 = vmul.f32 %v6074_v29, %v6074_v29  ;;  %v6110_v2 = vsub.f32 %v12139_v48, %v6074_v29 }
0x1cf9   : > { %v6083_v27 = vpop.xlane.xlu0 %6082  ;;  %v6100_v45 = vmul.f32 %v6076_v50, %v6076_v50  ;;  %v6112_v17 = vsub.f32 %v12137_v53, %v6076_v50 }
0x1cfa   : > { %v6093_v19 = vmul.f32 0.0625, %v6083_v27  ;;  %v6086_v54 = vpop.xlane.xlu1 %6085 }
0x1cfb   : > { %v6094_v13 = vmul.f32 0.0625, %v6086_v54 }
0x1cfc   : > { %v6101_v18 = vsub.f32 %v6093_v19, %v6097_v49 }
0x1cfd   : > { %v6102_v62 = vsub.f32 %v6094_v13, %v6098_v46  ;;  %v6089_v1 = vpop.xlane.xlu0 %6088  ;;  %v9931_v46 = vld [vmem:[%s12183_s1] ss:$12 sps:$4 sm:$0xff]  }
0x1cfe   : > { %v6105_v36 = vmax.f32 %v6101_v18, 0.0  ;;  %v6095_v55 = vmul.f32 0.0625, %v6089_v1  ;;  %v6092_v16 = vpop.xlane.xlu1 %6091  ;;  %v9934_v18 = vld [vmem:[%s12183_s1 + $0x8] ss:$12 sps:$4 sm:$0xff]  }
0x1cff   : > { %v6106_v5 = vmax.f32 %v6102_v62, 0.0  ;;  %v6096_v7 = vmul.f32 0.0625, %v6092_v16  ;;  %v9935_v62 = vld [vmem:[%s10452_s8] sm:$0xff]   ;;  %v9936_v1 = vld [vmem:[%s10452_s8 + $0x8] sm:$0xff]  }
0x1d00   : > { %v6113_v22 = vadd.f32 1e-05, %v6105_v36  ;;  %v6103_v44 = vsub.f32 %v6095_v55, %v6099_v14  ;;  %v9937_v14 = vld [vmem:[%s10452_s8 + $0x10] sm:$0xff]   ;;  %v9938_v36 = vld [vmem:[%s10452_s8 + $0x18] sm:$0xff]   ;;  %v9939_v55 = vld [vmem:[%s10452_s8 + $0x20] sm:$0xff]  }
0x1d01   : > { %v6114_v15 = vadd.f32 1e-05, %v6106_v5  ;;  %v6104_v21 = vsub.f32 %v6096_v7, %v6100_v45 }
0x1d02   : > { %10054 = vrsqrt.f32 %v6113_v22  ;;  %v6107_v37 = vmax.f32 %v6103_v44, 0.0 }
0x1d03   : > { %10056 = vrsqrt.f32 %v6114_v15  ;;  %v6108_v24 = vmax.f32 %v6104_v21, 0.0 }
0x1d04   : > { %v6115_v11 = vadd.f32 1e-05, %v6107_v37 }
0x1d05   : > { %v6116_v34 = vadd.f32 1e-05, %v6108_v24 }
0x1d06   : > { %10058 = vrsqrt.f32 %v6115_v11 }
0x1d07   : > { %10060 = vrsqrt.f32 %v6116_v34 }
0x1d0c   : > { %v10055_v41 = vpop.eup %10054 }
0x1d0d   : > { %v10057_v61 = vpop.eup %10056  ;;  %v6121_v3 = vmul.f32 %v10055_v41, %v6109_v33 }
0x1d0e   : > { %v6122_v25 = vmul.f32 %v10057_v61, %v6110_v2 }
0x1d0f   : > { %v6125_v28 = vadd.f32 %v6121_v3, %v12008_v32 }
0x1d10   : > { %v10059_v60 = vpop.eup %10058  ;;  %v6126_v23 = vadd.f32 %v6122_v25, %v12013_v8 }
0x1d11   : > { %v10061_v47 = vpop.eup %10060  ;;  %v6123_v9 = vmul.f32 %v10059_v60, %v6111_v35 }
0x1d12   : > { %v6129_v30 = vpack.c.bf16 %v6126_v23, %v6125_v28  ;;  %v6124_v10 = vmul.f32 %v10061_v47, %v6112_v17 }
0x1d13   : > { %v6127_v6 = vadd.f32 %v6123_v9, %v12019_v38  ;;  %v9933_v38 = vld [vmem:[%s12183_s1 + $0x4] ss:$12 sps:$4 sm:$0xff]   ;;  %s13651_s1 = smov 86  }
0x1d14   : > { %9448 = vmatprep.mubr.msk.bf16.mxu0 %vm4259_vm7, %v6129_v30  ;;  %v6128_v48 = vadd.f32 %v6124_v10, %v12024_v31  ;;  %6300 = vmatprep.mubr.bf16.mxu1 %v9933_v38  ;;  %v9954_v38 = vld [vmem:[%s13515_s3 + $0x4c] ss:$12 sps:$4 sm:$0xff]  }
0x1d16   : > { %v6130_v0 = vpack.c.bf16 %v6128_v48, %v6127_v6  ;;  %v9940_v6 = vld [vmem:[%s13515_s3] ss:$12 sps:$4 sm:$0xff]   ;;  %v9942_v48 = vld [vmem:[%s13515_s3 + $0x4] ss:$12 sps:$4 sm:$0xff]  }
0x1d17   : > { %6565 = vmatprep.subr.bf16.mxu0 %v9942_v48 }
0x1d18   : > { %9449 = vmatmul.mubr.msk.bf16.vlgmr.msra.gmra.mrb[72].mxu0 %vm4259_vm7, %v6130_v0  ;;  %v9943_v0 = vld [vmem:[%s13515_s3 + $0x8] ss:$12 sps:$4 sm:$0xff]  }
0x1d19   : > { %6597 = vmatprep.mubr.bf16.mxu0 %v13477_v4  ;;  %6566 = vmatpush1.bf16.msra.mxu0 %v9940_v6 }
0x1deb   : > { %v9450_v32 = vpop.f32.mrb[72].mxu0 }
0x1dec   : > { %v6179_v63 = vpop.f32.mrb[73].mxu0 }
0x1ded   : > { %v9451_v8 = vpop.f32.mrb[74].mxu0 }
0x1dee   : > { %v6195_v53 = vpack.c.bf16 %v9451_v8, %v9450_v32  ;;  %v6182_v39 = vpop.f32.mrb[75].mxu0  ;;  %v9946_v32 = vld [vmem:[%s13515_s3 + $0x1c] ss:$12 sps:$4 sm:$0xff]   ;;  %v9944_v8 = vld [vmem:[%s13515_s3 + $0x18] ss:$12 sps:$4 sm:$0xff]  }
0x1def   : > { %v6194_v56 = vpack.c.bf16 %v6182_v39, %v6179_v63  ;;  %v9947_v63 = vld [vmem:[%s13515_s3 + $0x20] ss:$12 sps:$4 sm:$0xff]   ;;  %6567 = vmatprep.subr.bf16.mxu0 %v9946_v32  ;;  %v9951_v39 = vld [vmem:[%s13515_s3 + $0x38] ss:$12 sps:$4 sm:$0xff]  }
0x1df0   : > { %6218 = vrot.lane.b32.xlu1 %v6195_v53, %s13640_s27  ;;  %6568 = vmatpush1.bf16.msra.mxu0 %v9944_v8 }
0x1df1   : > { %6216 = vrot.lane.b32.xlu0 %v6194_v56, %s13640_s27  ;;  %s13647_s27 = smov 124  }
0x1df4   : > { %6222 = vrot.lane.b32.xlu1 %v6194_v56, %s13631_s15 }
0x1df5   : > { %6198 = vrot.lane.b32.xlu0 %v6194_v56, %s13540_s11 }
0x1df8   : > { %6224 = vrot.lane.b32.xlu1 %v6195_v53, %s13631_s15  ;;  %s1414_s15 = scalar_lea.vmem %s13641_s7, %s11215_s18  ;;  %s13648_s7 = smov 105  }
0x1df9   : > { %6200 = vrot.lane.b32.xlu0 %v6195_v53, %s13540_s11  ;;  %v6361_v31 = vld [vmem:[%s1414_s15] sm:$0xff]  ;;  %v6362_v40 = vld [vmem:[%s1414_s15 + $0x8] sm:$0xff]  ;;  %s13652_s15 = smov 84  }
0x1dfc   : > { %6228 = vrot.lane.b32.xlu1 %v6194_v56, %s13541_s16 }
0x1dfd   : > { %6204 = vrot.lane.b32.xlu0 %v6194_v56, %s13619_s9 }
0x1e00   : > { %6230 = vrot.lane.b32.xlu1 %v6195_v53, %s13541_s16 }
0x1e01   : > { %6206 = vrot.lane.b32.xlu0 %v6195_v53, %s13619_s9 }
0x1e04   : > { %6234 = vrot.lane.b32.xlu1 %v6194_v56, %s13531_s22 }
0x1e05   : > { %6210 = vrot.lane.b32.xlu0 %v6194_v56, %s13610_s23 }
0x1e08   : > { %6236 = vrot.lane.b32.xlu1 %v6195_v53, %s13531_s22 }
0x1e09   : > { %6212 = vrot.lane.b32.xlu0 %v6195_v53, %s13610_s23 }
0x1e0c   : > { %6240 = vrot.lane.b32.xlu1 %v6194_v56, %s13542_s26 }
0x1e0d   : > { %6242 = vrot.lane.b32.xlu0 %v6195_v53, %s13542_s26 }
0x1e10   : > { %6365 = vperm.xlu1 %9629, %v6361_v31   ;;  %v9955_v31 = vld [vmem:[%s13515_s3 + $0x50] ss:$12 sps:$4 sm:$0xff]  }
0x1e11   : > { %6370 = vperm.xlu0 %9630, %v6362_v40   ;;  %v9952_v40 = vld [vmem:[%s13515_s3 + $0x48] ss:$12 sps:$4 sm:$0xff]  }
0x1e62   : > { %v6219_v42 = vpop.permute.xlu1 %6218 }
0x1e63   : > { %v6217_v12 = vpop.permute.xlu0 %6216 }
0x1e64   : > { %9252 = vmatprep.subr.bf16.mxu1 %v6217_v12 }
0x1e65   : > { %9253 = vmatpush3.bf16.msra.mxu1 %v6194_v56  ;;  %v9948_v56 = vld [vmem:[%s13515_s3 + $0x30] ss:$12 sps:$4 sm:$0xff]  }
0x1e66   : > { %v6223_v58 = vpop.permute.xlu1 %6222  ;;  %9254 = vmatprep.subr.bf16.mxu1 %v6219_v42 }
0x1e67   : > { %v6199_v51 = vpop.permute.xlu0 %6198 }
0x1e69   : > { %9255 = vmatpush3.bf16.msra.mxu1 %v6195_v53  ;;  %v9950_v53 = vld [vmem:[%s13515_s3 + $0x34] ss:$12 sps:$4 sm:$0xff]   ;;  %s13660_s3 = smov 123  }
0x1e6a   : > { %v6225_v26 = vpop.permute.xlu1 %6224  ;;  %9256 = vmatprep.subr.bf16.mxu1 %v6223_v58  ;;  %6569 = vmatprep.subr.bf16.mxu0 %v9950_v53 }
0x1e6b   : > { %v6201_v43 = vpop.permute.xlu0 %6200  ;;  %6570 = vmatpush1.bf16.msra.mxu0 %v9948_v56 }
0x1e6c   : > { %6571 = vmatprep.subr.bf16.mxu0 %v9954_v38 }
0x1e6d   : > { %9257 = vmatpush3.bf16.msra.mxu1 %v6199_v51 }
0x1e6e   : > { %v6229_v57 = vpop.permute.xlu1 %6228  ;;  %9258 = vmatprep.subr.bf16.mxu1 %v6225_v26 }
0x1e6f   : > { %v6205_v20 = vpop.permute.xlu0 %6204  ;;  %6572 = vmatpush1.bf16.msra.mxu0 %v9952_v40 }
0x1e71   : > { %9259 = vmatpush3.bf16.msra.mxu1 %v6201_v43 }
0x1e72   : > { %v6231_v29 = vpop.permute.xlu1 %6230  ;;  %9260 = vmatprep.subr.bf16.mxu1 %v6229_v57 }
0x1e73   : > { %v6207_v27 = vpop.permute.xlu0 %6206 }
0x1e75   : > { %9261 = vmatpush3.bf16.msra.mxu1 %v6205_v20 }
0x1e76   : > { %9262 = vmatprep.subr.bf16.mxu1 %v6231_v29  ;;  %v6235_v59 = vpop.permute.xlu1 %6234 }
0x1e77   : > { %v6211_v49 = vpop.permute.xlu0 %6210 }
0x1e79   : > { %9263 = vmatpush3.bf16.msra.mxu1 %v6207_v27 }
0x1e7a   : > { %9264 = vmatprep.subr.bf16.mxu1 %v6235_v59  ;;  %v6237_v19 = vpop.permute.xlu1 %6236 }
0x1e7b   : > { %v6213_v54 = vpop.permute.xlu0 %6212 }
0x1e7d   : > { %9265 = vmatpush3.bf16.msra.mxu1 %v6211_v49 }
0x1e7e   : > { %9266 = vmatprep.subr.bf16.mxu1 %v6237_v19  ;;  %v6241_v50 = vpop.permute.xlu1 %6240 }
0x1e7f   : > { %v6243_v13 = vpop.permute.xlu0 %6242 }
0x1e81   : > { %9267 = vmatpush3.bf16.msra.mxu1 %v6213_v54 }
0x1e82   : > { %9452 = vmatprep.subr.bf16.mxu1 %v10286_v52 }
0x1e84   : > { %6301 = vmatmul.mubr.bf16.vlgmr.msra.gmra.mrb[72].mxu1 %v9931_v46 }
0x1e85   : > { %9453 = vmatpush3.bf16.msra.mxu1 %v6241_v50  ;;  %9456 = vmatprep.mubr.msk.bf16.mxu1 %vm10287_vm9, %v10286_v52 }
0x1e86   : > { %9454 = vmatprep.subr.bf16.mxu1 %v10286_v52 }
0x1e89   : > { %9455 = vmatpush3.bf16.msra.mxu1 %v6243_v13 }
0x1e8a   : > { %9460 = vmatprep.subr.bf16.mxu1 %v10286_v52 }
0x1e8c   : > { %9457 = vmatmul.mubr.msk.bf16.vlgmr.msra.gmra.mrb[76].mxu1 %vm4013_vm10, %v9934_v18 }
0x1e8d   : > { %9461 = vmatpush3.bf16.msra.mxu1 %v9935_v62  ;;  %9470 = vmatprep.mubr.msk.bf16.mxu1 %vm10287_vm9, %v10286_v52 }
0x1e8e   : > { %9462 = vmatprep.subr.bf16.mxu1 %v10286_v52 }
0x1e8f   : > { %v6366_v41 = vpop.permute.xlu1 %6365 }
0x1e90   : > { %v6371_v25 = vpop.permute.xlu0 %6370 }
0x1e91   : > { %9463 = vmatpush3.bf16.msra.mxu1 %v9936_v1 }
0x1e92   : > { %9464 = vmatprep.subr.bf16.mxu1 %v10286_v52 }
0x1e95   : > { %9465 = vmatpush3.bf16.msra.mxu1 %v9937_v14 }
0x1e96   : > { %9466 = vmatprep.subr.bf16.mxu1 %v10286_v52 }
0x1e99   : > { %9467 = vmatpush3.bf16.msra.mxu1 %v9938_v36 }
0x1e9a   : > { %9468 = vmatprep.subr.bf16.mxu1 %v10286_v52 }
0x1e9d   : > { %9469 = vmatpush3.bf16.msra.mxu1 %v9939_v55 }
0x1e9e   : > { %9474 = vmatprep.subr.bf16.mxu1 %v10286_v52 }
0x1f57   : > { %v9268_v16 = vpop.f32.mrb[72].mxu1 }
0x1f58   : > { %v9269_v45 = vpop.f32.mrb[73].mxu1 }
0x1f59   : > { %v9270_v5 = vadd.f32 %v9269_v45, %v9268_v16  ;;  %v9271_v7 = vpop.f32.mrb[74].mxu1 }
0x1f5a   : > { %v9272_v22 = vpop.f32.mrb[75].mxu1 }
0x1f5b   : > { %v9273_v44 = vadd.f32 %v9272_v22, %v9271_v7 }
0x1f5f   : > { %v6343_v15 = vpop.f32.mrb[76].mxu1 }
0x1f60   : > { %v6344_v21 = vadd.f32 %v9270_v5, %v6343_v15  ;;  %v9458_v37 = vpop.f32.mrb[77].mxu1 }
0x1f61   : > { %v6346_v24 = vpop.f32.mrb[78].mxu1 }
0x1f62   : > { %v6347_v11 = vadd.f32 %v9273_v44, %v6346_v24  ;;  %v9459_v34 = vpop.f32.mrb[79].mxu1 }
0x1f64   : > { %v6350_v33 = vpack.c.bf16 %v6347_v11, %v6344_v21 }
0x1f66   : > { %9471 = vmatmul.mubr.msk.bf16.vlgmr.msra.gmra.mrb[80].mxu1 %vm4381_vm13, %v6350_v33  ;;  %v12266_v33 = vld [vmem:[%s1419_s29] sm:$0xff]  ;;  %s13656_s29 = smov 83   ;;  %vm13670_vm13 = vcmask 695296  }
0x1f67   : > { %9482 = vmatprep.mubr.msk.bf16.mxu1 %vm10287_vm9, %v10286_v52  ;;  %9475 = vmatpush3.bf16.msra.mxu1 %v9943_v0  ;;  %vm13667_vm9 = vcmask 850944  }
0x1f68   : > { %9476 = vmatprep.subr.bf16.mxu1 %v10286_v52 }
0x1f6b   : > { %9477 = vmatpush3.bf16.msra.mxu1 %v9947_v63 }
0x1f6c   : > { %9478 = vmatprep.subr.bf16.mxu1 %v10286_v52 }
0x1f6f   : > { %9479 = vmatpush3.bf16.msra.mxu1 %v9951_v39 }
0x1f70   : > { %9480 = vmatprep.subr.bf16.mxu1 %v10286_v52 }
0x1f73   : > { %9481 = vmatpush3.bf16.msra.mxu1 %v9955_v31 }
0x1f74   : > { %6794 = vmatprep.subr.bf16.mxu1 %v13477_v4 }
0x2039   : > { %v6440_v2 = vpop.f32.mrb[80].mxu1 }
0x203a   : > { %v12217_v61 = vadd.f32 %v6440_v2, %v6366_v41  ;;  %v9472_v3 = vpop.f32.mrb[81].mxu1  ;;  %v8944_v41 = vcombine.high %v12266_v33, %v12266_v33  ;;  %v6873_v2 = vld [vmem:[%s1423_s30] sm:$0xff]  ;;  %s13659_s30 = smov 87  }
0x203b   : > { %v6443_v35 = vpop.f32.mrb[82].mxu1 }
0x203c   : > { %v6444_v28 = vadd.f32 %v6443_v35, %v6371_v25  ;;  %v9473_v60 = vpop.f32.mrb[83].mxu1  ;;  %v6447_v17 = vsel %vm4099_vm8, %v12217_v61, 0.0  ;;  %v6455_v9 = vmul.f32 %v12217_v61, %v12217_v61 }
0x203d   : > { %6448 = vadd.xlane.f32.xlu1 %v6447_v17 }
0x203e   : > { %v6450_v23 = vsel %vm4099_vm8, %v6444_v28, 0.0  ;;  %v6456_v47 = vmul.f32 %v6444_v28, %v6444_v28  ;;  %v6457_v10 = vsel %vm4099_vm8, %v6455_v9, 0.0 }
0x203f   : > { %6451 = vadd.xlane.f32.xlu0 %v6450_v23 }
0x2040   : > { %v6460_v30 = vsel %vm4099_vm8, %v6456_v47, 0.0 }
0x2041   : > { %6461 = vadd.xlane.f32.xlu1 %v6460_v30 }
0x2043   : > { %6458 = vadd.xlane.f32.xlu0 %v6457_v10 }
0x20ca   : > { %v6449_v42 = vpop.xlane.xlu1 %6448 }
0x20cb   : > { %v6453_v58 = vmul.f32 0.015625, %v6449_v42 }
0x20cc   : > { %v6452_v12 = vpop.xlane.xlu0 %6451 }
0x20cd   : > { %v6454_v51 = vmul.f32 0.015625, %v6452_v12  ;;  %v6465_v29 = vmul.f32 %v6453_v58, %v6453_v58  ;;  %v6471_v18 = vsub.f32 %v12217_v61, %v6453_v58 }
0x20ce   : > { %v6462_v26 = vpop.xlane.xlu1 %6461 }
0x20cf   : > { %v6466_v43 = vmul.f32 %v6454_v51, %v6454_v51  ;;  %v6464_v57 = vmul.f32 0.015625, %v6462_v26  ;;  %v6472_v50 = vsub.f32 %v6444_v28, %v6454_v51 }
0x20d0   : > { %v6459_v20 = vpop.xlane.xlu0 %6458 }
0x20d1   : > { %v6468_v27 = vsub.f32 %v6464_v57, %v6466_v43  ;;  %v6463_v59 = vmul.f32 0.015625, %v6459_v20 }
0x20d3   : > { %v6470_v49 = vmax.f32 %v6468_v27, 0.0  ;;  %v6467_v19 = vsub.f32 %v6463_v59, %v6465_v29 }
0x20d5   : > { %v6474_v54 = vadd.f32 1e-05, %v6470_v49  ;;  %v6469_v52 = vmax.f32 %v6467_v19, 0.0 }
0x20d7   : > { %10062 = vrsqrt.f32 %v6474_v54  ;;  %v6473_v46 = vadd.f32 1e-05, %v6469_v52  ;;  %v9960_v54 = vld [vmem:[%s10462_s19 + $0x4] ss:$8 sps:$4 sm:$0xff]  }
0x20d9   : > { %10064 = vrsqrt.f32 %v6473_v46 }
0x20e1   : > { %v10063_v13 = vpop.eup %10062 }
0x20e2   : > { %v6478_v62 = vmul.f32 %v10063_v13, %v6472_v50  ;;  %v8943_v13 = vcombine.low %v12266_v33, %v12266_v33  ;;  %v9975_v33 = vld [vmem:[%s10462_s19 + $0x54] ss:$8 sps:$4 sm:$0xff]  }
0x20e3   : > { %v10065_v1 = vpop.eup %10064 }
0x20e4   : > { %v6477_v14 = vmul.f32 %v10065_v1, %v6471_v18  ;;  %v6480_v55 = vmax.f32 %v6478_v62, 0.0  ;;  %v10075_v18 = vld [vmem:[%s10407_s4 + $0x4] ss:$16 sps:$4 sm:$0xff]   ;;  %v9958_v62 = vld [vmem:[%s10462_s19] ss:$8 sps:$4 sm:$0xff]  }
0x20e5   : > { %v9963_v1 = vld [vmem:[%s10462_s19 + $0x14] ss:$8 sps:$4 sm:$0xff]  }
0x20e6   : > { %v6479_v36 = vmax.f32 %v6477_v14, 0.0  ;;  %v10076_v14 = vld [vmem:[%s10407_s4] ss:$16 sps:$4 sm:$0xff]  }
0x20e8   : > { %v6481_v16 = vpack.c.bf16 %v6480_v55, %v6479_v36  ;;  %v10077_v36 = vld [vmem:[%s10407_s4 + $0x24] ss:$16 sps:$4 sm:$0xff]   ;;  %v9961_v55 = vld [vmem:[%s10462_s19 + $0x10] ss:$8 sps:$4 sm:$0xff]  }
0x20ea   : > { %8941 = vmatmul.mubr.msk.bf16.vlgmr.msra.gmra.mrb[76].mxu0 %vm4099_vm8, %v6481_v16  ;;  %9483 = vmatmul.mubr.msk.bf16.vlgmr.msra.gmra.mrb[84].mxu1 %vm4099_vm8, %v6481_v16  ;;  %v9966_v16 = vld [vmem:[%s10462_s19 + $0x24] ss:$8 sps:$4 sm:$0xff]   ;;  %vm13666_vm8 = vcmask 859136  }
0x20eb   : > { %8945 = vmatprep.mubr.msk.bf16.mxu0 %vm4259_vm7, %v8944_v41  ;;  %8946 = vmatprep.mubr.msk.bf16.mxu1 %vm4259_vm7, %v8944_v41  ;;  %v10084_v41 = vld [vmem:[%s10407_s4 + $0x80] ss:$16 sps:$4 sm:$0xff]   ;;  %vm13665_vm7 = vcmask 867328  }
0x21bd   : > { %v6599_v45 = vpop.f32.mrb[76].mxu0  ;;  %v6642_v5 = vpop.f32.mrb[84].mxu1 }
0x21be   : > { %v6601_v7 = vpop.f32.mrb[77].mxu0  ;;  %v9484_v22 = vpop.f32.mrb[85].mxu1 }
0x21bf   : > { %v6603_v44 = vpop.f32.mrb[78].mxu0  ;;  %v6645_v15 = vpop.f32.mrb[86].mxu1  ;;  %v9969_v22 = vld [vmem:[%s10462_s19 + $0x34] ss:$8 sps:$4 sm:$0xff]  }
0x21c0   : > { %v6649_v21 = vpack.c.bf16 %v6603_v44, %v6599_v45  ;;  %v6651_v37 = vpack.c.bf16 %v6645_v15, %v6642_v5  ;;  %v6605_v24 = vpop.f32.mrb[79].mxu0  ;;  %v9485_v11 = vpop.f32.mrb[87].mxu1  ;;  %v10078_v45 = vld [vmem:[%s10407_s4 + $0x20] ss:$16 sps:$4 sm:$0xff]   ;;  %v10079_v5 = vld [vmem:[%s10407_s4 + $0x44] ss:$16 sps:$4 sm:$0xff]  }
0x21c1   : > { %v6650_v34 = vpack.c.bf16 %v6605_v24, %v6601_v7  ;;  %v9964_v7 = vld [vmem:[%s10462_s19 + $0x20] ss:$8 sps:$4 sm:$0xff]   ;;  %v10081_v15 = vld [vmem:[%s10407_s4 + $0x64] ss:$16 sps:$4 sm:$0xff]  }
0x21c2   : > { %6659 = vrot.lane.b32.xlu1 %v6651_v37, %s13540_s11  ;;  %6795 = vmatpush1.bf16.msra.mxu1 %v6651_v37  ;;  %v10080_v44 = vld [vmem:[%s10407_s4 + $0x40] ss:$16 sps:$4 sm:$0xff]   ;;  %v10083_v11 = vld [vmem:[%s10407_s4 + $0x84] ss:$16 sps:$4 sm:$0xff]  }
0x21c3   : > { %6666 = vrot.lane.b32.xlu0 %v6649_v21, %s13619_s9  ;;  %6753 = vmatprep.subr.bf16.mxu0 %v6650_v34  ;;  %v10082_v24 = vld [vmem:[%s10407_s4 + $0x60] ss:$16 sps:$4 sm:$0xff]  }
0x21c4   : > { %6754 = vmatpush1.bf16.msra.mxu0 %v6649_v21  ;;  %6796 = vmatprep.subr.bf16.mxu1 %v13477_v4 }
0x21c6   : > { %6655 = vrot.lane.b32.xlu1 %v6649_v21, %s13540_s11 }
0x21c7   : > { %6681 = vrot.lane.b32.xlu0 %v6651_v37, %s13620_s13 }
0x21ca   : > { %6670 = vrot.lane.b32.xlu1 %v6651_v37, %s13619_s9 }
0x21cb   : > { %6688 = vrot.lane.b32.xlu0 %v6649_v21, %s13537_s0 }
0x21ce   : > { %6677 = vrot.lane.b32.xlu1 %v6649_v21, %s13620_s13 }
0x21cf   : > { %6657 = vrot.lane.b32.xlu0 %v6650_v34, %s13540_s11 }
0x21d2   : > { %6692 = vrot.lane.b32.xlu1 %v6651_v37, %s13537_s0 }
0x21d3   : > { %6668 = vrot.lane.b32.xlu0 %v6650_v34, %s13619_s9 }
0x21d6   : > { %6699 = vrot.lane.b32.xlu1 %v6649_v21, %s13541_s16 }
0x21d7   : > { %6703 = vrot.lane.b32.xlu0 %v6651_v37, %s13541_s16 }
0x21da   : > { %6679 = vrot.lane.b32.xlu1 %v6650_v34, %s13620_s13 }
0x21db   : > { %6690 = vrot.lane.b32.xlu0 %v6650_v34, %s13537_s0 }
0x21de   : > { %6714 = vrot.lane.b32.xlu1 %v6651_v37, %s13644_s25 }
0x21df   : > { %6710 = vrot.lane.b32.xlu0 %v6649_v21, %s13644_s25 }
0x21e2   : > { %6701 = vrot.lane.b32.xlu1 %v6650_v34, %s13541_s16 }
0x21e3   : > { %6712 = vrot.lane.b32.xlu0 %v6650_v34, %s13644_s25  ;;  %s13655_s25 = smov 85  }
0x21e6   : > { %6721 = vrot.lane.b32.xlu1 %v6649_v21, %s13645_s12 }
0x21e7   : > { %6725 = vrot.lane.b32.xlu0 %v6651_v37, %s13645_s12 }
0x21ea   : > { %6723 = vrot.lane.b32.xlu1 %v6650_v34, %s13645_s12  ;;  %s13657_s12 = smov 100  }
0x21eb   : > { %6734 = vrot.lane.b32.xlu0 %v6650_v34, %s13646_s17  ;;  %v9970_v34 = vld [vmem:[%s10462_s19 + $0x40] ss:$8 sps:$4 sm:$0xff]  }
0x21ee   : > { %6736 = vrot.lane.b32.xlu1 %v6651_v37, %s13646_s17  ;;  %v9972_v37 = vld [vmem:[%s10462_s19 + $0x44] ss:$8 sps:$4 sm:$0xff]  }
0x21ef   : > { %6732 = vrot.lane.b32.xlu0 %v6649_v21, %s13646_s17  ;;  %v9967_v21 = vld [vmem:[%s10462_s19 + $0x30] ss:$8 sps:$4 sm:$0xff]   ;;  %s13658_s17 = smov 88  }
0x21f2   : > { %6876 = vperm.xlu1 %9629, %v6873_v2   ;;  %v10085_v2 = vld [vmem:[%s10407_s4 + $0xa4] ss:$16 sps:$4 sm:$0xff]  }
0x2234   : > { %v6660_v61 = vpop.permute.xlu1 %6659 }
0x2235   : > { %v6667_v3 = vpop.permute.xlu0 %6666  ;;  %6797 = vmatpush1.bf16.msra.mxu1 %v6660_v61 }
0x2236   : > { %6798 = vmatprep.subr.bf16.mxu1 %v13477_v4 }
0x2238   : > { %v6656_v25 = vpop.permute.xlu1 %6655 }
0x2239   : > { %v6682_v35 = vpop.permute.xlu0 %6681 }
0x223c   : > { %v6671_v28 = vpop.permute.xlu1 %6670 }
0x223d   : > { %v6689_v60 = vpop.permute.xlu0 %6688  ;;  %6799 = vmatpush1.bf16.msra.mxu1 %v6671_v28 }
0x223e   : > { %6800 = vmatprep.subr.bf16.mxu1 %v13477_v4 }
0x2240   : > { %v6678_v17 = vpop.permute.xlu1 %6677 }
0x2241   : > { %v6658_v23 = vpop.permute.xlu0 %6657  ;;  %6801 = vmatpush1.bf16.msra.mxu1 %v6682_v35 }
0x2242   : > { %v6662_v47 = vsel %vm1929_vm1, %v6658_v23, %v6660_v61  ;;  %v6661_v9 = vsel %vm1929_vm1, %v6656_v25, %v6658_v23  ;;  %6802 = vmatprep.subr.bf16.mxu1 %v13477_v4  ;;  %v9973_v61 = vld [vmem:[%s10462_s19 + $0x50] ss:$8 sps:$4 sm:$0xff]   ;;  %v10089_v23 = vld [vmem:[%s10407_s4 + $0xe4] ss:$16 sps:$4 sm:$0xff]  }
0x2243   : > { %6755 = vmatprep.subr.bf16.mxu0 %v6662_v47  ;;  %v10086_v25 = vld [vmem:[%s10407_s4 + $0xa0] ss:$16 sps:$4 sm:$0xff]  }
0x2244   : > { %6756 = vmatpush1.bf16.msra.mxu0 %v6661_v9  ;;  %v6693_v30 = vpop.permute.xlu1 %6692  ;;  %v9979_v47 = vld [vmem:[%s10462_s19 + $0x70] ss:$8 sps:$4 sm:$0xff]   ;;  %v9984_v9 = vld [vmem:[%s10462_s19 + $0x84] ss:$8 sps:$4 sm:$0xff]  }
0x2245   : > { %v6669_v10 = vpop.permute.xlu0 %6668  ;;  %6803 = vmatpush1.bf16.msra.mxu1 %v6693_v30 }
0x2246   : > { %v6673_v6 = vsel %vm1938_vm2, %v6669_v10, %v6671_v28  ;;  %v6672_v48 = vsel %vm1938_vm2, %v6667_v3, %v6669_v10  ;;  %6804 = vmatprep.subr.bf16.mxu1 %v13477_v4  ;;  %v9978_v3 = vld [vmem:[%s10462_s19 + $0x64] ss:$8 sps:$4 sm:$0xff]   ;;  %v9976_v28 = vld [vmem:[%s10462_s19 + $0x60] ss:$8 sps:$4 sm:$0xff]  }
0x2247   : > { %6757 = vmatprep.subr.bf16.mxu0 %v6673_v6  ;;  %v10091_v10 = vld [vmem:[%s10407_s4 + $0x104] ss:$16 sps:$4 sm:$0xff]   ;;  %v9982_v6 = vld [vmem:[%s10462_s19 + $0x80] ss:$8 sps:$4 sm:$0xff]  }
0x2248   : > { %6758 = vmatpush1.bf16.msra.mxu0 %v6672_v48  ;;  %v6700_v0 = vpop.permute.xlu1 %6699  ;;  %v9987_v48 = vld [vmem:[%s10462_s19 + $0x94] ss:$8 sps:$4 sm:$0xff]  }
0x2249   : > { %v6704_v32 = vpop.permute.xlu0 %6703 }
0x224a   : > { %6805 = vmatpush1.bf16.msra.mxu1 %v6704_v32 }
0x224b   : > { %6806 = vmatprep.subr.bf16.mxu1 %v13477_v4 }
0x224c   : > { %v6680_v63 = vpop.permute.xlu1 %6679 }
0x224d   : > { %v6691_v8 = vpop.permute.xlu0 %6690  ;;  %v6684_v53 = vsel %vm2304_vm6, %v6680_v63, %v6682_v35  ;;  %v6683_v39 = vsel %vm2304_vm6, %v6678_v17, %v6680_v63  ;;  %v10087_v35 = vld [vmem:[%s10407_s4 + $0xc4] ss:$16 sps:$4 sm:$0xff]   ;;  %v10088_v17 = vld [vmem:[%s10407_s4 + $0xc0] ss:$16 sps:$4 sm:$0xff]  }
0x224e   : > { %6759 = vmatprep.subr.bf16.mxu0 %v6684_v53  ;;  %v6695_v56 = vsel %vm2316_vm14, %v6691_v8, %v6693_v30  ;;  %v6694_v40 = vsel %vm2316_vm14, %v6689_v60, %v6691_v8  ;;  %v9981_v60 = vld [vmem:[%s10462_s19 + $0x74] ss:$8 sps:$4 sm:$0xff]   ;;  %v10090_v30 = vld [vmem:[%s10407_s4 + $0xe0] ss:$16 sps:$4 sm:$0xff]   ;;  %v9990_v8 = vld [vmem:[%s10462_s19 + $0xa4] ss:$8 sps:$4 sm:$0xff]  }
0x224f   : > { %6760 = vmatpush1.bf16.msra.mxu0 %v6683_v39  ;;  %v9985_v63 = vld [vmem:[%s10462_s19 + $0x90] ss:$8 sps:$4 sm:$0xff]   ;;  %v10095_v39 = vld [vmem:[%s10407_s4 + $0x144] ss:$16 sps:$4 sm:$0xff]  }
0x2250   : > { %v6715_v38 = vpop.permute.xlu1 %6714  ;;  %6761 = vmatprep.subr.bf16.mxu0 %v6695_v56  ;;  %v10094_v53 = vld [vmem:[%s10407_s4 + $0x120] ss:$16 sps:$4 sm:$0xff]  }
0x2251   : > { %v6711_v31 = vpop.permute.xlu0 %6710  ;;  %6807 = vmatpush1.bf16.msra.mxu1 %v6715_v38  ;;  %v9988_v56 = vld [vmem:[%s10462_s19 + $0xa0] ss:$8 sps:$4 sm:$0xff]  }
0x2252   : > { %6808 = vmatprep.subr.bf16.mxu1 %v13477_v4 }
0x2253   : > { %6762 = vmatpush1.bf16.msra.mxu0 %v6694_v40  ;;  %v10097_v40 = vld [vmem:[%s10407_s4 + $0x164] ss:$16 sps:$4 sm:$0xff]  }
0x2254   : > { %v6702_v42 = vpop.permute.xlu1 %6701 }
0x2255   : > { %v6713_v12 = vpop.permute.xlu0 %6712  ;;  %v6706_v58 = vsel %vm2183_vm15, %v6702_v42, %v6704_v32  ;;  %v6705_v51 = vsel %vm2183_vm15, %v6700_v0, %v6702_v42  ;;  %v10092_v0 = vld [vmem:[%s10407_s4 + $0x100] ss:$16 sps:$4 sm:$0xff]   ;;  %v10093_v32 = vld [vmem:[%s10407_s4 + $0x124] ss:$16 sps:$4 sm:$0xff]  }
0x2256   : > { %6763 = vmatprep.subr.bf16.mxu0 %v6706_v58  ;;  %v6717_v26 = vsel %vm3681_vm11, %v6713_v12, %v6715_v38  ;;  %v6716_v20 = vsel %vm3681_vm11, %v6711_v31, %v6713_v12  ;;  %v9993_v38 = vld [vmem:[%s10462_s19 + $0xb4] ss:$8 sps:$4 sm:$0xff]   ;;  %v10096_v31 = vld [vmem:[%s10407_s4 + $0x140] ss:$16 sps:$4 sm:$0xff]   ;;  %v9996_v12 = vld [vmem:[%s10462_s19 + $0xc4] ss:$8 sps:$4 sm:$0xff]  }
0x2257   : > { %6764 = vmatpush1.bf16.msra.mxu0 %v6705_v51  ;;  %v9991_v42 = vld [vmem:[%s10462_s19 + $0xb0] ss:$8 sps:$4 sm:$0xff]   ;;  %v10099_v51 = vld [vmem:[%s10407_s4 + $0x184] ss:$16 sps:$4 sm:$0xff]   ;;  %vm13668_vm11 = vcmask 842752  }
0x2258   : > { %v6722_v43 = vpop.permute.xlu1 %6721  ;;  %6765 = vmatprep.subr.bf16.mxu0 %v6717_v26  ;;  %v10098_v58 = vld [vmem:[%s10407_s4 + $0x160] ss:$16 sps:$4 sm:$0xff]  }
0x2259   : > { %v6726_v57 = vpop.permute.xlu0 %6725  ;;  %v9994_v26 = vld [vmem:[%s10462_s19 + $0xc0] ss:$8 sps:$4 sm:$0xff]  }
0x225a   : > { %6809 = vmatpush1.bf16.msra.mxu1 %v6726_v57 }
0x225b   : > { %6766 = vmatpush1.bf16.msra.mxu0 %v6716_v20  ;;  %6810 = vmatprep.subr.bf16.mxu1 %v13477_v4  ;;  %v10101_v20 = vld [vmem:[%s10407_s4 + $0x1a4] ss:$16 sps:$4 sm:$0xff]  }
0x225c   : > { %v6724_v29 = vpop.permute.xlu1 %6723 }
0x225d   : > { %v6735_v27 = vpop.permute.xlu0 %6734  ;;  %v6728_v59 = vsel %vm3690_vm12, %v6724_v29, %v6726_v57  ;;  %v6727_v49 = vsel %vm3690_vm12, %v6722_v43, %v6724_v29  ;;  %v9999_v43 = vld [vmem:[%s10462_s19 + $0xd4] ss:$8 sps:$4 sm:$0xff]   ;;  %v10100_v57 = vld [vmem:[%s10407_s4 + $0x180] ss:$16 sps:$4 sm:$0xff]   ;;  %vm13669_vm12 = vcmask 834560  }
0x225e   : > { %6767 = vmatprep.subr.bf16.mxu0 %v6728_v59  ;;  %v9997_v29 = vld [vmem:[%s10462_s19 + $0xd0] ss:$8 sps:$4 sm:$0xff]  }
0x225f   : > { %6768 = vmatpush1.bf16.msra.mxu0 %v6727_v49  ;;  %v10102_v59 = vld [vmem:[%s10407_s4 + $0x1a0] ss:$16 sps:$4 sm:$0xff]   ;;  %v10103_v49 = vld [vmem:[%s10407_s4 + $0x1c4] ss:$16 sps:$4 sm:$0xff]  }
0x2260   : > { %v6737_v19 = vpop.permute.xlu1 %6736 }
0x2261   : > { %v6733_v52 = vpop.permute.xlu0 %6732  ;;  %6811 = vmatpush1.bf16.msra.mxu1 %v6737_v19  ;;  %v6739_v46 = vsel %vm3699_vm5, %v6735_v27, %v6737_v19  ;;  %v10000_v19 = vld [vmem:[%s10462_s19 + $0xe0] ss:$8 sps:$4 sm:$0xff]  }
0x2262   : > { %v6738_v50 = vsel %vm3699_vm5, %v6733_v52, %v6735_v27  ;;  %6769 = vmatprep.subr.bf16.mxu0 %v6739_v46  ;;  %7167 = vmatprep.subr.bf16.mxu1 %v10075_v18  ;;  %v10002_v27 = vld [vmem:[%s10462_s19 + $0xe4] ss:$8 sps:$4 sm:$0xff]   ;;  %v10106_v46 = vld [vmem:[%s10407_s4 + $0x1e0] ss:$16 sps:$4 sm:$0xff]   ;;  %vm13664_vm5 = vcmask 875520  }
0x2263   : > { %6770 = vmatpush1.bf16.msra.mxu0 %v6738_v50  ;;  %v10105_v52 = vld [vmem:[%s10407_s4 + $0x1e4] ss:$16 sps:$4 sm:$0xff]   ;;  %v10107_v50 = vld [vmem:[%s10407_s4 + $0xc] ss:$16 sps:$4 sm:$0xff]   ;;  %v10003_v18 = vld [vmem:[%s10462_s19 + $0xf0] ss:$8 sps:$4 sm:$0xff]  }
0x2264   : > { %6827 = vmatmul.mubr.bf16.vlgmr.msra.gmra.mrb[88].mxu1 %v8943_v13  ;;  %7062 = vmatprep.subr.bf16.mxu0 %v9960_v54  ;;  %v10104_v54 = vld [vmem:[%s10407_s4 + $0x1c0] ss:$16 sps:$4 sm:$0xff]  }
0x2265   : > { %7168 = vmatpush1.bf16.msra.mxu1 %v10076_v14 }
0x2266   : > { %6786 = vmatmul.mubr.bf16.vlgmr.msra.gmra.mrb[80].mxu0 %v8943_v13  ;;  %7169 = vmatprep.subr.bf16.mxu1 %v10077_v36  ;;  %v10005_v13 = vld [vmem:[%s10462_s19 + $0xf4] ss:$8 sps:$4 sm:$0xff]  }
0x2267   : > { %7063 = vmatpush1.bf16.msra.mxu0 %v9958_v62  ;;  %v10008_v62 = vld [vmem:[%s10462_s19 + $0x104] ss:$8 sps:$4 sm:$0xff]  }
0x2268   : > { %7064 = vmatprep.subr.bf16.mxu0 %v9963_v1 }
0x2269   : > { %7170 = vmatpush1.bf16.msra.mxu1 %v10078_v45 }
0x226a   : > { %7171 = vmatprep.subr.bf16.mxu1 %v10079_v5 }
0x226b   : > { %7065 = vmatpush1.bf16.msra.mxu0 %v9961_v55 }
0x226c   : > { %7066 = vmatprep.subr.bf16.mxu0 %v9966_v16 }
0x226d   : > { %7172 = vmatpush1.bf16.msra.mxu1 %v10080_v44 }
0x226e   : > { %7173 = vmatprep.subr.bf16.mxu1 %v10081_v15 }
0x226f   : > { %7067 = vmatpush1.bf16.msra.mxu0 %v9964_v7 }
0x2270   : > { %7068 = vmatprep.subr.bf16.mxu0 %v9969_v22  ;;  %v10006_v22 = vld [vmem:[%s10462_s19 + $0x100] ss:$8 sps:$4 sm:$0xff]  }
0x2271   : > { %7174 = vmatpush1.bf16.msra.mxu1 %v10082_v24 }
0x2272   : > { %7175 = vmatprep.subr.bf16.mxu1 %v10083_v11  ;;  %v6877_v11 = vpop.permute.xlu1 %6876 }
0x2273   : > { %7069 = vmatpush1.bf16.msra.mxu0 %v9967_v21  ;;  %v10011_v21 = vld [vmem:[%s10462_s19 + $0x114] ss:$8 sps:$4 sm:$0xff]  }
0x2274   : > { %7070 = vmatprep.subr.bf16.mxu0 %v9972_v37  ;;  %v10009_v37 = vld [vmem:[%s10462_s19 + $0x110] ss:$8 sps:$4 sm:$0xff]  }
0x2275   : > { %7176 = vmatpush1.bf16.msra.mxu1 %v10084_v41 }
0x2276   : > { %7177 = vmatprep.subr.bf16.mxu1 %v10085_v2 }
0x2277   : > { %7071 = vmatpush1.bf16.msra.mxu0 %v9970_v34 }
0x2278   : > { %7072 = vmatprep.subr.bf16.mxu0 %v9975_v33 }
0x2279   : > { %7178 = vmatpush1.bf16.msra.mxu1 %v10086_v25 }
0x227a   : > { %7179 = vmatprep.subr.bf16.mxu1 %v10087_v35 }
0x227b   : > { %7073 = vmatpush1.bf16.msra.mxu0 %v9973_v61 }
0x227c   : > { %7074 = vmatprep.subr.bf16.mxu0 %v9978_v3 }
0x227d   : > { %7180 = vmatpush1.bf16.msra.mxu1 %v10088_v17 }
0x227e   : > { %7181 = vmatprep.subr.bf16.mxu1 %v10089_v23 }
0x227f   : > { %7075 = vmatpush1.bf16.msra.mxu0 %v9976_v28 }
0x2280   : > { %7076 = vmatprep.subr.bf16.mxu0 %v9981_v60 }
0x2281   : > { %7182 = vmatpush1.bf16.msra.mxu1 %v10090_v30 }
0x2282   : > { %7183 = vmatprep.subr.bf16.mxu1 %v10091_v10 }
0x2283   : > { %7077 = vmatpush1.bf16.msra.mxu0 %v9979_v47 }
0x2284   : > { %7078 = vmatprep.subr.bf16.mxu0 %v9984_v9 }
0x2285   : > { %7184 = vmatpush1.bf16.msra.mxu1 %v10092_v0 }
0x2286   : > { %7185 = vmatprep.subr.bf16.mxu1 %v10093_v32 }
0x2287   : > { %7079 = vmatpush1.bf16.msra.mxu0 %v9982_v6 }
0x2288   : > { %7080 = vmatprep.subr.bf16.mxu0 %v9987_v48 }
0x2289   : > { %7186 = vmatpush1.bf16.msra.mxu1 %v10094_v53 }
0x228a   : > { %7187 = vmatprep.subr.bf16.mxu1 %v10095_v39 }
0x228b   : > { %7081 = vmatpush1.bf16.msra.mxu0 %v9985_v63 }
0x228c   : > { %7082 = vmatprep.subr.bf16.mxu0 %v9990_v8 }
0x228d   : > { %7188 = vmatpush1.bf16.msra.mxu1 %v10096_v31 }
0x228e   : > { %7189 = vmatprep.subr.bf16.mxu1 %v10097_v40  ;;  %v10108_v40 = vld [vmem:[%s10407_s4 + $0x8] ss:$16 sps:$4 sm:$0xff]  }
0x228f   : > { %7083 = vmatpush1.bf16.msra.mxu0 %v9988_v56 }
0x2290   : > { %7084 = vmatprep.subr.bf16.mxu0 %v9993_v38 }
0x2291   : > { %7190 = vmatpush1.bf16.msra.mxu1 %v10098_v58  ;;  %v10111_v58 = vld [vmem:[%s10407_s4 + $0x4c] ss:$16 sps:$4 sm:$0xff]  }
0x2292   : > { %7191 = vmatprep.subr.bf16.mxu1 %v10099_v51  ;;  %v10112_v51 = vld [vmem:[%s10407_s4 + $0x48] ss:$16 sps:$4 sm:$0xff]  }
0x2293   : > { %7085 = vmatpush1.bf16.msra.mxu0 %v9991_v42  ;;  %v10109_v42 = vld [vmem:[%s10407_s4 + $0x2c] ss:$16 sps:$4 sm:$0xff]  }
0x2294   : > { %7086 = vmatprep.subr.bf16.mxu0 %v9996_v12  ;;  %v10110_v12 = vld [vmem:[%s10407_s4 + $0x28] ss:$16 sps:$4 sm:$0xff]  }
0x2295   : > { %7192 = vmatpush1.bf16.msra.mxu1 %v10100_v57  ;;  %v10115_v57 = vld [vmem:[%s10407_s4 + $0x8c] ss:$16 sps:$4 sm:$0xff]  }
0x2296   : > { %7193 = vmatprep.subr.bf16.mxu1 %v10101_v20  ;;  %v10116_v20 = vld [vmem:[%s10407_s4 + $0x88] ss:$16 sps:$4 sm:$0xff]  }
0x2297   : > { %7087 = vmatpush1.bf16.msra.mxu0 %v9994_v26  ;;  %v10113_v26 = vld [vmem:[%s10407_s4 + $0x6c] ss:$16 sps:$4 sm:$0xff]  }
0x2298   : > { %7088 = vmatprep.subr.bf16.mxu0 %v9999_v43  ;;  %v10114_v43 = vld [vmem:[%s10407_s4 + $0x68] ss:$16 sps:$4 sm:$0xff]  }
0x2299   : > { %7194 = vmatpush1.bf16.msra.mxu1 %v10102_v59  ;;  %v10119_v59 = vld [vmem:[%s10407_s4 + $0xcc] ss:$16 sps:$4 sm:$0xff]  }
0x229a   : > { %7195 = vmatprep.subr.bf16.mxu1 %v10103_v49  ;;  %v10120_v49 = vld [vmem:[%s10407_s4 + $0xc8] ss:$16 sps:$4 sm:$0xff]  }
0x229b   : > { %7089 = vmatpush1.bf16.msra.mxu0 %v9997_v29  ;;  %v10117_v29 = vld [vmem:[%s10407_s4 + $0xac] ss:$16 sps:$4 sm:$0xff]  }
0x229c   : > { %7090 = vmatprep.subr.bf16.mxu0 %v10002_v27  ;;  %v10118_v27 = vld [vmem:[%s10407_s4 + $0xa8] ss:$16 sps:$4 sm:$0xff]  }
0x229d   : > { %7196 = vmatpush1.bf16.msra.mxu1 %v10104_v54  ;;  %v10122_v54 = vld [vmem:[%s10407_s4 + $0xe8] ss:$16 sps:$4 sm:$0xff]  }
0x229e   : > { %7197 = vmatprep.subr.bf16.mxu1 %v10105_v52  ;;  %v10123_v52 = vld [vmem:[%s10407_s4 + $0x10c] ss:$16 sps:$4 sm:$0xff]  }
0x229f   : > { %7091 = vmatpush1.bf16.msra.mxu0 %v10000_v19  ;;  %v10121_v19 = vld [vmem:[%s10407_s4 + $0xec] ss:$16 sps:$4 sm:$0xff]  }
0x22a0   : > { %7092 = vmatprep.subr.bf16.mxu0 %v10005_v13  ;;  %v10126_v13 = vld [vmem:[%s10407_s4 + $0x128] ss:$16 sps:$4 sm:$0xff]  }
0x22a1   : > { %7198 = vmatpush1.bf16.msra.mxu1 %v10106_v46  ;;  %v10124_v46 = vld [vmem:[%s10407_s4 + $0x108] ss:$16 sps:$4 sm:$0xff]  }
0x22a2   : > { %7208 = vmatprep.subr.bf16.mxu1 %v10107_v50  ;;  %v10125_v50 = vld [vmem:[%s10407_s4 + $0x12c] ss:$16 sps:$4 sm:$0xff]  }
0x22a3   : > { %7093 = vmatpush1.bf16.msra.mxu0 %v10003_v18  ;;  %v10127_v18 = vld [vmem:[%s10407_s4 + $0x14c] ss:$16 sps:$4 sm:$0xff]  }
0x22a4   : > { %7103 = vmatprep.subr.bf16.mxu0 %v10008_v62  ;;  %v10128_v62 = vld [vmem:[%s10407_s4 + $0x148] ss:$16 sps:$4 sm:$0xff]  }
0x2337   : > { %v6828_v1 = vpop.f32.mrb[88].mxu1 }
0x2338   : > { %v6830_v14 = vpop.f32.mrb[89].mxu1  ;;  %v6836_v24 = vpack.c.bf16 %v6828_v1, %v6828_v1  ;;  %v10129_v1 = vld [vmem:[%s10407_s4 + $0x16c] ss:$16 sps:$4 sm:$0xff]  }
0x2339   : > { %v6787_v36 = vpop.f32.mrb[80].mxu0  ;;  %v6831_v55 = vpop.f32.mrb[90].mxu1  ;;  %v10130_v14 = vld [vmem:[%s10407_s4 + $0x168] ss:$16 sps:$4 sm:$0xff]  }
0x233a   : > { %v6789_v16 = vpop.f32.mrb[81].mxu0  ;;  %v6832_v45 = vpop.f32.mrb[91].mxu1  ;;  %v6834_v44 = vpack.c.bf16 %v6787_v36, %v6787_v36  ;;  %v10131_v36 = vld [vmem:[%s10407_s4 + $0x18c] ss:$16 sps:$4 sm:$0xff]   ;;  %v10132_v55 = vld [vmem:[%s10407_s4 + $0x188] ss:$16 sps:$4 sm:$0xff]  }
0x233b   : > { %v6835_v5 = vpack.c.bf16 %v6789_v16, %v6789_v16  ;;  %v6791_v7 = vpop.f32.mrb[82].mxu0  ;;  %v10133_v16 = vld [vmem:[%s10407_s4 + $0x1ac] ss:$16 sps:$4 sm:$0xff]   ;;  %v10134_v45 = vld [vmem:[%s10407_s4 + $0x1a8] ss:$16 sps:$4 sm:$0xff]  }
0x233c   : > { %v6792_v15 = vpop.f32.mrb[83].mxu0  ;;  %v10136_v7 = vld [vmem:[%s10407_s4 + $0x1c8] ss:$16 sps:$4 sm:$0xff]  }
0x233d   : > { %7094 = vmatprep.mubr.bf16.mxu0 %v6835_v5  ;;  %v10135_v5 = vld [vmem:[%s10407_s4 + $0x1cc] ss:$16 sps:$4 sm:$0xff]  }
0x233e   : > { %7095 = vmatmul.mubr.bf16.vlgmr.msra.gmra.mrb[84].mxu0 %v6834_v44  ;;  %v10138_v44 = vld [vmem:[%s10407_s4 + $0x1e8] ss:$16 sps:$4 sm:$0xff]  }
0x233f   : > { %7104 = vmatpush1.bf16.msra.mxu0 %v10006_v22  ;;  %7135 = vmatprep.mubr.bf16.mxu0 %v13477_v4  ;;  %v10137_v22 = vld [vmem:[%s10407_s4 + $0x1ec] ss:$16 sps:$4 sm:$0xff]  }
0x2340   : > { %7105 = vmatprep.subr.bf16.mxu0 %v10011_v21 }
0x2343   : > { %7106 = vmatpush1.bf16.msra.mxu0 %v10009_v37 }
0x234a   : > { %8983 = vmatmul.mubr.msk.bf16.vlgmr.msra.gmra.mrb[84].mxu0 %vm4013_vm10, %v6836_v24  ;;  %vm13672_vm10 = vcmask 703488  }
0x241d   : > { %v7137_v34 = vpop.f32.mrb[84].mxu0 }
0x241e   : > { %v9488_v33 = vadd.f32 %v7137_v34, %v6877_v11  ;;  %v7139_v41 = vpop.f32.mrb[85].mxu0 }
0x241f   : > { %v9489_v2 = vadd.f32 %v7139_v41, %v6877_v11  ;;  %v7141_v61 = vpop.f32.mrb[86].mxu0 }
0x2420   : > { %v7148_v3 = vmul.f32 %v9488_v33, %v9488_v33  ;;  %v7142_v25 = vpop.f32.mrb[87].mxu0 }
0x2421   : > { %v7149_v35 = vmul.f32 %v9489_v2, %v9489_v2  ;;  %v7144_v28 = vadd.f32 %v9489_v2, %v9488_v33 }
0x2423   : > { %7145 = vadd.xlane.f32.xlu0 %v7144_v28  ;;  %v7150_v60 = vadd.f32 %v7149_v35, %v7148_v3 }
0x2425   : > { %7151 = vadd.xlane.f32.xlu1 %v7150_v60 }
0x24b0   : > { %v7146_v17 = vpop.xlane.xlu0 %7145 }
0x24b1   : > { %v7147_v23 = vmul.f32 0.00390625, %v7146_v17 }
0x24b2   : > { %v7152_v47 = vpop.xlane.xlu1 %7151 }
0x24b3   : > { %v7153_v9 = vmul.f32 0.00390625, %v7152_v47  ;;  %v7154_v30 = vmul.f32 %v7147_v23, %v7147_v23  ;;  %v7157_v0 = vsub.f32 %v9488_v33, %v7147_v23  ;;  %v7158_v32 = vsub.f32 %v9489_v2, %v7147_v23 }
0x24b5   : > { %v7155_v10 = vsub.f32 %v7153_v9, %v7154_v30 }
0x24b7   : > { %v7156_v6 = vmax.f32 %v7155_v10, 0.0 }
0x24b9   : > { %v7159_v48 = vadd.f32 1e-05, %v7156_v6 }
0x24bb   : > { %10066 = vrsqrt.f32 %v7159_v48 }
0x24c5   : > { %v10067_v63 = vpop.eup %10066 }
0x24c6   : > { %v7162_v8 = vmul.f32 %v10067_v63, %v7158_v32  ;;  %v7161_v53 = vmul.f32 %v10067_v63, %v7157_v0 }
0x24c8   : > { %v7164_v39 = vmax.f32 %v7162_v8, 0.0  ;;  %v7163_v56 = vmax.f32 %v7161_v53, 0.0 }
0x24ca   : > { %v7166_v38 = vpack.c.bf16 %v7164_v39, %v7164_v39  ;;  %v12376_v31 = vpack.c.bf16 %v7163_v56, %v7163_v56 }
0x24cc   : > { %7199 = vmatprep.mubr.bf16.mxu1 %v7166_v38 }
0x24cd   : > { %7200 = vmatmul.mubr.bf16.vlgmr.msra.gmra.mrb[92].mxu1 %v12376_v31 }
0x24ce   : > { %7209 = vmatpush1.bf16.msra.mxu1 %v10108_v40  ;;  %7240 = vmatprep.mubr.bf16.mxu1 %v7166_v38 }
0x24cf   : > { %7210 = vmatprep.subr.bf16.mxu1 %v10109_v42 }
0x24d2   : > { %7211 = vmatpush1.bf16.msra.mxu1 %v10110_v12 }
0x24d3   : > { %7212 = vmatprep.subr.bf16.mxu1 %v10111_v58 }
0x24d6   : > { %7213 = vmatpush1.bf16.msra.mxu1 %v10112_v51 }
0x24d7   : > { %7214 = vmatprep.subr.bf16.mxu1 %v10113_v26 }
0x24da   : > { %7215 = vmatpush1.bf16.msra.mxu1 %v10114_v43 }
0x24db   : > { %7216 = vmatprep.subr.bf16.mxu1 %v10115_v57 }
0x24de   : > { %7217 = vmatpush1.bf16.msra.mxu1 %v10116_v20 }
0x24df   : > { %7218 = vmatprep.subr.bf16.mxu1 %v10117_v29 }
0x24e2   : > { %7219 = vmatpush1.bf16.msra.mxu1 %v10118_v27 }
0x24e3   : > { %7220 = vmatprep.subr.bf16.mxu1 %v10119_v59 }
0x24e6   : > { %7221 = vmatpush1.bf16.msra.mxu1 %v10120_v49 }
0x24e7   : > { %7222 = vmatprep.subr.bf16.mxu1 %v10121_v19 }
0x24ea   : > { %7223 = vmatpush1.bf16.msra.mxu1 %v10122_v54 }
0x24eb   : > { %7224 = vmatprep.subr.bf16.mxu1 %v10123_v52 }
0x24ee   : > { %7225 = vmatpush1.bf16.msra.mxu1 %v10124_v46 }
0x24ef   : > { %7226 = vmatprep.subr.bf16.mxu1 %v10125_v50 }
0x24f2   : > { %7227 = vmatpush1.bf16.msra.mxu1 %v10126_v13 }
0x24f3   : > { %7228 = vmatprep.subr.bf16.mxu1 %v10127_v18 }
0x24f6   : > { %7229 = vmatpush1.bf16.msra.mxu1 %v10128_v62 }
0x24f7   : > { %7230 = vmatprep.subr.bf16.mxu1 %v10129_v1 }
0x24fa   : > { %7231 = vmatpush1.bf16.msra.mxu1 %v10130_v14 }
0x24fb   : > { %7232 = vmatprep.subr.bf16.mxu1 %v10131_v36 }
0x24fe   : > { %7233 = vmatpush1.bf16.msra.mxu1 %v10132_v55 }
0x24ff   : > { %7234 = vmatprep.subr.bf16.mxu1 %v10133_v16 }
0x2502   : > { %7235 = vmatpush1.bf16.msra.mxu1 %v10134_v45 }
0x2503   : > { %7236 = vmatprep.subr.bf16.mxu1 %v10135_v5 }
0x2506   : > { %7237 = vmatpush1.bf16.msra.mxu1 %v10136_v7 }
0x2507   : > { %7238 = vmatprep.subr.bf16.mxu1 %v10137_v22 }
0x250a   : > { %7239 = vmatpush1.bf16.msra.mxu1 %v10138_v44 }
0x250d   : > { %7241 = vmatmul.mubr.bf16.vlgmr.msra.gmra.mrb[96].mxu1 %v12376_v31 }
0x25a0   : > { %v7201_v15 = vpop.f32.mrb[92].mxu1 }
0x25a1   : > { %v12411_v21 = vpack.c.bf16 %v7201_v15, %v7201_v15  ;;  %v7203_v37 = vpop.f32.mrb[93].mxu1 }
0x25a2   : > { %v7205_v24 = vpop.f32.mrb[94].mxu1  ;;  %v12425_v34 = vpack.c.bf16 %v7203_v37, %v7203_v37 }
0x25a3   : > { %7506 = vrot.lane.b32.xlu1 %v12411_v21, %s13531_s22  ;;  %7267 = vrot.lane.b32.xlu0 %v12411_v21, %s13619_s9  ;;  %v7206_v11 = vpop.f32.mrb[95].mxu1  ;;  %v7256_v33 = vrot.slane %v12411_v21, 4 }
0x25a4   : > { %13649 = vst [vmem:[#allocation47_spill] sm:$0xff] %v12425_v34  ;;  %v7257_v41 = vrot.slane %v12425_v34, 4 }
0x25a7   : > { %7299 = vrot.lane.b32.xlu1 %v12411_v21, %s13532_s2  ;;  %7283 = vrot.lane.b32.xlu0 %v12411_v21, %s13647_s27 }
0x25ab   : > { %7623 = vrot.lane.b32.xlu1 %v12411_v21, %s13537_s0  ;;  %7315 = vrot.lane.b32.xlu0 %v12411_v21, %s13648_s7 }
0x25af   : > { %7331 = vrot.lane.b32.xlu0 %v12411_v21, %s13650_s20  ;;  %7301 = vrot.lane.b32.xlu1 %v12425_v34, %s13532_s2 }
0x25b3   : > { %7532 = vrot.lane.b32.xlu0 %v12411_v21, %s13651_s1  ;;  %7259 = vrot.lane.b32.xlu1 %v7256_v33, %s13540_s11 }
0x25b7   : > { %7364 = vrot.lane.b32.xlu0 %v12411_v21, %s13652_s15  ;;  %7275 = vrot.lane.b32.xlu1 %v7256_v33, %s13543_s14 }
0x25bb   : > { %7347 = vrot.lane.b32.xlu0 %v12411_v21, %s13653_s10  ;;  %7495 = vrot.lane.b32.xlu1 %v7256_v33, %s13541_s16 }
0x25bf   : > { %7323 = vrot.lane.b32.xlu1 %v7256_v33, %s13550_s28  ;;  %7269 = vrot.lane.b32.xlu0 %v12425_v34, %s13619_s9 }
0x25c3   : > { %7339 = vrot.lane.b32.xlu1 %v7256_v33, %s13654_s21  ;;  %7285 = vrot.lane.b32.xlu0 %v12425_v34, %s13647_s27 }
0x25c7   : > { %7543 = vrot.lane.b32.xlu1 %v7256_v33, %s13655_s25  ;;  %7508 = vrot.lane.b32.xlu0 %v12425_v34, %s13531_s22 }
0x25cb   : > { %7376 = vrot.lane.b32.xlu1 %v7256_v33, %s13656_s29  ;;  %7317 = vrot.lane.b32.xlu0 %v12425_v34, %s13648_s7 }
0x25cf   : > { %7355 = vrot.lane.b32.xlu1 %v7256_v33, %s13657_s12  ;;  %7333 = vrot.lane.b32.xlu0 %v12425_v34, %s13650_s20 }
0x25d3   : > { %7534 = vrot.lane.b32.xlu0 %v12425_v34, %s13651_s1  ;;  %7497 = vrot.lane.b32.xlu1 %v7257_v41, %s13541_s16 }
0x25d7   : > { %7366 = vrot.lane.b32.xlu0 %v12425_v34, %s13652_s15  ;;  %7545 = vrot.lane.b32.xlu1 %v7257_v41, %s13655_s25 }
0x25db   : > { %7625 = vrot.lane.b32.xlu0 %v12425_v34, %s13537_s0  ;;  %7378 = vrot.lane.b32.xlu1 %v7257_v41, %s13656_s29 }
0x25df   : > { %7349 = vrot.lane.b32.xlu0 %v12425_v34, %s13653_s10  ;;  %7614 = vrot.lane.b32.xlu1 %v7257_v41, %s13620_s13 }
0x25e0   : > { %v7242_v2 = vpop.f32.mrb[96].mxu1 }
0x25e1   : > { %v7244_v61 = vpop.f32.mrb[97].mxu1  ;;  %v12472_v35 = vpack.c.bf16 %v7242_v2, %v7242_v2 }
0x25e2   : > { %v7246_v3 = vpop.f32.mrb[98].mxu1  ;;  %v12508_v60 = vpack.c.bf16 %v7244_v61, %v7244_v61 }
0x25e3   : > { %v7247_v25 = vpop.f32.mrb[99].mxu1  ;;  %7634 = vrot.lane.b32.xlu0 %v12425_v34, %s13658_s17  ;;  %7642 = vrot.lane.b32.xlu1 %v7257_v41, %s13659_s30  ;;  %v7258_v28 = vrot.slane %v12472_v35, 4 }
0x25e4   : > { %v7375_v53 = vrot.slane %v12508_v60, 4 }
0x25e7   : > { %7307 = vrot.lane.b32.xlu0 %v7256_v33, %s13542_s26  ;;  %7271 = vrot.lane.b32.xlu1 %v12472_v35, %s13619_s9 }
0x25eb   : > { %7291 = vrot.lane.b32.xlu0 %v7256_v33, %s13660_s3  ;;  %7287 = vrot.lane.b32.xlu1 %v12472_v35, %s13647_s27 }
0x25ef   : > { %7612 = vrot.lane.b32.xlu0 %v7256_v33, %s13620_s13  ;;  %7510 = vrot.lane.b32.xlu1 %v12472_v35, %s13531_s22 }
0x25f3   : > { %7261 = vrot.lane.b32.xlu0 %v7257_v41, %s13540_s11  ;;  %7319 = vrot.lane.b32.xlu1 %v12472_v35, %s13648_s7 }
0x25f7   : > { %7277 = vrot.lane.b32.xlu0 %v7257_v41, %s13543_s14  ;;  %7335 = vrot.lane.b32.xlu1 %v12472_v35, %s13650_s20 }
0x25fb   : > { %7309 = vrot.lane.b32.xlu0 %v7257_v41, %s13542_s26  ;;  %7536 = vrot.lane.b32.xlu1 %v12472_v35, %s13651_s1 }
0x25ff   : > { %7325 = vrot.lane.b32.xlu0 %v7257_v41, %s13550_s28  ;;  %7368 = vrot.lane.b32.xlu1 %v12472_v35, %s13652_s15 }
0x2603   : > { %7341 = vrot.lane.b32.xlu0 %v7257_v41, %s13654_s21  ;;  %7627 = vrot.lane.b32.xlu1 %v12472_v35, %s13537_s0 }
0x2607   : > { %7293 = vrot.lane.b32.xlu0 %v7257_v41, %s13660_s3  ;;  %7351 = vrot.lane.b32.xlu1 %v12472_v35, %s13653_s10 }
0x260b   : > { %7357 = vrot.lane.b32.xlu0 %v7257_v41, %s13657_s12  ;;  %7636 = vrot.lane.b32.xlu1 %v12472_v35, %s13658_s17 }
0x260f   : > { %7303 = vrot.lane.b32.xlu0 %v12472_v35, %s13532_s2  ;;  %7263 = vrot.lane.b32.xlu1 %v7258_v28, %s13540_s11 }
0x2613   : > { %7279 = vrot.lane.b32.xlu1 %v7258_v28, %s13543_s14  ;;  %7486 = vrot.lane.b32.xlu0 %v12508_v60, %s13619_s9 }
0x2615   : > { %v12513_v17 = vpop.permute.xlu1 %7506  ;;  %v12515_v23 = vpop.permute.xlu0 %7267 }
0x2617   : > { %7311 = vrot.lane.b32.xlu1 %v7258_v28, %s13542_s26  ;;  %7492 = vrot.lane.b32.xlu0 %v12508_v60, %s13647_s27 }
0x2619   : > { %v12520_v47 = vpop.permute.xlu1 %7299  ;;  %v12522_v9 = vpop.permute.xlu0 %7283 }
0x261b   : > { %7327 = vrot.lane.b32.xlu1 %v7258_v28, %s13550_s28  ;;  %7512 = vrot.lane.b32.xlu0 %v12508_v60, %s13531_s22 }
0x261d   : > { %v12527_v30 = vpop.permute.xlu1 %7623  ;;  %v12529_v10 = vpop.permute.xlu0 %7315 }
0x261f   : > { %7343 = vrot.lane.b32.xlu1 %v7258_v28, %s13654_s21  ;;  %7520 = vrot.lane.b32.xlu0 %v12508_v60, %s13648_s7 }
0x2621   : > { %v12534_v6 = vpop.permute.xlu0 %7331  ;;  %v12536_v48 = vpop.permute.xlu1 %7301 }
0x2623   : > { %7295 = vrot.lane.b32.xlu1 %v7258_v28, %s13660_s3  ;;  %7526 = vrot.lane.b32.xlu0 %v12508_v60, %s13650_s20  ;;  %s13676_s3 = smov 36  }
0x2625   : > { %v12541_v0 = vpop.permute.xlu0 %7532  ;;  %v7260_v32 = vpop.permute.xlu1 %7259 }
0x2627   : > { %7359 = vrot.lane.b32.xlu1 %v7258_v28, %s13657_s12  ;;  %7538 = vrot.lane.b32.xlu0 %v12508_v60, %s13651_s1 }
0x2629   : > { %v12546_v63 = vpop.permute.xlu0 %7364  ;;  %v7276_v8 = vpop.permute.xlu1 %7275 }
0x262b   : > { %7370 = vrot.lane.b32.xlu0 %v12508_v60, %s13652_s15  ;;  %7489 = vrot.lane.b32.xlu1 %v7375_v53, %s13543_s14  ;;  %s13713_s14 = sld [smem:[#allocation21_spill]] }
0x262d   : > { %v12552_v39 = vpop.permute.xlu0 %7347  ;;  %v7496_v56 = vpop.permute.xlu1 %7495 }
0x262f   : > { %7629 = vrot.lane.b32.xlu0 %v12508_v60, %s13537_s0  ;;  %7501 = vrot.lane.b32.xlu1 %v7375_v53, %s13541_s16 }
0x2631   : > { %v12557_v38 = vpop.permute.xlu1 %7323  ;;  %v12559_v31 = vpop.permute.xlu0 %7269 }
0x2632   : > { %v7273_v15 = vsel %vm1938_vm2, %v12515_v23, %v12559_v31 }
0x2633   : > { %7638 = vrot.lane.b32.xlu0 %v12508_v60, %s13658_s17  ;;  %7517 = vrot.lane.b32.xlu1 %v7375_v53, %s13542_s26  ;;  %s13774_s26 = sld [smem:[#allocation37_spill]] }
0x2635   : > { %v12564_v40 = vpop.permute.xlu1 %7339  ;;  %v12566_v42 = vpop.permute.xlu0 %7285 }
0x2636   : > { %v12638_v37 = vsel %vm1956_vm4, %v12522_v9, %v12566_v42 }
0x2637   : > { %7499 = vrot.lane.b32.xlu0 %v7258_v28, %s13541_s16  ;;  %7523 = vrot.lane.b32.xlu1 %v7375_v53, %s13550_s28  ;;  %s13714_s16 = sld [smem:[#allocation22_spill]]  ;;  %s13775_s28 = sld [smem:[#allocation31_spill]] }
0x2639   : > { %v12570_v12 = vpop.permute.xlu1 %7543  ;;  %v12572_v58 = vpop.permute.xlu0 %7508  ;;  %s13777_s2 = sshll.u32 %s13774_s26, 3 }
0x263a   : > { %v7514_v2 = vsel %vm13664_vm5, %v12513_v17, %v12572_v58  ;;  %vm13674_vm5 = vcmask 687104  }
0x263b   : > { %7547 = vrot.lane.b32.xlu0 %v7258_v28, %s13655_s25  ;;  %7529 = vrot.lane.b32.xlu1 %v7375_v53, %s13654_s21 }
0x263d   : > { %v12576_v51 = vpop.permute.xlu1 %7376  ;;  %v12578_v26 = vpop.permute.xlu0 %7317  ;;  %s1432_s0 = scalar_lea.vmem %s13714_s16, %s11537_s5  ;;  %s1441_s22 = scalar_lea.vmem %s13775_s28, %s13777_s2 }
0x263e   : > { %v7321_v23 = vsel %vm13666_vm8, %v12529_v10, %v12578_v26  ;;  %vm13678_vm8 = vcmask 867328  }
0x263f   : > { %7380 = vrot.lane.b32.xlu0 %v7258_v28, %s13656_s29  ;;  %7549 = vrot.lane.b32.xlu1 %v7375_v53, %s13655_s25 }
0x2641   : > { %v12582_v43 = vpop.permute.xlu1 %7355  ;;  %v12584_v57 = vpop.permute.xlu0 %7333 }
0x2643   : > { %7616 = vrot.lane.b32.xlu0 %v7258_v28, %s13620_s13  ;;  %7382 = vrot.lane.b32.xlu1 %v7375_v53, %s13656_s29 }
0x2645   : > { %v12588_v20 = vpop.permute.xlu0 %7534  ;;  %v12590_v29 = vpop.permute.xlu1 %7497 }
0x2646   : > { %v12627_v7 = vsel %vm2183_vm15, %v7496_v56, %v12590_v29 }
0x2647   : > { %7644 = vrot.lane.b32.xlu0 %v7258_v28, %s13659_s30  ;;  %7618 = vrot.lane.b32.xlu1 %v7375_v53, %s13620_s13  ;;  %s13661_s13 = smov 82   ;;  %v7566_v11 = vsel %vm2066_vm0, %v12638_v37, %v12627_v7 }
0x2649   : > { %v12594_v27 = vpop.permute.xlu0 %7366  ;;  %v12596_v59 = vpop.permute.xlu1 %7545 }
0x264b   : > { %7646 = vrot.lane.b32.xlu1 %v7375_v53, %s13659_s30  ;;  %7483 = vrot.lane.b32.xlu0 %v7375_v53, %s13540_s11  ;;  %v7337_v53 = vsel %vm13668_vm11, %v12534_v6, %v12584_v57  ;;  %v7540_v6 = vsel %vm13672_vm10, %v12541_v0, %v12588_v20  ;;  %vm13681_vm11 = vmmov %vm13669_vm12  ;;  %s13052_s11 = scalar_lea.vmem %s13713_s14, %s11215_s18  ;;  %s13764_s18 = sld [smem:[#allocation23_spill]] }
0x264d   : > { %v12600_v49 = vpop.permute.xlu0 %7625  ;;  %v12602_v19 = vpop.permute.xlu1 %7378 }
0x2651   : > { %v12604_v54 = vpop.permute.xlu0 %7349  ;;  %v12606_v52 = vpop.permute.xlu1 %7614 }
0x2655   : > { %v12608_v46 = vpop.permute.xlu0 %7634  ;;  %v12610_v50 = vpop.permute.xlu1 %7642 }
0x2659   : > { %v7308_v13 = vpop.permute.xlu0 %7307  ;;  %v12612_v18 = vpop.permute.xlu1 %7271 }
0x265d   : > { %v12614_v62 = vpop.permute.xlu0 %7291  ;;  %v12616_v1 = vpop.permute.xlu1 %7287 }
0x2661   : > { %v7613_v14 = vpop.permute.xlu0 %7612  ;;  %v12618_v36 = vpop.permute.xlu1 %7510 }
0x2665   : > { %v7262_v55 = vpop.permute.xlu0 %7261  ;;  %v12620_v16 = vpop.permute.xlu1 %7319 }
0x2666   : > { %v7265_v45 = vsel %vm1929_vm1, %v7260_v32, %v7262_v55 }
0x2667   : > { %v7389_v5 = vsel %vm2066_vm0, %v12411_v21, %v7265_v45 }
0x2668   : > { %7716 = vrot.lane.b32.xlu0 %v7389_v5, %s13661_s13 }
0x2669   : > { %v7278_v22 = vpop.permute.xlu0 %7277  ;;  %v12630_v44 = vpop.permute.xlu1 %7335 }
0x266a   : > { %13662 = vst [vmem:[#allocation39_spill] sm:$0xff] %v12630_v44  ;;  %v7281_v21 = vsel %vm13663_vm3, %v7276_v8, %v7278_v22  ;;  %vm13673_vm3 = vcmask 678912  }
0x266b   : > { %v7401_v24 = vsel %vm2066_vm0, %v7273_v15, %v7281_v21 }
0x266c   : > { %7724 = vrot.lane.b32.xlu1 %v7401_v24, %s13661_s13  ;;  %7732 = vrot.lane.b32.xlu0 %v7566_v11, %s13661_s13 }
0x266d   : > { %v7310_v33 = vpop.permute.xlu0 %7309  ;;  %v12647_v41 = vpop.permute.xlu1 %7536 }
0x266e   : > { %v12653_v61 = vsel %vm13665_vm7, %v7308_v13, %v7310_v33  ;;  %vm13677_vm7 = vcmask 1022976  }
0x266f   : > { %v12657_v3 = vsel %vm2066_vm0, %v7514_v2, %v12653_v61 }
0x2670   : > { %7740 = vrot.lane.b32.xlu1 %v12657_v3, %s13661_s13 }
0x2671   : > { %v12661_v25 = vpop.permute.xlu0 %7325  ;;  %v12663_v28 = vpop.permute.xlu1 %7368 }
0x2672   : > { %v7329_v17 = vsel %vm13667_vm9, %v12557_v38, %v12661_v25  ;;  %v7551_v38 = vsel %vm13670_vm13, %v12570_v12, %v12596_v59  ;;  %v7372_v12 = vsel %vm13674_vm5, %v12546_v63, %v12594_v27  ;;  %v7620_v63 = vsel %vm2304_vm6, %v7613_v14, %v12606_v52 }
0x2673   : > { %v12672_v9 = vsel %vm2066_vm0, %v7321_v23, %v7329_v17  ;;  %v7599_v21 = vsel %vm2066_vm0, %v7540_v6, %v7551_v38  ;;  %v12738_v6 = vsel %vm1938_vm2, %v12559_v31, %v12612_v18  ;;  %vm13679_vm9 = vcmask 875520  }
0x2674   : > { %7748 = vrot.lane.b32.xlu0 %v12672_v9, %s13661_s13  ;;  %vm13683_vm13 = vcmask 1006592   ;;  %vm13687_vm5 = vcmask 850944  }
0x2675   : > { %v7342_v32 = vpop.permute.xlu0 %7341  ;;  %v12676_v8 = vpop.permute.xlu1 %7627  ;;  %vm13684_vm10 = vmmov %vm13683_vm13 }
0x2676   : > { %v7345_v10 = vsel %vm13669_vm12, %v12564_v40, %v7342_v32  ;;  %v7384_v40 = vsel %vm13673_vm3, %v12576_v51, %v12602_v19  ;;  %vm13682_vm12 = vcmask 842752   ;;  %vm13685_vm3 = vcmask 998400  }
0x2677   : > { %v12684_v56 = vsel %vm2066_vm0, %v7337_v53, %v7345_v10  ;;  %v12709_v23 = vsel %vm2066_vm0, %v7372_v12, %v7384_v40 }
0x2678   : > { %7756 = vrot.lane.b32.xlu1 %v12684_v56, %s13661_s13 }
0x2679   : > { %v7294_v13 = vpop.permute.xlu0 %7293  ;;  %v12691_v45 = vpop.permute.xlu1 %7351 }
0x267a   : > { %13671 = vst [vmem:[#allocation46_spill] sm:$0xff] %v12691_v45 }
0x267c   : > { %7764 = vrot.lane.b32.xlu1 %v7599_v21, %s13661_s13  ;;  %v7651_v21 = vsel %vm2066_vm0, %v7273_v15, %v7620_v63  ;;  %v7515_v15 = vsel %vm13679_vm9, %v12572_v58, %v12618_v36  ;;  %v7297_v58 = vsel %vm13683_vm13, %v12614_v62, %v7294_v13  ;;  %vm13690_vm9 = vcmask 1022976  }
0x267d   : > { %v12701_v11 = vpop.permute.xlu0 %7357  ;;  %v12703_v2 = vpop.permute.xlu1 %7636  ;;  %v7413_v62 = vsel %vm2066_vm0, %v12638_v37, %v7297_v58  ;;  %vm13694_vm13 = vcmask 875520  }
0x2680   : > { %7772 = vrot.lane.b32.xlu1 %v12709_v23, %s13661_s13 }
0x2681   : > { %v12713_v0 = vpop.permute.xlu0 %7303  ;;  %v12715_v17 = vpop.permute.xlu1 %7263 }
0x2682   : > { %13675 = vst [vmem:[#allocation40_spill] sm:$0xff] %v12713_v0  ;;  %v7266_v51 = vsel %vm1929_vm1, %v7262_v55, %v12715_v17 }
0x2683   : > { %v12721_v53 = vsel %vm2066_vm0, %v12425_v34, %v7266_v51 }
0x2684   : > { %7989 = vmatprep.subr.bf16.mxu0 %v12721_v53  ;;  %7842 = vrot.lane.b32.xlu1 %v7389_v5, %s13676_s3 }
0x2685   : > { %7718 = vrot.lane.b32.xlu0 %v12721_v53, %s13661_s13  ;;  %7990 = vmatpush1.bf16.msra.mxu0 %v7389_v5  ;;  %v12729_v10 = vpop.permute.xlu1 %7279  ;;  %v12731_v38 = vpop.permute.xlu0 %7486 }
0x2686   : > { %v7282_v55 = vsel %vm13677_vm7, %v7278_v22, %v12729_v10  ;;  %vm13688_vm7 = vmmov %vm13685_vm3 }
0x2687   : > { %v7405_v14 = vsel %vm2066_vm0, %v12738_v6, %v7282_v55  ;;  %v7338_v55 = vsel %vm13682_vm12, %v12584_v57, %v12630_v44 }
0x2688   : > { %7991 = vmatprep.subr.bf16.mxu0 %v7405_v14  ;;  %7850 = vrot.lane.b32.xlu1 %v7651_v21, %s13676_s3 }
0x2689   : > { %7992 = vmatpush1.bf16.msra.mxu0 %v7401_v24  ;;  %v12744_v5 = vpop.permute.xlu1 %7311  ;;  %v12746_v40 = vpop.permute.xlu0 %7492 }
0x268a   : > { %v7314_v22 = vsel %vm13678_vm8, %v7310_v33, %v12744_v5  ;;  %vm13689_vm8 = vcmask 859136  }
0x268b   : > { %v12759_v51 = vsel %vm2066_vm0, %v7515_v15, %v7314_v22  ;;  %v7322_v37 = vsel %vm13689_vm8, %v12578_v26, %v12620_v16  ;;  %vm13699_vm8 = vcmask 695296  }
0x268c   : > { %7726 = vrot.lane.b32.xlu1 %v7405_v14, %s13661_s13 }
0x268d   : > { %v12751_v31 = vpop.permute.xlu1 %7327  ;;  %v12753_v12 = vpop.permute.xlu0 %7512 }
0x2690   : > { %7742 = vrot.lane.b32.xlu1 %v12759_v51, %s13661_s13 }
0x2691   : > { %v12763_v24 = vpop.permute.xlu1 %7343  ;;  %v12765_v63 = vpop.permute.xlu0 %7520 }
0x2692   : > { %13680 = vst [vmem:[#allocation60_spill] sm:$0xff] %v12763_v24  ;;  %v7346_v33 = vsel %vm13681_vm11, %v7342_v32, %v12763_v24  ;;  %v7290_v32 = vsel %vm1956_vm4, %v12566_v42, %v12616_v1  ;;  %v7330_v42 = vsel %vm13687_vm5, %v12661_v25, %v12751_v31  ;;  %v7488_v25 = vsel %vm1938_vm2, %v12612_v18, %v12731_v38 }
0x2693   : > { %v7453_v14 = vsel %vm2066_vm0, %v7338_v55, %v7346_v33  ;;  %v7306_v33 = vsel %vm13685_vm3, %v12536_v48, %v12713_v0  ;;  %vm13691_vm11 = vcmask 818176   ;;  %vm13692_vm2 = vcmask 826368  }
0x2694   : > { %7758 = vrot.lane.b32.xlu1 %v7453_v14, %s13661_s13  ;;  %vm13693_vm12 = vmmov %vm13691_vm11  ;;  %vm13697_vm5 = vcmask 703488  }
0x2695   : > { %v12776_v21 = vpop.permute.xlu1 %7295  ;;  %v12778_v15 = vpop.permute.xlu0 %7526  ;;  %vm13696_vm3 = vmmov %vm13692_vm2 }
0x2696   : > { %v7298_v4 = vsel %vm13684_vm10, %v7294_v13, %v12776_v21  ;;  %v7429_v13 = vsel %vm2066_vm0, %v7306_v33, %v7314_v22  ;;  %v12812_v33 = vsel %vm2066_vm0, %v7322_v37, %v7330_v42  ;;  %v7361_v42 = vsel %vm13693_vm12, %v12582_v43, %v12701_v11 }
0x2697   : > { %v7417_v57 = vsel %vm2066_vm0, %v7290_v32, %v7298_v4  ;;  %v7305_v4 = vsel %vm13688_vm7, %v12520_v47, %v12536_v48  ;;  %vm13695_vm10 = vcmask 867328   ;;  %v7353_v43 = vsel %vm13696_vm3, %v12552_v39, %v12604_v54 }
0x2698   : > { %7993 = vmatprep.subr.bf16.mxu0 %v7417_v57  ;;  %v7425_v57 = vsel %vm2066_vm0, %v7305_v4, %v12653_v61  ;;  %v7541_v39 = vsel %vm13697_vm5, %v12588_v20, %v12647_v41  ;;  %vm13698_vm7 = vcmask 842752   ;;  %vm13703_vm12 = vcmask 678912  }
0x2699   : > { %7994 = vmatpush1.bf16.msra.mxu0 %v7413_v62  ;;  %v12791_v55 = vpop.permute.xlu1 %7359  ;;  %v12793_v34 = vpop.permute.xlu0 %7538  ;;  %vm13706_vm3 = vmmov %vm13703_vm12 }
0x269a   : > { %13686 = vst [vmem:[#allocation63_spill] sm:$0xff] %v12791_v55  ;;  %7995 = vmatprep.subr.bf16.mxu0 %v7429_v13  ;;  %v7362_v62 = vsel %vm13691_vm11, %v12701_v11, %v12791_v55  ;;  %v7354_v13 = vsel %vm13692_vm2, %v12604_v54, %v12691_v45  ;;  %v7461_v11 = vsel %vm2066_vm0, %v7353_v43, %v7361_v42  ;;  %vm13701_vm11 = vcmask 687104   ;;  %vm13702_vm2 = vmmov %vm13697_vm5 }
0x269b   : > { %v7465_v37 = vsel %vm2066_vm0, %v7354_v13, %v7362_v62  ;;  %v7528_v54 = vsel %vm13698_vm7, %v12630_v44, %v12778_v15  ;;  %v7373_v43 = vsel %vm13701_vm11, %v12594_v27, %v12663_v28  ;;  %vm13707_vm5 = vcmask 719872  }
0x269c   : > { %vm13708_vm7 = vcmask 711680  }
0x269d   : > { %7996 = vmatpush1.bf16.msra.mxu0 %v7425_v57  ;;  %v12807_v58 = vpop.permute.xlu0 %7370  ;;  %v12809_v22 = vpop.permute.xlu1 %7489 }
0x269e   : > { %v7491_v47 = vsel %vm13690_vm9, %v12729_v10, %v12809_v22  ;;  %7997 = vmatprep.subr.bf16.mxu0 %v12812_v33  ;;  %vm13700_vm9 = vcmask 834560  }
0x269f   : > { %v12822_v48 = vsel %vm2066_vm0, %v7488_v25, %v7491_v47 }
0x26a1   : > { %7998 = vmatpush1.bf16.msra.mxu0 %v12672_v9  ;;  %v12825_v26 = vpop.permute.xlu0 %7629  ;;  %v12827_v61 = vpop.permute.xlu1 %7501 }
0x26a2   : > { %7999 = vmatprep.subr.bf16.mxu0 %v7453_v14  ;;  %v7516_v14 = vsel %vm13694_vm13, %v12618_v36, %v12753_v12  ;;  %vm13704_vm13 = vmmov %vm13699_vm8 }
0x26a5   : > { %8000 = vmatpush1.bf16.msra.mxu0 %v12684_v56  ;;  %v12839_v4 = vpop.permute.xlu0 %7638  ;;  %v12841_v57 = vpop.permute.xlu1 %7517 }
0x26a6   : > { %v7519_v47 = vsel %vm13695_vm10, %v12744_v5, %v12841_v57  ;;  %8001 = vmatprep.subr.bf16.mxu0 %v7465_v37  ;;  %vm13705_vm10 = vmmov %vm13701_vm11 }
0x26a7   : > { %v12854_v56 = vsel %vm2066_vm0, %v7516_v14, %v7519_v47 }
0x26a9   : > { %8002 = vmatpush1.bf16.msra.mxu0 %v7461_v11  ;;  %v7500_v62 = vpop.permute.xlu0 %7499  ;;  %v12857_v13 = vpop.permute.xlu1 %7523  ;;  %v7542_v11 = vsel %vm13702_vm2, %v12647_v41, %v12793_v34 }
0x26aa   : > { %v7504_v36 = vsel %vm2183_vm15, %v12590_v29, %v7500_v62 }
0x26ab   : > { %v7568_v45 = vsel %vm2066_vm0, %v7290_v32, %v7504_v36 }
0x26ac   : > { %7734 = vrot.lane.b32.xlu0 %v7568_v45, %s13661_s13 }
0x26ad   : > { %v7548_v37 = vpop.permute.xlu0 %7547  ;;  %v12863_v55 = vpop.permute.xlu1 %7529 }
0x26ae   : > { %v7552_v42 = vsel %vm13699_vm8, %v12596_v59, %v7548_v37  ;;  %v7531_v29 = vsel %vm13700_vm9, %v12763_v24, %v12863_v55  ;;  %v7374_v24 = vsel %vm13705_vm10, %v12663_v28, %v12807_v58 }
0x26af   : > { %v12877_v45 = vsel %vm2066_vm0, %v7541_v39, %v7552_v42  ;;  %v12880_v32 = vsel %vm2066_vm0, %v7528_v54, %v7531_v29 }
0x26b0   : > { %7766 = vrot.lane.b32.xlu1 %v12877_v45, %s13661_s13  ;;  %7750 = vrot.lane.b32.xlu0 %v12812_v33, %s13661_s13 }
0x26b1   : > { %v7381_v14 = vpop.permute.xlu0 %7380  ;;  %v12886_v47 = vpop.permute.xlu1 %7549 }
0x26b2   : > { %v7385_v39 = vsel %vm13703_vm12, %v12602_v19, %v7381_v14  ;;  %v7553_v54 = vsel %vm13704_vm13, %v7548_v37, %v12886_v47 }
0x26b3   : > { %v12899_v42 = vsel %vm2066_vm0, %v7373_v43, %v7385_v39  ;;  %v12902_v29 = vsel %vm2066_vm0, %v7542_v11, %v7553_v54 }
0x26b4   : > { %8003 = vmatprep.subr.bf16.mxu0 %v12899_v42  ;;  %7774 = vrot.lane.b32.xlu1 %v12899_v42, %s13661_s13 }
0x26b5   : > { %8004 = vmatpush1.bf16.msra.mxu0 %v12709_v23  ;;  %v7617_v41 = vpop.permute.xlu0 %7616  ;;  %v7383_v44 = vpop.permute.xlu1 %7382 }
0x26b6   : > { %v7386_v37 = vsel %vm13706_vm3, %v7381_v14, %v7383_v44  ;;  %v7621_v11 = vsel %vm2304_vm6, %v12606_v52, %v7617_v41  ;;  %v7641_v52 = vsel %vm13707_vm5, %v12703_v2, %v12839_v4 }
0x26b7   : > { %v12913_v43 = vsel %vm2066_vm0, %v7374_v24, %v7386_v37  ;;  %v7653_v0 = vsel %vm2066_vm0, %v12738_v6, %v7621_v11  ;;  %v7632_v37 = vsel %vm2316_vm14, %v12600_v49, %v12676_v8  ;;  %v7564_v11 = vsel %vm2066_vm0, %v12731_v38, %v12809_v22 }
0x26b8   : > { %7844 = vrot.lane.b32.xlu1 %v12721_v53, %s13676_s3 }
0x26b9   : > { %v7645_v39 = vpop.permute.xlu0 %7644  ;;  %v7619_v54 = vpop.permute.xlu1 %7618 }
0x26ba   : > { %v7622_v23 = vsel %vm2304_vm6, %v7617_v41, %v7619_v54  ;;  %vm13711_vm6 = vmmov %vm13708_vm7 }
0x26bb   : > { %v12923_v28 = vsel %vm2066_vm0, %v7488_v25, %v7622_v23  ;;  %v7661_v23 = vsel %vm2066_vm0, %v7632_v37, %v7504_v36  ;;  %v12976_v36 = vsel %vm2066_vm0, %v12753_v12, %v12841_v57 }
0x26bc   : > { %7852 = vrot.lane.b32.xlu1 %v7653_v0, %s13676_s3 }
0x26bd   : > { %v12926_v24 = vpop.permute.xlu1 %7646  ;;  %v7484_v14 = vpop.permute.xlu0 %7483 }
0x26be   : > { %v7649_v53 = vsel %vm13708_vm7, %v7645_v39, %v12926_v24  ;;  %v7485_v41 = vsel %vm1929_vm1, %v12715_v17, %v7484_v14  ;;  %v7558_v6 = vsel %vm2066_vm0, %v12508_v60, %v7484_v14  ;;  %v12957_v14 = vsel %vm2183_vm15, %v7500_v62, %v12827_v61  ;;  %vm13712_vm15 = vmmov %vm13707_vm5 }
0x26bf   : > { %7722 = vrot.lane.b32.xlu0 %v7558_v6, %s13661_s13  ;;  %v12940_v0 = vsel %vm2066_vm0, %v12472_v35, %v7485_v41  ;;  %v12943_v25 = vsel %vm2066_vm0, %v7641_v52, %v7649_v53  ;;  %v7494_v52 = vsel %vm1956_vm4, %v12616_v1, %v12746_v40  ;;  %v7574_v53 = vsel %vm2066_vm0, %v12746_v40, %v12827_v61 }
0x26c0   : > { %7720 = vrot.lane.b32.xlu1 %v12940_v0, %s13661_s13  ;;  %v7571_v22 = vsel %vm2066_vm0, %v7494_v52, %v12957_v14  ;;  %v7631_v62 = vsel %vm2316_vm14, %v12527_v30, %v12600_v49  ;;  %vm13709_vm1 = vcmask 850944   ;;  %vm13710_vm4 = vcmask 859136  }
0x26c1   : > { %v7659_v40 = vsel %vm2066_vm0, %v7631_v62, %v12627_v7  ;;  %v7525_v41 = vsel %vm13709_vm1, %v12751_v31, %v12857_v13  ;;  %v7522_v30 = vsel %vm13710_vm4, %v12620_v16, %v12765_v63  ;;  %v7590_v49 = vsel %vm2066_vm0, %v12765_v63, %v12857_v13 }
0x26c2   : > { %v7587_v12 = vsel %vm2066_vm0, %v7522_v30, %v7525_v41  ;;  %v7596_v7 = vsel %vm2066_vm0, %v12778_v15, %v12863_v55  ;;  %v7608_v63 = vsel %vm2066_vm0, %v12793_v34, %v12886_v47  ;;  %v13022_v15 = vsel %vm2066_vm0, %v12807_v58, %v7383_v44 }
0x26c3   : > { %7730 = vrot.lane.b32.xlu0 %v7564_v11, %s13661_s13  ;;  %v7657_v44 = vsel %vm2066_vm0, %v12731_v38, %v7619_v54  ;;  %v7665_v55 = vsel %vm2066_vm0, %v12825_v26, %v12827_v61  ;;  %v13055_v38 = vld [vmem:[%s13052_s11] sm:$0xff] }
0x26c4   : > { %7860 = vrot.lane.b32.xlu1 %v7661_v23, %s13676_s3  ;;  %v8985_v58 = vcombine.high %v13055_v38, %v13055_v38 }
0x26c6   : > { %8021 = vmatprep.mubr.bf16.mxu0 %v8985_v58  ;;  %8103 = vmatprep.mubr.bf16.mxu1 %v8985_v58 }
0x26c7   : > { %7738 = vrot.lane.b32.xlu0 %v7574_v53, %s13661_s13 }
0x26c8   : > { %7736 = vrot.lane.b32.xlu1 %v7571_v22, %s13661_s13 }
0x26cb   : > { %7746 = vrot.lane.b32.xlu0 %v12976_v36, %s13661_s13 }
0x26cc   : > { %7858 = vrot.lane.b32.xlu1 %v7659_v40, %s13676_s3 }
0x26cf   : > { %7754 = vrot.lane.b32.xlu0 %v7590_v49, %s13661_s13 }
0x26d0   : > { %7752 = vrot.lane.b32.xlu1 %v7587_v12, %s13661_s13 }
0x26d3   : > { %7728 = vrot.lane.b32.xlu0 %v12822_v48, %s13661_s13  ;;  %v13715_v48 = vld [vmem:[#allocation47_spill] sm:$0xff] }
0x26d4   : > { %7868 = vrot.lane.b32.xlu1 %v12759_v51, %s13676_s3  ;;  %v7648_v51 = vsel %vm13711_vm6, %v12610_v50, %v7645_v39 }
0x26d7   : > { %7762 = vrot.lane.b32.xlu0 %v7596_v7, %s13661_s13 }
0x26d8   : > { %7866 = vrot.lane.b32.xlu1 %v12657_v3, %s13676_s3  ;;  %v7640_v3 = vsel %vm13712_vm15, %v12608_v46, %v12703_v2 }
0x26d9   : > { %v7671_v34 = vsel %vm2066_vm0, %v7640_v3, %v7648_v51 }
0x26db   : > { %7744 = vrot.lane.b32.xlu0 %v12854_v56, %s13661_s13 }
0x26dc   : > { %7876 = vrot.lane.b32.xlu1 %v12812_v33, %s13676_s3 }
0x26de   : > { %v13035_v2 = vpop.permute.xlu1 %7724 }
0x26df   : > { %7770 = vrot.lane.b32.xlu0 %v7608_v63, %s13661_s13 }
0x26e0   : > { %7874 = vrot.lane.b32.xlu1 %v12672_v9, %s13676_s3  ;;  %v7668_v9 = vsel %vm2066_vm0, %v12608_v46, %v12610_v50  ;;  %v7680_v46 = vsel %vm2066_vm0, %v12588_v20, %v12596_v59  ;;  %v7683_v20 = vsel %vm2066_vm0, %v12594_v27, %v12602_v19  ;;  %v7633_v27 = vsel %vm2316_vm14, %v12676_v8, %v12825_v26  ;;  %v7717_v26 = vpop.permute.xlu0 %7716 }
0x26e1   : > { %v7663_v57 = vsel %vm2066_vm0, %v7633_v27, %v12957_v14  ;;  %vm13716_vm14 = vcmask 670720  }
0x26e2   : > { %v13047_v50 = vpop.permute.xlu1 %7740  ;;  %vm13717_vm8 = vmmov %vm13716_vm14 }
0x26e3   : > { %7778 = vrot.lane.b32.xlu0 %v13022_v15, %s13661_s13  ;;  %vm13718_vm9 = vmmov %vm13717_vm8 }
0x26e4   : > { %7884 = vrot.lane.b32.xlu1 %v7671_v34, %s13676_s3  ;;  %vm13719_vm11 = vmmov %vm13717_vm8 }
0x26e5   : > { %vm13720_vm2 = vmmov %vm13717_vm8 }
0x26e6   : > { %vm13721_vm12 = vmmov %vm13720_vm2 }
0x26e7   : > { %7848 = vrot.lane.b32.xlu0 %v7558_v6, %s13676_s3  ;;  %vm13722_vm13 = vmmov %vm13720_vm2 }
0x26e8   : > { %7882 = vrot.lane.b32.xlu1 %v7668_v9, %s13676_s3  ;;  %vm13723_vm10 = vmmov %vm13720_vm2 }
0x26e9   : > { %vm13724_vm3 = vmmov %vm13720_vm2 }
0x26ea   : > { %v13061_v33 = vpop.permute.xlu1 %7756  ;;  %vm13725_vm5 = vmmov %vm13720_vm2 }
0x26eb   : > { %7856 = vrot.lane.b32.xlu0 %v7657_v44, %s13676_s3  ;;  %vm13726_vm7 = vmmov %vm13720_vm2 }
0x26ec   : > { %7892 = vrot.lane.b32.xlu1 %v12877_v45, %s13676_s3  ;;  %vm13727_vm1 = vmmov %vm13720_vm2 }
0x26ed   : > { %vm13729_vm4 = vmmov %vm13727_vm1 }
0x26ee   : > { %v13071_v59 = vpop.permute.xlu1 %7764  ;;  %vm13730_vm6 = vmmov %vm13727_vm1 }
0x26ef   : > { %7864 = vrot.lane.b32.xlu0 %v7665_v55, %s13676_s3  ;;  %v13728_v55 = vld [vmem:[#allocation40_spill] sm:$0xff]  ;;  %vm13731_vm15 = vmmov %vm13727_vm1 }
0x26f0   : > { %7890 = vrot.lane.b32.xlu1 %v7680_v46, %s13676_s3 }
0x26f2   : > { %v13079_v61 = vpop.permute.xlu1 %7772 }
0x26f3   : > { %7760 = vrot.lane.b32.xlu0 %v12880_v32, %s13661_s13  ;;  %v7733_v32 = vpop.permute.xlu0 %7732 }
0x26f4   : > { %7900 = vrot.lane.b32.xlu1 %v12899_v42, %s13676_s3 }
0x26f6   : > { %v13089_v19 = vpop.permute.xlu1 %7842 }
0x26f7   : > { %7768 = vrot.lane.b32.xlu0 %v12902_v29, %s13661_s13 }
0x26f8   : > { %7898 = vrot.lane.b32.xlu1 %v7683_v20, %s13676_s3  ;;  %v7445_v20 = vsel %vm2066_vm0, %v12620_v16, %v12751_v31 }
0x26fa   : > { %v13099_v13 = vpop.permute.xlu1 %7850 }
0x26fb   : > { %7776 = vrot.lane.b32.xlu0 %v12913_v43, %s13661_s13 }
0x26fc   : > { %7954 = vrot.lane.b32.xlu1 %v13715_v48, %s13610_s23 }
0x26fe   : > { %v7727_v8 = vpop.permute.xlu1 %7726 }
0x26ff   : > { %7846 = vrot.lane.b32.xlu0 %v12940_v0, %s13676_s3  ;;  %v7783_v7 = vsel %vm13721_vm12, %v13035_v2, %v7727_v8  ;;  %vm13741_vm12 = vmmov %vm13727_vm1 }
0x2700   : > { %7958 = vrot.lane.b32.xlu1 %v12508_v60, %s13610_s23  ;;  %v8154_v60 = vld [vmem:[%s1432_s0] sm:$0xff] }
0x2702   : > { %v7743_v45 = vpop.permute.xlu1 %7742 }
0x2703   : > { %7854 = vrot.lane.b32.xlu0 %v12923_v28, %s13676_s3  ;;  %v7789_v44 = vsel %vm13727_vm1, %v13047_v50, %v7743_v45 }
0x2704   : > { %7880 = vrot.lane.b32.xlu1 %v7590_v49, %s13676_s3 }
0x2706   : > { %v13108_v47 = vpop.permute.xlu1 %7758 }
0x2707   : > { %7862 = vrot.lane.b32.xlu0 %v7663_v57, %s13676_s3 }
0x2708   : > { %7896 = vrot.lane.b32.xlu1 %v7608_v63, %s13676_s3 }
0x270b   : > { %7870 = vrot.lane.b32.xlu0 %v12854_v56, %s13676_s3  ;;  %v13110_v56 = vpop.permute.xlu0 %7748 }
0x270c   : > { %8157 = vperm.xlu1 %9629, %v8154_v60  }
0x270f   : > { %7878 = vrot.lane.b32.xlu0 %v7587_v12, %s13676_s3  ;;  %v7719_v39 = vpop.permute.xlu0 %7718 }
0x2713   : > { %7886 = vrot.lane.b32.xlu0 %v12943_v25, %s13676_s3 }
0x2717   : > { %7894 = vrot.lane.b32.xlu0 %v12902_v29, %s13676_s3  ;;  %v7677_v29 = vsel %vm2066_vm0, %v12839_v4, %v12926_v24  ;;  %v7780_v4 = vsel %vm13718_vm9, %v7717_v26, %v7719_v39  ;;  %v7397_v24 = vsel %vm2066_vm0, %v12472_v35, %v12715_v17  ;;  %vm13734_vm9 = vmmov %vm13727_vm1 }
0x2718   : > { %v7795_v16 = vsel %vm13734_vm9, %v13061_v33, %v13108_v47 }
0x271b   : > { %7902 = vrot.lane.b32.xlu0 %v12913_v43, %s13676_s3 }
0x271e   : > { %v7735_v28 = vpop.permute.xlu0 %7734 }
0x271f   : > { %7956 = vrot.lane.b32.xlu0 %v12472_v35, %s13610_s23  ;;  %v7409_v35 = vsel %vm2066_vm0, %v12612_v18, %v12729_v10  ;;  %v7786_v34 = vsel %vm13724_vm3, %v7733_v32, %v7735_v28  ;;  %vm13744_vm3 = vmmov %vm13727_vm1 }
0x2722   : > { %v13114_v42 = vpop.permute.xlu1 %7766  ;;  %v7751_v0 = vpop.permute.xlu0 %7750 }
0x2723   : > { %7872 = vrot.lane.b32.xlu0 %v12976_v36, %s13676_s3  ;;  %v7792_v50 = vsel %vm13731_vm15, %v13110_v56, %v7751_v0 }
0x2726   : > { %v13121_v54 = vpop.permute.xlu1 %7774 }
0x2727   : > { %7888 = vrot.lane.b32.xlu0 %v7677_v29, %s13676_s3  ;;  %v13736_v29 = vld [vmem:[#allocation39_spill] sm:$0xff] }
0x272a   : > { %v13124_v6 = vpop.permute.xlu1 %7844 }
0x272b   : > { %7904 = vrot.lane.b32.xlu0 %v13022_v15, %s13676_s3  ;;  %v7421_v15 = vsel %vm2066_vm0, %v12616_v1, %v12776_v21  ;;  %v7433_v1 = vsel %vm2066_vm0, %v13728_v55, %v12744_v5 }
0x272e   : > { %v13128_v25 = vpop.permute.xlu1 %7852 }
0x2731   : > { %v7723_v37 = vpop.permute.xlu0 %7722 }
0x2732   : > { %v7721_v11 = vpop.permute.xlu1 %7720 }
0x2733   : > { %v7781_v23 = vsel %vm13716_vm14, %v7719_v39, %v7721_v11  ;;  %v7782_v14 = vsel %vm13717_vm8, %v7721_v11, %v7723_v37  ;;  %vm13732_vm14 = vmmov %vm13727_vm1  ;;  %v13735_v39 = vld [vmem:[#allocation60_spill] sm:$0xff] }
0x2734   : > { %8005 = vmatprep.subr.bf16.mxu0 %v7781_v23  ;;  %9288 = vmatprep.subr.bf16.mxu1 %v7782_v14  ;;  %vm13733_vm8 = vmmov %vm13727_vm1  ;;  %v13739_v23 = vld [vmem:[#allocation63_spill] sm:$0xff]  ;;  %v13740_v14 = vld [vmem:[#allocation46_spill] sm:$0xff] }
0x2735   : > { %8006 = vmatpush1.bf16.msra.mxu0 %v7780_v4  ;;  %9289 = vmatpush3.bf16.msra.mxu1 %v7397_v24  ;;  %v7731_v52 = vpop.permute.xlu0 %7730  ;;  %v7469_v33 = vsel %vm2066_vm0, %v13740_v14, %v13739_v23  ;;  %v10145_v23 = vld [vmem:[%s13764_s18 + $0x34] ss:$8 sps:$4 sm:$0xff]  }
0x2736   : > { %v13136_v53 = vpop.permute.xlu1 %7860 }
0x2739   : > { %v7739_v22 = vpop.permute.xlu0 %7738 }
0x273a   : > { %v7737_v62 = vpop.permute.xlu1 %7736 }
0x273b   : > { %v7787_v17 = vsel %vm13722_vm13, %v7735_v28, %v7737_v62  ;;  %v7788_v63 = vsel %vm13723_vm10, %v7737_v62, %v7739_v22  ;;  %v7457_v28 = vsel %vm2066_vm0, %v13736_v29, %v13735_v39  ;;  %vm13742_vm13 = vmmov %vm13727_vm1  ;;  %v13199_v62 = vld [vmem:[%s13052_s11 + $0x8] sm:$0xff]  ;;  %v10142_v29 = vld [vmem:[%s13764_s18 + $0x10] ss:$8 sps:$4 sm:$0xff]  }
0x273c   : > { %vm13743_vm10 = vmmov %vm13727_vm1 }
0x273d   : > { %v7747_v36 = vpop.permute.xlu0 %7746 }
0x273e   : > { %v13138_v41 = vpop.permute.xlu1 %7858 }
0x2741   : > { %v7755_v40 = vpop.permute.xlu0 %7754 }
0x2742   : > { %v7753_v51 = vpop.permute.xlu1 %7752 }
0x2743   : > { %v7793_v21 = vsel %vm13729_vm4, %v7751_v0, %v7753_v51  ;;  %v7794_v46 = vsel %vm13730_vm6, %v7753_v51, %v7755_v40  ;;  %v13745_v40 = vmov 0   ;;  %vm13749_vm4 = vcmask 64512  }
0x2745   : > { %v7729_v30 = vpop.permute.xlu0 %7728 }
0x2746   : > { %v7784_v49 = vsel %vm13719_vm11, %v7727_v8, %v7729_v30  ;;  %v7785_v12 = vsel %vm13720_vm2, %v7729_v30, %v7731_v52  ;;  %v13157_v2 = vpop.permute.xlu1 %7868  ;;  %vm13737_vm11 = vmmov %vm13727_vm1  ;;  %v8987_v30 = vcombine.high %v13199_v62, %v13199_v62 }
0x2747   : > { %8007 = vmatprep.subr.bf16.mxu0 %v7784_v49  ;;  %9290 = vmatprep.subr.bf16.mxu1 %v7785_v12  ;;  %vm13738_vm2 = vmmov %vm13727_vm1 }
0x2748   : > { %8008 = vmatpush1.bf16.msra.mxu0 %v7783_v7  ;;  %9291 = vmatpush3.bf16.msra.mxu1 %v7409_v35 }
0x2749   : > { %8009 = vmatprep.subr.bf16.mxu0 %v7787_v17  ;;  %9292 = vmatprep.subr.bf16.mxu1 %v7788_v63  ;;  %v7763_v3 = vpop.permute.xlu0 %7762 }
0x274a   : > { %v13169_v48 = vpop.permute.xlu1 %7866 }
0x274c   : > { %8010 = vmatpush1.bf16.msra.mxu0 %v7786_v34  ;;  %9293 = vmatpush3.bf16.msra.mxu1 %v7421_v15 }
0x274d   : > { %v7745_v9 = vpop.permute.xlu0 %7744 }
0x274e   : > { %v7790_v18 = vsel %vm13725_vm5, %v7743_v45, %v7745_v9  ;;  %v7791_v10 = vsel %vm13726_vm7, %v7745_v9, %v7747_v36  ;;  %v13171_v57 = vpop.permute.xlu1 %7876  ;;  %v7801_v36 = vsel %vm13744_vm3, %v13079_v61, %v13121_v54  ;;  %vm13746_vm5 = vcmask 293888  }
0x274f   : > { %8011 = vmatprep.subr.bf16.mxu0 %v7790_v18  ;;  %9294 = vmatprep.subr.bf16.mxu1 %v7791_v10  ;;  %vm13747_vm7 = vmmov %vm13746_vm5 }
0x2750   : > { %8012 = vmatpush1.bf16.msra.mxu0 %v7789_v44  ;;  %9295 = vmatpush3.bf16.msra.mxu1 %v7433_v1  ;;  %vm13748_vm1 = vmmov %vm13746_vm5 }
0x2751   : > { %8013 = vmatprep.subr.bf16.mxu0 %v7793_v21  ;;  %9296 = vmatprep.subr.bf16.mxu1 %v7794_v46  ;;  %v7771_v58 = vpop.permute.xlu0 %7770  ;;  %v7906_v61 = vsel %vm13748_vm1, %v13089_v19, %v13124_v6  ;;  %vm13750_vm6 = vmmov %vm13748_vm1 }
0x2752   : > { %v13173_v8 = vpop.permute.xlu1 %7874  ;;  %vm13751_vm15 = vmmov %vm13748_vm1 }
0x2753   : > { %vm13754_vm9 = vmmov %vm13748_vm1 }
0x2754   : > { %8014 = vmatpush1.bf16.msra.mxu0 %v7792_v50  ;;  %9297 = vmatpush3.bf16.msra.mxu1 %v7445_v20  ;;  %vm13760_vm3 = vmmov %vm13748_vm1 }
0x2755   : > { %v7779_v5 = vpop.permute.xlu0 %7778 }
0x2756   : > { %v13181_v31 = vpop.permute.xlu1 %7884 }
0x2759   : > { %v7849_v27 = vpop.permute.xlu0 %7848 }
0x275a   : > { %v7883_v4 = vpop.permute.xlu1 %7882 }
0x275d   : > { %v7857_v60 = vpop.permute.xlu0 %7856 }
0x2761   : > { %v7865_v26 = vpop.permute.xlu0 %7864 }
0x2765   : > { %v7761_v45 = vpop.permute.xlu0 %7760 }
0x2766   : > { %v7796_v32 = vsel %vm13732_vm14, %v13108_v47, %v7761_v45  ;;  %v7797_v56 = vsel %vm13733_vm8, %v7761_v45, %v7763_v3  ;;  %v7798_v47 = vsel %vm13741_vm12, %v13071_v59, %v13114_v42  ;;  %v8984_v59 = vcombine.low %v13055_v38, %v13055_v38  ;;  %vm13752_vm14 = vmmov %vm13749_vm4 }
0x2767   : > { %8015 = vmatprep.subr.bf16.mxu0 %v7796_v32  ;;  %9298 = vmatprep.subr.bf16.mxu1 %v7797_v56  ;;  %vm13753_vm8 = vmmov %vm13748_vm1  ;;  %v10140_v32 = vld [vmem:[%s13764_s18] ss:$8 sps:$4 sm:$0xff]  }
0x2768   : > { %8016 = vmatpush1.bf16.msra.mxu0 %v7795_v16  ;;  %9299 = vmatpush3.bf16.msra.mxu1 %v7457_v28  ;;  %v7909_v19 = vsel %vm13753_vm8, %v13099_v13, %v13128_v25  ;;  %vm13757_vm12 = vmmov %vm13748_vm1  ;;  %v10141_v16 = vld [vmem:[%s13764_s18 + $0x14] ss:$8 sps:$4 sm:$0xff]   ;;  %v10143_v28 = vld [vmem:[%s13764_s18 + $0x24] ss:$8 sps:$4 sm:$0xff]  }
0x2769   : > { %v7769_v0 = vpop.permute.xlu0 %7768 }
0x276a   : > { %v7799_v37 = vsel %vm13737_vm11, %v13114_v42, %v7769_v0  ;;  %v7800_v11 = vsel %vm13738_vm2, %v7769_v0, %v7771_v58  ;;  %vm13755_vm11 = vmmov %vm13748_vm1 }
0x276b   : > { %8017 = vmatprep.subr.bf16.mxu0 %v7799_v37  ;;  %9300 = vmatprep.subr.bf16.mxu1 %v7800_v11  ;;  %vm13756_vm2 = vmmov %vm13748_vm1  ;;  %v10144_v37 = vld [vmem:[%s13764_s18 + $0x20] ss:$8 sps:$4 sm:$0xff]  }
0x276c   : > { %8018 = vmatpush1.bf16.msra.mxu0 %v7798_v47  ;;  %9301 = vmatpush3.bf16.msra.mxu1 %v7469_v33  ;;  %v7912_v51 = vsel %vm13756_vm2, %v13138_v41, %v13136_v53  ;;  %v7918_v41 = vsel %vm13760_vm3, %v13173_v8, %v13171_v57  ;;  %vm13771_vm2 = vmmov %vm13748_vm1  ;;  %v10146_v47 = vld [vmem:[%s13764_s18 + $0x30] ss:$8 sps:$4 sm:$0xff]  }
0x276d   : > { %v7777_v24 = vpop.permute.xlu0 %7776 }
0x276e   : > { %v7802_v52 = vsel %vm13742_vm13, %v13121_v54, %v7777_v24  ;;  %v7803_v22 = vsel %vm13743_vm10, %v7777_v24, %v7779_v5  ;;  %v7893_v54 = vpop.permute.xlu1 %7892  ;;  %vm13758_vm13 = vmmov %vm13748_vm1 }
0x276f   : > { %8019 = vmatprep.subr.bf16.mxu0 %v7802_v52  ;;  %9302 = vmatprep.subr.bf16.mxu1 %v7803_v22  ;;  %v7915_v3 = vsel %vm13758_vm13, %v13169_v48, %v13157_v2  ;;  %vm13759_vm10 = vmmov %vm13748_vm1  ;;  %v10148_v52 = vld [vmem:[%s13764_s18 + $0x40] ss:$8 sps:$4 sm:$0xff]   ;;  %v10149_v22 = vld [vmem:[%s13764_s18 + $0x54] ss:$8 sps:$4 sm:$0xff]  }
0x2770   : > { %8020 = vmatpush1.bf16.msra.mxu0 %v7801_v36  ;;  %9303 = vmatpush3.bf16.msra.mxu1 %v12913_v43  ;;  %vm13773_vm13 = vmmov %vm13748_vm1  ;;  %v10150_v36 = vld [vmem:[%s13764_s18 + $0x50] ss:$8 sps:$4 sm:$0xff]  }
0x2771   : > { %v7847_v42 = vpop.permute.xlu0 %7846  ;;  %8111 = vmatprep.subr.bf16.mxu1 %v13745_v40 }
0x2772   : > { %v7908_v49 = vsel %vm13746_vm5, %v7847_v42, %v7849_v27  ;;  %v7907_v12 = vsel %vm13747_vm7, %v13124_v6, %v7847_v42  ;;  %v7891_v6 = vpop.permute.xlu1 %7890  ;;  %vm13761_vm5 = vmmov %vm13748_vm1  ;;  %v10152_v42 = vld [vmem:[%s13764_s18 + $0x60] ss:$8 sps:$4 sm:$0xff]  }
0x2773   : > { %8030 = vmatprep.subr.bf16.mxu0 %v7907_v12  ;;  %8022 = vmatmul.mubr.bf16.vlgmr.msra.gmra.mrb[88].mxu0 %v8984_v59  ;;  %vm13762_vm7 = vmmov %vm13748_vm1  ;;  %v10155_v12 = vld [vmem:[%s13764_s18 + $0x84] ss:$8 sps:$4 sm:$0xff]  }
0x2774   : > { %8031 = vmatpush1.bf16.msra.mxu0 %v7906_v61  ;;  %8104 = vmatmul.mubr.bf16.vlgmr.msra.gmra.mrb[100].mxu1 %v8984_v59  ;;  %v7921_v44 = vsel %vm13762_vm7, %v7883_v4, %v13181_v31  ;;  %v10147_v4 = vld [vmem:[%s13764_s18 + $0x44] ss:$8 sps:$4 sm:$0xff]   ;;  %v10156_v61 = vld [vmem:[%s13764_s18 + $0x80] ss:$8 sps:$4 sm:$0xff]  }
0x2775   : > { %8112 = vmatpush1.bf16.msra.mxu1 %v7908_v49  ;;  %v7855_v43 = vpop.permute.xlu0 %7854  ;;  %8989 = vmatprep.mubr.msk.bf16.mxu0 %vm13749_vm4, %v8987_v30  ;;  %vm13763_vm4 = vmmov %vm13748_vm1  ;;  %v10151_v59 = vld [vmem:[%s13764_s18 + $0x64] ss:$8 sps:$4 sm:$0xff]   ;;  %v10154_v49 = vld [vmem:[%s13764_s18 + $0x70] ss:$8 sps:$4 sm:$0xff]  }
0x2776   : > { %v7911_v38 = vsel %vm13750_vm6, %v7855_v43, %v7857_v60  ;;  %v7910_v7 = vsel %vm13751_vm15, %v13128_v25, %v7855_v43  ;;  %8113 = vmatprep.subr.bf16.mxu1 %v13745_v40  ;;  %8990 = vmatprep.mubr.msk.bf16.mxu1 %vm13752_vm14, %v8987_v30  ;;  %v7901_v15 = vpop.permute.xlu1 %7900  ;;  %v7924_v1 = vsel %vm13763_vm4, %v7891_v6, %v7893_v54  ;;  %vm13765_vm6 = vmmov %vm13748_vm1  ;;  %vm13767_vm14 = vcmask 965632   ;;  %v10153_v30 = vld [vmem:[%s13764_s18 + $0x74] ss:$8 sps:$4 sm:$0xff]   ;;  %v10158_v43 = vld [vmem:[%s13764_s18 + $0x90] ss:$8 sps:$4 sm:$0xff]  }
0x2777   : > { %8032 = vmatprep.subr.bf16.mxu0 %v7910_v7  ;;  %vm13766_vm15 = vmmov %vm13748_vm1  ;;  %v8986_v60 = vcombine.low %v13199_v62, %v13199_v62  ;;  %v10160_v7 = vld [vmem:[%s13764_s18 + $0xa0] ss:$8 sps:$4 sm:$0xff]   ;;  %v10162_v6 = vld [vmem:[%s13764_s18 + $0xb0] ss:$8 sps:$4 sm:$0xff]  }
0x2778   : > { %8033 = vmatpush1.bf16.msra.mxu0 %v7909_v19  ;;  %vm13768_vm8 = vmmov %vm13767_vm14  ;;  %v10161_v19 = vld [vmem:[%s13764_s18 + $0xb4] ss:$8 sps:$4 sm:$0xff]  }
0x2779   : > { %8114 = vmatpush1.bf16.msra.mxu1 %v7911_v38  ;;  %v7863_v35 = vpop.permute.xlu0 %7862  ;;  %v10159_v38 = vld [vmem:[%s13764_s18 + $0xa4] ss:$8 sps:$4 sm:$0xff]  }
0x277a   : > { %v7914_v17 = vsel %vm13754_vm9, %v7863_v35, %v7865_v26  ;;  %v7913_v63 = vsel %vm13755_vm11, %v13136_v53, %v7863_v35  ;;  %8115 = vmatprep.subr.bf16.mxu1 %v13745_v40  ;;  %v7899_v9 = vpop.permute.xlu1 %7898  ;;  %v10139_v26 = vld [vmem:[%s13764_s18 + $0x4] ss:$8 sps:$4 sm:$0xff]   ;;  %vm13769_vm9 = vmmov %vm13748_vm1 }
0x277b   : > { %8034 = vmatprep.subr.bf16.mxu0 %v7913_v63  ;;  %v7927_v50 = vsel %vm13766_vm15, %v7899_v9, %v7901_v15  ;;  %vm13770_vm11 = vmmov %vm13748_vm1  ;;  %v10163_v35 = vld [vmem:[%s13764_s18 + $0xc4] ss:$8 sps:$4 sm:$0xff]   ;;  %v10165_v63 = vld [vmem:[%s13764_s18 + $0xd4] ss:$8 sps:$4 sm:$0xff]  }
0x277c   : > { %8035 = vmatpush1.bf16.msra.mxu0 %v7912_v51  ;;  %v10166_v51 = vld [vmem:[%s13764_s18 + $0xd0] ss:$8 sps:$4 sm:$0xff]  }
0x277d   : > { %8116 = vmatpush1.bf16.msra.mxu1 %v7914_v17  ;;  %v7871_v13 = vpop.permute.xlu0 %7870  ;;  %v10164_v17 = vld [vmem:[%s13764_s18 + $0xc0] ss:$8 sps:$4 sm:$0xff]  }
0x277e   : > { %v7916_v25 = vsel %vm13757_vm12, %v13157_v2, %v7871_v13  ;;  %8117 = vmatprep.subr.bf16.mxu1 %v13745_v40  ;;  %v7955_v21 = vpop.permute.xlu1 %7954  ;;  %vm13772_vm12 = vmmov %vm13748_vm1 }
0x277f   : > { %8036 = vmatprep.subr.bf16.mxu0 %v7916_v25  ;;  %v10168_v25 = vld [vmem:[%s13764_s18 + $0xe0] ss:$8 sps:$4 sm:$0xff]  }
0x2780   : > { %8037 = vmatpush1.bf16.msra.mxu0 %v7915_v3  ;;  %v10169_v3 = vld [vmem:[%s13764_s18 + $0xf4] ss:$8 sps:$4 sm:$0xff]  }
0x2781   : > { %v7879_v34 = vpop.permute.xlu0 %7878 }
0x2782   : > { %v7919_v53 = vsel %vm13759_vm10, %v13171_v57, %v7879_v34  ;;  %v7959_v20 = vpop.permute.xlu1 %7958 }
0x2783   : > { %8038 = vmatprep.subr.bf16.mxu0 %v7919_v53  ;;  %v7987_v62 = vsel %vm2066_vm0, %v7959_v20, 0 }
0x2784   : > { %8039 = vmatpush1.bf16.msra.mxu0 %v7918_v41 }
0x2785   : > { %v7887_v18 = vpop.permute.xlu0 %7886 }
0x2786   : > { %v7922_v10 = vsel %vm13761_vm5, %v13181_v31, %v7887_v18  ;;  %v7881_v56 = vpop.permute.xlu1 %7880 }
0x2787   : > { %8040 = vmatprep.subr.bf16.mxu0 %v7922_v10  ;;  %v7920_v31 = vsel %vm13770_vm11, %v7879_v34, %v7881_v56  ;;  %v10171_v34 = vld [vmem:[%s13764_s18 + $0x104] ss:$8 sps:$4 sm:$0xff]  }
0x2788   : > { %8041 = vmatpush1.bf16.msra.mxu0 %v7921_v44 }
0x2789   : > { %v7895_v2 = vpop.permute.xlu0 %7894 }
0x278a   : > { %v7925_v55 = vsel %vm13748_vm1, %v7893_v54, %v7895_v2  ;;  %v7897_v11 = vpop.permute.xlu1 %7896  ;;  %v10157_v54 = vld [vmem:[%s13764_s18 + $0x94] ss:$8 sps:$4 sm:$0xff]  }
0x278b   : > { %8042 = vmatprep.subr.bf16.mxu0 %v7925_v55  ;;  %v7926_v14 = vsel %vm13772_vm12, %v7895_v2, %v7897_v11 }
0x278c   : > { %8043 = vmatpush1.bf16.msra.mxu0 %v7924_v1 }
0x278d   : > { %v7903_v46 = vpop.permute.xlu0 %7902 }
0x278e   : > { %v7928_v58 = vsel %vm13765_vm6, %v7901_v15, %v7903_v46  ;;  %v10170_v15 = vld [vmem:[%s13764_s18 + $0xf0] ss:$8 sps:$4 sm:$0xff]  }
0x278f   : > { %8044 = vmatprep.subr.bf16.mxu0 %v7928_v58  ;;  %v10172_v58 = vld [vmem:[%s13764_s18 + $0x100] ss:$8 sps:$4 sm:$0xff]  }
0x2790   : > { %8045 = vmatpush1.bf16.msra.mxu0 %v7927_v50  ;;  %v10173_v50 = vld [vmem:[%s13764_s18 + $0x114] ss:$8 sps:$4 sm:$0xff]  }
0x2791   : > { %v7957_v48 = vpop.permute.xlu0 %7956 }
0x2792   : > { %v7960_v5 = vsel %vm13767_vm14, %v7955_v21, %v7957_v48  ;;  %v7961_v27 = vsel %vm13768_vm8, %v7957_v48, %v7959_v20  ;;  %v10174_v20 = vld [vmem:[%s13764_s18 + $0x110] ss:$8 sps:$4 sm:$0xff]   ;;  %v10175_v48 = vld [vmem:[%s13764_s18 + $0x124] ss:$8 sps:$4 sm:$0xff]  }
0x2793   : > { %v7981_v57 = vsel %vm2066_vm0, %v7960_v5, 0  ;;  %8988 = vmatprep.subr.msk.bf16.mxu0 %vm2066_vm0, %v7961_v27  ;;  %v10176_v5 = vld [vmem:[%s13764_s18 + $0x120] ss:$8 sps:$4 sm:$0xff]   ;;  %v10177_v27 = vld [vmem:[%s13764_s18 + $0x134] ss:$8 sps:$4 sm:$0xff]   ;;  %vm13776_vm0 = vcmask 785408  }
0x2794   : > { %8047 = vmatpush1.bf16.msra.mxu0 %v7981_v57  ;;  %v10178_v57 = vld [vmem:[%s13764_s18 + $0x130] ss:$8 sps:$4 sm:$0xff]  }
0x2795   : > { %v7873_v8 = vpop.permute.xlu0 %7872  ;;  %8163 = vmatprep.subr.bf16.mxu0 %v10139_v26 }
0x2796   : > { %v7917_v45 = vsel %vm13769_vm9, %v7871_v13, %v7873_v8  ;;  %v10167_v13 = vld [vmem:[%s13764_s18 + $0xe4] ss:$8 sps:$4 sm:$0xff]   ;;  %v10180_v8 = vld [vmem:[%s13764_s18 + $0x140] ss:$8 sps:$4 sm:$0xff]  }
0x2797   : > { %8063 = vmatmul.mubr.bf16.vlgmr.msra.gmra.mrb[88].mxu0 %v8986_v60  ;;  %8118 = vmatpush1.bf16.msra.mxu1 %v7917_v45 }
0x2798   : > { %8119 = vmatprep.subr.bf16.mxu1 %v13745_v40  ;;  %8164 = vmatpush1.bf16.msra.mxu0 %v10140_v32 }
0x2799   : > { %8165 = vmatprep.subr.bf16.mxu0 %v10141_v16  ;;  %v7889_v39 = vpop.permute.xlu0 %7888 }
0x279a   : > { %v7923_v0 = vsel %vm13771_vm2, %v7887_v18, %v7889_v39 }
0x279b   : > { %8120 = vmatpush1.bf16.msra.mxu1 %v7920_v31  ;;  %v10182_v31 = vld [vmem:[%s13764_s18 + $0x150] ss:$8 sps:$4 sm:$0xff]  }
0x279c   : > { %8121 = vmatprep.subr.bf16.mxu1 %v13745_v40  ;;  %8166 = vmatpush1.bf16.msra.mxu0 %v10142_v29  ;;  %v8158_v29 = vpop.permute.xlu1 %8157 }
0x279d   : > { %8167 = vmatprep.subr.bf16.mxu0 %v10143_v28  ;;  %v7905_v33 = vpop.permute.xlu0 %7904 }
0x279e   : > { %v7929_v24 = vsel %vm13773_vm13, %v7903_v46, %v7905_v33 }
0x279f   : > { %8122 = vmatpush1.bf16.msra.mxu1 %v7923_v0 }
0x27a0   : > { %8123 = vmatprep.subr.bf16.mxu1 %v13745_v40  ;;  %8168 = vmatpush1.bf16.msra.mxu0 %v10144_v37 }
0x27a1   : > { %8169 = vmatprep.subr.bf16.mxu0 %v10145_v23 }
0x27a3   : > { %8124 = vmatpush1.bf16.msra.mxu1 %v7926_v14 }
0x27a4   : > { %8125 = vmatprep.subr.bf16.mxu1 %v13745_v40  ;;  %8170 = vmatpush1.bf16.msra.mxu0 %v10146_v47 }
0x27a5   : > { %8171 = vmatprep.subr.bf16.mxu0 %v10147_v4 }
0x27a7   : > { %8126 = vmatpush1.bf16.msra.mxu1 %v7929_v24 }
0x27a8   : > { %8127 = vmatprep.subr.bf16.mxu1 %v13745_v40  ;;  %8172 = vmatpush1.bf16.msra.mxu0 %v10148_v52 }
0x27a9   : > { %8173 = vmatprep.subr.bf16.mxu0 %v10149_v22 }
0x27ab   : > { %8128 = vmatpush1.bf16.msra.mxu1 %v7987_v62 }
0x27ac   : > { %8174 = vmatpush1.bf16.msra.mxu0 %v10150_v36 }
0x27ad   : > { %8175 = vmatprep.subr.bf16.mxu0 %v10151_v59 }
0x27ae   : > { %8144 = vmatmul.mubr.bf16.vlgmr.msra.gmra.mrb[104].mxu1 %v8986_v60  ;;  %v10179_v60 = vld [vmem:[%s13764_s18 + $0x144] ss:$8 sps:$4 sm:$0xff]  }
0x27b0   : > { %8176 = vmatpush1.bf16.msra.mxu0 %v10152_v42 }
0x27b1   : > { %8177 = vmatprep.subr.bf16.mxu0 %v10153_v30 }
0x27b4   : > { %8178 = vmatpush1.bf16.msra.mxu0 %v10154_v49 }
0x27b5   : > { %8179 = vmatprep.subr.bf16.mxu0 %v10155_v12 }
0x27b8   : > { %8180 = vmatpush1.bf16.msra.mxu0 %v10156_v61 }
0x27b9   : > { %8181 = vmatprep.subr.bf16.mxu0 %v10157_v54 }
0x27bc   : > { %8182 = vmatpush1.bf16.msra.mxu0 %v10158_v43 }
0x27bd   : > { %8183 = vmatprep.subr.bf16.mxu0 %v10159_v38 }
0x27c0   : > { %8184 = vmatpush1.bf16.msra.mxu0 %v10160_v7 }
0x27c1   : > { %8185 = vmatprep.subr.bf16.mxu0 %v10161_v19 }
0x27c4   : > { %8186 = vmatpush1.bf16.msra.mxu0 %v10162_v6 }
0x27c5   : > { %8187 = vmatprep.subr.bf16.mxu0 %v10163_v35 }
0x27c8   : > { %8188 = vmatpush1.bf16.msra.mxu0 %v10164_v17 }
0x27c9   : > { %8189 = vmatprep.subr.bf16.mxu0 %v10165_v63 }
0x27cc   : > { %8190 = vmatpush1.bf16.msra.mxu0 %v10166_v51 }
0x27cd   : > { %8191 = vmatprep.subr.bf16.mxu0 %v10167_v13 }
0x27d0   : > { %8192 = vmatpush1.bf16.msra.mxu0 %v10168_v25 }
0x27d1   : > { %8193 = vmatprep.subr.bf16.mxu0 %v10169_v3 }
0x27d4   : > { %8194 = vmatpush1.bf16.msra.mxu0 %v10170_v15 }
0x27d5   : > { %8204 = vmatprep.subr.bf16.mxu0 %v10171_v34 }
0x2847   : > { %v9304_v53 = vpop.f32.mrb[100].mxu1 }
0x2848   : > { %v9305_v41 = vpop.f32.mrb[101].mxu1 }
0x2849   : > { %v9306_v9 = vadd.f32 %v9305_v41, %v9304_v53  ;;  %v9307_v18 = vpop.f32.mrb[102].mxu1 }
0x284a   : > { %v9308_v10 = vpop.f32.mrb[103].mxu1 }
0x286a   : > { %v8064_v44 = vpop.f32.mrb[88].mxu0 }
0x286b   : > { %v8066_v2 = vpop.f32.mrb[89].mxu0  ;;  %v8151_v21 = vpack.c.bf16 %v8064_v44, %v8064_v44 }
0x286c   : > { %v8152_v55 = vpack.c.bf16 %v8066_v2, %v8066_v2  ;;  %v8068_v1 = vpop.f32.mrb[90].mxu0 }
0x286d   : > { %v8069_v46 = vpop.f32.mrb[91].mxu0 }
0x286e   : > { %8195 = vmatprep.mubr.bf16.mxu0 %v8152_v55 }
0x286f   : > { %8196 = vmatmul.mubr.bf16.vlgmr.msra.gmra.mrb[92].mxu0 %v8151_v21 }
0x2870   : > { %8205 = vmatpush1.bf16.msra.mxu0 %v10172_v58  ;;  %8236 = vmatprep.mubr.bf16.mxu0 %v13745_v40  ;;  %v10181_v40 = vld [vmem:[%s13764_s18 + $0x154] ss:$8 sps:$4 sm:$0xff]  }
0x2871   : > { %8206 = vmatprep.subr.bf16.mxu0 %v10173_v50 }
0x2874   : > { %8207 = vmatpush1.bf16.msra.mxu0 %v10174_v20 }
0x2875   : > { %8208 = vmatprep.subr.bf16.mxu0 %v10175_v48 }
0x2878   : > { %8209 = vmatpush1.bf16.msra.mxu0 %v10176_v5 }
0x2879   : > { %8210 = vmatprep.subr.bf16.mxu0 %v10177_v27 }
0x287c   : > { %8211 = vmatpush1.bf16.msra.mxu0 %v10178_v57 }
0x287d   : > { %8212 = vmatprep.subr.bf16.mxu0 %v10179_v60 }
0x2880   : > { %8213 = vmatpush1.bf16.msra.mxu0 %v10180_v8 }
0x2881   : > { %v8145_v26 = vpop.f32.mrb[104].mxu1  ;;  %8214 = vmatprep.subr.bf16.mxu0 %v10181_v40 }
0x2882   : > { %v8146_v45 = vadd.f32 %v9306_v9, %v8145_v26  ;;  %v8147_v32 = vpop.f32.mrb[105].mxu1 }
0x2883   : > { %v8148_v56 = vpop.f32.mrb[106].mxu1 }
0x2884   : > { %v8153_v16 = vpack.c.bf16 %v8146_v45, %v8146_v45  ;;  %8215 = vmatpush1.bf16.msra.mxu0 %v10182_v31  ;;  %v8149_v39 = vpop.f32.mrb[107].mxu1 }
0x2887   : > { %8991 = vmatmul.mubr.msk.bf16.vlgmr.msra.gmra.mrb[92].mxu0 %vm13776_vm0, %v8153_v16 }
0x295a   : > { %v8238_v28 = vpop.f32.mrb[92].mxu0 }
0x295b   : > { %v9490_v0 = vadd.f32 %v8238_v28, %v8158_v29  ;;  %v8240_v37 = vpop.f32.mrb[93].mxu0 }
0x295c   : > { %v9491_v11 = vadd.f32 %v8240_v37, %v8158_v29  ;;  %v8242_v23 = vpop.f32.mrb[94].mxu0 }
0x295d   : > { %10068 = vtanh.f32 %v9490_v0  ;;  %v8243_v14 = vpop.f32.mrb[95].mxu0 }
0x295e   : > { %10070 = vtanh.f32 %v9491_v11 }
0x2967   : > { %v10069_v33 = vpop.eup %10068 }
0x2968   : > { %v10071_v47 = vpop.eup %10070  ;;  %8247 = vst [vmem:[%s1441_s22] sm:$0xff] %v10069_v33 }
0x2969   : > { %8248 = vst [vmem:[%s1441_s22 + $0x8] sm:$0xff] %v10071_v47 }
0x296a PF: > { %s13778_s23 = sld [smem:[#allocation34_spill]]  ;;  %s13779_s7 = sld [smem:[#allocation32_spill]] }
0x296b   : > { %s13780_s10 = sld [smem:[#allocation33_spill]]  ;;  %s13781_s11 = sld [smem:[#allocation35_spill]] }
0x296c   : > { %s13782_s15 = sld [smem:[#allocation36_spill]] }
0x2970   : > { %s77_s16 = sadd.s32 1, %s13778_s23  }
0x2971   : > { %p74_p7 = scmp.ge.s32.totalorder %s77_s16, 6  }
0x2973   :  { %76 = sbr.rel (!%p74_p7) target bundleno = 67 (0x43), region = 275 }

</bundles_post_ra>
